<compile_context>
chip_gen: v5e
topology: v5e:2x2
jax: 0.10.0
libtpu: 0.0.40
codegen_flags: <defaults>
</compile_context>

<pallas_src>
import functools
import math

import jax
import jax.numpy as jnp
from jax.experimental import pallas as pl
from jax.experimental.pallas import tpu as pltpu

D_MODEL = 128
D_FF = 512
N_LAYERS = 2
HEADS = 8
D_K = D_MODEL // HEADS          # 16
SEQ = 64                        # max_board_len
POL_DIM = 65
ID_KIND = 3
EPS = 1e-6


# ----------------------------------------------------------------------------
# Norm math: torch Norm = alpha * (x - mean) / (std_unbiased + eps) + bias
# (exact divide -- approx reciprocal is reserved for the softmax denominator)
# ----------------------------------------------------------------------------
def _norm(x, alpha, bias):
    mu = jnp.mean(x, axis=-1, keepdims=True)
    xc = x - mu
    var = jnp.sum(xc * xc, axis=-1, keepdims=True) * (1.0 / (x.shape[-1] - 1))
    return alpha * xc / (jnp.sqrt(var) + EPS) + bias


# ----------------------------------------------------------------------------
# fused Pallas kernel: both encoder layers + final Norm + fused PV head-1
# ----------------------------------------------------------------------------
def fused_kernel(x_ref, norms, wqkv, bqkv, wo, bo, w1, b1, w2, b2, wph, bph,
                 hmask, o_ref, *, bt):
    m = bt * SEQ
    x = x_ref[...].reshape(m, D_MODEL)        # (M, 128), M = bt*64
    nrm = norms[...]                          # (2N+1, 2, 1, 128)
    hm = hmask[...]                           # (H, 1, 128) 0/1 head mask

    for l in range(N_LAYERS):
        # ---------------- self-attention sub-block --------------------------
        x2 = _norm(x, nrm[2 * l, 0], nrm[2 * l, 1])
        qkv = jnp.dot(x2, wqkv[l], preferred_element_type=jnp.float32) + bqkv[l]
        # 128-lane-aligned slices (free) + leading-dim splits (free)
        q = qkv[:, :D_MODEL].reshape(bt, SEQ, D_MODEL)
        k = qkv[:, D_MODEL:2 * D_MODEL].reshape(bt, SEQ, D_MODEL)
        v = qkv[:, 2 * D_MODEL:].reshape(bt, SEQ, D_MODEL)

        # head-masked broadcast of Q: row (h*64+q) only keeps head-h columns,
        # so one big batched matmul yields all per-head score blocks at once.
        qb = (q[:, None, :, :] * hm[None]).reshape(bt, HEADS * SEQ, D_MODEL)
        s = jnp.einsum('bqd,bkd->bqk', qb, k,
                       preferred_element_type=jnp.float32)      # (bt, 512, 64)
        s = s - jnp.max(s, axis=-1, keepdims=True)
        e = jnp.exp(s)
        p = e * pl.reciprocal(jnp.sum(e, axis=-1, keepdims=True), approx=True)
        f = jnp.einsum('bqk,bkd->bqd', p, v,
                       preferred_element_type=jnp.float32)      # (bt, 512, 128)
        # keep only each head's own 16 columns and collapse the head axis:
        # this is exactly the per-head concat, done with VPU mask+adds.
        attn = jnp.sum(f.reshape(bt, HEADS, SEQ, D_MODEL) * hm[None], axis=1)
        attn = attn.reshape(m, D_MODEL)
        x = x + jnp.dot(attn, wo[l], preferred_element_type=jnp.float32) + bo[l]

        # ---------------- feed-forward sub-block ----------------------------
        x2 = _norm(x, nrm[2 * l + 1, 0], nrm[2 * l + 1, 1])
        h1 = jnp.maximum(
            jnp.dot(x2, w1[l], preferred_element_type=jnp.float32) + b1[l], 0.0)
        x = x + jnp.dot(h1, w2[l], preferred_element_type=jnp.float32) + b2[l]

    # -------- final encoder Norm + fused policy/value head-1 (lane-dense) ---
    xn = _norm(x, nrm[2 * N_LAYERS, 0], nrm[2 * N_LAYERS, 1])
    head = jnp.maximum(
        jnp.dot(xn, wph[...], preferred_element_type=jnp.float32) + bph[...], 0.0)
    o_ref[...] = head.reshape(bt, SEQ, D_MODEL)   # single unmasked 128-lane store


# ----------------------------------------------------------------------------
# pallas_call wrapper
# ----------------------------------------------------------------------------
def _full_spec(shape):
    nd = len(shape)
    return pl.BlockSpec(tuple(shape), lambda b: (0,) * nd)


def _pick_bt(bs):
    """Generation-aware batch tile: grid >= 2 only on multi-TC chips."""
    kind = ''
    try:
        kind = jax.devices()[0].device_kind.lower()
    except Exception:
        pass
    # single-TensorCore chips: v5e / v6e ("lite" family)
    single_tc = any(t in kind for t in ('lite', 'v5e', 'v6e'))
    cands = [c for c in (4, 2, 1) if bs % c == 0]     # M = bt*64 <= 256
    if not single_tc:
        for c in cands:                               # prefer largest bt with grid>=2
            if bs // c >= 2:
                return c
    return cands[0]                                    # largest bt dividing bs


def run_fused(x, params):
    bs = x.shape[0]
    bt = _pick_bt(bs)
    grid = bs // bt

    # Fused QKV weight (scale 1/sqrt(d_k) folded into the Q third).
    scale = 1.0 / math.sqrt(D_K)
    wqkv = jnp.concatenate([params['wq'] * scale, params['wk'], params['wv']],
                           axis=-1)                    # (N, 128, 384)
    bqkv = jnp.concatenate([params['bq'] * scale, params['bk'], params['bv']],
                           axis=-1)                    # (N, 1, 384)

    # All norm params packed into one slab: (2N+1, 2, 1, 128)
    norm_stacks = []
    for l in range(N_LAYERS):
        norm_stacks.append(jnp.stack([params['n1a'][l], params['n1b'][l]]))
        norm_stacks.append(jnp.stack([params['n2a'][l], params['n2b'][l]]))
    norm_stacks.append(jnp.stack([params['fna'], params['fnb']]))
    norms = jnp.stack(norm_stacks)

    # Fold value_layer1 into policy_layer1: column 65 of a lane-dense (128,128)
    # head weight carries the value projection; remaining columns are zero.
    wph = jnp.zeros((D_MODEL, D_MODEL), jnp.float32)
    wph = wph.at[:, :POL_DIM].set(params['wp1'])
    wph = wph.at[:, POL_DIM:POL_DIM + 1].set(params['wv1'])
    bph = jnp.zeros((1, D_MODEL), jnp.float32)
    bph = bph.at[:, :POL_DIM].set(params['bp1'])
    bph = bph.at[:, POL_DIM:POL_DIM + 1].set(params['bv1'])

    # 0/1 head mask (H, 1, 128): hmask[h, 0, d] = 1 iff d // 16 == h
    hmask = (jnp.arange(D_MODEL)[None, :] // D_K
             == jnp.arange(HEADS)[:, None]).astype(jnp.float32)[:, None, :]

    weights = [norms, wqkv, bqkv, params['wo'], params['bo'],
               params['w1'], params['b1'], params['w2'], params['b2'],
               wph, bph, hmask]

    in_specs = [pl.BlockSpec((bt, SEQ, D_MODEL), lambda b: (b, 0, 0))]
    in_specs += [_full_spec(w.shape) for w in weights]

    # advisory cost estimate (scheduling hint only)
    flops_layer = (2 * SEQ * D_MODEL * 3 * D_MODEL        # fused qkv proj
                   + 2 * HEADS * SEQ * D_MODEL * SEQ      # masked-stack QK^T
                   + 2 * HEADS * SEQ * SEQ * D_MODEL      # PV
                   + 2 * SEQ * D_MODEL * D_MODEL          # out proj
                   + 2 * 2 * SEQ * D_MODEL * D_FF)        # feed-forward
    flops = bs * (N_LAYERS * flops_layer + 2 * SEQ * D_MODEL * D_MODEL)
    transcendentals = bs * N_LAYERS * HEADS * SEQ * SEQ
    bytes_accessed = (int(sum(int(w.size) for w in weights)) * 4
                      + bs * SEQ * D_MODEL * 4 * 2)

    return pl.pallas_call(
        functools.partial(fused_kernel, bt=bt),
        out_shape=jax.ShapeDtypeStruct((bs, SEQ, D_MODEL), jnp.float32),
        grid_spec=pltpu.PrefetchScalarGridSpec(
            num_scalar_prefetch=0,
            grid=(grid,),
            in_specs=in_specs,
            out_specs=pl.BlockSpec((bt, SEQ, D_MODEL), lambda b: (b, 0, 0))),
        compiler_params=pltpu.CompilerParams(
            dimension_semantics=("parallel",)),
        cost_estimate=pl.CostEstimate(flops=flops,
                                      transcendentals=transcendentals,
                                      bytes_accessed=bytes_accessed),
    )(x, *weights)


# ----------------------------------------------------------------------------
# parameter init (deterministic, torch-Linear-like uniform bounds)
# ----------------------------------------------------------------------------
def _make_pe():
    pos = jnp.arange(SEQ, dtype=jnp.float32)[:, None]             # (S, 1)
    i_even = jnp.arange(0, D_MODEL, 2, dtype=jnp.float32)         # (D/2,)
    # torch loop: exponent is 2*i/d_model with i the even index
    angle = pos / (10000.0 ** (2.0 * i_even / D_MODEL))           # (S, D/2)
    pe = jnp.zeros((SEQ, D_MODEL), jnp.float32)
    pe = pe.at[:, 0::2].set(jnp.sin(angle))
    pe = pe.at[:, 1::2].set(jnp.cos(angle))
    return pe[None]                                               # (1, S, D)


def init_params(key):
    keys = iter(jax.random.split(key, 64))

    def lin(in_f, out_f):
        # torch nn.Linear default init: U(-1/sqrt(in), 1/sqrt(in)).
        # Weights stored pre-transposed as (in, out) so kernels do x @ W.
        bound = 1.0 / math.sqrt(in_f)
        w = jax.random.uniform(next(keys), (in_f, out_f), jnp.float32, -bound, bound)
        b = jax.random.uniform(next(keys), (1, out_f), jnp.float32, -bound, bound)
        return w, b

    def stacked_lin(in_f, out_f):
        ws, bs_ = zip(*[lin(in_f, out_f) for _ in range(N_LAYERS)])
        return jnp.stack(ws), jnp.stack(bs_)

    params = {
        'embed': jax.random.normal(next(keys), (ID_KIND, D_MODEL), jnp.float32),
        'pe': _make_pe(),
        # per-layer params stacked along a leading (N_LAYERS,) axis
        'n1a': jnp.ones((N_LAYERS, 1, D_MODEL), jnp.float32),
        'n1b': jnp.zeros((N_LAYERS, 1, D_MODEL), jnp.float32),
        'n2a': jnp.ones((N_LAYERS, 1, D_MODEL), jnp.float32),
        'n2b': jnp.zeros((N_LAYERS, 1, D_MODEL), jnp.float32),
    }
    params['wq'], params['bq'] = stacked_lin(D_MODEL, D_MODEL)
    params['wk'], params['bk'] = stacked_lin(D_MODEL, D_MODEL)
    params['wv'], params['bv'] = stacked_lin(D_MODEL, D_MODEL)
    params['wo'], params['bo'] = stacked_lin(D_MODEL, D_MODEL)
    params['w1'], params['b1'] = stacked_lin(D_MODEL, D_FF)
    params['w2'], params['b2'] = stacked_lin(D_FF, D_MODEL)

    # final encoder norm
    params['fna'] = jnp.ones((1, D_MODEL), jnp.float32)
    params['fnb'] = jnp.zeros((1, D_MODEL), jnp.float32)

    # PolicyValue head
    params['wp1'], params['bp1'] = lin(D_MODEL, POL_DIM)          # policy_layer1
    params['wv1'], params['bv1'] = lin(D_MODEL, 1)                # value_layer1
    params['wp2'], params['bp2'] = lin(SEQ, 1)                    # policy_layer2
    params['wv2'], params['bv2'] = lin(SEQ, 1)                    # value_layer2
    return params


# ----------------------------------------------------------------------------
# full forward pass (Pallas) and pure-JAX reference
# ----------------------------------------------------------------------------
def _policy_value_tail(p1, v1, params):
    bs = p1.shape[0]
    # torch: p.view(-1, 65, 64) is a row-major reshape of (bs, 64, 65), NOT a transpose.
    p = p1.reshape(bs, POL_DIM, SEQ)
    p = p @ params['wp2'] + params['bp2']            # Linear(64, 1)
    p = p.reshape(bs, POL_DIM)
    v = v1.reshape(bs, 1, SEQ)
    v = v @ params['wv2'] + params['bv2']            # Linear(64, 1)
    v = jnp.tanh(v.reshape(bs))
    return p, v


def forward(tokens, params):
    x = math.sqrt(D_MODEL) * params['embed'][tokens] + params['pe']
    head = run_fused(x, params)                      # (bs, S, 128) lane-dense slab
    p1 = head[:, :, :POL_DIM]                        # relu(policy_layer1(x))
    v1 = head[:, :, POL_DIM:POL_DIM + 1]             # relu(value_layer1(x))
    return _policy_value_tail(p1, v1, params)


def ref_forward(tokens, params):
    bs = tokens.shape[0]
    x = math.sqrt(D_MODEL) * params['embed'][tokens] + params['pe']
    for l in range(N_LAYERS):
        x2 = _norm(x, params['n1a'][l], params['n1b'][l])
        q = x2 @ params['wq'][l] + params['bq'][l]
        k = x2 @ params['wk'][l] + params['bk'][l]
        v = x2 @ params['wv'][l] + params['bv'][l]

        def split(t):
            return t.reshape(bs, SEQ, HEADS, D_K).transpose(0, 2, 1, 3)

        q, k, v = split(q), split(k), split(v)
        s = (q @ k.transpose(0, 1, 3, 2)) / math.sqrt(D_K)
        a = jax.nn.softmax(s, axis=-1)
        o = (a @ v).transpose(0, 2, 1, 3).reshape(bs, SEQ, D_MODEL)
        x = x + (o @ params['wo'][l] + params['bo'][l])
        x2 = _norm(x, params['n2a'][l], params['n2b'][l])
        h1 = jnp.maximum(x2 @ params['w1'][l] + params['b1'][l], 0.0)
        x = x + (h1 @ params['w2'][l] + params['b2'][l])
    x = _norm(x, params['fna'], params['fnb'])
    p1 = jnp.maximum(x @ params['wp1'] + params['bp1'], 0.0)
    v1 = jnp.maximum(x @ params['wv1'] + params['bv1'], 0.0)
    return _policy_value_tail(p1, v1, params)


# ----------------------------------------------------------------------------
if __name__ == "__main__":
    root = jax.random.PRNGKey(0)
    k_params, k_tok = jax.random.split(root)
    params = init_params(k_params)
    # batch=2, seq=64 token ids in [0, 3)  (nn.Embedding(3, 128))
    tokens = jax.random.randint(k_tok, (2, SEQ), 0, ID_KIND, dtype=jnp.int32)

    fwd = jax.jit(forward)
    policy, value = fwd(tokens, params)
    policy, value = jax.block_until_ready((policy, value))

    # correctness check against a pure-JAX reference of the same math
    # (tolerance leaves headroom for the approx-reciprocal softmax divide)
    policy_ref, value_ref = ref_forward(tokens, params)
    assert policy.shape == (2, POL_DIM) and value.shape == (2,)
    assert jnp.allclose(policy, policy_ref, atol=5e-3, rtol=5e-3)
    assert jnp.allclose(value, value_ref, atol=5e-3, rtol=5e-3)

    print("KERNEL_OK")
</pallas_src>

<mosaic_0001>
module attributes {stable_mosaic.version = 11 : i64} {
  func.func @fused_kernel(%arg0: i32, %arg1: memref<1x64x128xf32, #tpu.memory_space<vmem>>, %arg2: memref<5x2x1x128xf32, #tpu.memory_space<vmem>>, %arg3: memref<2x128x384xf32, #tpu.memory_space<vmem>>, %arg4: memref<2x1x384xf32, #tpu.memory_space<vmem>>, %arg5: memref<2x128x128xf32, #tpu.memory_space<vmem>>, %arg6: memref<2x1x128xf32, #tpu.memory_space<vmem>>, %arg7: memref<2x128x512xf32, #tpu.memory_space<vmem>>, %arg8: memref<2x1x512xf32, #tpu.memory_space<vmem>>, %arg9: memref<2x512x128xf32, #tpu.memory_space<vmem>>, %arg10: memref<2x1x128xf32, #tpu.memory_space<vmem>>, %arg11: memref<128x128xf32, #tpu.memory_space<vmem>>, %arg12: memref<1x128xf32, #tpu.memory_space<vmem>>, %arg13: memref<8x1x128xf32, #tpu.memory_space<vmem>>, %arg14: memref<1x64x128xf32, #tpu.memory_space<vmem>>) attributes {dimension_semantics = [#tpu.dimension_semantics<parallel>], iteration_bounds = array<i64: 2>, scalar_prefetch = 0 : i64, scratch_operands = 0 : i64, tpu.core_type = #tpu.core_type<tc>, window_params = [{transform_indices = @transform_0, window_bounds = array<i64: 1, 64, 128>}, {pipeline_mode = #tpu.pipeline_mode<synchronous>, transform_indices = @transform_1, window_bounds = array<i64: 5, 2, 1, 128>}, {pipeline_mode = #tpu.pipeline_mode<synchronous>, transform_indices = @transform_2, window_bounds = array<i64: 2, 128, 384>}, {pipeline_mode = #tpu.pipeline_mode<synchronous>, transform_indices = @transform_3, window_bounds = array<i64: 2, 1, 384>}, {pipeline_mode = #tpu.pipeline_mode<synchronous>, transform_indices = @transform_4, window_bounds = array<i64: 2, 128, 128>}, {pipeline_mode = #tpu.pipeline_mode<synchronous>, transform_indices = @transform_5, window_bounds = array<i64: 2, 1, 128>}, {pipeline_mode = #tpu.pipeline_mode<synchronous>, transform_indices = @transform_6, window_bounds = array<i64: 2, 128, 512>}, {pipeline_mode = #tpu.pipeline_mode<synchronous>, transform_indices = @transform_7, window_bounds = array<i64: 2, 1, 512>}, {pipeline_mode = #tpu.pipeline_mode<synchronous>, transform_indices = @transform_8, window_bounds = array<i64: 2, 512, 128>}, {pipeline_mode = #tpu.pipeline_mode<synchronous>, transform_indices = @transform_9, window_bounds = array<i64: 2, 1, 128>}, {pipeline_mode = #tpu.pipeline_mode<synchronous>, transform_indices = @transform_10, window_bounds = array<i64: 128, 128>}, {pipeline_mode = #tpu.pipeline_mode<synchronous>, transform_indices = @transform_11, window_bounds = array<i64: 1, 128>}, {pipeline_mode = #tpu.pipeline_mode<synchronous>, transform_indices = @transform_12, window_bounds = array<i64: 8, 1, 128>}, {transform_indices = @transform_13, window_bounds = array<i64: 1, 64, 128>}]} {
    %c0 = arith.constant 0 : index
    %c0_0 = arith.constant 0 : index
    %c0_1 = arith.constant 0 : index
    %0 = vector.load %arg1[%c0, %c0_0, %c0_1] : memref<1x64x128xf32, #tpu.memory_space<vmem>>, vector<1x64x128xf32>
    %1 = vector.shape_cast %0 : vector<1x64x128xf32> to vector<64x128xf32>
    %c0_2 = arith.constant 0 : index
    %c0_3 = arith.constant 0 : index
    %c0_4 = arith.constant 0 : index
    %c0_5 = arith.constant 0 : index
    %2 = vector.load %arg2[%c0_2, %c0_3, %c0_4, %c0_5] : memref<5x2x1x128xf32, #tpu.memory_space<vmem>>, vector<5x2x1x128xf32>
    %c0_6 = arith.constant 0 : index
    %c0_7 = arith.constant 0 : index
    %c0_8 = arith.constant 0 : index
    %3 = vector.load %arg13[%c0_6, %c0_7, %c0_8] : memref<8x1x128xf32, #tpu.memory_space<vmem>>, vector<8x1x128xf32>
    %4 = vector.extract_strided_slice %2 {offsets = [0, 0, 0, 0], sizes = [1, 1, 1, 128], strides = [1, 1, 1, 1]} : vector<5x2x1x128xf32> to vector<1x1x1x128xf32>
    %5 = vector.shape_cast %4 : vector<1x1x1x128xf32> to vector<1x128xf32>
    %6 = vector.extract_strided_slice %2 {offsets = [0, 1, 0, 0], sizes = [1, 1, 1, 128], strides = [1, 1, 1, 1]} : vector<5x2x1x128xf32> to vector<1x1x1x128xf32>
    %7 = vector.shape_cast %6 : vector<1x1x1x128xf32> to vector<1x128xf32>
    %cst = arith.constant dense<0.000000e+00> : vector<64xf32>
    %8 = vector.multi_reduction <add>, %1, %cst [1] : vector<64x128xf32> to vector<64xf32>
    %9 = vector.shape_cast %8 : vector<64xf32> to vector<64x1xf32>
    %cst_9 = arith.constant 1.280000e+02 : f32
    %10 = vector.broadcast %cst_9 : f32 to vector<64x1xf32>
    %11 = arith.divf %9, %10 : vector<64x1xf32>
    %12 = vector.broadcast %11 : vector<64x1xf32> to vector<64x128xf32>
    %13 = arith.subf %1, %12 : vector<64x128xf32>
    %14 = arith.mulf %13, %13 : vector<64x128xf32>
    %cst_10 = arith.constant dense<0.000000e+00> : vector<64xf32>
    %15 = vector.multi_reduction <add>, %14, %cst_10 [1] : vector<64x128xf32> to vector<64xf32>
    %16 = vector.shape_cast %15 : vector<64xf32> to vector<64x1xf32>
    %cst_11 = arith.constant 0.00787401571 : f32
    %17 = vector.broadcast %cst_11 : f32 to vector<64x1xf32>
    %18 = arith.mulf %16, %17 : vector<64x1xf32>
    %19 = vector.broadcast %5 : vector<1x128xf32> to vector<64x128xf32>
    %20 = arith.mulf %19, %13 : vector<64x128xf32>
    %21 = math.sqrt %18 : vector<64x1xf32>
    %cst_12 = arith.constant 9.99999997E-7 : f32
    %22 = vector.broadcast %cst_12 : f32 to vector<64x1xf32>
    %23 = arith.addf %21, %22 : vector<64x1xf32>
    %24 = vector.broadcast %23 : vector<64x1xf32> to vector<64x128xf32>
    %25 = arith.divf %20, %24 : vector<64x128xf32>
    %26 = vector.broadcast %7 : vector<1x128xf32> to vector<64x128xf32>
    %27 = arith.addf %25, %26 : vector<64x128xf32>
    %c0_13 = arith.constant 0 : index
    %c0_14 = arith.constant 0 : index
    %c0_15 = arith.constant 0 : index
    %28 = vector.load %arg3[%c0_13, %c0_14, %c0_15] : memref<2x128x384xf32, #tpu.memory_space<vmem>>, vector<1x128x384xf32>
    %29 = vector.shape_cast %28 : vector<1x128x384xf32> to vector<128x384xf32>
    %cst_16 = arith.constant dense<0.000000e+00> : vector<64x384xf32>
    %30 = tpu.matmul %27, %29, %cst_16 {dimension_numbers = #tpu.dot_dimension_numbers<[1], [0], [0], [1], [0, 0, 1, 1], [], []>} : vector<64x128xf32>, vector<128x384xf32>, vector<64x384xf32> -> vector<64x384xf32>
    %c0_17 = arith.constant 0 : index
    %c0_18 = arith.constant 0 : index
    %c0_19 = arith.constant 0 : index
    %31 = vector.load %arg4[%c0_17, %c0_18, %c0_19] : memref<2x1x384xf32, #tpu.memory_space<vmem>>, vector<1x1x384xf32>
    %32 = vector.shape_cast %31 : vector<1x1x384xf32> to vector<1x384xf32>
    %33 = vector.broadcast %32 : vector<1x384xf32> to vector<64x384xf32>
    %34 = arith.addf %30, %33 : vector<64x384xf32>
    %35 = vector.extract_strided_slice %34 {offsets = [0, 0], sizes = [64, 128], strides = [1, 1]} : vector<64x384xf32> to vector<64x128xf32>
    %36 = vector.shape_cast %35 : vector<64x128xf32> to vector<1x64x128xf32>
    %37 = vector.extract_strided_slice %34 {offsets = [0, 128], sizes = [64, 128], strides = [1, 1]} : vector<64x384xf32> to vector<64x128xf32>
    %38 = vector.shape_cast %37 : vector<64x128xf32> to vector<1x64x128xf32>
    %39 = vector.extract_strided_slice %34 {offsets = [0, 256], sizes = [64, 128], strides = [1, 1]} : vector<64x384xf32> to vector<64x128xf32>
    %40 = vector.shape_cast %39 : vector<64x128xf32> to vector<1x64x128xf32>
    %41 = vector.shape_cast %36 : vector<1x64x128xf32> to vector<1x1x64x128xf32>
    %42 = vector.shape_cast %3 : vector<8x1x128xf32> to vector<1x8x1x128xf32>
    %43 = vector.broadcast %41 : vector<1x1x64x128xf32> to vector<1x8x64x128xf32>
    %44 = vector.broadcast %42 : vector<1x8x1x128xf32> to vector<1x8x64x128xf32>
    %45 = arith.mulf %43, %44 : vector<1x8x64x128xf32>
    %46 = vector.shape_cast %45 : vector<1x8x64x128xf32> to vector<1x512x128xf32>
    "tpu.trace_start"() <{level = 10 : i32, message = "bqd,bkd->bqk"}> : () -> ()
    %cst_20 = arith.constant dense<0.000000e+00> : vector<1x512x64xf32>
    %47 = tpu.matmul %46, %38, %cst_20 {dimension_numbers = #tpu.dot_dimension_numbers<[2], [2], [1], [1], [0, 0, 0, 1, 1, 1], [0], [0]>} : vector<1x512x128xf32>, vector<1x64x128xf32>, vector<1x512x64xf32> -> vector<1x512x64xf32>
    "tpu.trace_stop"() : () -> ()
    %cst_21 = arith.constant dense<0xFF800000> : vector<1x512xf32>
    %48 = vector.multi_reduction <maximumf>, %47, %cst_21 [2] : vector<1x512x64xf32> to vector<1x512xf32>
    %49 = vector.shape_cast %48 : vector<1x512xf32> to vector<1x512x1xf32>
    %50 = vector.broadcast %49 : vector<1x512x1xf32> to vector<1x512x64xf32>
    %51 = arith.subf %47, %50 : vector<1x512x64xf32>
    %52 = math.exp %51 : vector<1x512x64xf32>
    %cst_22 = arith.constant dense<0.000000e+00> : vector<1x512xf32>
    %53 = vector.multi_reduction <add>, %52, %cst_22 [2] : vector<1x512x64xf32> to vector<1x512xf32>
    %54 = vector.shape_cast %53 : vector<1x512xf32> to vector<1x512x1xf32>
    %55 = tpu.reciprocal %54 {approx = true} : vector<1x512x1xf32> -> vector<1x512x1xf32>
    %56 = vector.broadcast %55 : vector<1x512x1xf32> to vector<1x512x64xf32>
    %57 = arith.mulf %52, %56 : vector<1x512x64xf32>
    "tpu.trace_start"() <{level = 10 : i32, message = "bqk,bkd->bqd"}> : () -> ()
    %cst_23 = arith.constant dense<0.000000e+00> : vector<1x512x128xf32>
    %58 = tpu.matmul %57, %40, %cst_23 {dimension_numbers = #tpu.dot_dimension_numbers<[2], [1], [1], [2], [0, 0, 0, 1, 1, 2], [0], [0]>} : vector<1x512x64xf32>, vector<1x64x128xf32>, vector<1x512x128xf32> -> vector<1x512x128xf32>
    "tpu.trace_stop"() : () -> ()
    %59 = vector.shape_cast %58 : vector<1x512x128xf32> to vector<1x8x64x128xf32>
    %60 = vector.shape_cast %3 : vector<8x1x128xf32> to vector<1x8x1x128xf32>
    %61 = vector.broadcast %60 : vector<1x8x1x128xf32> to vector<1x8x64x128xf32>
    %62 = arith.mulf %59, %61 : vector<1x8x64x128xf32>
    %cst_24 = arith.constant dense<0.000000e+00> : vector<1x64x128xf32>
    %63 = vector.multi_reduction <add>, %62, %cst_24 [1] : vector<1x8x64x128xf32> to vector<1x64x128xf32>
    %64 = vector.shape_cast %63 : vector<1x64x128xf32> to vector<64x128xf32>
    %c0_25 = arith.constant 0 : index
    %c0_26 = arith.constant 0 : index
    %c0_27 = arith.constant 0 : index
    %65 = vector.load %arg5[%c0_25, %c0_26, %c0_27] : memref<2x128x128xf32, #tpu.memory_space<vmem>>, vector<1x128x128xf32>
    %66 = vector.shape_cast %65 : vector<1x128x128xf32> to vector<128x128xf32>
    %cst_28 = arith.constant dense<0.000000e+00> : vector<64x128xf32>
    %67 = tpu.matmul %64, %66, %cst_28 {dimension_numbers = #tpu.dot_dimension_numbers<[1], [0], [0], [1], [0, 0, 1, 1], [], []>} : vector<64x128xf32>, vector<128x128xf32>, vector<64x128xf32> -> vector<64x128xf32>
    %68 = arith.addf %1, %67 : vector<64x128xf32>
    %c0_29 = arith.constant 0 : index
    %c0_30 = arith.constant 0 : index
    %c0_31 = arith.constant 0 : index
    %69 = vector.load %arg6[%c0_29, %c0_30, %c0_31] : memref<2x1x128xf32, #tpu.memory_space<vmem>>, vector<1x1x128xf32>
    %70 = vector.shape_cast %69 : vector<1x1x128xf32> to vector<1x128xf32>
    %71 = vector.broadcast %70 : vector<1x128xf32> to vector<64x128xf32>
    %72 = arith.addf %68, %71 : vector<64x128xf32>
    %73 = vector.extract_strided_slice %2 {offsets = [1, 0, 0, 0], sizes = [1, 1, 1, 128], strides = [1, 1, 1, 1]} : vector<5x2x1x128xf32> to vector<1x1x1x128xf32>
    %74 = vector.shape_cast %73 : vector<1x1x1x128xf32> to vector<1x128xf32>
    %75 = vector.extract_strided_slice %2 {offsets = [1, 1, 0, 0], sizes = [1, 1, 1, 128], strides = [1, 1, 1, 1]} : vector<5x2x1x128xf32> to vector<1x1x1x128xf32>
    %76 = vector.shape_cast %75 : vector<1x1x1x128xf32> to vector<1x128xf32>
    %cst_32 = arith.constant dense<0.000000e+00> : vector<64xf32>
    %77 = vector.multi_reduction <add>, %72, %cst_32 [1] : vector<64x128xf32> to vector<64xf32>
    %78 = vector.shape_cast %77 : vector<64xf32> to vector<64x1xf32>
    %cst_33 = arith.constant 1.280000e+02 : f32
    %79 = vector.broadcast %cst_33 : f32 to vector<64x1xf32>
    %80 = arith.divf %78, %79 : vector<64x1xf32>
    %81 = vector.broadcast %80 : vector<64x1xf32> to vector<64x128xf32>
    %82 = arith.subf %72, %81 : vector<64x128xf32>
    %83 = arith.mulf %82, %82 : vector<64x128xf32>
    %cst_34 = arith.constant dense<0.000000e+00> : vector<64xf32>
    %84 = vector.multi_reduction <add>, %83, %cst_34 [1] : vector<64x128xf32> to vector<64xf32>
    %85 = vector.shape_cast %84 : vector<64xf32> to vector<64x1xf32>
    %cst_35 = arith.constant 0.00787401571 : f32
    %86 = vector.broadcast %cst_35 : f32 to vector<64x1xf32>
    %87 = arith.mulf %85, %86 : vector<64x1xf32>
    %88 = vector.broadcast %74 : vector<1x128xf32> to vector<64x128xf32>
    %89 = arith.mulf %88, %82 : vector<64x128xf32>
    %90 = math.sqrt %87 : vector<64x1xf32>
    %cst_36 = arith.constant 9.99999997E-7 : f32
    %91 = vector.broadcast %cst_36 : f32 to vector<64x1xf32>
    %92 = arith.addf %90, %91 : vector<64x1xf32>
    %93 = vector.broadcast %92 : vector<64x1xf32> to vector<64x128xf32>
    %94 = arith.divf %89, %93 : vector<64x128xf32>
    %95 = vector.broadcast %76 : vector<1x128xf32> to vector<64x128xf32>
    %96 = arith.addf %94, %95 : vector<64x128xf32>
    %c0_37 = arith.constant 0 : index
    %c0_38 = arith.constant 0 : index
    %c0_39 = arith.constant 0 : index
    %97 = vector.load %arg7[%c0_37, %c0_38, %c0_39] : memref<2x128x512xf32, #tpu.memory_space<vmem>>, vector<1x128x512xf32>
    %98 = vector.shape_cast %97 : vector<1x128x512xf32> to vector<128x512xf32>
    %cst_40 = arith.constant dense<0.000000e+00> : vector<64x512xf32>
    %99 = tpu.matmul %96, %98, %cst_40 {dimension_numbers = #tpu.dot_dimension_numbers<[1], [0], [0], [1], [0, 0, 1, 1], [], []>} : vector<64x128xf32>, vector<128x512xf32>, vector<64x512xf32> -> vector<64x512xf32>
    %c0_41 = arith.constant 0 : index
    %c0_42 = arith.constant 0 : index
    %c0_43 = arith.constant 0 : index
    %100 = vector.load %arg8[%c0_41, %c0_42, %c0_43] : memref<2x1x512xf32, #tpu.memory_space<vmem>>, vector<1x1x512xf32>
    %101 = vector.shape_cast %100 : vector<1x1x512xf32> to vector<1x512xf32>
    %102 = vector.broadcast %101 : vector<1x512xf32> to vector<64x512xf32>
    %103 = arith.addf %99, %102 : vector<64x512xf32>
    %cst_44 = arith.constant 0.000000e+00 : f32
    %104 = vector.broadcast %cst_44 : f32 to vector<64x512xf32>
    %105 = arith.maximumf %103, %104 : vector<64x512xf32>
    %c0_45 = arith.constant 0 : index
    %c0_46 = arith.constant 0 : index
    %c0_47 = arith.constant 0 : index
    %106 = vector.load %arg9[%c0_45, %c0_46, %c0_47] : memref<2x512x128xf32, #tpu.memory_space<vmem>>, vector<1x512x128xf32>
    %107 = vector.shape_cast %106 : vector<1x512x128xf32> to vector<512x128xf32>
    %cst_48 = arith.constant dense<0.000000e+00> : vector<64x128xf32>
    %108 = tpu.matmul %105, %107, %cst_48 {dimension_numbers = #tpu.dot_dimension_numbers<[1], [0], [0], [1], [0, 0, 1, 1], [], []>} : vector<64x512xf32>, vector<512x128xf32>, vector<64x128xf32> -> vector<64x128xf32>
    %109 = arith.addf %72, %108 : vector<64x128xf32>
    %c0_49 = arith.constant 0 : index
    %c0_50 = arith.constant 0 : index
    %c0_51 = arith.constant 0 : index
    %110 = vector.load %arg10[%c0_49, %c0_50, %c0_51] : memref<2x1x128xf32, #tpu.memory_space<vmem>>, vector<1x1x128xf32>
    %111 = vector.shape_cast %110 : vector<1x1x128xf32> to vector<1x128xf32>
    %112 = vector.broadcast %111 : vector<1x128xf32> to vector<64x128xf32>
    %113 = arith.addf %109, %112 : vector<64x128xf32>
    %114 = vector.extract_strided_slice %2 {offsets = [2, 0, 0, 0], sizes = [1, 1, 1, 128], strides = [1, 1, 1, 1]} : vector<5x2x1x128xf32> to vector<1x1x1x128xf32>
    %115 = vector.shape_cast %114 : vector<1x1x1x128xf32> to vector<1x128xf32>
    %116 = vector.extract_strided_slice %2 {offsets = [2, 1, 0, 0], sizes = [1, 1, 1, 128], strides = [1, 1, 1, 1]} : vector<5x2x1x128xf32> to vector<1x1x1x128xf32>
    %117 = vector.shape_cast %116 : vector<1x1x1x128xf32> to vector<1x128xf32>
    %cst_52 = arith.constant dense<0.000000e+00> : vector<64xf32>
    %118 = vector.multi_reduction <add>, %113, %cst_52 [1] : vector<64x128xf32> to vector<64xf32>
    %119 = vector.shape_cast %118 : vector<64xf32> to vector<64x1xf32>
    %cst_53 = arith.constant 1.280000e+02 : f32
    %120 = vector.broadcast %cst_53 : f32 to vector<64x1xf32>
    %121 = arith.divf %119, %120 : vector<64x1xf32>
    %122 = vector.broadcast %121 : vector<64x1xf32> to vector<64x128xf32>
    %123 = arith.subf %113, %122 : vector<64x128xf32>
    %124 = arith.mulf %123, %123 : vector<64x128xf32>
    %cst_54 = arith.constant dense<0.000000e+00> : vector<64xf32>
    %125 = vector.multi_reduction <add>, %124, %cst_54 [1] : vector<64x128xf32> to vector<64xf32>
    %126 = vector.shape_cast %125 : vector<64xf32> to vector<64x1xf32>
    %cst_55 = arith.constant 0.00787401571 : f32
    %127 = vector.broadcast %cst_55 : f32 to vector<64x1xf32>
    %128 = arith.mulf %126, %127 : vector<64x1xf32>
    %129 = vector.broadcast %115 : vector<1x128xf32> to vector<64x128xf32>
    %130 = arith.mulf %129, %123 : vector<64x128xf32>
    %131 = math.sqrt %128 : vector<64x1xf32>
    %cst_56 = arith.constant 9.99999997E-7 : f32
    %132 = vector.broadcast %cst_56 : f32 to vector<64x1xf32>
    %133 = arith.addf %131, %132 : vector<64x1xf32>
    %134 = vector.broadcast %133 : vector<64x1xf32> to vector<64x128xf32>
    %135 = arith.divf %130, %134 : vector<64x128xf32>
    %136 = vector.broadcast %117 : vector<1x128xf32> to vector<64x128xf32>
    %137 = arith.addf %135, %136 : vector<64x128xf32>
    %c1 = arith.constant 1 : index
    %c0_57 = arith.constant 0 : index
    %c0_58 = arith.constant 0 : index
    %138 = vector.load %arg3[%c1, %c0_57, %c0_58] : memref<2x128x384xf32, #tpu.memory_space<vmem>>, vector<1x128x384xf32>
    %139 = vector.shape_cast %138 : vector<1x128x384xf32> to vector<128x384xf32>
    %cst_59 = arith.constant dense<0.000000e+00> : vector<64x384xf32>
    %140 = tpu.matmul %137, %139, %cst_59 {dimension_numbers = #tpu.dot_dimension_numbers<[1], [0], [0], [1], [0, 0, 1, 1], [], []>} : vector<64x128xf32>, vector<128x384xf32>, vector<64x384xf32> -> vector<64x384xf32>
    %c1_60 = arith.constant 1 : index
    %c0_61 = arith.constant 0 : index
    %c0_62 = arith.constant 0 : index
    %141 = vector.load %arg4[%c1_60, %c0_61, %c0_62] : memref<2x1x384xf32, #tpu.memory_space<vmem>>, vector<1x1x384xf32>
    %142 = vector.shape_cast %141 : vector<1x1x384xf32> to vector<1x384xf32>
    %143 = vector.broadcast %142 : vector<1x384xf32> to vector<64x384xf32>
    %144 = arith.addf %140, %143 : vector<64x384xf32>
    %145 = vector.extract_strided_slice %144 {offsets = [0, 0], sizes = [64, 128], strides = [1, 1]} : vector<64x384xf32> to vector<64x128xf32>
    %146 = vector.shape_cast %145 : vector<64x128xf32> to vector<1x64x128xf32>
    %147 = vector.extract_strided_slice %144 {offsets = [0, 128], sizes = [64, 128], strides = [1, 1]} : vector<64x384xf32> to vector<64x128xf32>
    %148 = vector.shape_cast %147 : vector<64x128xf32> to vector<1x64x128xf32>
    %149 = vector.extract_strided_slice %144 {offsets = [0, 256], sizes = [64, 128], strides = [1, 1]} : vector<64x384xf32> to vector<64x128xf32>
    %150 = vector.shape_cast %149 : vector<64x128xf32> to vector<1x64x128xf32>
    %151 = vector.shape_cast %146 : vector<1x64x128xf32> to vector<1x1x64x128xf32>
    %152 = vector.shape_cast %3 : vector<8x1x128xf32> to vector<1x8x1x128xf32>
    %153 = vector.broadcast %151 : vector<1x1x64x128xf32> to vector<1x8x64x128xf32>
    %154 = vector.broadcast %152 : vector<1x8x1x128xf32> to vector<1x8x64x128xf32>
    %155 = arith.mulf %153, %154 : vector<1x8x64x128xf32>
    %156 = vector.shape_cast %155 : vector<1x8x64x128xf32> to vector<1x512x128xf32>
    "tpu.trace_start"() <{level = 10 : i32, message = "bqd,bkd->bqk"}> : () -> ()
    %cst_63 = arith.constant dense<0.000000e+00> : vector<1x512x64xf32>
    %157 = tpu.matmul %156, %148, %cst_63 {dimension_numbers = #tpu.dot_dimension_numbers<[2], [2], [1], [1], [0, 0, 0, 1, 1, 1], [0], [0]>} : vector<1x512x128xf32>, vector<1x64x128xf32>, vector<1x512x64xf32> -> vector<1x512x64xf32>
    "tpu.trace_stop"() : () -> ()
    %cst_64 = arith.constant dense<0xFF800000> : vector<1x512xf32>
    %158 = vector.multi_reduction <maximumf>, %157, %cst_64 [2] : vector<1x512x64xf32> to vector<1x512xf32>
    %159 = vector.shape_cast %158 : vector<1x512xf32> to vector<1x512x1xf32>
    %160 = vector.broadcast %159 : vector<1x512x1xf32> to vector<1x512x64xf32>
    %161 = arith.subf %157, %160 : vector<1x512x64xf32>
    %162 = math.exp %161 : vector<1x512x64xf32>
    %cst_65 = arith.constant dense<0.000000e+00> : vector<1x512xf32>
    %163 = vector.multi_reduction <add>, %162, %cst_65 [2] : vector<1x512x64xf32> to vector<1x512xf32>
    %164 = vector.shape_cast %163 : vector<1x512xf32> to vector<1x512x1xf32>
    %165 = tpu.reciprocal %164 {approx = true} : vector<1x512x1xf32> -> vector<1x512x1xf32>
    %166 = vector.broadcast %165 : vector<1x512x1xf32> to vector<1x512x64xf32>
    %167 = arith.mulf %162, %166 : vector<1x512x64xf32>
    "tpu.trace_start"() <{level = 10 : i32, message = "bqk,bkd->bqd"}> : () -> ()
    %cst_66 = arith.constant dense<0.000000e+00> : vector<1x512x128xf32>
    %168 = tpu.matmul %167, %150, %cst_66 {dimension_numbers = #tpu.dot_dimension_numbers<[2], [1], [1], [2], [0, 0, 0, 1, 1, 2], [0], [0]>} : vector<1x512x64xf32>, vector<1x64x128xf32>, vector<1x512x128xf32> -> vector<1x512x128xf32>
    "tpu.trace_stop"() : () -> ()
    %169 = vector.shape_cast %168 : vector<1x512x128xf32> to vector<1x8x64x128xf32>
    %170 = vector.shape_cast %3 : vector<8x1x128xf32> to vector<1x8x1x128xf32>
    %171 = vector.broadcast %170 : vector<1x8x1x128xf32> to vector<1x8x64x128xf32>
    %172 = arith.mulf %169, %171 : vector<1x8x64x128xf32>
    %cst_67 = arith.constant dense<0.000000e+00> : vector<1x64x128xf32>
    %173 = vector.multi_reduction <add>, %172, %cst_67 [1] : vector<1x8x64x128xf32> to vector<1x64x128xf32>
    %174 = vector.shape_cast %173 : vector<1x64x128xf32> to vector<64x128xf32>
    %c1_68 = arith.constant 1 : index
    %c0_69 = arith.constant 0 : index
    %c0_70 = arith.constant 0 : index
    %175 = vector.load %arg5[%c1_68, %c0_69, %c0_70] : memref<2x128x128xf32, #tpu.memory_space<vmem>>, vector<1x128x128xf32>
    %176 = vector.shape_cast %175 : vector<1x128x128xf32> to vector<128x128xf32>
    %cst_71 = arith.constant dense<0.000000e+00> : vector<64x128xf32>
    %177 = tpu.matmul %174, %176, %cst_71 {dimension_numbers = #tpu.dot_dimension_numbers<[1], [0], [0], [1], [0, 0, 1, 1], [], []>} : vector<64x128xf32>, vector<128x128xf32>, vector<64x128xf32> -> vector<64x128xf32>
    %178 = arith.addf %113, %177 : vector<64x128xf32>
    %c1_72 = arith.constant 1 : index
    %c0_73 = arith.constant 0 : index
    %c0_74 = arith.constant 0 : index
    %179 = vector.load %arg6[%c1_72, %c0_73, %c0_74] : memref<2x1x128xf32, #tpu.memory_space<vmem>>, vector<1x1x128xf32>
    %180 = vector.shape_cast %179 : vector<1x1x128xf32> to vector<1x128xf32>
    %181 = vector.broadcast %180 : vector<1x128xf32> to vector<64x128xf32>
    %182 = arith.addf %178, %181 : vector<64x128xf32>
    %183 = vector.extract_strided_slice %2 {offsets = [3, 0, 0, 0], sizes = [1, 1, 1, 128], strides = [1, 1, 1, 1]} : vector<5x2x1x128xf32> to vector<1x1x1x128xf32>
    %184 = vector.shape_cast %183 : vector<1x1x1x128xf32> to vector<1x128xf32>
    %185 = vector.extract_strided_slice %2 {offsets = [3, 1, 0, 0], sizes = [1, 1, 1, 128], strides = [1, 1, 1, 1]} : vector<5x2x1x128xf32> to vector<1x1x1x128xf32>
    %186 = vector.shape_cast %185 : vector<1x1x1x128xf32> to vector<1x128xf32>
    %cst_75 = arith.constant dense<0.000000e+00> : vector<64xf32>
    %187 = vector.multi_reduction <add>, %182, %cst_75 [1] : vector<64x128xf32> to vector<64xf32>
    %188 = vector.shape_cast %187 : vector<64xf32> to vector<64x1xf32>
    %cst_76 = arith.constant 1.280000e+02 : f32
    %189 = vector.broadcast %cst_76 : f32 to vector<64x1xf32>
    %190 = arith.divf %188, %189 : vector<64x1xf32>
    %191 = vector.broadcast %190 : vector<64x1xf32> to vector<64x128xf32>
    %192 = arith.subf %182, %191 : vector<64x128xf32>
    %193 = arith.mulf %192, %192 : vector<64x128xf32>
    %cst_77 = arith.constant dense<0.000000e+00> : vector<64xf32>
    %194 = vector.multi_reduction <add>, %193, %cst_77 [1] : vector<64x128xf32> to vector<64xf32>
    %195 = vector.shape_cast %194 : vector<64xf32> to vector<64x1xf32>
    %cst_78 = arith.constant 0.00787401571 : f32
    %196 = vector.broadcast %cst_78 : f32 to vector<64x1xf32>
    %197 = arith.mulf %195, %196 : vector<64x1xf32>
    %198 = vector.broadcast %184 : vector<1x128xf32> to vector<64x128xf32>
    %199 = arith.mulf %198, %192 : vector<64x128xf32>
    %200 = math.sqrt %197 : vector<64x1xf32>
    %cst_79 = arith.constant 9.99999997E-7 : f32
    %201 = vector.broadcast %cst_79 : f32 to vector<64x1xf32>
    %202 = arith.addf %200, %201 : vector<64x1xf32>
    %203 = vector.broadcast %202 : vector<64x1xf32> to vector<64x128xf32>
    %204 = arith.divf %199, %203 : vector<64x128xf32>
    %205 = vector.broadcast %186 : vector<1x128xf32> to vector<64x128xf32>
    %206 = arith.addf %204, %205 : vector<64x128xf32>
    %c1_80 = arith.constant 1 : index
    %c0_81 = arith.constant 0 : index
    %c0_82 = arith.constant 0 : index
    %207 = vector.load %arg7[%c1_80, %c0_81, %c0_82] : memref<2x128x512xf32, #tpu.memory_space<vmem>>, vector<1x128x512xf32>
    %208 = vector.shape_cast %207 : vector<1x128x512xf32> to vector<128x512xf32>
    %cst_83 = arith.constant dense<0.000000e+00> : vector<64x512xf32>
    %209 = tpu.matmul %206, %208, %cst_83 {dimension_numbers = #tpu.dot_dimension_numbers<[1], [0], [0], [1], [0, 0, 1, 1], [], []>} : vector<64x128xf32>, vector<128x512xf32>, vector<64x512xf32> -> vector<64x512xf32>
    %c1_84 = arith.constant 1 : index
    %c0_85 = arith.constant 0 : index
    %c0_86 = arith.constant 0 : index
    %210 = vector.load %arg8[%c1_84, %c0_85, %c0_86] : memref<2x1x512xf32, #tpu.memory_space<vmem>>, vector<1x1x512xf32>
    %211 = vector.shape_cast %210 : vector<1x1x512xf32> to vector<1x512xf32>
    %212 = vector.broadcast %211 : vector<1x512xf32> to vector<64x512xf32>
    %213 = arith.addf %209, %212 : vector<64x512xf32>
    %cst_87 = arith.constant 0.000000e+00 : f32
    %214 = vector.broadcast %cst_87 : f32 to vector<64x512xf32>
    %215 = arith.maximumf %213, %214 : vector<64x512xf32>
    %c1_88 = arith.constant 1 : index
    %c0_89 = arith.constant 0 : index
    %c0_90 = arith.constant 0 : index
    %216 = vector.load %arg9[%c1_88, %c0_89, %c0_90] : memref<2x512x128xf32, #tpu.memory_space<vmem>>, vector<1x512x128xf32>
    %217 = vector.shape_cast %216 : vector<1x512x128xf32> to vector<512x128xf32>
    %cst_91 = arith.constant dense<0.000000e+00> : vector<64x128xf32>
    %218 = tpu.matmul %215, %217, %cst_91 {dimension_numbers = #tpu.dot_dimension_numbers<[1], [0], [0], [1], [0, 0, 1, 1], [], []>} : vector<64x512xf32>, vector<512x128xf32>, vector<64x128xf32> -> vector<64x128xf32>
    %219 = arith.addf %182, %218 : vector<64x128xf32>
    %c1_92 = arith.constant 1 : index
    %c0_93 = arith.constant 0 : index
    %c0_94 = arith.constant 0 : index
    %220 = vector.load %arg10[%c1_92, %c0_93, %c0_94] : memref<2x1x128xf32, #tpu.memory_space<vmem>>, vector<1x1x128xf32>
    %221 = vector.shape_cast %220 : vector<1x1x128xf32> to vector<1x128xf32>
    %222 = vector.broadcast %221 : vector<1x128xf32> to vector<64x128xf32>
    %223 = arith.addf %219, %222 : vector<64x128xf32>
    %224 = vector.extract_strided_slice %2 {offsets = [4, 0, 0, 0], sizes = [1, 1, 1, 128], strides = [1, 1, 1, 1]} : vector<5x2x1x128xf32> to vector<1x1x1x128xf32>
    %225 = vector.shape_cast %224 : vector<1x1x1x128xf32> to vector<1x128xf32>
    %226 = vector.extract_strided_slice %2 {offsets = [4, 1, 0, 0], sizes = [1, 1, 1, 128], strides = [1, 1, 1, 1]} : vector<5x2x1x128xf32> to vector<1x1x1x128xf32>
    %227 = vector.shape_cast %226 : vector<1x1x1x128xf32> to vector<1x128xf32>
    %cst_95 = arith.constant dense<0.000000e+00> : vector<64xf32>
    %228 = vector.multi_reduction <add>, %223, %cst_95 [1] : vector<64x128xf32> to vector<64xf32>
    %229 = vector.shape_cast %228 : vector<64xf32> to vector<64x1xf32>
    %cst_96 = arith.constant 1.280000e+02 : f32
    %230 = vector.broadcast %cst_96 : f32 to vector<64x1xf32>
    %231 = arith.divf %229, %230 : vector<64x1xf32>
    %232 = vector.broadcast %231 : vector<64x1xf32> to vector<64x128xf32>
    %233 = arith.subf %223, %232 : vector<64x128xf32>
    %234 = arith.mulf %233, %233 : vector<64x128xf32>
    %cst_97 = arith.constant dense<0.000000e+00> : vector<64xf32>
    %235 = vector.multi_reduction <add>, %234, %cst_97 [1] : vector<64x128xf32> to vector<64xf32>
    %236 = vector.shape_cast %235 : vector<64xf32> to vector<64x1xf32>
    %cst_98 = arith.constant 0.00787401571 : f32
    %237 = vector.broadcast %cst_98 : f32 to vector<64x1xf32>
    %238 = arith.mulf %236, %237 : vector<64x1xf32>
    %239 = vector.broadcast %225 : vector<1x128xf32> to vector<64x128xf32>
    %240 = arith.mulf %239, %233 : vector<64x128xf32>
    %241 = math.sqrt %238 : vector<64x1xf32>
    %cst_99 = arith.constant 9.99999997E-7 : f32
    %242 = vector.broadcast %cst_99 : f32 to vector<64x1xf32>
    %243 = arith.addf %241, %242 : vector<64x1xf32>
    %244 = vector.broadcast %243 : vector<64x1xf32> to vector<64x128xf32>
    %245 = arith.divf %240, %244 : vector<64x128xf32>
    %246 = vector.broadcast %227 : vector<1x128xf32> to vector<64x128xf32>
    %247 = arith.addf %245, %246 : vector<64x128xf32>
    %c0_100 = arith.constant 0 : index
    %c0_101 = arith.constant 0 : index
    %248 = vector.load %arg11[%c0_100, %c0_101] : memref<128x128xf32, #tpu.memory_space<vmem>>, vector<128x128xf32>
    %cst_102 = arith.constant dense<0.000000e+00> : vector<64x128xf32>
    %249 = tpu.matmul %247, %248, %cst_102 {dimension_numbers = #tpu.dot_dimension_numbers<[1], [0], [0], [1], [0, 0, 1, 1], [], []>} : vector<64x128xf32>, vector<128x128xf32>, vector<64x128xf32> -> vector<64x128xf32>
    %c0_103 = arith.constant 0 : index
    %c0_104 = arith.constant 0 : index
    %250 = vector.load %arg12[%c0_103, %c0_104] : memref<1x128xf32, #tpu.memory_space<vmem>>, vector<1x128xf32>
    %251 = vector.broadcast %250 : vector<1x128xf32> to vector<64x128xf32>
    %252 = arith.addf %249, %251 : vector<64x128xf32>
    %cst_105 = arith.constant 0.000000e+00 : f32
    %253 = vector.broadcast %cst_105 : f32 to vector<64x128xf32>
    %254 = arith.maximumf %252, %253 : vector<64x128xf32>
    %255 = vector.shape_cast %254 : vector<64x128xf32> to vector<1x64x128xf32>
    %c0_106 = arith.constant 0 : index
    %c0_107 = arith.constant 0 : index
    %c0_108 = arith.constant 0 : index
    %256 = vector.load %arg14[%c0_106, %c0_107, %c0_108] : memref<1x64x128xf32, #tpu.memory_space<vmem>>, vector<1x64x128xf32>
    tpu.vector_store %arg14[%c0_106, %c0_107, %c0_108], %255 {strides = array<i32>} : memref<1x64x128xf32, #tpu.memory_space<vmem>>, vector<1x64x128xf32>,
    return
  }
  func.func @transform_0(%arg0: i32) -> (i32, i32, i32) {
    %c0_i32 = arith.constant 0 : i32
    %c0_i32_0 = arith.constant 0 : i32
    %c0_i32_1 = arith.constant 0 : i32
    return %arg0, %c0_i32, %c0_i32_0 : i32, i32, i32
  }
  func.func @transform_1(%arg0: i32) -> (i32, i32, i32, i32) {
    %c0_i32 = arith.constant 0 : i32
    %c0_i32_0 = arith.constant 0 : i32
    %c0_i32_1 = arith.constant 0 : i32
    %c0_i32_2 = arith.constant 0 : i32
    %c0_i32_3 = arith.constant 0 : i32
    return %c0_i32, %c0_i32_0, %c0_i32_1, %c0_i32_2 : i32, i32, i32, i32
  }
  func.func @transform_2(%arg0: i32) -> (i32, i32, i32) {
    %c0_i32 = arith.constant 0 : i32
    %c0_i32_0 = arith.constant 0 : i32
    %c0_i32_1 = arith.constant 0 : i32
    %c0_i32_2 = arith.constant 0 : i32
    return %c0_i32, %c0_i32_0, %c0_i32_1 : i32, i32, i32
  }
  func.func @transform_3(%arg0: i32) -> (i32, i32, i32) {
    %c0_i32 = arith.constant 0 : i32
    %c0_i32_0 = arith.constant 0 : i32
    %c0_i32_1 = arith.constant 0 : i32
    %c0_i32_2 = arith.constant 0 : i32
    return %c0_i32, %c0_i32_0, %c0_i32_1 : i32, i32, i32
  }
  func.func @transform_4(%arg0: i32) -> (i32, i32, i32) {
    %c0_i32 = arith.constant 0 : i32
    %c0_i32_0 = arith.constant 0 : i32
    %c0_i32_1 = arith.constant 0 : i32
    %c0_i32_2 = arith.constant 0 : i32
    return %c0_i32, %c0_i32_0, %c0_i32_1 : i32, i32, i32
  }
  func.func @transform_5(%arg0: i32) -> (i32, i32, i32) {
    %c0_i32 = arith.constant 0 : i32
    %c0_i32_0 = arith.constant 0 : i32
    %c0_i32_1 = arith.constant 0 : i32
    %c0_i32_2 = arith.constant 0 : i32
    return %c0_i32, %c0_i32_0, %c0_i32_1 : i32, i32, i32
  }
  func.func @transform_6(%arg0: i32) -> (i32, i32, i32) {
    %c0_i32 = arith.constant 0 : i32
    %c0_i32_0 = arith.constant 0 : i32
    %c0_i32_1 = arith.constant 0 : i32
    %c0_i32_2 = arith.constant 0 : i32
    return %c0_i32, %c0_i32_0, %c0_i32_1 : i32, i32, i32
  }
  func.func @transform_7(%arg0: i32) -> (i32, i32, i32) {
    %c0_i32 = arith.constant 0 : i32
    %c0_i32_0 = arith.constant 0 : i32
    %c0_i32_1 = arith.constant 0 : i32
    %c0_i32_2 = arith.constant 0 : i32
    return %c0_i32, %c0_i32_0, %c0_i32_1 : i32, i32, i32
  }
  func.func @transform_8(%arg0: i32) -> (i32, i32, i32) {
    %c0_i32 = arith.constant 0 : i32
    %c0_i32_0 = arith.constant 0 : i32
    %c0_i32_1 = arith.constant 0 : i32
    %c0_i32_2 = arith.constant 0 : i32
    return %c0_i32, %c0_i32_0, %c0_i32_1 : i32, i32, i32
  }
  func.func @transform_9(%arg0: i32) -> (i32, i32, i32) {
    %c0_i32 = arith.constant 0 : i32
    %c0_i32_0 = arith.constant 0 : i32
    %c0_i32_1 = arith.constant 0 : i32
    %c0_i32_2 = arith.constant 0 : i32
    return %c0_i32, %c0_i32_0, %c0_i32_1 : i32, i32, i32
  }
  func.func @transform_10(%arg0: i32) -> (i32, i32) {
    %c0_i32 = arith.constant 0 : i32
    %c0_i32_0 = arith.constant 0 : i32
    %c0_i32_1 = arith.constant 0 : i32
    return %c0_i32, %c0_i32_0 : i32, i32
  }
  func.func @transform_11(%arg0: i32) -> (i32, i32) {
    %c0_i32 = arith.constant 0 : i32
    %c0_i32_0 = arith.constant 0 : i32
    %c0_i32_1 = arith.constant 0 : i32
    return %c0_i32, %c0_i32_0 : i32, i32
  }
  func.func @transform_12(%arg0: i32) -> (i32, i32, i32) {
    %c0_i32 = arith.constant 0 : i32
    %c0_i32_0 = arith.constant 0 : i32
    %c0_i32_1 = arith.constant 0 : i32
    %c0_i32_2 = arith.constant 0 : i32
    return %c0_i32, %c0_i32_0, %c0_i32_1 : i32, i32, i32
  }
  func.func @transform_13(%arg0: i32) -> (i32, i32, i32) {
    %c0_i32 = arith.constant 0 : i32
    %c0_i32_0 = arith.constant 0 : i32
    %c0_i32_1 = arith.constant 0 : i32
    return %arg0, %c0_i32, %c0_i32_0 : i32, i32, i32
  }
}

</mosaic_0001>

<bundles_post_ra>
// kernel: forward.1
= control target key start
LH: loop header
LB: loop body
LE: loop exit
PB: predicated region body
PF: predicated region fallthrough
CT: control target
= control target key end

     0   :  { %s7919_s25 = smov 0   ;;  %s12767_s0 = inlined_call_operand.vmem [shape: f32[2,64,128], index: 0, kind: input, shape index: {}]   ;;  %s12768_s1 = inlined_call_operand.vmem [shape: f32[5,2,1,128], index: 1, kind: input, shape index: {}]   ;;  %s12769_s2 = inlined_call_operand.vmem [shape: f32[2,128,384], index: 2, kind: input, shape index: {}]   ;;  %s12770_s3 = inlined_call_operand.vmem [shape: f32[2,1,384], index: 3, kind: input, shape index: {}]   ;;  %s12771_s4 = inlined_call_operand.vmem [shape: f32[2,128,128], index: 4, kind: input, shape index: {}]   ;;  %s12772_s5 = inlined_call_operand.vmem [shape: f32[2,1,128], index: 5, kind: input, shape index: {}]   ;;  %s12773_s6 = inlined_call_operand.vmem [shape: f32[2,128,512], index: 6, kind: input, shape index: {}]   ;;  %s12774_s7 = inlined_call_operand.vmem [shape: f32[2,1,512], index: 7, kind: input, shape index: {}]   ;;  %s12775_s8 = inlined_call_operand.vmem [shape: f32[2,512,128], index: 8, kind: input, shape index: {}]   ;;  %s12776_s9 = inlined_call_operand.vmem [shape: f32[2,1,128], index: 9, kind: input, shape index: {}]   ;;  %s12777_s10 = inlined_call_operand.vmem [shape: f32[128,128], index: 10, kind: input, shape index: {}]   ;;  %s12778_s11 = inlined_call_operand.vmem [shape: f32[1,128], index: 11, kind: input, shape index: {}]   ;;  %s12779_s12 = inlined_call_operand.vmem [shape: f32[8,1,128], index: 12, kind: input, shape index: {}]   ;;  %s12780_s13 = inlined_call_operand.vmem [shape: f32[2,64,128], index: 13, kind: output, shape index: {}]  }
   0x1 LB: > { %s6733_s26 = sadd.s32 4294967295, %s7846_s25   ;;  %p6737_p0 = scmp.ge.s32.totalorder %s7846_s25, 1  ;;  %s7846_s25 = sphi %s7919_s25, %s23_s25  }
   0x2   : > { %p387_p1 = scmp.lt.s32.totalorder %s7846_s25, 3 }
   0x4   : > { %p388_p2 = pnand %p6737_p0, %p387_p1 }
   0x6   : > { %391 = sbr.rel (%p388_p2) target bundleno = 6312 (0x18a8), region = 72 }
   0xb   : > { %p431_p3 = scmp.lt.s32.totalorder %s6733_s26, 1  ;;  %v7848_v7 = vmov 128.0   ;;  %v829_v43 = vld [vmem:[%s12769_s2 + $0x168] sm:$0xff]  ;;  %v830_v44 = vld [vmem:[%s12769_s2 + $0x170] sm:$0xff]  ;;  %v827_v46 = vld [vmem:[%s12769_s2 + $0x158] sm:$0xff] }
   0xc   : > { %7134 = vrcp.f32 %v7848_v7  ;;  %840 = vmatpush.msra.mxu0 %v829_v43  ;;  %881 = vmatpush.msra.mxu3 %v830_v44  ;;  %v826_v45 = vld [vmem:[%s12769_s2 + $0x150] sm:$0xff]  ;;  %v823_v47 = vld [vmem:[%s12769_s2 + $0x138] sm:$0xff]  ;;  %v824_v48 = vld [vmem:[%s12769_s2 + $0x140] sm:$0xff] }
   0xd   : > { %s12850_s26 = smov (!%p431_p3, %s6733_s26), 1  ;;  %v820_v49 = vld [vmem:[%s12769_s2 + $0x120] sm:$0xff]  ;;  %v821_v50 = vld [vmem:[%s12769_s2 + $0x128] sm:$0xff]  ;;  %v818_v52 = vld [vmem:[%s12769_s2 + $0x110] sm:$0xff] }
   0xe   : > { %s7068_s27 = sshll.u32 %s12850_s26, 6  ;;  %841 = vmatpush.msra.mxu0 %v826_v45  ;;  %882 = vmatpush.msra.mxu3 %v827_v46  ;;  %v817_v51 = vld [vmem:[%s12769_s2 + $0x108] sm:$0xff]  ;;  %v814_v53 = vld [vmem:[%s12769_s2 + $0xf0] sm:$0xff]  ;;  %v815_v54 = vld [vmem:[%s12769_s2 + $0xf8] sm:$0xff] }
   0xf   : > { %s7935_s30 = scalar_lea.vmem %s12767_s0, %s7068_s27  ;;  %v811_v55 = vld [vmem:[%s12769_s2 + $0xd8] sm:$0xff]  ;;  %v812_v56 = vld [vmem:[%s12769_s2 + $0xe0] sm:$0xff]  ;;  %v809_v58 = vld [vmem:[%s12769_s2 + $0xc8] sm:$0xff]  ;;  %s12753_s20 = scalar_lea.vmem %s12780_s13, %s7068_s27 }
  0x10   : > { %v445_v0 = vld [vmem:[%s7935_s30 + $0x20] sm:$0xff]  ;;  %v443_v1 = vld [vmem:[%s7935_s30 + $0x10] sm:$0xff]  ;;  %v446_v3 = vld [vmem:[%s7935_s30 + $0x28] sm:$0xff]  ;;  %842 = vmatpush.msra.mxu0 %v823_v47  ;;  %883 = vmatpush.msra.mxu3 %v824_v48 }
  0x11   : > { %v441_v2 = vld [vmem:[%s7935_s30] sm:$0xff]  ;;  %475 = vadd.xlane.f32.xlu2 %v445_v0  ;;  %471 = vadd.xlane.f32.xlu1 %v443_v1  ;;  %v444_v4 = vld [vmem:[%s7935_s30 + $0x18] sm:$0xff]  ;;  %v442_v5 = vld [vmem:[%s7935_s30 + $0x8] sm:$0xff] }
  0x12   : > { %467 = vadd.xlane.f32.xlu0 %v441_v2  ;;  %v447_v6 = vld [vmem:[%s7935_s30 + $0x30] sm:$0xff]  ;;  %v7135_v8 = vpop.eup %7134  ;;  %v7967_v33 = vld [vmem:[%s7935_s30 + $0x38] sm:$0xff]  ;;  %843 = vmatpush.msra.mxu0 %v820_v49  ;;  %v808_v57 = vld [vmem:[%s12769_s2 + $0xc0] sm:$0xff] }
  0x13   : > { %v484_v9 = vmul.f32 128.0, %v7135_v8  ;;  %vm488_vm0 = vweird.f32 %v7135_v8  ;;  %884 = vmatpush.msra.mxu3 %v821_v50  ;;  %v805_v62 = vld [vmem:[%s12769_s2 + $0xa8] sm:$0xff]  ;;  %v806_v63 = vld [vmem:[%s12769_s2 + $0xb0] sm:$0xff]  ;;  %v8151_v48 = vld [vmem:[%s12769_s2 + $0xb8] sm:$0xff] }
  0x14   : > { %844 = vmatpush.msra.mxu0 %v817_v51  ;;  %v8072_v7 = vld [vmem:[%s12769_s2 + $0x148] sm:$0xff]  ;;  %v8143_v44 = vld [vmem:[%s12769_s2 + $0xd0] sm:$0xff] }
  0x15   : > { %v485_v10 = vsub.f32 1.0, %v484_v9  ;;  %885 = vmatpush.msra.mxu3 %v818_v52  ;;  %v797_v9 = vld [vmem:[%s12769_s2 + $0x68] sm:$0xff] }
  0x16   : > { %845 = vmatpush.msra.mxu0 %v814_v53  ;;  %v785_v43 = vld [vmem:[%s12769_s2 + $0x8] sm:$0xff] }
  0x17   : > { %v486_v11 = vmul.f32 %v7135_v8, %v485_v10  ;;  %886 = vmatpush.msra.mxu3 %v815_v54  ;;  %v8084_v10 = vld [vmem:[%s12769_s2 + $0x130] sm:$0xff] }
  0x18   : > { %846 = vmatpush.msra.mxu0 %v811_v55 }
  0x19   : > { %477 = vadd.xlane.f32.xlu2 %v446_v3  ;;  %473 = vadd.xlane.f32.xlu1 %v444_v4  ;;  %v487_v12 = vadd.f32 %v7135_v8, %v486_v11 }
  0x1a   : > { %469 = vadd.xlane.f32.xlu0 %v442_v5  ;;  %887 = vmatpush.msra.mxu3 %v812_v56 }
  0x1b   : > { %v7944_v13 = vsel %vm488_vm0, %v7135_v8, %v487_v12  ;;  %847 = vmatpush.msra.mxu0 %v808_v57  ;;  %v796_v8 = vld [vmem:[%s12769_s2 + $0x60] sm:$0xff] }
  0x1c   : > { %12792 = vst [vmem:[#allocation2_spill] sm:$0xff] %v7944_v13  ;;  %888 = vmatpush.msra.mxu3 %v809_v58  ;;  %v8165_v58 = vld [vmem:[%s12769_s2 + $0xa0] sm:$0xff] }
  0x1d   : > { %848 = vmatpush.msra.mxu0 %v805_v62 }
  0x1e   : > { %889 = vmatpush.msra.mxu3 %v806_v63  ;;  %v8175_v63 = vld [vmem:[%s12768_s1] ss:$0 sm:$0xff] }
  0x21   : > { %479 = vadd.xlane.f32.xlu1 %v447_v6 }
  0x84   : > { %v476_v14 = vpop.xlane.xlu2 %475  ;;  %v472_v15 = vpop.xlane.xlu1 %471 }
  0x85   : > { %v492_v16 = vmul.f32 %v7944_v13, %v472_v15  ;;  %v468_v17 = vpop.xlane.xlu0 %467  ;;  %v494_v29 = vmul.f32 %v7944_v13, %v476_v14 }
  0x86   : > { %v490_v18 = vmul.f32 %v7944_v13, %v468_v17  ;;  %v793_v17 = vld [vmem:[%s12769_s2 + $0x48] sm:$0xff] }
  0x87   : > { %v7948_v19 = vsub.f32 %v443_v1, %v492_v16  ;;  %v7972_v35 = vsub.f32 %v445_v0, %v494_v29  ;;  %v8044_v0 = vld [vmem:[%s12769_s2 + $0x178] sm:$0xff] }
  0x88   : > { %v7950_v20 = vsub.f32 %v441_v2, %v490_v18  ;;  %7070 = vmatpush.msra.mxu2 %v8044_v0  ;;  %v802_v2 = vld [vmem:[%s12769_s2 + $0x90] sm:$0xff]  ;;  %v791_v29 = vld [vmem:[%s12769_s2 + $0x38] sm:$0xff] }
  0x89   : > { %v508_v21 = vmul.f32 %v7948_v19, %v7948_v19  ;;  %v510_v38 = vmul.f32 %v7972_v35, %v7972_v35  ;;  %849 = vmatpush.msra.mxu0 %v802_v2  ;;  %v794_v18 = vld [vmem:[%s12769_s2 + $0x50] sm:$0xff] }
  0x8a   : > { %v506_v22 = vmul.f32 %v7950_v20, %v7950_v20 }
  0x8b   : > { %518 = vadd.xlane.f32.xlu1 %v508_v21  ;;  %v8098_v21 = vld [vmem:[%s12769_s2 + $0x118] sm:$0xff] }
  0x8c   : > { %514 = vadd.xlane.f32.xlu0 %v506_v22  ;;  %v478_v23 = vpop.xlane.xlu2 %477  ;;  %v474_v24 = vpop.xlane.xlu1 %473 }
  0x8d   : > { %v495_v25 = vmul.f32 %v7944_v13, %v478_v23  ;;  %v470_v26 = vpop.xlane.xlu0 %469  ;;  %v493_v31 = vmul.f32 %v7944_v13, %v474_v24 }
  0x8e   : > { %v491_v27 = vmul.f32 %v7944_v13, %v470_v26 }
  0x8f   : > { %v7958_v28 = vsub.f32 %v446_v3, %v495_v25  ;;  %v7974_v36 = vsub.f32 %v444_v4, %v493_v31  ;;  %v803_v3 = vld [vmem:[%s12769_s2 + $0x98] sm:$0xff]  ;;  %v8059_v4 = vld [vmem:[%s12769_s2 + $0x160] sm:$0xff] }
  0x90   : > { %v7961_v30 = vsub.f32 %v442_v5, %v491_v27  ;;  %890 = vmatpush.msra.mxu3 %v803_v3  ;;  %7071 = vmatpush.msra.mxu2 %v8059_v4  ;;  %v799_v5 = vld [vmem:[%s12769_s2 + $0x78] sm:$0xff]  ;;  %v790_v27 = vld [vmem:[%s12769_s2 + $0x30] sm:$0xff]  ;;  %v8116_v31 = vld [vmem:[%s12769_s2 + $0x100] sm:$0xff] }
  0x91   : > { %v511_v32 = vmul.f32 %v7958_v28, %v7958_v28  ;;  %v509_v39 = vmul.f32 %v7974_v36, %v7974_v36  ;;  %850 = vmatpush.msra.mxu0 %v799_v5 }
  0x92   : > { %v507_v34 = vmul.f32 %v7961_v30, %v7961_v30  ;;  %7072 = vmatpush.msra.mxu2 %v8072_v7 }
  0x93   : > { %524 = vadd.xlane.f32.xlu1 %v511_v32  ;;  %851 = vmatpush.msra.mxu0 %v796_v8 }
  0x94   : > { %481 = vadd.xlane.f32.xlu0 %v7967_v33  ;;  %516 = vadd.xlane.f32.xlu2 %v507_v34  ;;  %v480_v37 = vpop.xlane.xlu1 %479 }
  0x95   : > { %v496_v40 = vmul.f32 %v7944_v13, %v480_v37  ;;  %7073 = vmatpush.msra.mxu2 %v8084_v10  ;;  %852 = vmatpush.msra.mxu0 %v793_v17  ;;  %v8208_v17 = vmul.f32 %v8175_v63, %v7950_v20 }
  0x97   : > { %v7981_v41 = vsub.f32 %v447_v6, %v496_v40  ;;  %v800_v6 = vld [vmem:[%s12769_s2 + $0x80] sm:$0xff]  ;;  %7074 = vmatpush.msra.mxu2 %v8098_v21  ;;  %853 = vmatpush.msra.mxu0 %v790_v27  ;;  %v8132_v40 = vld [vmem:[%s12769_s2 + $0xe8] sm:$0xff] }
  0x98   : > { %891 = vmatpush.msra.mxu3 %v800_v6 }
  0x99   : > { %v512_v42 = vmul.f32 %v7981_v41, %v7981_v41  ;;  %7075 = vmatpush.msra.mxu2 %v8116_v31 }
  0x9a   : > { %892 = vmatpush.msra.mxu3 %v797_v9 }
  0x9b   : > { %7076 = vmatpush.msra.mxu2 %v8132_v40 }
  0x9c   : > { %522 = vadd.xlane.f32.xlu0 %v510_v38  ;;  %520 = vadd.xlane.f32.xlu2 %v509_v39  ;;  %v787_v38 = vld [vmem:[%s12769_s2 + $0x18] sm:$0xff]  ;;  %v788_v39 = vld [vmem:[%s12769_s2 + $0x20] sm:$0xff] }
  0x9d   : > { %893 = vmatpush.msra.mxu3 %v794_v18  ;;  %854 = vmatpush.msra.mxu0 %v787_v38 }
  0x9e   : > { %7077 = vmatpush.msra.mxu2 %v8143_v44 }
  0x9f   : > { %894 = vmatpush.msra.mxu3 %v791_v29 }
  0xa0   : > { %7078 = vmatpush.msra.mxu2 %v8151_v48 }
  0xa1   : > { %895 = vmatpush.msra.mxu3 %v788_v39 }
  0xa2   : > { %7079 = vmatpush.msra.mxu2 %v8165_v58 }
  0xa3   : > { %896 = vmatpush.msra.mxu3 %v785_v43 }
  0xa4   : > { %526 = vadd.xlane.f32.xlu2 %v512_v42 }
  0xfe   : > { %v519_v59 = vpop.xlane.xlu1 %518 }
  0xff   : > { %v8033_v60 = vmul.f32 0.007874016, %v519_v59  ;;  %v515_v61 = vpop.xlane.xlu0 %514 }
 0x100   : > { %v8046_v1 = vmul.f32 0.007874016, %v515_v61 }
 0x101   : > { %7136 = vrsqrt.f32 %v8033_v60  ;;  %vm580_vm1 = vcmp.eq.f32.partialorder %v8033_v60, inf  ;;  %v583_v59 = vand.u32 2147483648, %v8033_v60  ;;  %vm582_vm2 = vcmp.eq.f32.partialorder %v8033_v60, 0.0 }
 0x102   : > { %7138 = vrsqrt.f32 %v8046_v1  ;;  %vm556_vm3 = vcmp.eq.f32.partialorder %v8046_v1, inf  ;;  %v559_v8 = vand.u32 2147483648, %v8046_v1  ;;  %vm558_vm4 = vcmp.eq.f32.partialorder %v8046_v1, 0.0 }
 0x106   : > { %v525_v11 = vpop.xlane.xlu1 %524 }
 0x107   : > { %v7137_v12 = vpop.eup %7136  ;;  %v8086_v14 = vmul.f32 0.007874016, %v525_v11  ;;  %v517_v15 = vpop.xlane.xlu2 %516  ;;  %v8195_v11 = vld [vmem:[%s12769_s2 + $0x70] sm:$0xff] }
 0x108   : > { %v482_v16 = vpop.xlane.xlu0 %481  ;;  %v7139_v22 = vpop.eup %7138  ;;  %v574_v23 = vmul.f32 %v7137_v12, %v8033_v60  ;;  %v8101_v24 = vmul.f32 0.007874016, %v517_v15 }
 0x109   : > { %v497_v25 = vmul.f32 %v7944_v13, %v482_v16  ;;  %v550_v26 = vmul.f32 %v7139_v22, %v8046_v1  ;;  %7140 = vrsqrt.f32 %v8086_v14  ;;  %vm616_vm5 = vcmp.eq.f32.partialorder %v8086_v14, inf }
 0x10a   : > { %v575_v32 = vmul.f32 %v7137_v12, %v574_v23  ;;  %7142 = vrsqrt.f32 %v8101_v24  ;;  %vm568_vm6 = vcmp.eq.f32.partialorder %v8101_v24, inf  ;;  %v571_v27 = vand.u32 2147483648, %v8101_v24 }
 0x10b   : > { %v551_v34 = vmul.f32 %v7139_v22, %v550_v26  ;;  %v8120_v37 = vsub.f32 %v7967_v33, %v497_v25  ;;  %v784_v33 = vld [vmem:[%s12769_s2] sm:$0xff]  ;;  %vm570_vm7 = vcmp.eq.f32.partialorder %v8101_v24, 0.0  ;;  %vm618_vm8 = vcmp.eq.f32.partialorder %v8086_v14, 0.0 }
 0x10c   : > { %v576_v42 = vmul.f32 0.5, %v575_v32  ;;  %855 = vmatpush.msra.mxu0 %v784_v33 }
 0x10d   : > { %v552_v45 = vmul.f32 0.5, %v551_v34  ;;  %v513_v46 = vmul.f32 %v8120_v37, %v8120_v37 }
 0x10e   : > { %v577_v47 = vsub.f32 1.5, %v576_v42  ;;  %922 = vmatpush.msrb.mxu0 %v8044_v0  ;;  %v8183_v0 = vld [vmem:[%s12769_s2 + $0x88] sm:$0xff] }
 0x10f   : > { %v8153_v49 = vpop.eup %7140  ;;  %v553_v50 = vsub.f32 1.5, %v552_v45  ;;  %528 = vadd.xlane.f32.xlu0 %v513_v46  ;;  %v521_v51 = vpop.xlane.xlu2 %520  ;;  %7080 = vmatpush.msra.mxu2 %v8183_v0 }
 0x110   : > { %v523_v52 = vpop.xlane.xlu0 %522  ;;  %v7143_v53 = vpop.eup %7142  ;;  %v578_v54 = vmul.f32 %v7137_v12, %v577_v47  ;;  %v610_v55 = vmul.f32 %v8153_v49, %v8086_v14  ;;  %v8158_v56 = vmul.f32 0.007874016, %v521_v51  ;;  %923 = vmatpush.msrb.mxu0 %v8059_v4 }
 0x111   : > { %v8160_v57 = vmul.f32 0.007874016, %v523_v52  ;;  %v554_v61 = vmul.f32 %v7139_v22, %v553_v50  ;;  %v562_v62 = vmul.f32 %v7143_v53, %v8101_v24  ;;  %7081 = vmatpush.msra.mxu2 %v8195_v11 }
 0x112   : > { %v579_v2 = vmul.f32 %v578_v54, %v8033_v60  ;;  %v611_v3 = vmul.f32 %v8153_v49, %v610_v55  ;;  %7144 = vrsqrt.f32 %v8158_v56  ;;  %924 = vmatpush.msrb.mxu0 %v8072_v7  ;;  %v8213_v7 = vld [vmem:[%s12769_s2 + $0x58] sm:$0xff]  ;;  %vm592_vm9 = vcmp.eq.f32.partialorder %v8158_v56, inf }
 0x113   : > { %v555_v5 = vmul.f32 %v554_v61, %v8046_v1  ;;  %v563_v6 = vmul.f32 %v7143_v53, %v562_v62  ;;  %7146 = vrsqrt.f32 %v8160_v57  ;;  %7082 = vmatpush.msra.mxu2 %v8213_v7  ;;  %v595_v45 = vand.u32 2147483648, %v8158_v56 }
 0x114   : > { %v612_v9 = vmul.f32 0.5, %v611_v3  ;;  %v581_v4 = vsel %vm580_vm1, %v8033_v60, %v579_v2  ;;  %925 = vmatpush.msrb.mxu0 %v8084_v10  ;;  %v619_v60 = vand.u32 2147483648, %v8086_v14  ;;  %v8230_v10 = vld [vmem:[%s12769_s2 + $0x40] sm:$0xff]  ;;  %vm604_vm10 = vcmp.eq.f32.partialorder %v8160_v57, inf }
 0x115   : > { %v564_v12 = vmul.f32 0.5, %v563_v6  ;;  %v557_v15 = vsel %vm556_vm3, %v8046_v1, %v555_v5  ;;  %v584_v16 = vsel %vm582_vm2, %v583_v59, %v581_v4  ;;  %7083 = vmatpush.msra.mxu2 %v8230_v10  ;;  %v607_v47 = vand.u32 2147483648, %v8160_v57 }
 0x116   : > { %v613_v18 = vsub.f32 1.5, %v612_v9  ;;  %v560_v22 = vsel %vm558_vm4, %v559_v8, %v557_v15  ;;  %v8215_v23 = vadd.f32 1e-06, %v584_v16  ;;  %926 = vmatpush.msrb.mxu0 %v8098_v21  ;;  %v8244_v21 = vld [vmem:[%s12769_s2 + $0x28] sm:$0xff]  ;;  %vm606_vm11 = vcmp.eq.f32.partialorder %v8160_v57, 0.0 }
 0x117   : > { %v565_v1 = vsub.f32 1.5, %v564_v12  ;;  %v527_v25 = vpop.xlane.xlu2 %526  ;;  %v8220_v26 = vadd.f32 1e-06, %v560_v22  ;;  %7084 = vmatpush.msra.mxu2 %v8244_v21  ;;  %vm594_vm12 = vcmp.eq.f32.partialorder %v8158_v56, 0.0 }
 0x118   : > { %v7145_v20 = vpop.eup %7144  ;;  %v8225_v29 = vmul.f32 0.007874016, %v527_v25  ;;  %7148 = vrcp.f32 %v8215_v23  ;;  %v614_v39 = vmul.f32 %v8153_v49, %v613_v18  ;;  %927 = vmatpush.msrb.mxu0 %v8116_v31  ;;  %v8257_v49 = vld [vmem:[%s12769_s2 + $0x10] sm:$0xff]  ;;  %vm688_vm14 = vweird.f32 %v8215_v23 }
 0x119   : > { %v7147_v32 = vpop.eup %7146  ;;  %v566_v34 = vmul.f32 %v7143_v53, %v565_v1  ;;  %v586_v38 = vmul.f32 %v7145_v20, %v8158_v56  ;;  %7150 = vrcp.f32 %v8220_v26  ;;  %v662_v50 = vand.u32 2147483647, %v8220_v26  ;;  %7085 = vmatpush.msra.mxu2 %v8257_v49 }
 0x11a   : > { %v598_v42 = vmul.f32 %v7147_v32, %v8160_v57  ;;  %7152 = vrsqrt.f32 %v8225_v29  ;;  %928 = vmatpush.msrb.mxu0 %v8132_v40  ;;  %v615_v53 = vmul.f32 %v614_v39, %v8086_v14  ;;  %v664_v55 = vand.u32 2147483648, %v8220_v26 }
 0x11b   : > { %v567_v33 = vmul.f32 %v566_v34, %v8101_v24  ;;  %v587_v43 = vmul.f32 %v7145_v20, %v586_v38  ;;  %vm658_vm13 = vweird.f32 %v8220_v26  ;;  %v692_v6 = vand.u32 2147483647, %v8215_v23 }
 0x11c   : > { %v599_v46 = vmul.f32 %v7147_v32, %v598_v42  ;;  %929 = vmatpush.msrb.mxu0 %v8143_v44  ;;  %v694_v44 = vand.u32 2147483648, %v8215_v23  ;;  %vm8286_vm15 = vcmp.eq.f32.partialorder %v662_v50, 8.507059e+37  ;;  %v665_v16 = vor.u32 1.1754944e-38, %v664_v55 }
 0x11d   : > { %v588_v31 = vmul.f32 0.5, %v587_v43  ;;  %v569_v51 = vsel %vm568_vm6, %v8101_v24, %v567_v33  ;;  %v617_v18 = vsel %vm616_vm5, %v8086_v14, %v615_v53  ;;  %vm628_vm6 = vcmp.eq.f32.partialorder %v8225_v29, inf }
 0x11e   : > { %v8267_v52 = vpop.eup %7148  ;;  %v600_v54 = vmul.f32 0.5, %v599_v46  ;;  %v572_v40 = vsel %vm570_vm7, %v571_v27, %v569_v51  ;;  %930 = vmatpush.msrb.mxu0 %v8151_v48  ;;  %v620_v34 = vsel %vm618_vm8, %v619_v60, %v617_v18  ;;  %vm693_vm8 = vcmp.eq.f32.partialorder %v692_v6, 8.507059e+37 }
 0x11f   : > { %v7151_v59 = vpop.eup %7150  ;;  %v589_v61 = vsub.f32 1.5, %v588_v31  ;;  %v8275_v62 = vadd.f32 1e-06, %v572_v40  ;;  %v684_v2 = vmul.f32 %v8267_v52, %v8215_v23  ;;  %vm689_vm0 = vweird.f32 %v8267_v52 }
 0x120   : > { %v7153_v3 = vpop.eup %7152  ;;  %v601_v5 = vsub.f32 1.5, %v600_v54  ;;  %v654_v24 = vmul.f32 %v7151_v59, %v8220_v26  ;;  %931 = vmatpush.msrb.mxu0 %v8165_v58  ;;  %vm659_vm1 = vweird.f32 %v7151_v59  ;;  %v8330_v50 = vadd.f32 1e-06, %v620_v34  ;;  %vm8342_vm5 = vmor %vm688_vm14, %vm689_vm0 }
 0x121   : > { %v590_v8 = vmul.f32 %v7145_v20, %v589_v61  ;;  %v622_v9 = vmul.f32 %v7153_v3, %v8225_v29  ;;  %7154 = vrcp.f32 %v8275_v62  ;;  %v685_v1 = vsub.f32 1.0, %v684_v2  ;;  %vm660_vm3 = vmor %vm658_vm13, %vm659_vm1 }
 0x122   : > { %v602_v12 = vmul.f32 %v7147_v32, %v601_v5  ;;  %v655_v15 = vsub.f32 1.0, %v654_v24  ;;  %vm673_vm2 = vweird.f32 %v8275_v62  ;;  %932 = vmatpush.msrb.mxu0 %v8183_v0  ;;  %v677_v39 = vand.u32 2147483647, %v8275_v62 }
 0x123   : > { %v591_v48 = vmul.f32 %v590_v8, %v8158_v56  ;;  %v623_v22 = vmul.f32 %v7153_v3, %v622_v9  ;;  %v686_v32 = vmul.f32 %v8267_v52, %v685_v1  ;;  %v679_v14 = vand.u32 2147483648, %v8275_v62 }
 0x124   : > { %v603_v25 = vmul.f32 %v602_v12, %v8160_v57  ;;  %v656_v20 = vmul.f32 %v7151_v59, %v655_v15  ;;  %933 = vmatpush.msrb.mxu0 %v8195_v11  ;;  %v695_v40 = vor.u32 1.1754944e-38, %v694_v44  ;;  %v631_v61 = vand.u32 2147483648, %v8225_v29 }
 0x125   : > { %v624_v27 = vmul.f32 0.5, %v623_v22  ;;  %v593_v58 = vsel %vm592_vm9, %v8158_v56, %v591_v48  ;;  %v8325_v56 = vld [vmem:[%s12768_s1 + $0x1] ss:$0 sm:$0xff]  ;;  %vm678_vm9 = vcmp.eq.f32.partialorder %v677_v39, 8.507059e+37  ;;  %v543_v2 = vmul.f32 %v8175_v63, %v7948_v19 }
 0x126   : > { %v657_v38 = vadd.f32 %v7151_v59, %v656_v20  ;;  %v605_v42 = vsel %vm604_vm10, %v8160_v57, %v603_v25  ;;  %v596_v0 = vsel %vm594_vm12, %v595_v45, %v593_v58  ;;  %934 = vmatpush.msrb.mxu0 %v8213_v7  ;;  %vm630_vm10 = vcmp.eq.f32.partialorder %v8225_v29, 0.0 }
 0x127   : > { %v7155_v33 = vpop.eup %7154  ;;  %v625_v43 = vsub.f32 1.5, %v624_v27  ;;  %v608_v60 = vsel %vm606_vm11, %v607_v47, %v605_v42  ;;  %v8320_v46 = vadd.f32 1e-06, %v596_v0  ;;  %v687_v47 = vadd.f32 %v8267_v52, %v686_v32 }
 0x128   : > { %v661_v31 = vsel %vm660_vm3, %v7151_v59, %v657_v38  ;;  %v669_v11 = vmul.f32 %v7155_v33, %v8275_v62  ;;  %v8328_v45 = vadd.f32 1e-06, %v608_v60  ;;  %vm674_vm4 = vweird.f32 %v7155_v33  ;;  %935 = vmatpush.msrb.mxu0 %v8230_v10 }
 0x129   : > { %v626_v26 = vmul.f32 %v7153_v3, %v625_v43  ;;  %v666_v57 = vsel %vm8286_vm15, %v665_v16, %v661_v31  ;;  %7156 = vrcp.f32 %v8320_v46  ;;  %vm8356_vm7 = vmor %vm673_vm2, %vm674_vm4  ;;  %v680_v59 = vor.u32 1.1754944e-38, %v679_v14 }
 0x12a   : > { %v667_v51 = vmul.f32 %v666_v57, %v8208_v17  ;;  %v670_v53 = vsub.f32 1.0, %v669_v11  ;;  %7158 = vrcp.f32 %v8328_v45  ;;  %936 = vmatpush.msrb.mxu0 %v8244_v21  ;;  %v691_v10 = vsel %vm8342_vm5, %v8267_v52, %v687_v47 }
 0x12b   : > { %v627_v7 = vmul.f32 %v626_v26, %v8225_v29  ;;  %7160 = vrcp.f32 %v8330_v50  ;;  %v542_v3 = vmul.f32 %v8175_v63, %v7961_v30  ;;  %v722_v52 = vand.u32 2147483647, %v8328_v45 }
 0x12c   : > { %v8350_v55 = vadd.f32 %v8325_v56, %v667_v51  ;;  %v671_v17 = vmul.f32 %v7155_v33, %v670_v53  ;;  %937 = vmatpush.msrb.mxu0 %v8257_v49  ;;  %v696_v6 = vsel %vm693_vm8, %v695_v40, %v691_v10  ;;  %vm718_vm11 = vweird.f32 %v8328_v45 }
 0x12d   : > { %v629_v19 = vsel %vm628_vm6, %v8225_v29, %v627_v7  ;;  %v724_v9 = vand.u32 2147483648, %v8328_v45  ;;  %vm703_vm12 = vweird.f32 %v8320_v46  ;;  %vm8387_vm14 = vcmp.eq.f32.partialorder %v722_v52, 8.507059e+37 }
 0x12e   : > { %856 = vmatmul.f32.vlgmr.msra.gmra.mxu0 %v8350_v55  ;;  %897 = vmatmul.f32.vlgmr.msra.gmra.mxu3 %v8350_v55  ;;  %v672_v21 = vadd.f32 %v7155_v33, %v671_v17  ;;  %v632_v12 = vsel %vm630_vm10, %v631_v61, %v629_v19  ;;  %v707_v1 = vand.u32 2147483647, %v8320_v46  ;;  %v709_v20 = vand.u32 2147483648, %v8320_v46 }
 0x12f   : > { %v8367_v62 = vpop.eup %7156  ;;  %v651_v18 = vadd.f32 1e-06, %v632_v12  ;;  %v725_v58 = vor.u32 1.1754944e-38, %v724_v9  ;;  %vm733_vm1 = vweird.f32 %v8330_v50  ;;  %v739_v38 = vand.u32 2147483648, %v8330_v50 }
 0x130   : > { %v7159_v5 = vpop.eup %7158  ;;  %v676_v24 = vsel %vm8356_vm7, %v7155_v33, %v672_v21  ;;  %v699_v44 = vmul.f32 %v8367_v62, %v8320_v46  ;;  %vm704_vm15 = vweird.f32 %v8367_v62  ;;  %v737_v33 = vand.u32 2147483647, %v8330_v50 }
 0x131   : > { %v681_v8 = vsel %vm678_vm9, %v680_v59, %v676_v24  ;;  %v714_v30 = vmul.f32 %v7159_v5, %v8328_v45  ;;  %vm719_vm13 = vweird.f32 %v7159_v5  ;;  %v7161_v29 = vpop.eup %7160  ;;  %7162 = vrcp.f32 %v651_v18  ;;  %vm8412_vm2 = vmor %vm703_vm12, %vm704_vm15 }
 0x132   : > { %v682_v49 = vmul.f32 %v681_v8, %v542_v3  ;;  %v700_v4 = vsub.f32 1.0, %v699_v44  ;;  %v729_v27 = vmul.f32 %v7161_v29, %v8330_v50  ;;  %vm8403_vm0 = vmor %vm718_vm11, %vm719_vm13  ;;  %vm734_vm3 = vweird.f32 %v7161_v29 }
 0x133   : > { %v715_v15 = vsub.f32 1.0, %v714_v30  ;;  %v697_v43 = vmul.f32 %v696_v6, %v543_v2  ;;  %v545_v14 = vmul.f32 %v8175_v63, %v7972_v35  ;;  %v710_v31 = vor.u32 1.1754944e-38, %v709_v20  ;;  %vm8428_vm5 = vmor %vm733_vm1, %vm734_vm3 }
 0x134   : > { %v8392_v48 = vadd.f32 %v8325_v56, %v682_v49  ;;  %v701_v22 = vmul.f32 %v8367_v62, %v700_v4  ;;  %v730_v0 = vsub.f32 1.0, %v729_v27  ;;  %vm708_vm4 = vcmp.eq.f32.partialorder %v707_v1, 8.507059e+37 }
 0x135   : > { %v716_v25 = vmul.f32 %v7159_v5, %v715_v15  ;;  %v740_v35 = vor.u32 1.1754944e-38, %v739_v38  ;;  %vm738_vm6 = vcmp.eq.f32.partialorder %v737_v33, 8.507059e+37  ;;  %v544_v53 = vmul.f32 %v8175_v63, %v7974_v36 }
 0x136   : > { %859 = vmatmul.f32.gmra.mxu0 %v8392_v48  ;;  %900 = vmatmul.f32.gmra.mxu3 %v8392_v48  ;;  %v702_v34 = vadd.f32 %v8367_v62, %v701_v22  ;;  %v731_v11 = vmul.f32 %v7161_v29, %v730_v0  ;;  %v8435_v54 = vadd.f32 %v8325_v56, %v697_v43  ;;  %vm748_vm7 = vweird.f32 %v651_v18 }
 0x137   : > { %v717_v39 = vadd.f32 %v7159_v5, %v716_v25  ;;  %v7163_v57 = vpop.eup %7162  ;;  %v754_v10 = vand.u32 2147483648, %v651_v18  ;;  %v546_v36 = vmul.f32 %v8175_v63, %v7958_v28  ;;  %v752_v61 = vand.u32 2147483647, %v651_v18 }
 0x138   : > { %v706_v45 = vsel %vm8412_vm2, %v8367_v62, %v702_v34  ;;  %v732_v51 = vadd.f32 %v7161_v29, %v731_v11  ;;  %v744_v7 = vmul.f32 %v7163_v57, %v651_v18  ;;  %vm749_vm8 = vweird.f32 %v7163_v57 }
 0x139   : > { %v721_v60 = vsel %vm8403_vm0, %v7159_v5, %v717_v39  ;;  %v711_v40 = vsel %vm708_vm4, %v710_v31, %v706_v45  ;;  %vm750_vm9 = vmor %vm748_vm7, %vm749_vm8  ;;  %v755_v52 = vor.u32 1.1754944e-38, %v754_v10  ;;  %vm753_vm10 = vcmp.eq.f32.partialorder %v752_v61, 8.507059e+37 }
 0x13a   : > { %v726_v46 = vsel %vm8387_vm14, %v725_v58, %v721_v60  ;;  %v736_v50 = vsel %vm8428_vm5, %v7161_v29, %v732_v51  ;;  %v745_v59 = vsub.f32 1.0, %v744_v7  ;;  %v712_v21 = vmul.f32 %v711_v40, %v544_v53  ;;  %v832_v40 = vld [vmem:[%s12770_s3] sm:$0x7] }
 0x13b   : > { %v727_v47 = vmul.f32 %v726_v46, %v545_v14  ;;  %v741_v23 = vsel %vm738_vm6, %v740_v35, %v736_v50  ;;  %v547_v28 = vmul.f32 %v8175_v63, %v7981_v41  ;;  %v548_v0 = vmul.f32 %v8175_v63, %v8120_v37 }
 0x13c   : > { %v746_v62 = vmul.f32 %v7163_v57, %v745_v59  ;;  %v742_v2 = vmul.f32 %v741_v23, %v546_v36  ;;  %v779_v5 = vadd.f32 %v8325_v56, %v712_v21  ;;  %v835_v50 = vperm.slane %v832_v40, 1 }
 0x13d   : > { %v780_v17 = vadd.f32 %v8325_v56, %v727_v47  ;;  %v836_v23 = vperm.slane %v832_v40, 2  ;;  %vm1260_vm1 = vcmask 523264  }
 0x13e   : > { %862 = vmatmul.f32.gmra.mxu0 %v8435_v54  ;;  %903 = vmatmul.f32.gmra.mxu3 %v8435_v54  ;;  %v747_v3 = vadd.f32 %v7163_v57, %v746_v62  ;;  %v781_v6 = vadd.f32 %v8325_v56, %v742_v2 }
 0x13f   : > { %950 = vmatmul.f32.vlgmr.msra.gmra.mxu2 %v780_v17 }
 0x140   : > { %v751_v24 = vsel %vm750_vm9, %v7163_v57, %v747_v3 }
 0x141   : > { %v756_v44 = vsel %vm753_vm10, %v755_v52, %v751_v24 }
 0x142   : > { %v757_v19 = vmul.f32 %v756_v44, %v547_v28 }
 0x144   : > { %v782_v8 = vadd.f32 %v8325_v56, %v757_v19 }
 0x146   : > { %865 = vmatmul.f32.gmra.mxu0 %v779_v5  ;;  %906 = vmatmul.f32.gmra.mxu3 %v779_v5 }
 0x147   : > { %953 = vmatmul.f32.gmra.mxu2 %v781_v6 }
 0x14e   : > { %868 = vmatmul.f32.gmra.mxu0 %v780_v17  ;;  %909 = vmatmul.f32.gmra.mxu3 %v780_v17 }
 0x14f   : > { %956 = vmatmul.f32.gmra.mxu2 %v782_v8 }
 0x156   : > { %871 = vmatmul.f32.gmra.mxu0 %v781_v6  ;;  %912 = vmatmul.f32.gmra.mxu3 %v781_v6 }
 0x15e   : > { %874 = vmatmul.f32.gmra.mxu0 %v782_v8  ;;  %915 = vmatmul.f32.gmra.mxu3 %v782_v8  ;;  %v834_v8 = vperm.slane %v832_v40, 0 }
 0x182   : > { %v529_v30 = vpop.xlane.xlu0 %528 }
 0x183   : > { %v537_v9 = vmul.f32 0.007874016, %v529_v30 }
 0x185   : > { %7164 = vrsqrt.f32 %v537_v9  ;;  %vm640_vm11 = vcmp.eq.f32.partialorder %v537_v9, inf  ;;  %v643_v29 = vand.u32 2147483648, %v537_v9  ;;  %vm642_vm12 = vcmp.eq.f32.partialorder %v537_v9, 0.0 }
 0x18b   : > { %v7165_v49 = vpop.eup %7164 }
 0x18c   : > { %v634_v4 = vmul.f32 %v7165_v49, %v537_v9 }
 0x18e   : > { %v635_v12 = vmul.f32 %v7165_v49, %v634_v4 }
 0x190   : > { %v636_v15 = vmul.f32 0.5, %v635_v12  ;;  %v7113_v12 = vld [vmem:[%s12779_s12] ss:$0 sm:$0xff] }
 0x192   : > { %v637_v16 = vsub.f32 1.5, %v636_v15 }
 0x194   : > { %v638_v41 = vmul.f32 %v7165_v49, %v637_v16 }
 0x196   : > { %v639_v18 = vmul.f32 %v638_v41, %v537_v9 }
 0x198   : > { %v641_v22 = vsel %vm640_vm11, %v537_v9, %v639_v18 }
 0x199   : > { %v644_v1 = vsel %vm642_vm12, %v643_v29, %v641_v22 }
 0x19a   : > { %v652_v25 = vadd.f32 1e-06, %v644_v1 }
 0x19c   : > { %7166 = vrcp.f32 %v652_v25  ;;  %v769_v58 = vand.u32 2147483648, %v652_v25  ;;  %v767_v38 = vand.u32 2147483647, %v652_v25  ;;  %vm763_vm14 = vweird.f32 %v652_v25 }
 0x19e   : > { %v770_v42 = vor.u32 1.1754944e-38, %v769_v58  ;;  %vm768_vm0 = vcmp.eq.f32.partialorder %v767_v38, 8.507059e+37 }
 0x1a2   : > { %v7167_v20 = vpop.eup %7166 }
 0x1a3   : > { %v759_v27 = vmul.f32 %v7167_v20, %v652_v25  ;;  %vm764_vm13 = vweird.f32 %v7167_v20 }
 0x1a4   : > { %vm765_vm15 = vmor %vm763_vm14, %vm764_vm13 }
 0x1a5   : > { %v760_v32 = vsub.f32 1.0, %v759_v27 }
 0x1a7   : > { %v761_v34 = vmul.f32 %v7167_v20, %v760_v32 }
 0x1a9   : > { %v762_v39 = vadd.f32 %v7167_v20, %v761_v34 }
 0x1ab   : > { %v766_v33 = vsel %vm765_vm15, %v7167_v20, %v762_v39  ;;  %v857_v31 = vpop.f32.mrf.mxu0 }
 0x1ac   : > { %v771_v43 = vsel %vm768_vm0, %v770_v42, %v766_v33  ;;  %v8470_v4 = vadd.f32 %v857_v31, %v834_v8 }
 0x1ad   : > { %v772_v14 = vmul.f32 %v771_v43, %v548_v0 }
 0x1ae   : > { %v987_v18 = vmul.f32 %v7113_v12, %v8470_v4 }
 0x1af   : > { %v783_v60 = vadd.f32 %v8325_v56, %v772_v14  ;;  %v7114_v14 = vld [vmem:[%s12779_s12 + $0x1] ss:$0 sm:$0xff] }
 0x1b1   : > { %877 = vmatmul.f32.gmra.mxu0 %v783_v60  ;;  %918 = vmatmul.f32.gmra.mxu3 %v783_v60  ;;  %v898_v11 = vpop.f32.mrf.mxu3 }
 0x1b2   : > { %959 = vmatmul.f32.gmra.mxu2 %v783_v60  ;;  %v899_v16 = vadd.f32 %v898_v11, %v835_v50  ;;  %v995_v60 = vmul.f32 %v7114_v14, %v8470_v4 }
 0x1b3   : > { %v860_v46 = vpop.f32.mrf.mxu0 }
 0x1b4   : > { %v8476_v22 = vadd.f32 %v860_v46, %v834_v8 }
 0x1b6   : > { %v988_v1 = vmul.f32 %v7113_v12, %v8476_v22  ;;  %v996_v31 = vmul.f32 %v7114_v14, %v8476_v22 }
 0x1b9   : > { %938 = vmatmul.f32.vlgmr.msrb.gmra.mxu0 %v8350_v55  ;;  %v901_v37 = vpop.f32.mrf.mxu3 }
 0x1ba   : > { %v902_v30 = vadd.f32 %v901_v37, %v835_v50 }
 0x1bb   : > { %v8455_v63 = vpop.f32.mrf.mxu0 }
 0x1bc   : > { %v8480_v25 = vadd.f32 %v8455_v63, %v834_v8 }
 0x1be   : > { %v989_v20 = vmul.f32 %v7113_v12, %v8480_v25  ;;  %v997_v11 = vmul.f32 %v7114_v14, %v8480_v25 }
 0x1c1   : > { %941 = vmatmul.f32.gmra.mxu0 %v8392_v48  ;;  %v904_v45 = vpop.f32.mrf.mxu3 }
 0x1c2   : > { %v951_v47 = vpop.f32.mrf.mxu2  ;;  %v905_v19 = vadd.f32 %v904_v45, %v835_v50 }
 0x1c3   : > { %v8457_v26 = vpop.f32.mrf.mxu0  ;;  %v952_v52 = vadd.f32 %v951_v47, %v836_v23 }
 0x1c4   : > { %v8484_v27 = vadd.f32 %v8457_v26, %v834_v8 }
 0x1c6   : > { %v990_v32 = vmul.f32 %v7113_v12, %v8484_v27  ;;  %v998_v46 = vmul.f32 %v7114_v14, %v8484_v27 }
 0x1c9   : > { %944 = vmatmul.f32.gmra.mxu0 %v8435_v54  ;;  %v907_v56 = vpop.f32.mrf.mxu3 }
 0x1ca   : > { %v954_v51 = vpop.f32.mrf.mxu2  ;;  %v908_v44 = vadd.f32 %v907_v56, %v835_v50  ;;  %v7115_v56 = vld [vmem:[%s12779_s12 + $0x2] ss:$0 sm:$0xff] }
 0x1cb   : > { %v8459_v35 = vpop.f32.mrf.mxu0  ;;  %v955_v3 = vadd.f32 %v954_v51, %v836_v23 }
 0x1cc   : > { %v8488_v58 = vadd.f32 %v8459_v35, %v834_v8  ;;  %v1003_v35 = vmul.f32 %v7115_v56, %v8470_v4 }
 0x1ce   : > { %v991_v34 = vmul.f32 %v7113_v12, %v8488_v58  ;;  %v999_v37 = vmul.f32 %v7114_v14, %v8488_v58 }
 0x1d1   : > { %947 = vmatmul.f32.gmra.mxu0 %v779_v5  ;;  %v910_v57 = vpop.f32.mrf.mxu3 }
 0x1d2   : > { %v957_v7 = vpop.f32.mrf.mxu2  ;;  %v911_v6 = vadd.f32 %v910_v57, %v835_v50 }
 0x1d3   : > { %v8461_v55 = vpop.f32.mrf.mxu0  ;;  %v958_v62 = vadd.f32 %v957_v7, %v836_v23 }
 0x1d4   : > { %v8492_v38 = vadd.f32 %v8461_v55, %v834_v8  ;;  %v1004_v55 = vmul.f32 %v7115_v56, %v8476_v22 }
 0x1d6   : > { %v992_v39 = vmul.f32 %v7113_v12, %v8492_v38  ;;  %v1000_v63 = vmul.f32 %v7114_v14, %v8492_v38 }
 0x1d9   : > { %v913_v48 = vpop.f32.mrf.mxu3 }
 0x1da   : > { %v914_v5 = vadd.f32 %v913_v48, %v835_v50 }
 0x1db   : > { %v8463_v53 = vpop.f32.mrf.mxu0 }
 0x1dc   : > { %v8496_v42 = vadd.f32 %v8463_v53, %v834_v8  ;;  %v1005_v53 = vmul.f32 %v7115_v56, %v8480_v25 }
 0x1de   : > { %v993_v0 = vmul.f32 %v7113_v12, %v8496_v42  ;;  %v1001_v45 = vmul.f32 %v7114_v14, %v8496_v42 }
 0x1e1   : > { %v916_v54 = vpop.f32.mrf.mxu3 }
 0x1e2   : > { %v917_v2 = vadd.f32 %v916_v54, %v835_v50 }
 0x22e   : > { %v8465_v17 = vpop.f32.mrf.mxu0 }
 0x22f   : > { %v8500_v33 = vadd.f32 %v8465_v17, %v834_v8  ;;  %v1006_v17 = vmul.f32 %v7115_v56, %v8484_v27 }
 0x231   : > { %v994_v43 = vmul.f32 %v7113_v12, %v8500_v33  ;;  %v1002_v26 = vmul.f32 %v7114_v14, %v8500_v33 }
 0x234   : > { %v919_v59 = vpop.f32.mrf.mxu3 }
 0x235   : > { %v960_v10 = vpop.f32.mrf.mxu2  ;;  %v920_v36 = vadd.f32 %v919_v59, %v835_v50 }
 0x236   : > { %v961_v61 = vadd.f32 %v960_v10, %v836_v23  ;;  %v939_v21 = vpop.f32.mrf.mxu0 }
 0x237   : > { %1059 = vmatpush.xpose.msrb.mxu3 %v920_v36  ;;  %v940_v29 = vadd.f32 %v939_v21, %v836_v23  ;;  %v1008_v36 = vmul.f32 %v7115_v56, %v8492_v38 }
 0x238   : > { %2165 = vmatpush.msra.mxu0 %v961_v61 }
 0x23a   : > { %2166 = vmatpush.msra.mxu0 %v958_v62  ;;  %v1009_v62 = vmul.f32 %v7115_v56, %v8496_v42 }
 0x23b   : > { %1060 = vmatpush.xpose.msrb.mxu3 %v917_v2 }
 0x23c   : > { %2167 = vmatpush.msra.mxu0 %v955_v3 }
 0x23e   : > { %2168 = vmatpush.msra.mxu0 %v952_v52  ;;  %v942_v24 = vpop.f32.mrf.mxu0  ;;  %v1010_v52 = vmul.f32 %v7115_v56, %v8500_v33 }
 0x23f   : > { %1061 = vmatpush.xpose.msrb.mxu3 %v914_v5  ;;  %v943_v41 = vadd.f32 %v942_v24, %v836_v23  ;;  %v7116_v5 = vld [vmem:[%s12779_s12 + $0x3] ss:$0 sm:$0xff] }
 0x240   : > { %v1015_v12 = vmul.f32 %v7116_v5, %v8488_v58 }
 0x243   : > { %1062 = vmatpush.xpose.msrb.mxu3 %v911_v6 }
 0x246   : > { %v945_v28 = vpop.f32.mrf.mxu0 }
 0x247   : > { %1063 = vmatpush.xpose.msrb.mxu3 %v908_v44  ;;  %v946_v15 = vadd.f32 %v945_v28, %v836_v23  ;;  %v1011_v44 = vmul.f32 %v7116_v5, %v8470_v4 }
 0x24b   : > { %1064 = vmatpush.xpose.msrb.mxu3 %v905_v19  ;;  %v1012_v19 = vmul.f32 %v7116_v5, %v8476_v22 }
 0x24e   : > { %v948_v9 = vpop.f32.mrf.mxu0 }
 0x24f   : > { %v949_v49 = vadd.f32 %v948_v9, %v836_v23  ;;  %1065 = vmatpush.xpose.msrb.mxu3 %v902_v30  ;;  %v1007_v23 = vmul.f32 %v7115_v56, %v8488_v58  ;;  %v1013_v30 = vmul.f32 %v7116_v5, %v8480_v25 }
 0x251   : > { %2169 = vmatpush.msra.mxu0 %v949_v49  ;;  %v1014_v49 = vmul.f32 %v7116_v5, %v8484_v27 }
 0x253   : > { %1066 = vmatpush.xpose.msrb.mxu3 %v899_v16  ;;  %2170 = vmatpush.msra.mxu0 %v946_v15  ;;  %v1016_v16 = vmul.f32 %v7116_v5, %v8492_v38 }
 0x255   : > { %2171 = vmatpush.msra.mxu0 %v943_v41 }
 0x256   : > { %1067 = vmatmul.f32.vlgmr.msrb.gmra.mxu3 %v987_v18  ;;  %v1017_v18 = vmul.f32 %v7116_v5, %v8496_v42 }
 0x257   : > { %2172 = vmatpush.msra.mxu0 %v940_v29 }
 0x25e   : > { %1070 = vmatmul.f32.gmra.mxu3 %v988_v1  ;;  %v1018_v1 = vmul.f32 %v7116_v5, %v8500_v33 }
 0x266   : > { %1073 = vmatmul.f32.gmra.mxu3 %v989_v20 }
 0x26e   : > { %1076 = vmatmul.f32.gmra.mxu3 %v990_v32 }
 0x276   : > { %1079 = vmatmul.f32.gmra.mxu3 %v991_v34  ;;  %v8584_v34 = vld [vmem:[%s12779_s12 + $0x4] ss:$0 sm:$0xff] }
 0x277   : > { %v1023_v5 = vmul.f32 %v8584_v34, %v8488_v58 }
 0x27e   : > { %1082 = vmatmul.f32.gmra.mxu3 %v992_v39 }
 0x286   : > { %1085 = vmatmul.f32.gmra.mxu3 %v993_v0 }
 0x28e   : > { %1088 = vmatmul.f32.gmra.mxu3 %v994_v43  ;;  %v1019_v43 = vmul.f32 %v8584_v34, %v8470_v4 }
 0x296   : > { %1091 = vmatmul.f32.gmra.mxu3 %v995_v60 }
 0x29e   : > { %1094 = vmatmul.f32.gmra.mxu3 %v996_v31 }
 0x2a6   : > { %1097 = vmatmul.f32.gmra.mxu3 %v997_v11 }
 0x2ae   : > { %1100 = vmatmul.f32.gmra.mxu3 %v998_v46 }
 0x2b6   : > { %1103 = vmatmul.f32.gmra.mxu3 %v999_v37  ;;  %v1020_v37 = vmul.f32 %v8584_v34, %v8476_v22 }
 0x2be   : > { %1106 = vmatmul.f32.gmra.mxu3 %v1000_v63 }
 0x2c6   : > { %1109 = vmatmul.f32.gmra.mxu3 %v1001_v45 }
 0x2ce   : > { %1112 = vmatmul.f32.gmra.mxu3 %v1002_v26 }
 0x2d6   : > { %1115 = vmatmul.f32.gmra.mxu3 %v1003_v35 }
 0x2d9   : > { %v8518_v57 = vpop.f32.mrf.mxu3 }
 0x2da   : > { %v1261_v47 = vsel %vm1260_vm1, %v8518_v57, -inf }
 0x2db   : > { %1262 = vmax.xlane.f32.xlu1 %v1261_v47 }
 0x2de   : > { %1118 = vmatmul.f32.gmra.mxu3 %v1004_v55  ;;  %v1021_v55 = vmul.f32 %v8584_v34, %v8480_v25 }
 0x2e1   : > { %v8523_v48 = vpop.f32.mrf.mxu3 }
 0x2e2   : > { %v1264_v51 = vsel %vm1260_vm1, %v8523_v48, -inf }
 0x2e3   : > { %1265 = vmax.xlane.f32.xlu2 %v1264_v51 }
 0x2e6   : > { %1121 = vmatmul.f32.gmra.mxu3 %v1005_v53 }
 0x2e9   : > { %v8528_v54 = vpop.f32.mrf.mxu3 }
 0x2ea   : > { %v1267_v7 = vsel %vm1260_vm1, %v8528_v54, -inf }
 0x2eb   : > { %1268 = vmax.xlane.f32.xlu0 %v1267_v7 }
 0x2ee   : > { %1124 = vmatmul.f32.gmra.mxu3 %v1006_v17 }
 0x2f1   : > { %v8533_v40 = vpop.f32.mrf.mxu3 }
 0x2f2   : > { %v1270_v50 = vsel %vm1260_vm1, %v8533_v40, -inf }
 0x2f3   : > { %1271 = vmax.xlane.f32.xlu1 %v1270_v50 }
 0x2f6   : > { %1127 = vmatmul.f32.gmra.mxu3 %v1007_v23  ;;  %v1022_v23 = vmul.f32 %v8584_v34, %v8484_v27 }
 0x2f9   : > { %v8538_v59 = vpop.f32.mrf.mxu3 }
 0x2fa   : > { %v1273_v10 = vsel %vm1260_vm1, %v8538_v59, -inf }
 0x2fb   : > { %1274 = vmax.xlane.f32.xlu2 %v1273_v10 }
 0x2fe   : > { %1130 = vmatmul.f32.gmra.mxu3 %v1008_v36 }
 0x301   : > { %v8543_v61 = vpop.f32.mrf.mxu3 }
 0x302   : > { %v1276_v21 = vsel %vm1260_vm1, %v8543_v61, -inf }
 0x303   : > { %1277 = vmax.xlane.f32.xlu0 %v1276_v21 }
 0x306   : > { %1133 = vmatmul.f32.gmra.mxu3 %v1009_v62 }
 0x309   : > { %v8548_v2 = vpop.f32.mrf.mxu3 }
 0x30a   : > { %v1279_v3 = vsel %vm1260_vm1, %v8548_v2, -inf }
 0x30b   : > { %1280 = vmax.xlane.f32.xlu1 %v1279_v3 }
 0x30e   : > { %1136 = vmatmul.f32.gmra.mxu3 %v1010_v52 }
 0x311   : > { %v8556_v24 = vpop.f32.mrf.mxu3 }
 0x312   : > { %v1282_v6 = vsel %vm1260_vm1, %v8556_v24, -inf }
 0x313   : > { %1283 = vmax.xlane.f32.xlu0 %v1282_v6 }
 0x316   : > { %1139 = vmatmul.f32.gmra.mxu3 %v1011_v44 }
 0x319   : > { %v8561_v28 = vpop.f32.mrf.mxu3 }
 0x31a   : > { %v1285_v47 = vsel %vm1260_vm1, %v8561_v28, -inf }
 0x31e   : > { %1142 = vmatmul.f32.gmra.mxu3 %v1012_v19 }
 0x321   : > { %v8564_v8 = vpop.f32.mrf.mxu3 }
 0x322   : > { %v1288_v50 = vsel %vm1260_vm1, %v8564_v8, -inf }
 0x326   : > { %1145 = vmatmul.f32.gmra.mxu3 %v1013_v30 }
 0x329   : > { %v8567_v9 = vpop.f32.mrf.mxu3 }
 0x32a   : > { %v1291_v52 = vsel %vm1260_vm1, %v8567_v9, -inf }
 0x32e   : > { %1148 = vmatmul.f32.gmra.mxu3 %v1014_v49 }
 0x331   : > { %v8571_v15 = vpop.f32.mrf.mxu3 }
 0x332   : > { %v1294_v49 = vsel %vm1260_vm1, %v8571_v15, -inf }
 0x336   : > { %1151 = vmatmul.f32.gmra.mxu3 %v1015_v12 }
 0x339   : > { %v8574_v41 = vpop.f32.mrf.mxu3 }
 0x33e   : > { %1154 = vmatmul.f32.gmra.mxu3 %v1016_v16  ;;  %v1024_v16 = vmul.f32 %v8584_v34, %v8492_v38 }
 0x341   : > { %v8577_v29 = vpop.f32.mrf.mxu3 }
 0x346   : > { %1157 = vmatmul.f32.gmra.mxu3 %v1017_v18 }
 0x349   : > { %v8586_v0 = vpop.f32.mrf.mxu3 }
 0x34e   : > { %v1263_v20 = vpop.xlane.xlu1 %1262  ;;  %1160 = vmatmul.f32.gmra.mxu3 %v1018_v1 }
 0x34f   : > { %v1453_v32 = vsub.f32 %v8518_v57, %v1263_v20 }
 0x351   : > { %v1517_v39 = vmul.f32 1.442695, %v1453_v32  ;;  %v8597_v63 = vpop.f32.mrf.mxu3 }
 0x353   : > { %7168 = vpow2.f32 %v1517_v39  ;;  %v1297_v39 = vsel %vm1260_vm1, %v8574_v41, -inf }
 0x356   : > { %v1266_v14 = vpop.xlane.xlu2 %1265  ;;  %1163 = vmatmul.f32.gmra.mxu3 %v1019_v43  ;;  %v1025_v43 = vmul.f32 %v8584_v34, %v8496_v42 }
 0x357   : > { %v1454_v60 = vsub.f32 %v8523_v48, %v1266_v14 }
 0x359   : > { %v8591_v31 = vpop.eup %7168  ;;  %v1519_v11 = vmul.f32 1.442695, %v1454_v60  ;;  %v8608_v51 = vpop.f32.mrf.mxu3 }
 0x35a   : > { %v1645_v46 = vsel %vm1260_vm1, %v8591_v31, 0.0 }
 0x35b   : > { %7170 = vpow2.f32 %v1519_v11  ;;  %1646 = vadd.xlane.f32.xlu2 %v1645_v46 }
 0x35e   : > { %v1269_v45 = vpop.xlane.xlu0 %1268  ;;  %1166 = vmatmul.f32.gmra.mxu3 %v1020_v37 }
 0x35f   : > { %v1455_v26 = vsub.f32 %v8528_v54, %v1269_v45  ;;  %v1300_v45 = vsel %vm1260_vm1, %v8577_v29, -inf }
 0x361   : > { %v8600_v56 = vpop.eup %7170  ;;  %v1521_v35 = vmul.f32 1.442695, %v1455_v26  ;;  %v8622_v21 = vpop.f32.mrf.mxu3  ;;  %v1026_v26 = vmul.f32 %v8584_v34, %v8500_v33 }
 0x362   : > { %v1648_v57 = vsel %vm1260_vm1, %v8600_v56, 0.0 }
 0x363   : > { %7172 = vpow2.f32 %v1521_v35  ;;  %1649 = vadd.xlane.f32.xlu1 %v1648_v57  ;;  %1286 = vmax.xlane.f32.xlu2 %v1285_v47 }
 0x366   : > { %v1272_v48 = vpop.xlane.xlu1 %1271  ;;  %1169 = vmatmul.f32.gmra.mxu3 %v1021_v55  ;;  %v1303_v55 = vsel %vm1260_vm1, %v8586_v0, -inf }
 0x367   : > { %v1456_v53 = vsub.f32 %v8533_v40, %v1272_v48 }
 0x369   : > { %v8611_v54 = vpop.eup %7172  ;;  %v1523_v7 = vmul.f32 1.442695, %v1456_v53  ;;  %v8637_v12 = vpop.f32.mrf.mxu3  ;;  %v1306_v53 = vsel %vm1260_vm1, %v8597_v63, -inf }
 0x36a   : > { %v1651_v17 = vsel %vm1260_vm1, %v8611_v54, 0.0 }
 0x36b   : > { %7174 = vpow2.f32 %v1523_v7  ;;  %1652 = vadd.xlane.f32.xlu0 %v1651_v17  ;;  %1289 = vmax.xlane.f32.xlu1 %v1288_v50 }
 0x36e   : > { %v1275_v10 = vpop.xlane.xlu2 %1274  ;;  %1172 = vmatmul.f32.gmra.mxu3 %v1022_v23 }
 0x36f   : > { %v1457_v36 = vsub.f32 %v8538_v59, %v1275_v10 }
 0x371   : > { %v8620_v40 = vpop.eup %7174  ;;  %v1525_v62 = vmul.f32 1.442695, %v1457_v36  ;;  %v8650_v14 = vpop.f32.mrf.mxu3 }
 0x372   : > { %v1654_v3 = vsel %vm1260_vm1, %v8620_v40, 0.0 }
 0x373   : > { %7176 = vpow2.f32 %v1525_v62  ;;  %1655 = vadd.xlane.f32.xlu2 %v1654_v3  ;;  %1292 = vmax.xlane.f32.xlu0 %v1291_v52 }
 0x376   : > { %v1278_v6 = vpop.xlane.xlu0 %1277  ;;  %1175 = vmatmul.f32.gmra.mxu3 %v1023_v5 }
 0x377   : > { %v1458_v59 = vsub.f32 %v8543_v61, %v1278_v6 }
 0x379   : > { %v8631_v44 = vpop.eup %7176  ;;  %v1527_v19 = vmul.f32 1.442695, %v1458_v59  ;;  %v8661_v35 = vpop.f32.mrf.mxu3 }
 0x37a   : > { %v1657_v30 = vsel %vm1260_vm1, %v8631_v44, 0.0 }
 0x37b   : > { %7178 = vpow2.f32 %v1527_v19  ;;  %1658 = vadd.xlane.f32.xlu1 %v1657_v30  ;;  %1295 = vmax.xlane.f32.xlu2 %v1294_v49  ;;  %v8697_v30 = vld [vmem:[%s12779_s12 + $0x6] ss:$0 sm:$0xff] }
 0x37c   : > { %v1035_v49 = vmul.f32 %v8697_v30, %v8470_v4 }
 0x37e   : > { %v1281_v18 = vpop.xlane.xlu1 %1280  ;;  %1178 = vmatmul.f32.gmra.mxu3 %v1024_v16 }
 0x37f   : > { %v1459_v61 = vsub.f32 %v8548_v2, %v1281_v18 }
 0x381   : > { %v8642_v1 = vpop.eup %7178  ;;  %v1529_v20 = vmul.f32 1.442695, %v1459_v61  ;;  %v8673_v34 = vpop.f32.mrf.mxu3 }
 0x382   : > { %v1660_v32 = vsel %vm1260_vm1, %v8642_v1, 0.0 }
 0x383   : > { %7180 = vpow2.f32 %v1529_v20  ;;  %1661 = vadd.xlane.f32.xlu0 %v1660_v32  ;;  %1298 = vmax.xlane.f32.xlu1 %v1297_v39 }
 0x386   : > { %v1284_v60 = vpop.xlane.xlu0 %1283  ;;  %1181 = vmatmul.f32.gmra.mxu3 %v1025_v43 }
 0x387   : > { %v1460_v2 = vsub.f32 %v8556_v24, %v1284_v60  ;;  %v7118_v24 = vld [vmem:[%s12779_s12 + $0x5] ss:$0 sm:$0xff]  ;;  %v1036_v60 = vmul.f32 %v8697_v30, %v8476_v22 }
 0x388   : > { %v1027_v48 = vmul.f32 %v7118_v24, %v8470_v4  ;;  %v1028_v7 = vmul.f32 %v7118_v24, %v8476_v22  ;;  %v1029_v50 = vmul.f32 %v7118_v24, %v8480_v25  ;;  %v1030_v23 = vmul.f32 %v7118_v24, %v8484_v27 }
 0x389   : > { %v8653_v11 = vpop.eup %7180  ;;  %v1531_v46 = vmul.f32 1.442695, %v1460_v2  ;;  %v8678_v17 = vpop.f32.mrf.mxu3  ;;  %v1031_v36 = vmul.f32 %v7118_v24, %v8488_v58  ;;  %v1032_v3 = vmul.f32 %v7118_v24, %v8492_v38  ;;  %v1033_v5 = vmul.f32 %v7118_v24, %v8496_v42 }
 0x38a   : > { %v1663_v37 = vsel %vm1260_vm1, %v8653_v11, 0.0  ;;  %v1034_v59 = vmul.f32 %v7118_v24, %v8500_v33 }
 0x38b   : > { %7182 = vpow2.f32 %v1531_v46  ;;  %1664 = vadd.xlane.f32.xlu2 %v1663_v37  ;;  %1301 = vmax.xlane.f32.xlu0 %v1300_v45 }
 0x38e   : > { %1184 = vmatmul.f32.gmra.mxu3 %v1026_v26 }
 0x391   : > { %v8666_v57 = vpop.eup %7182  ;;  %v8682_v10 = vpop.f32.mrf.mxu3 }
 0x392   : > { %v1666_v47 = vsel %vm1260_vm1, %v8666_v57, 0.0 }
 0x393   : > { %1667 = vadd.xlane.f32.xlu1 %v1666_v47  ;;  %1304 = vmax.xlane.f32.xlu2 %v1303_v55  ;;  %v1037_v55 = vmul.f32 %v8697_v30, %v8480_v25 }
 0x396   : > { %1187 = vmatmul.f32.gmra.mxu3 %v1027_v48 }
 0x399   : > { %v8685_v62 = vpop.f32.mrf.mxu3 }
 0x39b   : > { %1307 = vmax.xlane.f32.xlu1 %v1306_v53 }
 0x39e   : > { %1190 = vmatmul.f32.gmra.mxu3 %v1028_v7 }
 0x3a1   : > { %v8688_v52 = vpop.f32.mrf.mxu3 }
 0x3a6   : > { %1193 = vmatmul.f32.gmra.mxu3 %v1029_v50 }
 0x3a9   : > { %v8691_v6 = vpop.f32.mrf.mxu3 }
 0x3ae   : > { %1196 = vmatmul.f32.gmra.mxu3 %v1030_v23 }
 0x3b1   : > { %v8701_v18 = vpop.f32.mrf.mxu3 }
 0x3b6   : > { %1199 = vmatmul.f32.gmra.mxu3 %v1031_v36 }
 0x3be   : > { %1202 = vmatmul.f32.gmra.mxu3 %v1032_v3 }
 0x3c6   : > { %1205 = vmatmul.f32.gmra.mxu3 %v1033_v5  ;;  %v1309_v5 = vsel %vm1260_vm1, %v8608_v51, -inf }
 0x3ce   : > { %v1647_v19 = vpop.xlane.xlu2 %1646  ;;  %1208 = vmatmul.f32.gmra.mxu3 %v1034_v59 }
 0x3cf   : > { %7184 = vrcp.f32 %v1647_v19 }
 0x3d5   : > { %v7185_v16 = vpop.eup %7184 }
 0x3d6   : > { %v1901_v61 = vmul.f32 %v7185_v16, %v8591_v31  ;;  %v1650_v20 = vpop.xlane.xlu1 %1649  ;;  %v1287_v32 = vpop.xlane.xlu2 %1286  ;;  %1211 = vmatmul.f32.gmra.mxu3 %v1035_v49 }
 0x3d7   : > { %7186 = vrcp.f32 %v1650_v20  ;;  %v1461_v39 = vsub.f32 %v8561_v28, %v1287_v32  ;;  %v8709_v31 = vpop.f32.mrf.mxu3 }
 0x3d8   : > { %6742 = vmatmul.msk.f32.vlgmr.msra.gmra.mxu0 %vm1260_vm1, %v1901_v61 }
 0x3d9   : > { %v1533_v43 = vmul.f32 1.442695, %v1461_v39  ;;  %v1312_v39 = vsel %vm1260_vm1, %v8622_v21, -inf }
 0x3db   : > { %7188 = vpow2.f32 %v1533_v43 }
 0x3dd   : > { %v7187_v2 = vpop.eup %7186 }
 0x3de   : > { %v1653_v46 = vpop.xlane.xlu0 %1652  ;;  %v1290_v37 = vpop.xlane.xlu1 %1289  ;;  %1214 = vmatmul.f32.gmra.mxu3 %v1036_v60  ;;  %v1902_v45 = vmul.f32 %v7187_v2, %v8600_v56 }
 0x3df   : > { %7190 = vrcp.f32 %v1653_v46  ;;  %v1462_v26 = vsub.f32 %v8564_v8, %v1290_v37  ;;  %v8724_v23 = vpop.f32.mrf.mxu3 }
 0x3e0   : > { %6743 = vmatmul.msk.f32.gmra.mxu0 %vm1260_vm1, %v1902_v45 }
 0x3e1   : > { %v8713_v28 = vpop.eup %7188  ;;  %v1535_v24 = vmul.f32 1.442695, %v1462_v26 }
 0x3e2   : > { %v1669_v47 = vsel %vm1260_vm1, %v8713_v28, 0.0 }
 0x3e3   : > { %7192 = vpow2.f32 %v1535_v24  ;;  %1670 = vadd.xlane.f32.xlu0 %v1669_v47  ;;  %v1315_v47 = vsel %vm1260_vm1, %v8637_v12, -inf }
 0x3e5   : > { %v7191_v48 = vpop.eup %7190 }
 0x3e6   : > { %v1656_v56 = vpop.xlane.xlu2 %1655  ;;  %v1293_v53 = vpop.xlane.xlu0 %1292  ;;  %1217 = vmatmul.f32.gmra.mxu3 %v1037_v55  ;;  %v1903_v7 = vmul.f32 %v7191_v48, %v8611_v54  ;;  %v1038_v54 = vmul.f32 %v8697_v30, %v8484_v27 }
 0x3e7   : > { %7194 = vrcp.f32 %v1656_v56  ;;  %v1463_v8 = vsub.f32 %v8567_v9, %v1293_v53  ;;  %v8741_v43 = vpop.f32.mrf.mxu3 }
 0x3e8   : > { %6744 = vmatmul.msk.f32.gmra.mxu0 %vm1260_vm1, %v1903_v7 }
 0x3e9   : > { %v8722_v50 = vpop.eup %7192  ;;  %v1537_v36 = vmul.f32 1.442695, %v1463_v8 }
 0x3ea   : > { %v1672_v3 = vsel %vm1260_vm1, %v8722_v50, 0.0 }
 0x3eb   : > { %7196 = vpow2.f32 %v1537_v36  ;;  %1673 = vadd.xlane.f32.xlu2 %v1672_v3  ;;  %1310 = vmax.xlane.f32.xlu0 %v1309_v5  ;;  %v1318_v5 = vsel %vm1260_vm1, %v8650_v14, -inf }
 0x3ed   : > { %v7195_v9 = vpop.eup %7194 }
 0x3ee   : > { %v1659_v59 = vpop.xlane.xlu1 %1658  ;;  %v1296_v19 = vpop.xlane.xlu2 %1295  ;;  %1220 = vmatmul.f32.gmra.mxu3 %v1038_v54  ;;  %v1904_v49 = vmul.f32 %v7195_v9, %v8620_v40  ;;  %v1039_v40 = vmul.f32 %v8697_v30, %v8488_v58 }
 0x3ef   : > { %7198 = vrcp.f32 %v1659_v59  ;;  %v1464_v16 = vsub.f32 %v8571_v15, %v1296_v19  ;;  %v8756_v48 = vpop.f32.mrf.mxu3 }
 0x3f0   : > { %6745 = vmatmul.msk.f32.gmra.mxu0 %vm1260_vm1, %v1904_v49 }
 0x3f1   : > { %v8735_v61 = vpop.eup %7196  ;;  %v1539_v20 = vmul.f32 1.442695, %v1464_v16 }
 0x3f2   : > { %v1675_v32 = vsel %vm1260_vm1, %v8735_v61, 0.0 }
 0x3f3   : > { %7200 = vpow2.f32 %v1539_v20  ;;  %1676 = vadd.xlane.f32.xlu1 %v1675_v32  ;;  %1313 = vmax.xlane.f32.xlu2 %v1312_v39  ;;  %v1321_v39 = vsel %vm1260_vm1, %v8661_v35, -inf }
 0x3f5   : > { %v7199_v15 = vpop.eup %7198 }
 0x3f6   : > { %v1662_v60 = vpop.xlane.xlu0 %1661  ;;  %v1299_v2 = vpop.xlane.xlu1 %1298  ;;  %1223 = vmatmul.f32.gmra.mxu3 %v1039_v40  ;;  %v1905_v46 = vmul.f32 %v7199_v15, %v8631_v44  ;;  %v1040_v44 = vmul.f32 %v8697_v30, %v8492_v38 }
 0x3f7   : > { %7202 = vrcp.f32 %v1662_v60  ;;  %v1465_v37 = vsub.f32 %v8574_v41, %v1299_v2  ;;  %v8771_v49 = vpop.f32.mrf.mxu3  ;;  %v7120_v2 = vld [vmem:[%s12779_s12 + $0x7] ss:$0 sm:$0xff] }
 0x3f8   : > { %6746 = vmatmul.msk.f32.gmra.mxu0 %vm1260_vm1, %v1905_v46 }
 0x3f9   : > { %v8748_v45 = vpop.eup %7200  ;;  %v1541_v26 = vmul.f32 1.442695, %v1465_v37 }
 0x3fa   : > { %v1678_v24 = vsel %vm1260_vm1, %v8748_v45, 0.0 }
 0x3fb   : > { %7204 = vpow2.f32 %v1541_v26  ;;  %1679 = vadd.xlane.f32.xlu0 %v1678_v24  ;;  %1316 = vmax.xlane.f32.xlu1 %v1315_v47  ;;  %v1324_v24 = vsel %vm1260_vm1, %v8673_v34, -inf }
 0x3fd   : > { %v7203_v55 = vpop.eup %7202 }
 0x3fe   : > { %v1665_v41 = vpop.xlane.xlu2 %1664  ;;  %v1302_v56 = vpop.xlane.xlu0 %1301  ;;  %1226 = vmatmul.f32.gmra.mxu3 %v1040_v44  ;;  %v1906_v53 = vmul.f32 %v7203_v55, %v8642_v1  ;;  %v1041_v1 = vmul.f32 %v8697_v30, %v8496_v42  ;;  %v1327_v44 = vsel %vm1260_vm1, %v8678_v17, -inf }
 0x3ff   : > { %7206 = vrcp.f32 %v1665_v41  ;;  %v1466_v7 = vsub.f32 %v8577_v29, %v1302_v56  ;;  %v8790_v26 = vpop.f32.mrf.mxu3  ;;  %v1044_v41 = vmul.f32 %v7120_v2, %v8476_v22  ;;  %v1330_v56 = vsel %vm1260_vm1, %v8682_v10, -inf }
 0x400   : > { %6747 = vmatmul.msk.f32.gmra.mxu0 %vm1260_vm1, %v1906_v53  ;;  %v1048_v22 = vmul.f32 %v7120_v2, %v8492_v38 }
 0x401   : > { %v8761_v8 = vpop.eup %7204  ;;  %v1543_v36 = vmul.f32 1.442695, %v1466_v7  ;;  %v1046_v7 = vmul.f32 %v7120_v2, %v8484_v27 }
 0x402   : > { %v1681_v3 = vsel %vm1260_vm1, %v8761_v8, 0.0 }
 0x403   : > { %7208 = vpow2.f32 %v1543_v36  ;;  %1682 = vadd.xlane.f32.xlu2 %v1681_v3  ;;  %1319 = vmax.xlane.f32.xlu0 %v1318_v5  ;;  %v1047_v3 = vmul.f32 %v7120_v2, %v8488_v58 }
 0x405   : > { %v7207_v54 = vpop.eup %7206 }
 0x406   : > { %v1668_v9 = vpop.xlane.xlu1 %1667  ;;  %v1305_v29 = vpop.xlane.xlu2 %1304  ;;  %1229 = vmatmul.f32.gmra.mxu3 %v1041_v1  ;;  %v1907_v59 = vmul.f32 %v7207_v54, %v8653_v11  ;;  %v1042_v11 = vmul.f32 %v8697_v30, %v8500_v33  ;;  %v1050_v54 = vmul.f32 %v7120_v2, %v8500_v33 }
 0x407   : > { %7210 = vrcp.f32 %v1668_v9  ;;  %v1467_v19 = vsub.f32 %v8586_v0, %v1305_v29  ;;  %v8803_v55 = vpop.f32.mrf.mxu3 }
 0x408   : > { %6748 = vmatmul.msk.f32.gmra.mxu0 %vm1260_vm1, %v1907_v59 }
 0x409   : > { %v8774_v16 = vpop.eup %7208  ;;  %v1545_v20 = vmul.f32 1.442695, %v1467_v19 }
 0x40a   : > { %v1684_v32 = vsel %vm1260_vm1, %v8774_v16, 0.0 }
 0x40b   : > { %7212 = vpow2.f32 %v1545_v20  ;;  %1685 = vadd.xlane.f32.xlu1 %v1684_v32  ;;  %1322 = vmax.xlane.f32.xlu2 %v1321_v39 }
 0x40d   : > { %v7211_v0 = vpop.eup %7210 }
 0x40e   : > { %v1308_v40 = vpop.xlane.xlu1 %1307  ;;  %1232 = vmatmul.f32.gmra.mxu3 %v1042_v11  ;;  %v1908_v15 = vmul.f32 %v7211_v0, %v8666_v57 }
 0x40f   : > { %v1468_v60 = vsub.f32 %v8597_v63, %v1308_v40  ;;  %v1043_v63 = vmul.f32 %v7120_v2, %v8470_v4  ;;  %v1045_v4 = vmul.f32 %v7120_v2, %v8480_v25  ;;  %v8809_v53 = vpop.f32.mrf.mxu3  ;;  %v1049_v25 = vmul.f32 %v7120_v2, %v8496_v42 }
 0x410   : > { %6749 = vmatmul.msk.f32.gmra.mxu0 %vm1260_vm1, %v1908_v15 }
 0x411   : > { %v8788_v46 = vpop.eup %7212  ;;  %v1547_v37 = vmul.f32 1.442695, %v1468_v60 }
 0x412   : > { %v1687_v30 = vsel %vm1260_vm1, %v8788_v46, 0.0 }
 0x413   : > { %7214 = vpow2.f32 %v1547_v37  ;;  %1688 = vadd.xlane.f32.xlu0 %v1687_v30  ;;  %1325 = vmax.xlane.f32.xlu1 %v1324_v24  ;;  %v1333_v24 = vsel %vm1260_vm1, %v8685_v62, -inf }
 0x416   : > { %1235 = vmatmul.f32.gmra.mxu3 %v1043_v63 }
 0x417   : > { %v8812_v36 = vpop.f32.mrf.mxu3 }
 0x419   : > { %v8797_v57 = vpop.eup %7214 }
 0x41a   : > { %v1690_v47 = vsel %vm1260_vm1, %v8797_v57, 0.0 }
 0x41b   : > { %1691 = vadd.xlane.f32.xlu2 %v1690_v47  ;;  %1328 = vmax.xlane.f32.xlu0 %v1327_v44 }
 0x41e   : > { %1238 = vmatmul.f32.gmra.mxu3 %v1044_v41 }
 0x41f   : > { %v8815_v5 = vpop.f32.mrf.mxu3 }
 0x423   : > { %1331 = vmax.xlane.f32.xlu2 %v1330_v56 }
 0x426   : > { %1241 = vmatmul.f32.gmra.mxu3 %v1045_v4 }
 0x427   : > { %v8818_v1 = vpop.f32.mrf.mxu3 }
 0x42e   : > { %1244 = vmatmul.f32.gmra.mxu3 %v1046_v7  ;;  %v1336_v7 = vsel %vm1260_vm1, %v8688_v52, -inf }
 0x42f   : > { %v8822_v9 = vpop.f32.mrf.mxu3 }
 0x436   : > { %1247 = vmatmul.f32.gmra.mxu3 %v1047_v3 }
 0x43e   : > { %1250 = vmatmul.f32.gmra.mxu3 %v1048_v22 }
 0x446   : > { %1253 = vmatmul.f32.gmra.mxu3 %v1049_v25 }
 0x44e   : > { %1256 = vmatmul.f32.gmra.mxu3 %v1050_v54 }
 0x456   : > { %v1671_v27 = vpop.xlane.xlu0 %1670 }
 0x457   : > { %7216 = vrcp.f32 %v1671_v27 }
 0x45d   : > { %v7217_v29 = vpop.eup %7216 }
 0x45e   : > { %v1674_v58 = vpop.xlane.xlu2 %1673  ;;  %v1311_v59 = vpop.xlane.xlu0 %1310  ;;  %v1909_v19 = vmul.f32 %v7217_v29, %v8713_v28 }
 0x45f   : > { %7218 = vrcp.f32 %v1674_v58  ;;  %v1469_v38 = vsub.f32 %v8608_v51, %v1311_v59  ;;  %v1339_v58 = vsel %vm1260_vm1, %v8691_v6, -inf }
 0x460   : > { %6750 = vmatmul.msk.f32.gmra.mxu0 %vm1260_vm1, %v1909_v19 }
 0x461   : > { %v1549_v20 = vmul.f32 1.442695, %v1469_v38 }
 0x463   : > { %7220 = vpow2.f32 %v1549_v20 }
 0x465   : > { %v7219_v42 = vpop.eup %7218 }
 0x466   : > { %v1677_v32 = vpop.xlane.xlu1 %1676  ;;  %v1314_v33 = vpop.xlane.xlu2 %1313  ;;  %v1910_v39 = vmul.f32 %v7219_v42, %v8722_v50 }
 0x467   : > { %7222 = vrcp.f32 %v1677_v32  ;;  %v1470_v11 = vsub.f32 %v8622_v21, %v1314_v33  ;;  %v1342_v33 = vsel %vm1260_vm1, %v8701_v18, -inf }
 0x468   : > { %6751 = vmatmul.msk.f32.gmra.mxu0 %vm1260_vm1, %v1910_v39 }
 0x469   : > { %v8830_v0 = vpop.eup %7220  ;;  %v1551_v28 = vmul.f32 1.442695, %v1470_v11 }
 0x46a   : > { %v1693_v51 = vsel %vm1260_vm1, %v8830_v0, 0.0 }
 0x46b   : > { %7224 = vpow2.f32 %v1551_v28  ;;  %1694 = vadd.xlane.f32.xlu1 %v1693_v51 }
 0x46d   : > { %v7223_v40 = vpop.eup %7222 }
 0x46e   : > { %v1680_v15 = vpop.xlane.xlu0 %1679  ;;  %v1317_v60 = vpop.xlane.xlu1 %1316  ;;  %v1911_v2 = vmul.f32 %v7223_v40, %v8735_v61 }
 0x46f   : > { %7226 = vrcp.f32 %v1680_v15  ;;  %v1471_v50 = vsub.f32 %v8637_v12, %v1317_v60  ;;  %v1345_v60 = vsel %vm1260_vm1, %v8709_v31, -inf }
 0x470   : > { %6752 = vmatmul.msk.f32.gmra.mxu0 %vm1260_vm1, %v1911_v2 }
 0x471   : > { %v8837_v21 = vpop.eup %7224  ;;  %v1553_v37 = vmul.f32 1.442695, %v1471_v50 }
 0x472   : > { %v1696_v30 = vsel %vm1260_vm1, %v8837_v21, 0.0 }
 0x473   : > { %7228 = vpow2.f32 %v1553_v37  ;;  %1697 = vadd.xlane.f32.xlu0 %v1696_v30  ;;  %1334 = vmax.xlane.f32.xlu1 %v1333_v24 }
 0x475   : > { %v7227_v63 = vpop.eup %7226 }
 0x476   : > { %v1683_v47 = vpop.xlane.xlu2 %1682  ;;  %v1320_v61 = vpop.xlane.xlu0 %1319  ;;  %v1912_v44 = vmul.f32 %v7227_v63, %v8748_v45  ;;  %v1348_v63 = vsel %vm1260_vm1, %v8724_v23, -inf }
 0x477   : > { %7230 = vrcp.f32 %v1683_v47  ;;  %v1472_v12 = vsub.f32 %v8650_v14, %v1320_v61  ;;  %v1354_v61 = vsel %vm1260_vm1, %v8756_v48, -inf }
 0x478   : > { %6753 = vmatmul.msk.f32.gmra.mxu0 %vm1260_vm1, %v1912_v44 }
 0x479   : > { %v8846_v41 = vpop.eup %7228  ;;  %v1555_v56 = vmul.f32 1.442695, %v1472_v12 }
 0x47a   : > { %v1699_v4 = vsel %vm1260_vm1, %v8846_v41, 0.0 }
 0x47b   : > { %7232 = vpow2.f32 %v1555_v56  ;;  %1700 = vadd.xlane.f32.xlu2 %v1699_v4  ;;  %1337 = vmax.xlane.f32.xlu0 %v1336_v7 }
 0x47d   : > { %v7231_v3 = vpop.eup %7230 }
 0x47e   : > { %v1686_v22 = vpop.xlane.xlu1 %1685  ;;  %v1323_v45 = vpop.xlane.xlu2 %1322  ;;  %v1913_v25 = vmul.f32 %v7231_v3, %v8761_v8 }
 0x47f   : > { %7234 = vrcp.f32 %v1686_v22  ;;  %v1473_v14 = vsub.f32 %v8661_v35, %v1323_v45 }
 0x480   : > { %6754 = vmatmul.msk.f32.gmra.mxu0 %vm1260_vm1, %v1913_v25 }
 0x481   : > { %v8855_v54 = vpop.eup %7232  ;;  %v1557_v27 = vmul.f32 1.442695, %v1473_v14 }
 0x482   : > { %v1702_v29 = vsel %vm1260_vm1, %v8855_v54, 0.0 }
 0x483   : > { %7236 = vpow2.f32 %v1557_v27  ;;  %1703 = vadd.xlane.f32.xlu1 %v1702_v29  ;;  %1340 = vmax.xlane.f32.xlu2 %v1339_v58 }
 0x485   : > { %v7235_v59 = vpop.eup %7234 }
 0x486   : > { %v1689_v19 = vpop.xlane.xlu0 %1688  ;;  %v1326_v8 = vpop.xlane.xlu1 %1325  ;;  %v1914_v38 = vmul.f32 %v7235_v59, %v8774_v16 }
 0x487   : > { %7238 = vrcp.f32 %v1689_v19  ;;  %v1474_v35 = vsub.f32 %v8673_v34, %v1326_v8 }
 0x488   : > { %6755 = vmatmul.msk.f32.gmra.mxu0 %vm1260_vm1, %v1914_v38 }
 0x489   : > { %v8864_v20 = vpop.eup %7236  ;;  %v1559_v42 = vmul.f32 1.442695, %v1474_v35 }
 0x48a   : > { %v1705_v32 = vsel %vm1260_vm1, %v8864_v20, 0.0 }
 0x48b   : > { %7240 = vpow2.f32 %v1559_v42  ;;  %1706 = vadd.xlane.f32.xlu0 %v1705_v32  ;;  %1343 = vmax.xlane.f32.xlu1 %v1342_v33  ;;  %v1357_v32 = vsel %vm1260_vm1, %v8771_v49, -inf }
 0x48d   : > { %v7239_v39 = vpop.eup %7238 }
 0x48e   : > { %v1692_v11 = vpop.xlane.xlu2 %1691  ;;  %v1329_v16 = vpop.xlane.xlu0 %1328  ;;  %v1915_v28 = vmul.f32 %v7239_v39, %v8788_v46 }
 0x48f   : > { %7242 = vrcp.f32 %v1692_v11  ;;  %v1475_v34 = vsub.f32 %v8678_v17, %v1329_v16 }
 0x490   : > { %6756 = vmatmul.msk.f32.gmra.mxu0 %vm1260_vm1, %v1915_v28 }
 0x491   : > { %v8873_v51 = vpop.eup %7240  ;;  %v1561_v40 = vmul.f32 1.442695, %v1475_v34 }
 0x492   : > { %v1708_v15 = vsel %vm1260_vm1, %v8873_v51, 0.0 }
 0x493   : > { %7244 = vpow2.f32 %v1561_v40  ;;  %1709 = vadd.xlane.f32.xlu2 %v1708_v15  ;;  %1346 = vmax.xlane.f32.xlu0 %v1345_v60  ;;  %v1360_v40 = vsel %vm1260_vm1, %v8790_v26, -inf }
 0x495   : > { %v7243_v2 = vpop.eup %7242 }
 0x496   : > { %v1332_v50 = vpop.xlane.xlu2 %1331  ;;  %v1916_v46 = vmul.f32 %v7243_v2, %v8797_v57 }
 0x497   : > { %v1476_v17 = vsub.f32 %v8682_v10, %v1332_v50  ;;  %v1351_v10 = vsel %vm1260_vm1, %v8741_v43, -inf }
 0x498   : > { %6757 = vmatmul.msk.f32.gmra.mxu0 %vm1260_vm1, %v1916_v46 }
 0x499   : > { %v8882_v37 = vpop.eup %7244  ;;  %v1563_v30 = vmul.f32 1.442695, %v1476_v17 }
 0x49a   : > { %v1711_v24 = vsel %vm1260_vm1, %v8882_v37, 0.0 }
 0x49b   : > { %7246 = vpow2.f32 %v1563_v30  ;;  %1712 = vadd.xlane.f32.xlu1 %v1711_v24  ;;  %1349 = vmax.xlane.f32.xlu2 %v1348_v63  ;;  %v1363_v30 = vsel %vm1260_vm1, %v8803_v55, -inf }
 0x4a1   : > { %v8888_v47 = vpop.eup %7246 }
 0x4a2   : > { %v1714_v57 = vsel %vm1260_vm1, %v8888_v47, 0.0 }
 0x4a3   : > { %1715 = vadd.xlane.f32.xlu0 %v1714_v57  ;;  %1352 = vmax.xlane.f32.xlu1 %v1351_v10 }
 0x4ab   : > { %1355 = vmax.xlane.f32.xlu0 %v1354_v61 }
 0x4de   : > { %v1695_v44 = vpop.xlane.xlu1 %1694 }
 0x4df   : > { %7248 = vrcp.f32 %v1695_v44 }
 0x4e5   : > { %v7249_v12 = vpop.eup %7248 }
 0x4e6   : > { %v1698_v56 = vpop.xlane.xlu0 %1697  ;;  %v1335_v4 = vpop.xlane.xlu1 %1334  ;;  %v1917_v7 = vmul.f32 %v7249_v12, %v8830_v0  ;;  %v1366_v12 = vsel %vm1260_vm1, %v8809_v53, -inf }
 0x4e7   : > { %7250 = vrcp.f32 %v1698_v56  ;;  %v1477_v3 = vsub.f32 %v8685_v62, %v1335_v4 }
 0x4e8   : > { %6758 = vmatmul.msk.f32.gmra.mxu0 %vm1260_vm1, %v1917_v7 }
 0x4e9   : > { %v1565_v22 = vmul.f32 1.442695, %v1477_v3 }
 0x4eb   : > { %7252 = vpow2.f32 %v1565_v22 }
 0x4ed   : > { %v7251_v45 = vpop.eup %7250 }
 0x4ee   : > { %v1701_v25 = vpop.xlane.xlu2 %1700  ;;  %v1338_v14 = vpop.xlane.xlu0 %1337  ;;  %v1918_v27 = vmul.f32 %v7251_v45, %v8837_v21 }
 0x4ef   : > { %7254 = vrcp.f32 %v1701_v25  ;;  %v1478_v29 = vsub.f32 %v8688_v52, %v1338_v14  ;;  %v1369_v25 = vsel %vm1260_vm1, %v8812_v36, -inf }
 0x4f0   : > { %6759 = vmatmul.msk.f32.gmra.mxu0 %vm1260_vm1, %v1918_v27 }
 0x4f1   : > { %v8902_v58 = vpop.eup %7252  ;;  %v1567_v0 = vmul.f32 1.442695, %v1478_v29 }
 0x4f2   : > { %v1717_v62 = vsel %vm1260_vm1, %v8902_v58, 0.0 }
 0x4f3   : > { %7256 = vpow2.f32 %v1567_v0  ;;  %1718 = vadd.xlane.f32.xlu2 %v1717_v62 }
 0x4f5   : > { %v7255_v59 = vpop.eup %7254 }
 0x4f6   : > { %v1704_v19 = vpop.xlane.xlu1 %1703  ;;  %v1341_v8 = vpop.xlane.xlu2 %1340  ;;  %v1919_v38 = vmul.f32 %v7255_v59, %v8846_v41  ;;  %v1372_v59 = vsel %vm1260_vm1, %v8815_v5, -inf }
 0x4f7   : > { %7258 = vrcp.f32 %v1704_v19  ;;  %v1479_v21 = vsub.f32 %v8691_v6, %v1341_v8  ;;  %v1378_v8 = vsel %vm1260_vm1, %v8822_v9, -inf }
 0x4f8   : > { %6760 = vmatmul.msk.f32.gmra.mxu0 %vm1260_vm1, %v1919_v38  ;;  %v8968_v38 = vpop.f32.mrf.mxu0 }
 0x4f9   : > { %v8909_v52 = vpop.eup %7256  ;;  %v1569_v35 = vmul.f32 1.442695, %v1479_v21 }
 0x4fa   : > { %v1720_v42 = vsel %vm1260_vm1, %v8909_v52, 0.0 }
 0x4fb   : > { %7260 = vpow2.f32 %v1569_v35  ;;  %1721 = vadd.xlane.f32.xlu1 %v1720_v42  ;;  %1358 = vmax.xlane.f32.xlu2 %v1357_v32 }
 0x4fd   : > { %v7259_v33 = vpop.eup %7258 }
 0x4fe   : > { %v1707_v39 = vpop.xlane.xlu0 %1706  ;;  %v1344_v41 = vpop.xlane.xlu1 %1343  ;;  %v1920_v11 = vmul.f32 %v7259_v33, %v8855_v54 }
 0x4ff   : > { %7262 = vrcp.f32 %v1707_v39  ;;  %v1480_v6 = vsub.f32 %v8701_v18, %v1344_v41 }
 0x500   : > { %6761 = vmatmul.msk.f32.gmra.mxu0 %vm1260_vm1, %v1920_v11  ;;  %v8970_v35 = vpop.f32.mrf.mxu0  ;;  %v8975_v11 = vpop.f32.mrf.mxu3 }
 0x501   : > { %v8918_v16 = vpop.eup %7260  ;;  %v1571_v28 = vmul.f32 1.442695, %v1480_v6 }
 0x502   : > { %v1723_v34 = vsel %vm1260_vm1, %v8918_v16, 0.0 }
 0x503   : > { %7264 = vpow2.f32 %v1571_v28  ;;  %1724 = vadd.xlane.f32.xlu0 %v1723_v34  ;;  %1361 = vmax.xlane.f32.xlu1 %v1360_v40 }
 0x505   : > { %v7263_v15 = vpop.eup %7262 }
 0x506   : > { %v1710_v60 = vpop.xlane.xlu2 %1709  ;;  %v1347_v54 = vpop.xlane.xlu0 %1346  ;;  %v1921_v2 = vmul.f32 %v7263_v15, %v8864_v20 }
 0x507   : > { %7266 = vrcp.f32 %v1710_v60  ;;  %v1481_v18 = vsub.f32 %v8709_v31, %v1347_v54 }
 0x508   : > { %6762 = vmatmul.msk.f32.gmra.mxu0 %vm1260_vm1, %v1921_v2  ;;  %v8977_v34 = vpop.f32.mrf.mxu0 }
 0x509   : > { %v8927_v50 = vpop.eup %7264  ;;  %v1573_v46 = vmul.f32 1.442695, %v1481_v18  ;;  %v8986_v18 = vpop.f32.mrf.mxu3 }
 0x50a   : > { %v1726_v17 = vsel %vm1260_vm1, %v8927_v50, 0.0 }
 0x50b   : > { %7268 = vpow2.f32 %v1573_v46  ;;  %1727 = vadd.xlane.f32.xlu2 %v1726_v17  ;;  %1364 = vmax.xlane.f32.xlu0 %v1363_v30 }
 0x50d   : > { %v7267_v24 = vpop.eup %7266 }
 0x50e   : > { %v1713_v63 = vpop.xlane.xlu1 %1712  ;;  %v1350_v20 = vpop.xlane.xlu2 %1349  ;;  %v1922_v57 = vmul.f32 %v7267_v24, %v8873_v51 }
 0x50f   : > { %7270 = vrcp.f32 %v1713_v63  ;;  %v1482_v31 = vsub.f32 %v8724_v23, %v1350_v20 }
 0x510   : > { %6763 = vmatmul.msk.f32.gmra.mxu0 %vm1260_vm1, %v1922_v57  ;;  %v8989_v24 = vpop.f32.mrf.mxu0 }
 0x511   : > { %v8936_v10 = vpop.eup %7268  ;;  %v1575_v61 = vmul.f32 1.442695, %v1482_v31  ;;  %v1381_v31 = vsel %vm1260_vm1, %v8975_v11, -inf }
 0x512   : > { %v1729_v44 = vsel %vm1260_vm1, %v8936_v10, 0.0 }
 0x513   : > { %7272 = vpow2.f32 %v1575_v61  ;;  %1730 = vadd.xlane.f32.xlu1 %v1729_v44  ;;  %1367 = vmax.xlane.f32.xlu2 %v1366_v12  ;;  %v8999_v61 = vpop.f32.mrf.mxu3 }
 0x515   : > { %v7271_v56 = vpop.eup %7270 }
 0x516   : > { %v1716_v4 = vpop.xlane.xlu0 %1715  ;;  %v1353_v51 = vpop.xlane.xlu1 %1352  ;;  %v1923_v7 = vmul.f32 %v7271_v56, %v8882_v37 }
 0x517   : > { %7274 = vrcp.f32 %v1716_v4  ;;  %v1483_v23 = vsub.f32 %v8741_v43, %v1353_v51 }
 0x518   : > { %6764 = vmatmul.msk.f32.gmra.mxu0 %vm1260_vm1, %v1923_v7  ;;  %v9006_v51 = vpop.f32.mrf.mxu0 }
 0x519   : > { %v8945_v3 = vpop.eup %7272  ;;  %v1577_v22 = vmul.f32 1.442695, %v1483_v23 }
 0x51a   : > { %v1732_v45 = vsel %vm1260_vm1, %v8945_v3, 0.0 }
 0x51b   : > { %7276 = vpow2.f32 %v1577_v22  ;;  %1733 = vadd.xlane.f32.xlu0 %v1732_v45  ;;  %1370 = vmax.xlane.f32.xlu1 %v1369_v25  ;;  %v1384_v22 = vsel %vm1260_vm1, %v8986_v18, -inf }
 0x51d   : > { %v7275_v14 = vpop.eup %7274 }
 0x51e   : > { %v1356_v27 = vpop.xlane.xlu0 %1355  ;;  %v1924_v37 = vmul.f32 %v7275_v14, %v8888_v47  ;;  %v9013_v14 = vpop.f32.mrf.mxu3 }
 0x51f   : > { %v1484_v43 = vsub.f32 %v8756_v48, %v1356_v27  ;;  %v1375_v48 = vsel %vm1260_vm1, %v8818_v1, -inf }
 0x520   : > { %6765 = vmatmul.msk.f32.gmra.mxu0 %vm1260_vm1, %v1924_v37 }
 0x521   : > { %v8954_v29 = vpop.eup %7276  ;;  %v1579_v0 = vmul.f32 1.442695, %v1484_v43 }
 0x522   : > { %v1735_v62 = vsel %vm1260_vm1, %v8954_v29, 0.0 }
 0x523   : > { %7278 = vpow2.f32 %v1579_v0  ;;  %1736 = vadd.xlane.f32.xlu2 %v1735_v62  ;;  %1373 = vmax.xlane.f32.xlu0 %v1372_v59  ;;  %v1387_v62 = vsel %vm1260_vm1, %v8999_v61, -inf  ;;  %v9023_v59 = vpop.f32.mrf.mxu0 }
 0x529   : > { %v8960_v19 = vpop.eup %7278 }
 0x52a   : > { %v1738_v47 = vsel %vm1260_vm1, %v8960_v19, 0.0 }
 0x52b   : > { %1739 = vadd.xlane.f32.xlu1 %v1738_v47  ;;  %1376 = vmax.xlane.f32.xlu2 %v1375_v48 }
 0x533   : > { %1379 = vmax.xlane.f32.xlu1 %v1378_v8 }
 0x566   : > { %v1719_v21 = vpop.xlane.xlu2 %1718 }
 0x567   : > { %7280 = vrcp.f32 %v1719_v21 }
 0x56d   : > { %v7281_v42 = vpop.eup %7280 }
 0x56e   : > { %v1722_v32 = vpop.xlane.xlu1 %1721  ;;  %v1359_v33 = vpop.xlane.xlu2 %1358  ;;  %v1925_v39 = vmul.f32 %v7281_v42, %v8902_v58 }
 0x56f   : > { %7282 = vrcp.f32 %v1722_v32  ;;  %v1485_v41 = vsub.f32 %v8771_v49, %v1359_v33  ;;  %v9030_v42 = vpop.f32.mrf.mxu3 }
 0x570   : > { %6766 = vmatmul.msk.f32.gmra.mxu0 %vm1260_vm1, %v1925_v39  ;;  %v1390_v39 = vsel %vm1260_vm1, %v9013_v14, -inf }
 0x571   : > { %v1581_v6 = vmul.f32 1.442695, %v1485_v41  ;;  %v9036_v41 = vpop.f32.mrf.mxu0 }
 0x573   : > { %7284 = vpow2.f32 %v1581_v6 }
 0x575   : > { %v7283_v28 = vpop.eup %7282 }
 0x576   : > { %v1725_v40 = vpop.xlane.xlu0 %1724  ;;  %v1362_v15 = vpop.xlane.xlu1 %1361  ;;  %v1926_v60 = vmul.f32 %v7283_v28, %v8909_v52 }
 0x577   : > { %7286 = vrcp.f32 %v1725_v40  ;;  %v1486_v54 = vsub.f32 %v8790_v26, %v1362_v15 }
 0x578   : > { %6767 = vmatmul.msk.f32.gmra.mxu0 %vm1260_vm1, %v1926_v60 }
 0x579   : > { %v8982_v58 = vpop.eup %7284  ;;  %v1583_v49 = vmul.f32 1.442695, %v1486_v54 }
 0x57a   : > { %v1741_v2 = vsel %vm1260_vm1, %v8982_v58, 0.0 }
 0x57b   : > { %7288 = vpow2.f32 %v1583_v49  ;;  %1742 = vadd.xlane.f32.xlu0 %v1741_v2  ;;  %v1393_v49 = vsel %vm1260_vm1, %v9030_v42, -inf  ;;  %v9047_v2 = vpop.f32.mrf.mxu3 }
 0x57d   : > { %v7287_v46 = vpop.eup %7286 }
 0x57e   : > { %v1728_v17 = vpop.xlane.xlu2 %1727  ;;  %v1365_v30 = vpop.xlane.xlu0 %1364  ;;  %v1927_v52 = vmul.f32 %v7287_v46, %v8918_v16 }
 0x57f   : > { %7290 = vrcp.f32 %v1728_v17  ;;  %v1487_v26 = vsub.f32 %v8803_v55, %v1365_v30  ;;  %v9051_v30 = vpop.f32.mrf.mxu0 }
 0x580   : > { %6768 = vmatmul.msk.f32.gmra.mxu0 %vm1260_vm1, %v1927_v52 }
 0x581   : > { %v8993_v63 = vpop.eup %7288  ;;  %v1585_v20 = vmul.f32 1.442695, %v1487_v26 }
 0x582   : > { %v1744_v57 = vsel %vm1260_vm1, %v8993_v63, 0.0 }
 0x583   : > { %7292 = vpow2.f32 %v1585_v20  ;;  %1745 = vadd.xlane.f32.xlu2 %v1744_v57  ;;  %1382 = vmax.xlane.f32.xlu0 %v1381_v31  ;;  %v1396_v57 = vsel %vm1260_vm1, %v9047_v2, -inf  ;;  %v9060_v31 = vpop.f32.mrf.mxu3 }
 0x585   : > { %v7291_v16 = vpop.eup %7290 }
 0x586   : > { %v1731_v44 = vpop.xlane.xlu1 %1730  ;;  %v1368_v12 = vpop.xlane.xlu2 %1367  ;;  %v1928_v55 = vmul.f32 %v7291_v16, %v8927_v50  ;;  %v1399_v16 = vsel %vm1260_vm1, %v9060_v31, -inf }
 0x587   : > { %7294 = vrcp.f32 %v1731_v44  ;;  %v1488_v56 = vsub.f32 %v8809_v53, %v1368_v12 }
 0x588   : > { %6769 = vmatmul.msk.f32.gmra.mxu0 %vm1260_vm1, %v1928_v55  ;;  %v9072_v55 = vpop.f32.mrf.mxu0 }
 0x589   : > { %v9004_v4 = vpop.eup %7292  ;;  %v1587_v7 = vmul.f32 1.442695, %v1488_v56 }
 0x58a   : > { %v1747_v23 = vsel %vm1260_vm1, %v9004_v4, 0.0 }
 0x58b   : > { %7296 = vpow2.f32 %v1587_v7  ;;  %1748 = vadd.xlane.f32.xlu1 %v1747_v23  ;;  %1385 = vmax.xlane.f32.xlu2 %v1384_v22  ;;  %v9068_v44 = vpop.f32.mrf.mxu3 }
 0x58c   : > { %v1402_v12 = vsel %vm1260_vm1, %v9068_v44, -inf }
 0x58d   : > { %v7295_v50 = vpop.eup %7294 }
 0x58e   : > { %v1734_v45 = vpop.xlane.xlu0 %1733  ;;  %v1371_v25 = vpop.xlane.xlu1 %1370  ;;  %v1929_v53 = vmul.f32 %v7295_v50, %v8936_v10 }
 0x58f   : > { %7298 = vrcp.f32 %v1734_v45  ;;  %v1489_v27 = vsub.f32 %v8812_v36, %v1371_v25 }
 0x590   : > { %6770 = vmatmul.msk.f32.gmra.mxu0 %vm1260_vm1, %v1929_v53  ;;  %v9074_v7 = vpop.f32.mrf.mxu0 }
 0x591   : > { %v9017_v37 = vpop.eup %7296  ;;  %v1589_v43 = vmul.f32 1.442695, %v1489_v27 }
 0x592   : > { %v1750_v0 = vsel %vm1260_vm1, %v9017_v37, 0.0 }
 0x593   : > { %7300 = vpow2.f32 %v1589_v43  ;;  %1751 = vadd.xlane.f32.xlu0 %v1750_v0  ;;  %1388 = vmax.xlane.f32.xlu1 %v1387_v62  ;;  %v9079_v53 = vpop.f32.mrf.mxu3 }
 0x595   : > { %v7299_v10 = vpop.eup %7298 }
 0x596   : > { %v1737_v47 = vpop.xlane.xlu2 %1736  ;;  %v1374_v48 = vpop.xlane.xlu0 %1373  ;;  %v1930_v36 = vmul.f32 %v7299_v10, %v8945_v3 }
 0x597   : > { %7302 = vrcp.f32 %v1737_v47  ;;  %v1490_v8 = vsub.f32 %v8815_v5, %v1374_v48 }
 0x598   : > { %6771 = vmatmul.msk.f32.gmra.mxu0 %vm1260_vm1, %v1930_v36  ;;  %v9081_v0 = vpop.f32.mrf.mxu0 }
 0x599   : > { %v9028_v21 = vpop.eup %7300  ;;  %v1591_v32 = vmul.f32 1.442695, %v1490_v8 }
 0x59a   : > { %v1753_v33 = vsel %vm1260_vm1, %v9028_v21, 0.0 }
 0x59b   : > { %7304 = vpow2.f32 %v1591_v32  ;;  %1754 = vadd.xlane.f32.xlu2 %v1753_v33  ;;  %1391 = vmax.xlane.f32.xlu0 %v1390_v39  ;;  %v9090_v8 = vpop.f32.mrf.mxu3 }
 0x59d   : > { %v7303_v3 = vpop.eup %7302 }
 0x59e   : > { %v1740_v5 = vpop.xlane.xlu1 %1739  ;;  %v1377_v6 = vpop.xlane.xlu2 %1376  ;;  %v1931_v28 = vmul.f32 %v7303_v3, %v8954_v29 }
 0x59f   : > { %7306 = vrcp.f32 %v1740_v5  ;;  %v1491_v40 = vsub.f32 %v8818_v1, %v1377_v6 }
 0x5a0   : > { %6772 = vmatmul.msk.f32.gmra.mxu0 %vm1260_vm1, %v1931_v28  ;;  %v9093_v3 = vpop.f32.mrf.mxu0 }
 0x5a1   : > { %v9041_v15 = vpop.eup %7304  ;;  %v1593_v60 = vmul.f32 1.442695, %v1491_v40  ;;  %v1405_v40 = vsel %vm1260_vm1, %v9079_v53, -inf }
 0x5a2   : > { %v1756_v54 = vsel %vm1260_vm1, %v9041_v15, 0.0 }
 0x5a3   : > { %7308 = vpow2.f32 %v1593_v60  ;;  %1757 = vadd.xlane.f32.xlu1 %v1756_v54  ;;  %1394 = vmax.xlane.f32.xlu2 %v1393_v49  ;;  %v9103_v60 = vpop.f32.mrf.mxu3 }
 0x5a5   : > { %v7307_v29 = vpop.eup %7306 }
 0x5a6   : > { %v1380_v46 = vpop.xlane.xlu1 %1379  ;;  %v1932_v1 = vmul.f32 %v7307_v29, %v8960_v19 }
 0x5a7   : > { %v1492_v17 = vsub.f32 %v8822_v9, %v1380_v46 }
 0x5a8   : > { %6773 = vmatmul.msk.f32.gmra.mxu0 %vm1260_vm1, %v1932_v1  ;;  %v9110_v1 = vpop.f32.mrf.mxu0 }
 0x5a9   : > { %v9054_v52 = vpop.eup %7308  ;;  %v1595_v26 = vmul.f32 1.442695, %v1492_v17 }
 0x5aa   : > { %v1759_v20 = vsel %vm1260_vm1, %v9054_v52, 0.0 }
 0x5ab   : > { %7310 = vpow2.f32 %v1595_v26  ;;  %1760 = vadd.xlane.f32.xlu0 %v1759_v20  ;;  %1397 = vmax.xlane.f32.xlu1 %v1396_v57  ;;  %v1408_v20 = vsel %vm1260_vm1, %v9090_v8, -inf }
 0x5b1   : > { %v9062_v19 = vpop.eup %7310 }
 0x5b2   : > { %v1762_v9 = vsel %vm1260_vm1, %v9062_v19, 0.0 }
 0x5b3   : > { %1763 = vadd.xlane.f32.xlu2 %v1762_v9  ;;  %1400 = vmax.xlane.f32.xlu0 %v1399_v16  ;;  %v9117_v16 = vpop.f32.mrf.mxu3 }
 0x5bb   : > { %1403 = vmax.xlane.f32.xlu2 %v1402_v12 }
 0x5ee   : > { %v1743_v56 = vpop.xlane.xlu0 %1742 }
 0x5ef   : > { %7312 = vrcp.f32 %v1743_v56 }
 0x5f5   : > { %v7313_v23 = vpop.eup %7312 }
 0x5f6   : > { %v1746_v22 = vpop.xlane.xlu2 %1745  ;;  %v1383_v50 = vpop.xlane.xlu0 %1382  ;;  %v1933_v45 = vmul.f32 %v7313_v23, %v8982_v58 }
 0x5f7   : > { %7314 = vrcp.f32 %v1746_v22  ;;  %v1493_v25 = vsub.f32 %v8975_v11, %v1383_v50  ;;  %v1411_v50 = vsel %vm1260_vm1, %v9103_v60, -inf }
 0x5f8   : > { %6774 = vmatmul.msk.f32.gmra.mxu0 %vm1260_vm1, %v1933_v45  ;;  %v9127_v45 = vpop.f32.mrf.mxu0 }
 0x5f9   : > { %v1597_v27 = vmul.f32 1.442695, %v1493_v25 }
 0x5fb   : > { %7316 = vpow2.f32 %v1597_v27 }
 0x5fd   : > { %v7315_v43 = vpop.eup %7314 }
 0x5fe   : > { %v1749_v62 = vpop.xlane.xlu1 %1748  ;;  %v1386_v10 = vpop.xlane.xlu2 %1385  ;;  %v1934_v47 = vmul.f32 %v7315_v43, %v8993_v63 }
 0x5ff   : > { %7318 = vrcp.f32 %v1749_v62  ;;  %v1494_v48 = vsub.f32 %v8986_v18, %v1386_v10  ;;  %v9134_v10 = vpop.f32.mrf.mxu3 }
 0x600   : > { %6775 = vmatmul.msk.f32.gmra.mxu0 %vm1260_vm1, %v1934_v47 }
 0x601   : > { %v9086_v58 = vpop.eup %7316  ;;  %v1599_v11 = vmul.f32 1.442695, %v1494_v48 }
 0x602   : > { %v1765_v36 = vsel %vm1260_vm1, %v9086_v58, 0.0 }
 0x603   : > { %7320 = vpow2.f32 %v1599_v11  ;;  %1766 = vadd.xlane.f32.xlu1 %v1765_v36  ;;  %v1414_v11 = vsel %vm1260_vm1, %v9117_v16, -inf  ;;  %v9140_v36 = vpop.f32.mrf.mxu0 }
 0x605   : > { %v7319_v32 = vpop.eup %7318 }
 0x606   : > { %v1752_v33 = vpop.xlane.xlu0 %1751  ;;  %v1389_v39 = vpop.xlane.xlu1 %1388  ;;  %v1935_v63 = vmul.f32 %v7319_v32, %v9004_v4 }
 0x607   : > { %7322 = vrcp.f32 %v1752_v33  ;;  %v1495_v18 = vsub.f32 %v8999_v61, %v1389_v39 }
 0x608   : > { %6776 = vmatmul.msk.f32.gmra.mxu0 %vm1260_vm1, %v1935_v63 }
 0x609   : > { %v9097_v5 = vpop.eup %7320  ;;  %v1601_v6 = vmul.f32 1.442695, %v1495_v18 }
 0x60a   : > { %v1768_v28 = vsel %vm1260_vm1, %v9097_v5, 0.0 }
 0x60b   : > { %7324 = vpow2.f32 %v1601_v6  ;;  %1769 = vadd.xlane.f32.xlu0 %v1768_v28  ;;  %1406 = vmax.xlane.f32.xlu1 %v1405_v40  ;;  %v1417_v28 = vsel %vm1260_vm1, %v9134_v10, -inf  ;;  %v9151_v40 = vpop.f32.mrf.mxu3 }
 0x60d   : > { %v7323_v4 = vpop.eup %7322 }
 0x60e   : > { %v1755_v54 = vpop.xlane.xlu2 %1754  ;;  %v1392_v49 = vpop.xlane.xlu0 %1391  ;;  %v1936_v61 = vmul.f32 %v7323_v4, %v9017_v37 }
 0x60f   : > { %7326 = vrcp.f32 %v1755_v54  ;;  %v1496_v29 = vsub.f32 %v9013_v14, %v1392_v49  ;;  %v9155_v49 = vpop.f32.mrf.mxu0 }
 0x610   : > { %6777 = vmatmul.msk.f32.gmra.mxu0 %vm1260_vm1, %v1936_v61 }
 0x611   : > { %v9108_v46 = vpop.eup %7324  ;;  %v1603_v17 = vmul.f32 1.442695, %v1496_v29 }
 0x612   : > { %v1771_v26 = vsel %vm1260_vm1, %v9108_v46, 0.0 }
 0x613   : > { %7328 = vpow2.f32 %v1603_v17  ;;  %1772 = vadd.xlane.f32.xlu2 %v1771_v26  ;;  %1409 = vmax.xlane.f32.xlu0 %v1408_v20  ;;  %v1420_v26 = vsel %vm1260_vm1, %v9151_v40, -inf  ;;  %v9164_v20 = vpop.f32.mrf.mxu3 }
 0x615   : > { %v7327_v37 = vpop.eup %7326 }
 0x616   : > { %v1758_v57 = vpop.xlane.xlu1 %1757  ;;  %v1395_v9 = vpop.xlane.xlu2 %1394  ;;  %v1937_v14 = vmul.f32 %v7327_v37, %v9028_v21  ;;  %v1423_v37 = vsel %vm1260_vm1, %v9164_v20, -inf }
 0x617   : > { %7330 = vrcp.f32 %v1758_v57  ;;  %v1497_v12 = vsub.f32 %v9030_v42, %v1395_v9 }
 0x618   : > { %6778 = vmatmul.msk.f32.gmra.mxu0 %vm1260_vm1, %v1937_v14  ;;  %v9176_v14 = vpop.f32.mrf.mxu0 }
 0x619   : > { %v9121_v56 = vpop.eup %7328  ;;  %v1605_v23 = vmul.f32 1.442695, %v1497_v12 }
 0x61a   : > { %v1774_v22 = vsel %vm1260_vm1, %v9121_v56, 0.0 }
 0x61b   : > { %7332 = vpow2.f32 %v1605_v23  ;;  %1775 = vadd.xlane.f32.xlu1 %v1774_v22  ;;  %1412 = vmax.xlane.f32.xlu2 %v1411_v50  ;;  %v9172_v57 = vpop.f32.mrf.mxu3 }
 0x61c   : > { %v1426_v9 = vsel %vm1260_vm1, %v9172_v57, -inf }
 0x61d   : > { %v7331_v21 = vpop.eup %7330 }
 0x61e   : > { %v1761_v25 = vpop.xlane.xlu0 %1760  ;;  %v1398_v27 = vpop.xlane.xlu1 %1397  ;;  %v1938_v42 = vmul.f32 %v7331_v21, %v9041_v15 }
 0x61f   : > { %7334 = vrcp.f32 %v1761_v25  ;;  %v1498_v43 = vsub.f32 %v9047_v2, %v1398_v27 }
 0x620   : > { %6779 = vmatmul.msk.f32.gmra.mxu0 %vm1260_vm1, %v1938_v42  ;;  %v9178_v23 = vpop.f32.mrf.mxu0 }
 0x621   : > { %v9132_v62 = vpop.eup %7332  ;;  %v1607_v47 = vmul.f32 1.442695, %v1498_v43 }
 0x622   : > { %v1777_v48 = vsel %vm1260_vm1, %v9132_v62, 0.0 }
 0x623   : > { %7336 = vpow2.f32 %v1607_v47  ;;  %1778 = vadd.xlane.f32.xlu0 %v1777_v48  ;;  %1415 = vmax.xlane.f32.xlu1 %v1414_v11  ;;  %v9183_v42 = vpop.f32.mrf.mxu3 }
 0x625   : > { %v7335_v15 = vpop.eup %7334 }
 0x626   : > { %v1764_v2 = vpop.xlane.xlu2 %1763  ;;  %v1401_v32 = vpop.xlane.xlu0 %1400  ;;  %v1939_v33 = vmul.f32 %v7335_v15, %v9054_v52 }
 0x627   : > { %7338 = vrcp.f32 %v1764_v2  ;;  %v1499_v39 = vsub.f32 %v9060_v31, %v1401_v32 }
 0x628   : > { %6780 = vmatmul.msk.f32.gmra.mxu0 %vm1260_vm1, %v1939_v33  ;;  %v9185_v48 = vpop.f32.mrf.mxu0 }
 0x629   : > { %v9145_v63 = vpop.eup %7336  ;;  %v1609_v18 = vmul.f32 1.442695, %v1499_v39 }
 0x62a   : > { %v1780_v6 = vsel %vm1260_vm1, %v9145_v63, 0.0 }
 0x62b   : > { %7340 = vpow2.f32 %v1609_v18  ;;  %1781 = vadd.xlane.f32.xlu2 %v1780_v6  ;;  %1418 = vmax.xlane.f32.xlu0 %v1417_v28  ;;  %v9194_v39 = vpop.f32.mrf.mxu3 }
 0x62d   : > { %v7339_v52 = vpop.eup %7338 }
 0x62e   : > { %v1404_v4 = vpop.xlane.xlu2 %1403  ;;  %v1940_v31 = vmul.f32 %v7339_v52, %v9062_v19 }
 0x62f   : > { %v1500_v54 = vsub.f32 %v9068_v44, %v1404_v4 }
 0x630   : > { %6781 = vmatmul.msk.f32.gmra.mxu0 %vm1260_vm1, %v1940_v31  ;;  %v9197_v52 = vpop.f32.mrf.mxu0 }
 0x631   : > { %v9158_v61 = vpop.eup %7340  ;;  %v1611_v29 = vmul.f32 1.442695, %v1500_v54 }
 0x632   : > { %v1783_v17 = vsel %vm1260_vm1, %v9158_v61, 0.0 }
 0x633   : > { %7342 = vpow2.f32 %v1611_v29  ;;  %1784 = vadd.xlane.f32.xlu1 %v1783_v17  ;;  %1421 = vmax.xlane.f32.xlu2 %v1420_v26  ;;  %v1429_v29 = vsel %vm1260_vm1, %v9183_v42, -inf  ;;  %v9207_v17 = vpop.f32.mrf.mxu3 }
 0x639   : > { %v9166_v19 = vpop.eup %7342 }
 0x63a   : > { %v1786_v44 = vsel %vm1260_vm1, %v9166_v19, 0.0 }
 0x63b   : > { %1787 = vadd.xlane.f32.xlu0 %v1786_v44  ;;  %1424 = vmax.xlane.f32.xlu1 %v1423_v37 }
 0x643   : > { %1427 = vmax.xlane.f32.xlu0 %v1426_v9 }
 0x676   : > { %v1767_v12 = vpop.xlane.xlu1 %1766 }
 0x677   : > { %7344 = vrcp.f32 %v1767_v12  ;;  %v9214_v12 = vpop.f32.mrf.mxu0 }
 0x67d   : > { %v7345_v22 = vpop.eup %7344 }
 0x67e   : > { %v1770_v50 = vpop.xlane.xlu0 %1769  ;;  %v1407_v21 = vpop.xlane.xlu1 %1406  ;;  %v1941_v25 = vmul.f32 %v7345_v22, %v9086_v58 }
 0x67f   : > { %7346 = vrcp.f32 %v1770_v50  ;;  %v1501_v27 = vsub.f32 %v9079_v53, %v1407_v21  ;;  %v1432_v21 = vsel %vm1260_vm1, %v9194_v39, -inf }
 0x680   : > { %6782 = vmatmul.msk.f32.gmra.mxu0 %vm1260_vm1, %v1941_v25 }
 0x681   : > { %v1613_v43 = vmul.f32 1.442695, %v1501_v27 }
 0x683   : > { %7348 = vpow2.f32 %v1613_v43  ;;  %v9221_v43 = vpop.f32.mrf.mxu3 }
 0x685   : > { %v7347_v47 = vpop.eup %7346 }
 0x686   : > { %v1773_v11 = vpop.xlane.xlu2 %1772  ;;  %v1410_v15 = vpop.xlane.xlu0 %1409  ;;  %v1942_v2 = vmul.f32 %v7347_v47, %v9097_v5 }
 0x687   : > { %7350 = vrcp.f32 %v1773_v11  ;;  %v1502_v32 = vsub.f32 %v9090_v8, %v1410_v15 }
 0x688   : > { %6783 = vmatmul.msk.f32.gmra.mxu0 %vm1260_vm1, %v1942_v2 }
 0x689   : > { %v9190_v58 = vpop.eup %7348  ;;  %v1615_v53 = vmul.f32 1.442695, %v1502_v32  ;;  %v1435_v32 = vsel %vm1260_vm1, %v9207_v17, -inf }
 0x68a   : > { %v1789_v33 = vsel %vm1260_vm1, %v9190_v58, 0.0 }
 0x68b   : > { %7352 = vpow2.f32 %v1615_v53  ;;  %1790 = vadd.xlane.f32.xlu2 %v1789_v33  ;;  %v9231_v53 = vpop.f32.mrf.mxu0 }
 0x68d   : > { %v7351_v18 = vpop.eup %7350 }
 0x68e   : > { %v1776_v6 = vpop.xlane.xlu1 %1775  ;;  %v1413_v28 = vpop.xlane.xlu2 %1412  ;;  %v1943_v5 = vmul.f32 %v7351_v18, %v9108_v46 }
 0x68f   : > { %7354 = vrcp.f32 %v1776_v6  ;;  %v1503_v8 = vsub.f32 %v9103_v60, %v1413_v28 }
 0x690   : > { %6784 = vmatmul.msk.f32.gmra.mxu0 %vm1260_vm1, %v1943_v5  ;;  %v9238_v5 = vpop.f32.mrf.mxu3 }
 0x691   : > { %v9201_v4 = vpop.eup %7352  ;;  %v1617_v31 = vmul.f32 1.442695, %v1503_v8 }
 0x692   : > { %v1792_v54 = vsel %vm1260_vm1, %v9201_v4, 0.0 }
 0x693   : > { %7356 = vpow2.f32 %v1617_v31  ;;  %1793 = vadd.xlane.f32.xlu1 %v1792_v54  ;;  %1430 = vmax.xlane.f32.xlu2 %v1429_v29  ;;  %v1438_v54 = vsel %vm1260_vm1, %v9221_v43, -inf  ;;  %v9244_v29 = vpop.f32.mrf.mxu0 }
 0x695   : > { %v7355_v46 = vpop.eup %7354 }
 0x696   : > { %v1779_v26 = vpop.xlane.xlu0 %1778  ;;  %v1416_v44 = vpop.xlane.xlu1 %1415  ;;  %v1944_v60 = vmul.f32 %v7355_v46, %v9121_v56 }
 0x697   : > { %7358 = vrcp.f32 %v1779_v26  ;;  %v1504_v37 = vsub.f32 %v9117_v16, %v1416_v44 }
 0x698   : > { %6785 = vmatmul.msk.f32.gmra.mxu0 %vm1260_vm1, %v1944_v60 }
 0x699   : > { %v9212_v9 = vpop.eup %7356  ;;  %v1619_v22 = vmul.f32 1.442695, %v1504_v37 }
 0x69a   : > { %v1795_v50 = vsel %vm1260_vm1, %v9212_v9, 0.0 }
 0x69b   : > { %7360 = vpow2.f32 %v1619_v22  ;;  %1796 = vadd.xlane.f32.xlu0 %v1795_v50  ;;  %1433 = vmax.xlane.f32.xlu1 %v1432_v21  ;;  %v1441_v50 = vsel %vm1260_vm1, %v9238_v5, -inf  ;;  %v9255_v21 = vpop.f32.mrf.mxu3 }
 0x69d   : > { %v7359_v56 = vpop.eup %7358 }
 0x69e   : > { %v1782_v25 = vpop.xlane.xlu2 %1781  ;;  %v1419_v27 = vpop.xlane.xlu0 %1418  ;;  %v1945_v16 = vmul.f32 %v7359_v56, %v9132_v62 }
 0x69f   : > { %7362 = vrcp.f32 %v1782_v25  ;;  %v1505_v47 = vsub.f32 %v9134_v10, %v1419_v27  ;;  %v9259_v27 = vpop.f32.mrf.mxu0 }
 0x6a0   : > { %6786 = vmatmul.msk.f32.gmra.mxu0 %vm1260_vm1, %v1945_v16 }
 0x6a1   : > { %v9225_v11 = vpop.eup %7360  ;;  %v1621_v15 = vmul.f32 1.442695, %v1505_v47 }
 0x6a2   : > { %v1798_v2 = vsel %vm1260_vm1, %v9225_v11, 0.0 }
 0x6a3   : > { %7364 = vpow2.f32 %v1621_v15  ;;  %1799 = vadd.xlane.f32.xlu2 %v1798_v2  ;;  %1436 = vmax.xlane.f32.xlu0 %v1435_v32  ;;  %v1444_v2 = vsel %vm1260_vm1, %v9255_v21, -inf  ;;  %v9268_v32 = vpop.f32.mrf.mxu3 }
 0x6a5   : > { %v7363_v62 = vpop.eup %7362 }
 0x6a6   : > { %v1785_v33 = vpop.xlane.xlu1 %1784  ;;  %v1422_v18 = vpop.xlane.xlu2 %1421  ;;  %v1946_v10 = vmul.f32 %v7363_v62, %v9145_v63  ;;  %v1447_v62 = vsel %vm1260_vm1, %v9268_v32, -inf }
 0x6a7   : > { %7366 = vrcp.f32 %v1785_v33  ;;  %v1506_v6 = vsub.f32 %v9151_v40, %v1422_v18 }
 0x6a8   : > { %6787 = vmatmul.msk.f32.gmra.mxu0 %vm1260_vm1, %v1946_v10  ;;  %v9280_v10 = vpop.f32.mrf.mxu0 }
 0x6a9   : > { %v9236_v28 = vpop.eup %7364  ;;  %v1623_v8 = vmul.f32 1.442695, %v1506_v6 }
 0x6aa   : > { %v1801_v31 = vsel %vm1260_vm1, %v9236_v28, 0.0 }
 0x6ab   : > { %7368 = vpow2.f32 %v1623_v8  ;;  %1802 = vadd.xlane.f32.xlu1 %v1801_v31  ;;  %1439 = vmax.xlane.f32.xlu2 %v1438_v54  ;;  %v9276_v33 = vpop.f32.mrf.mxu3 }
 0x6ac   : > { %v1450_v18 = vsel %vm1260_vm1, %v9276_v33, -inf }
 0x6ad   : > { %v7367_v63 = vpop.eup %7366 }
 0x6ae   : > { %v1788_v40 = vpop.xlane.xlu0 %1787  ;;  %v1425_v46 = vpop.xlane.xlu1 %1424  ;;  %v1947_v26 = vmul.f32 %v7367_v63, %v9158_v61 }
 0x6af   : > { %7370 = vrcp.f32 %v1788_v40  ;;  %v1507_v44 = vsub.f32 %v9164_v20, %v1425_v46 }
 0x6b0   : > { %6788 = vmatmul.msk.f32.gmra.mxu0 %vm1260_vm1, %v1947_v26  ;;  %v9282_v6 = vpop.f32.mrf.mxu0 }
 0x6b1   : > { %v9249_v60 = vpop.eup %7368  ;;  %v1625_v37 = vmul.f32 1.442695, %v1507_v44 }
 0x6b2   : > { %v1804_v22 = vsel %vm1260_vm1, %v9249_v60, 0.0 }
 0x6b3   : > { %7372 = vpow2.f32 %v1625_v37  ;;  %1805 = vadd.xlane.f32.xlu0 %v1804_v22  ;;  %1442 = vmax.xlane.f32.xlu1 %v1441_v50 }
 0x6b5   : > { %v7371_v61 = vpop.eup %7370 }
 0x6b6   : > { %v1428_v56 = vpop.xlane.xlu0 %1427  ;;  %v1948_v20 = vmul.f32 %v7371_v61, %v9166_v19 }
 0x6b7   : > { %v1508_v25 = vsub.f32 %v9172_v57, %v1428_v56 }
 0x6b8   : > { %6789 = vmatmul.msk.f32.gmra.mxu0 %vm1260_vm1, %v1948_v20  ;;  %v9284_v8 = vpop.f32.mrf.mxu0 }
 0x6b9   : > { %v9262_v16 = vpop.eup %7372  ;;  %v1627_v47 = vmul.f32 1.442695, %v1508_v25 }
 0x6ba   : > { %v1807_v15 = vsel %vm1260_vm1, %v9262_v16, 0.0 }
 0x6bb   : > { %7374 = vpow2.f32 %v1627_v47  ;;  %1808 = vadd.xlane.f32.xlu2 %v1807_v15  ;;  %1445 = vmax.xlane.f32.xlu0 %v1444_v2 }
 0x6c0   : > { %v9286_v31 = vpop.f32.mrf.mxu0 }
 0x6c1   : > { %v9270_v19 = vpop.eup %7374 }
 0x6c2   : > { %v1810_v57 = vsel %vm1260_vm1, %v9270_v19, 0.0 }
 0x6c3   : > { %1811 = vadd.xlane.f32.xlu1 %v1810_v57  ;;  %1448 = vmax.xlane.f32.xlu2 %v1447_v62 }
 0x6c8   : > { %v9288_v54 = vpop.f32.mrf.mxu0 }
 0x6cb   : > { %1451 = vmax.xlane.f32.xlu1 %v1450_v18 }
 0x6d0   : > { %v9291_v37 = vpop.f32.mrf.mxu0 }
 0x6d8   : > { %v9300_v15 = vpop.f32.mrf.mxu0 }
 0x6fe   : > { %v1791_v63 = vpop.xlane.xlu2 %1790 }
 0x6ff   : > { %7376 = vrcp.f32 %v1791_v63 }
 0x705   : > { %v7377_v40 = vpop.eup %7376 }
 0x706   : > { %v1794_v46 = vpop.xlane.xlu1 %1793  ;;  %v1431_v26 = vpop.xlane.xlu2 %1430  ;;  %v1949_v44 = vmul.f32 %v7377_v40, %v9190_v58 }
 0x707   : > { %7378 = vrcp.f32 %v1794_v46  ;;  %v1509_v22 = vsub.f32 %v9183_v42, %v1431_v26  ;;  %v9311_v26 = vpop.f32.mrf.mxu0 }
 0x708   : > { %6790 = vmatmul.msk.f32.gmra.mxu0 %vm1260_vm1, %v1949_v44  ;;  %12807 = vst [vmem:[#allocation3_spill] sm:$0xff] %v9311_v26 }
 0x709   : > { %v1629_v50 = vmul.f32 1.442695, %v1509_v22 }
 0x70b   : > { %7380 = vpow2.f32 %v1629_v50 }
 0x70d   : > { %v7379_v61 = vpop.eup %7378 }
 0x70e   : > { %v1797_v56 = vpop.xlane.xlu0 %1796  ;;  %v1434_v20 = vpop.xlane.xlu1 %1433  ;;  %v1950_v25 = vmul.f32 %v7379_v61, %v9201_v4 }
 0x70f   : > { %7382 = vrcp.f32 %v1797_v56  ;;  %v1510_v47 = vsub.f32 %v9194_v39, %v1434_v20 }
 0x710   : > { %6791 = vmatmul.msk.f32.gmra.mxu0 %vm1260_vm1, %v1950_v25  ;;  %v9320_v25 = vpop.f32.mrf.mxu0 }
 0x711   : > { %v9298_v58 = vpop.eup %7380  ;;  %v1631_v2 = vmul.f32 1.442695, %v1510_v47 }
 0x712   : > { %v1813_v42 = vsel %vm1260_vm1, %v9298_v58, 0.0 }
 0x713   : > { %7384 = vpow2.f32 %v1631_v2  ;;  %1814 = vadd.xlane.f32.xlu0 %v1813_v42 }
 0x715   : > { %v7383_v57 = vpop.eup %7382 }
 0x716   : > { %v1800_v62 = vpop.xlane.xlu2 %1799  ;;  %v1437_v18 = vpop.xlane.xlu0 %1436  ;;  %v1951_v4 = vmul.f32 %v7383_v57, %v9212_v9 }
 0x717   : > { %7386 = vrcp.f32 %v1800_v62  ;;  %v1511_v39 = vsub.f32 %v9207_v17, %v1437_v18 }
 0x718   : > { %6792 = vmatmul.msk.f32.gmra.mxu0 %vm1260_vm1, %v1951_v4 }
 0x719   : > { %v9307_v63 = vpop.eup %7384  ;;  %v1633_v40 = vmul.f32 1.442695, %v1511_v39  ;;  %v9329_v39 = vpop.f32.mrf.mxu0 }
 0x71a   : > { %v1816_v46 = vsel %vm1260_vm1, %v9307_v63, 0.0 }
 0x71b   : > { %7388 = vpow2.f32 %v1633_v40  ;;  %1817 = vadd.xlane.f32.xlu2 %v1816_v46 }
 0x71d   : > { %v7387_v44 = vpop.eup %7386 }
 0x71e   : > { %v1803_v22 = vpop.xlane.xlu1 %1802  ;;  %v1440_v50 = vpop.xlane.xlu2 %1439  ;;  %v1952_v9 = vmul.f32 %v7387_v44, %v9225_v11 }
 0x71f   : > { %7390 = vrcp.f32 %v1803_v22  ;;  %v1512_v17 = vsub.f32 %v9221_v43, %v1440_v50 }
 0x720   : > { %6793 = vmatmul.msk.f32.gmra.mxu0 %vm1260_vm1, %v1952_v9 }
 0x721   : > { %v9316_v61 = vpop.eup %7388  ;;  %v1635_v56 = vmul.f32 1.442695, %v1512_v17 }
 0x722   : > { %v1819_v20 = vsel %vm1260_vm1, %v9316_v61, 0.0 }
 0x723   : > { %7392 = vpow2.f32 %v1635_v56  ;;  %1820 = vadd.xlane.f32.xlu0 %v1819_v20 }
 0x725   : > { %v7391_v47 = vpop.eup %7390 }
 0x726   : > { %v1806_v2 = vpop.xlane.xlu0 %1805  ;;  %v1443_v42 = vpop.xlane.xlu1 %1442  ;;  %v1953_v11 = vmul.f32 %v7391_v47, %v9236_v28 }
 0x727   : > { %7394 = vrcp.f32 %v1806_v2  ;;  %v1513_v43 = vsub.f32 %v9238_v5, %v1443_v42  ;;  %v9339_v47 = vpop.f32.mrf.mxu0 }
 0x728   : > { %6794 = vmatmul.msk.f32.gmra.mxu0 %vm1260_vm1, %v1953_v11 }
 0x729   : > { %v9325_v57 = vpop.eup %7392  ;;  %v1637_v62 = vmul.f32 1.442695, %v1513_v43 }
 0x72a   : > { %v1822_v18 = vsel %vm1260_vm1, %v9325_v57, 0.0 }
 0x72b   : > { %7396 = vpow2.f32 %v1637_v62  ;;  %1823 = vadd.xlane.f32.xlu1 %v1822_v18 }
 0x72d   : > { %v7395_v4 = vpop.eup %7394 }
 0x72e   : > { %v1809_v40 = vpop.xlane.xlu2 %1808  ;;  %v1446_v46 = vpop.xlane.xlu0 %1445  ;;  %v1954_v28 = vmul.f32 %v7395_v4, %v9249_v60 }
 0x72f   : > { %7398 = vrcp.f32 %v1809_v40  ;;  %v1514_v5 = vsub.f32 %v9255_v21, %v1446_v46 }
 0x730   : > { %6795 = vmatmul.msk.f32.gmra.mxu0 %vm1260_vm1, %v1954_v28 }
 0x731   : > { %v9334_v44 = vpop.eup %7396  ;;  %v1639_v22 = vmul.f32 1.442695, %v1514_v5 }
 0x732   : > { %v1825_v50 = vsel %vm1260_vm1, %v9334_v44, 0.0 }
 0x733   : > { %7400 = vpow2.f32 %v1639_v22  ;;  %1826 = vadd.xlane.f32.xlu2 %v1825_v50 }
 0x735   : > { %v7399_v9 = vpop.eup %7398 }
 0x736   : > { %v1812_v17 = vpop.xlane.xlu1 %1811  ;;  %v1449_v56 = vpop.xlane.xlu2 %1448  ;;  %v1955_v20 = vmul.f32 %v7399_v9, %v9262_v16 }
 0x737   : > { %7402 = vrcp.f32 %v1812_v17  ;;  %v1515_v60 = vsub.f32 %v9268_v32, %v1449_v56  ;;  %v9352_v32 = vpop.f32.mrf.mxu0 }
 0x738   : > { %6796 = vmatmul.msk.f32.gmra.mxu0 %vm1260_vm1, %v1955_v20 }
 0x739   : > { %v9343_v21 = vpop.eup %7400  ;;  %v1641_v2 = vmul.f32 1.442695, %v1515_v60 }
 0x73a   : > { %v1828_v42 = vsel %vm1260_vm1, %v9343_v21, 0.0 }
 0x73b   : > { %7404 = vpow2.f32 %v1641_v2  ;;  %1829 = vadd.xlane.f32.xlu0 %v1828_v42 }
 0x73d   : > { %v7403_v11 = vpop.eup %7402 }
 0x73e   : > { %v1452_v43 = vpop.xlane.xlu1 %1451  ;;  %v1956_v62 = vmul.f32 %v7403_v11, %v9270_v19 }
 0x73f   : > { %v1516_v16 = vsub.f32 %v9276_v33, %v1452_v43  ;;  %v9360_v19 = vpop.f32.mrf.mxu0 }
 0x740   : > { %6797 = vmatmul.msk.f32.gmra.mxu0 %vm1260_vm1, %v1956_v62 }
 0x741   : > { %v9350_v18 = vpop.eup %7404  ;;  %v1643_v4 = vmul.f32 1.442695, %v1516_v16 }
 0x742   : > { %v1831_v40 = vsel %vm1260_vm1, %v9350_v18, 0.0 }
 0x743   : > { %7406 = vpow2.f32 %v1643_v4  ;;  %1832 = vadd.xlane.f32.xlu1 %v1831_v40 }
 0x747   : > { %v9362_v33 = vpop.f32.mrf.mxu0 }
 0x749   : > { %v9356_v46 = vpop.eup %7406 }
 0x74a   : > { %v1834_v28 = vsel %vm1260_vm1, %v9356_v46, 0.0 }
 0x74b   : > { %1835 = vadd.xlane.f32.xlu2 %v1834_v28 }
 0x74f   : > { %v9364_v5 = vpop.f32.mrf.mxu0 }
 0x757   : > { %v9366_v22 = vpop.f32.mrf.mxu0 }
 0x758   : > { %12808 = vst [vmem:[#allocation4_spill] sm:$0xff] %v9366_v22  ;;  %v9500_v22 = vld [vmem:[%s12779_s12 + $0x5] ss:$0 sm:$0xff] }
 0x75f   : > { %v9368_v50 = vpop.f32.mrf.mxu0 }
 0x767   : > { %v9370_v9 = vpop.f32.mrf.mxu0 }
 0x76f   : > { %v9372_v17 = vpop.f32.mrf.mxu0 }
 0x777   : > { %v9375_v42 = vpop.f32.mrf.mxu0 }
 0x77f   : > { %v9380_v16 = vpop.f32.mrf.mxu0 }
 0x786   : > { %v1815_v56 = vpop.xlane.xlu0 %1814 }
 0x787   : > { %7408 = vrcp.f32 %v1815_v56 }
 0x78d   : > { %v7409_v20 = vpop.eup %7408 }
 0x78e   : > { %v1818_v60 = vpop.xlane.xlu2 %1817  ;;  %v1957_v2 = vmul.f32 %v7409_v20, %v9298_v58  ;;  %v9384_v58 = vpop.f32.mrf.mxu0 }
 0x78f   : > { %7410 = vrcp.f32 %v1818_v60 }
 0x790   : > { %6798 = vmatmul.msk.f32.gmra.mxu0 %vm1260_vm1, %v1957_v2  ;;  %v2499_v2 = vld [vmem:[%s12771_s4 + $0x68] sm:$0xff] }
 0x795   : > { %v7411_v11 = vpop.eup %7410 }
 0x796   : > { %v1821_v43 = vpop.xlane.xlu0 %1820  ;;  %v1958_v62 = vmul.f32 %v7411_v11, %v9307_v63  ;;  %v2501_v63 = vld [vmem:[%s12771_s4 + $0x78] sm:$0xff] }
 0x797   : > { %7412 = vrcp.f32 %v1821_v43  ;;  %2502 = vmatpush.msra.mxu1 %v2501_v63  ;;  %v9400_v43 = vpop.f32.mrf.mxu0 }
 0x798   : > { %6799 = vmatmul.msk.f32.gmra.mxu0 %vm1260_vm1, %v1958_v62 }
 0x79d   : > { %v7413_v4 = vpop.eup %7412 }
 0x79e   : > { %v1824_v40 = vpop.xlane.xlu1 %1823  ;;  %v1959_v28 = vmul.f32 %v7413_v4, %v9316_v61  ;;  %v2500_v61 = vld [vmem:[%s12771_s4 + $0x70] sm:$0xff] }
 0x79f   : > { %7414 = vrcp.f32 %v1824_v40  ;;  %2503 = vmatpush.msra.mxu1 %v2500_v61  ;;  %v2497_v40 = vld [vmem:[%s12771_s4 + $0x58] sm:$0xff] }
 0x7a0   : > { %6800 = vmatmul.msk.f32.gmra.mxu0 %vm1260_vm1, %v1959_v28  ;;  %v2496_v28 = vld [vmem:[%s12771_s4 + $0x50] sm:$0xff]  ;;  %v2493_v61 = vld [vmem:[%s12771_s4 + $0x38] sm:$0xff] }
 0x7a1   : > { %2504 = vmatpush.msra.mxu1 %v2499_v2  ;;  %v9420_v2 = vpop.f32.mrf.mxu0 }
 0x7a2   : > { %12809 = vst [vmem:[#allocation5_spill] sm:$0xff] %v9420_v2  ;;  %v9491_v2 = vld [vmem:[%s12779_s12 + $0x4] ss:$0 sm:$0xff] }
 0x7a5   : > { %v7415_v56 = vpop.eup %7414 }
 0x7a6   : > { %v1827_v20 = vpop.xlane.xlu2 %1826  ;;  %v1960_v60 = vmul.f32 %v7415_v56, %v9325_v57  ;;  %v2498_v57 = vld [vmem:[%s12771_s4 + $0x60] sm:$0xff]  ;;  %v2495_v56 = vld [vmem:[%s12771_s4 + $0x48] sm:$0xff] }
 0x7a7   : > { %7416 = vrcp.f32 %v1827_v20  ;;  %2505 = vmatpush.msra.mxu1 %v2498_v57  ;;  %v2492_v57 = vld [vmem:[%s12771_s4 + $0x30] sm:$0xff] }
 0x7a8   : > { %6801 = vmatmul.msk.f32.gmra.mxu0 %vm1260_vm1, %v1960_v60 }
 0x7a9   : > { %2506 = vmatpush.msra.mxu1 %v2497_v40 }
 0x7ab   : > { %2507 = vmatpush.msra.mxu1 %v2496_v28  ;;  %v2489_v28 = vld [vmem:[%s12771_s4 + $0x18] sm:$0xff] }
 0x7ad   : > { %v7417_v11 = vpop.eup %7416  ;;  %2508 = vmatpush.msra.mxu1 %v2495_v56  ;;  %v2318_v56 = vpop.f32.mrf.mxu0 }
 0x7ae   : > { %v1830_v62 = vpop.xlane.xlu0 %1829  ;;  %v1961_v4 = vmul.f32 %v7417_v11, %v9334_v44  ;;  %v2494_v44 = vld [vmem:[%s12771_s4 + $0x40] sm:$0xff]  ;;  %v2491_v11 = vld [vmem:[%s12771_s4 + $0x28] sm:$0xff] }
 0x7af   : > { %7418 = vrcp.f32 %v1830_v62  ;;  %2509 = vmatpush.msra.mxu1 %v2494_v44 }
 0x7b0   : > { %6802 = vmatmul.msk.f32.gmra.mxu0 %vm1260_vm1, %v1961_v4 }
 0x7b1   : > { %2510 = vmatpush.msra.mxu1 %v2493_v61 }
 0x7b3   : > { %2511 = vmatpush.msra.mxu1 %v2492_v57  ;;  %v2488_v57 = vld [vmem:[%s12771_s4 + $0x10] sm:$0xff] }
 0x7b5   : > { %v7419_v20 = vpop.eup %7418  ;;  %2512 = vmatpush.msra.mxu1 %v2491_v11  ;;  %v2487_v11 = vld [vmem:[%s12771_s4 + $0x8] sm:$0xff] }
 0x7b6   : > { %v1833_v60 = vpop.xlane.xlu1 %1832  ;;  %v1962_v63 = vmul.f32 %v7419_v20, %v9343_v21  ;;  %v2490_v21 = vld [vmem:[%s12771_s4 + $0x20] sm:$0xff] }
 0x7b7   : > { %7420 = vrcp.f32 %v1833_v60  ;;  %2513 = vmatpush.msra.mxu1 %v2490_v21  ;;  %v2321_v60 = vpop.f32.mrf.mxu0 }
 0x7b8   : > { %6803 = vmatmul.msk.f32.gmra.mxu0 %vm1260_vm1, %v1962_v63 }
 0x7b9   : > { %2514 = vmatpush.msra.mxu1 %v2489_v28  ;;  %v9468_v28 = vld [vmem:[%s12779_s12] ss:$0 sm:$0xff] }
 0x7bb   : > { %2515 = vmatpush.msra.mxu1 %v2488_v57 }
 0x7bd   : > { %v7421_v62 = vpop.eup %7420  ;;  %2516 = vmatpush.msra.mxu1 %v2487_v11 }
 0x7be   : > { %v1836_v4 = vpop.xlane.xlu2 %1835  ;;  %v1963_v40 = vmul.f32 %v7421_v62, %v9350_v18 }
 0x7bf   : > { %7422 = vrcp.f32 %v1836_v4  ;;  %v9439_v63 = vpop.f32.mrf.mxu0  ;;  %v9461_v4 = vld [vmem:[%s12779_s12 + $0x1] ss:$0 sm:$0xff] }
 0x7c0   : > { %6804 = vmatmul.msk.f32.gmra.mxu0 %vm1260_vm1, %v1963_v40  ;;  %v2374_v40 = vmul.f32 %v9461_v4, %v9072_v55  ;;  %v9482_v55 = vld [vmem:[%s12779_s12 + $0x3] ss:$0 sm:$0xff] }
 0x7c5   : > { %v7423_v44 = vpop.eup %7422 }
 0x7c6   : > { %v1964_v20 = vmul.f32 %v7423_v44, %v9356_v46  ;;  %v2486_v46 = vld [vmem:[%s12771_s4] sm:$0xff]  ;;  %v2366_v44 = vmul.f32 %v9468_v28, %v8968_v38 }
 0x7c7   : > { %v9441_v61 = vpop.f32.mrf.mxu0  ;;  %2517 = vmatpush.msra.mxu1 %v2486_v46  ;;  %v2390_v46 = vmul.f32 %v9482_v55, %v9280_v10  ;;  %v2406_v10 = vmul.f32 %v9500_v22, %v9368_v50 }
 0x7c8   : > { %6805 = vmatmul.msk.f32.gmra.mxu0 %vm1260_vm1, %v1964_v20  ;;  %v9475_v20 = vld [vmem:[%s12779_s12 + $0x2] ss:$0 sm:$0xff]  ;;  %v2430_v11 = vadd.f32 %v2374_v40, %v2366_v44  ;;  %v2375_v40 = vmul.f32 %v9461_v4, %v9074_v7  ;;  %v9511_v7 = vld [vmem:[%s12779_s12 + $0x6] ss:$0 sm:$0xff] }
 0x7c9   : > { %v2382_v57 = vmul.f32 %v9475_v20, %v9176_v14  ;;  %v2398_v14 = vmul.f32 %v9491_v2, %v9320_v25  ;;  %v2414_v25 = vmul.f32 %v9511_v7, %v2318_v56  ;;  %v2376_v56 = vmul.f32 %v9461_v4, %v9081_v0 }
 0x7cb   : > { %v2431_v38 = vadd.f32 %v2430_v11, %v2382_v57  ;;  %v2367_v57 = vmul.f32 %v9468_v28, %v8970_v35  ;;  %v2383_v11 = vmul.f32 %v9475_v20, %v9178_v23  ;;  %v2399_v35 = vmul.f32 %v9491_v2, %v9329_v39  ;;  %v9521_v23 = vld [vmem:[%s12779_s12 + $0x7] ss:$0 sm:$0xff] }
 0x7cc   : > { %v2384_v39 = vmul.f32 %v9475_v20, %v9185_v48  ;;  %v2377_v48 = vmul.f32 %v9461_v4, %v9093_v3  ;;  %v2393_v3 = vmul.f32 %v9482_v55, %v9286_v31  ;;  %v2370_v31 = vmul.f32 %v9468_v28, %v9006_v51 }
 0x7cd   : > { %v2432_v44 = vadd.f32 %v2431_v38, %v2390_v46  ;;  %v2437_v46 = vadd.f32 %v2375_v40, %v2367_v57  ;;  %v2391_v38 = vmul.f32 %v9482_v55, %v9282_v6 }
 0x7cf   : > { %v9443_v18 = vpop.f32.mrf.mxu0 }
 0x7d7   : > { %v9454_v21 = vpop.f32.mrf.mxu0 }
 0x7df   : > { %v9456_v62 = vpop.f32.mrf.mxu0 }
 0x7e0   : > { %12810 = vst [vmem:[#allocation6_spill] sm:$0xff] %v9456_v62  ;;  %v2438_v62 = vadd.f32 %v2437_v46, %v2383_v11  ;;  %v2415_v11 = vmul.f32 %v9511_v7, %v2321_v60  ;;  %v2408_v60 = vmul.f32 %v9500_v22, %v9372_v17  ;;  %v2401_v17 = vmul.f32 %v9491_v2, %v9352_v32 }
 0x7e1   : > { %v2417_v32 = vmul.f32 %v9511_v7, %v9441_v61  ;;  %v2410_v61 = vmul.f32 %v9500_v22, %v9380_v16  ;;  %v2403_v16 = vmul.f32 %v9491_v2, %v9362_v33  ;;  %v2419_v33 = vmul.f32 %v9511_v7, %v9454_v21 }
 0x7e2   : > { %v2439_v40 = vadd.f32 %v2438_v62, %v2391_v38  ;;  %v2412_v21 = vmul.f32 %v9500_v22, %v9400_v43  ;;  %v12814_v43 = vld [vmem:[#allocation4_spill] sm:$0xff] }
 0x7e4   : > { %v2440_v57 = vadd.f32 %v2439_v40, %v2399_v35 }
 0x7e7   : > { %v9486_v13 = vpop.f32.mrf.mxu0 }
 0x7e8   : > { %12811 = vst [vmem:[#allocation7_spill] sm:$0xff] %v9486_v13  ;;  %v2433_v13 = vadd.f32 %v2432_v44, %v2398_v14 }
 0x7ea   : > { %v2434_v26 = vadd.f32 %v2433_v13, %v2406_v10  ;;  %v2407_v13 = vmul.f32 %v9500_v22, %v9370_v9  ;;  %v2368_v10 = vmul.f32 %v9468_v28, %v8977_v34  ;;  %v2400_v9 = vmul.f32 %v9491_v2, %v9339_v47 }
 0x7eb   : > { %v2416_v47 = vmul.f32 %v9511_v7, %v9439_v63  ;;  %v2409_v63 = vmul.f32 %v9500_v22, %v9375_v42  ;;  %v2402_v42 = vmul.f32 %v9491_v2, %v9360_v19  ;;  %v2418_v19 = vmul.f32 %v9511_v7, %v9443_v18 }
 0x7ec   : > { %v2435_v44 = vadd.f32 %v2434_v26, %v2414_v25  ;;  %v2444_v46 = vadd.f32 %v2376_v56, %v2368_v10  ;;  %v2392_v26 = vmul.f32 %v9482_v55, %v9284_v8  ;;  %v2441_v0 = vadd.f32 %v2440_v57, %v2407_v13 }
 0x7ed   : > { %v2369_v8 = vmul.f32 %v9468_v28, %v8989_v24  ;;  %v2411_v18 = vmul.f32 %v9500_v22, %v9384_v58  ;;  %v2404_v58 = vmul.f32 %v9491_v2, %v9364_v5 }
 0x7ee   : > { %v2445_v25 = vadd.f32 %v2444_v46, %v2384_v39  ;;  %v2442_v34 = vadd.f32 %v2441_v0, %v2415_v11  ;;  %v2386_v11 = vmul.f32 %v9475_v20, %v9214_v12  ;;  %v2379_v12 = vmul.f32 %v9461_v4, %v9127_v45 }
 0x7ef   : > { %v2451_v56 = vadd.f32 %v2377_v48, %v2369_v8  ;;  %v2387_v48 = vmul.f32 %v9475_v20, %v9231_v53  ;;  %v2395_v45 = vmul.f32 %v9482_v55, %v9291_v37  ;;  %v2380_v53 = vmul.f32 %v9461_v4, %v9140_v36 }
 0x7f0   : > { %v2372_v37 = vmul.f32 %v9468_v28, %v9036_v41  ;;  %v2396_v36 = vmul.f32 %v9482_v55, %v9300_v15  ;;  %v2373_v15 = vmul.f32 %v9468_v28, %v9051_v30 }
 0x80d   : > { %v2342_v50 = vpop.f32.mrf.mxu0 }
 0x80e   : > { %v2422_v14 = vmul.f32 %v9521_v23, %v2342_v50  ;;  %v2446_v50 = vadd.f32 %v2445_v25, %v2392_v26 }
 0x810   : > { %v2436_v6 = vadd.f32 %v2435_v44, %v2422_v14  ;;  %v2385_v14 = vmul.f32 %v9475_v20, %v9197_v52  ;;  %v2447_v44 = vadd.f32 %v2446_v50, %v2400_v9  ;;  %v2378_v52 = vmul.f32 %v9461_v4, %v9110_v1 }
 0x811   : > { %v2394_v1 = vmul.f32 %v9482_v55, %v9288_v54  ;;  %v2371_v54 = vmul.f32 %v9468_v28, %v9023_v59 }
 0x812   : > { %2518 = vmatmul.f32.vlgmr.msra.gmra.mxu1 %v2436_v6  ;;  %v2448_v40 = vadd.f32 %v2447_v44, %v2408_v60  ;;  %v2452_v6 = vadd.f32 %v2451_v56, %v2385_v14  ;;  %v2458_v26 = vadd.f32 %v2378_v52, %v2370_v31  ;;  %v12812_v31 = vld [vmem:[#allocation6_spill] sm:$0xff] }
 0x813   : > { %v2465_v60 = vadd.f32 %v2379_v12, %v2371_v54  ;;  %v2420_v5 = vmul.f32 %v9511_v7, %v12812_v31 }
 0x814   : > { %v2449_v10 = vadd.f32 %v2448_v40, %v2416_v47  ;;  %v2453_v39 = vadd.f32 %v2452_v6, %v2393_v3  ;;  %v2459_v25 = vadd.f32 %v2458_v26, %v2386_v11  ;;  %v2388_v3 = vmul.f32 %v9475_v20, %v9244_v29 }
 0x815   : > { %v2345_v62 = vpop.f32.mrf.mxu0  ;;  %v2466_v14 = vadd.f32 %v2465_v60, %v2387_v48  ;;  %v2381_v29 = vmul.f32 %v9461_v4, %v9155_v49 }
 0x816   : > { %v2423_v38 = vmul.f32 %v9521_v23, %v2345_v62  ;;  %v2454_v46 = vadd.f32 %v2453_v39, %v2401_v17 }
 0x817   : > { %v2467_v47 = vadd.f32 %v2466_v14, %v2395_v45  ;;  %v2479_v11 = vadd.f32 %v2381_v29, %v2373_v15  ;;  %v7818_v45 = vld [vmem:[%s7935_s30 + $0x10] sm:$0xff] }
 0x818   : > { %v2443_v35 = vadd.f32 %v2442_v34, %v2423_v38  ;;  %v2455_v0 = vadd.f32 %v2454_v46, %v2409_v63  ;;  %v2460_v38 = vadd.f32 %v2459_v25, %v2394_v1  ;;  %v2389_v63 = vmul.f32 %v9475_v20, %v9259_v27  ;;  %v12813_v46 = vld [vmem:[#allocation3_spill] sm:$0xff]  ;;  %v12815_v20 = vld [vmem:[#allocation5_spill] sm:$0xff] }
 0x819   : > { %v2468_v40 = vadd.f32 %v2467_v47, %v2403_v16  ;;  %v2397_v49 = vmul.f32 %v9482_v55, %v12813_v46  ;;  %v2405_v1 = vmul.f32 %v9491_v2, %v12814_v43  ;;  %v7819_v16 = vld [vmem:[%s7935_s30 + $0x18] sm:$0xff]  ;;  %v7820_v47 = vld [vmem:[%s7935_s30 + $0x20] sm:$0xff] }
 0x81a   : > { %2521 = vmatmul.f32.gmra.mxu1 %v2443_v35  ;;  %v2456_v9 = vadd.f32 %v2455_v0, %v2417_v32  ;;  %v2461_v50 = vadd.f32 %v2460_v38, %v2402_v42  ;;  %v2480_v26 = vadd.f32 %v2479_v11, %v2389_v63  ;;  %v2413_v0 = vmul.f32 %v9500_v22, %v12815_v20  ;;  %v12816_v42 = vld [vmem:[#allocation7_spill] sm:$0xff] }
 0x81b   : > { %v2469_v6 = vadd.f32 %v2468_v40, %v2411_v18  ;;  %v2421_v55 = vmul.f32 %v9511_v7, %v12816_v42 }
 0x81c   : > { %v2462_v35 = vadd.f32 %v2461_v50, %v2410_v61  ;;  %v2481_v27 = vadd.f32 %v2480_v26, %v2397_v49  ;;  %v7121_v61 = vld [vmem:[%s12772_s5] ss:$0 sm:$0xff]  ;;  %v7817_v50 = vld [vmem:[%s7935_s30 + $0x8] sm:$0xff] }
 0x81d   : > { %v2348_v13 = vpop.f32.mrf.mxu0 }
 0x81e   : > { %v2424_v24 = vmul.f32 %v9521_v23, %v2348_v13  ;;  %v2463_v44 = vadd.f32 %v2462_v35, %v2418_v19  ;;  %v2472_v13 = vadd.f32 %v2380_v53, %v2372_v37  ;;  %v2482_v25 = vadd.f32 %v2481_v27, %v2405_v1 }
 0x820   : > { %v2450_v57 = vadd.f32 %v2449_v10, %v2424_v24  ;;  %v2473_v24 = vadd.f32 %v2472_v13, %v2388_v3  ;;  %v2470_v10 = vadd.f32 %v2469_v6, %v2419_v33  ;;  %v7821_v3 = vld [vmem:[%s7935_s30 + $0x28] sm:$0xff] }
 0x822   : > { %2524 = vmatmul.f32.gmra.mxu1 %v2450_v57  ;;  %v2474_v52 = vadd.f32 %v2473_v24, %v2396_v36  ;;  %v7822_v36 = vld [vmem:[%s7935_s30 + $0x30] sm:$0xff] }
 0x824   : > { %v2475_v57 = vadd.f32 %v2474_v52, %v2404_v58  ;;  %v12817_v58 = vld [vmem:[#allocation2_spill] sm:$0xff] }
 0x825   : > { %v2351_v62 = vpop.f32.mrf.mxu0 }
 0x826   : > { %v2425_v51 = vmul.f32 %v9521_v23, %v2351_v62  ;;  %v2476_v4 = vadd.f32 %v2475_v57, %v2412_v21 }
 0x828   : > { %v2457_v34 = vadd.f32 %v2456_v9, %v2425_v51  ;;  %v2477_v28 = vadd.f32 %v2476_v4, %v2420_v5  ;;  %v2483_v51 = vadd.f32 %v2482_v25, %v2413_v0 }
 0x82a   : > { %2527 = vmatmul.f32.gmra.mxu1 %v2457_v34  ;;  %v2484_v2 = vadd.f32 %v2483_v51, %v2421_v55  ;;  %v7816_v34 = vld [vmem:[%s7935_s30] sm:$0xff] }
 0x82d   : > { %v2354_v8 = vpop.f32.mrf.mxu0 }
 0x82e   : > { %v2426_v59 = vmul.f32 %v9521_v23, %v2354_v8 }
 0x830   : > { %v2464_v56 = vadd.f32 %v2463_v44, %v2426_v59 }
 0x832   : > { %2530 = vmatmul.f32.gmra.mxu1 %v2464_v56 }
 0x835   : > { %v2357_v17 = vpop.f32.mrf.mxu0 }
 0x836   : > { %v2427_v41 = vmul.f32 %v9521_v23, %v2357_v17 }
 0x838   : > { %v2471_v39 = vadd.f32 %v2470_v10, %v2427_v41 }
 0x83a   : > { %2533 = vmatmul.f32.gmra.mxu1 %v2471_v39  ;;  %v7823_v39 = vld [vmem:[%s7935_s30 + $0x38] sm:$0xff] }
 0x83d   : > { %v2360_v32 = vpop.f32.mrf.mxu0 }
 0x83e   : > { %v2428_v30 = vmul.f32 %v9521_v23, %v2360_v32 }
 0x840   : > { %v2478_v62 = vadd.f32 %v2477_v28, %v2428_v30 }
 0x842   : > { %2536 = vmatmul.f32.gmra.mxu1 %v2478_v62 }
 0x845   : > { %v2363_v9 = vpop.f32.mrf.mxu0 }
 0x846   : > { %v2429_v12 = vmul.f32 %v9521_v23, %v2363_v9 }
 0x848   : > { %v2485_v38 = vadd.f32 %v2484_v2, %v2429_v12  ;;  %v2933_v2 = vld [vmem:[%s12773_s6 + $0x1e0] sm:$0xff] }
 0x849   : > { %2947 = vmatpush.msrb.mxu2 %v2933_v2  ;;  %v2882_v2 = vld [vmem:[%s12773_s6 + $0x48] sm:$0xff] }
 0x84a   : > { %2539 = vmatmul.f32.gmra.mxu1 %v2485_v38  ;;  %v2934_v38 = vld [vmem:[%s12773_s6 + $0x1e8] sm:$0xff] }
 0x84b   : > { %2988 = vmatpush.msrb.mxu1 %v2934_v38 }
 0x88f   : > { %v2519_v22 = vpop.f32.mrf.mxu1 }
 0x890   : > { %v2543_v54 = vadd.f32 %v7816_v34, %v2519_v22  ;;  %v2930_v22 = vld [vmem:[%s12773_s6 + $0x1c8] sm:$0xff]  ;;  %v2925_v34 = vld [vmem:[%s12773_s6 + $0x1a0] sm:$0xff] }
 0x891   : > { %2989 = vmatpush.msrb.mxu1 %v2930_v22  ;;  %v2877_v22 = vld [vmem:[%s12773_s6 + $0x20] sm:$0xff] }
 0x892   : > { %v9622_v48 = vadd.f32 %v7121_v61, %v2543_v54  ;;  %v2926_v54 = vld [vmem:[%s12773_s6 + $0x1a8] sm:$0xff] }
 0x893   : > { %2990 = vmatpush.msrb.mxu1 %v2926_v54 }
 0x894   : > { %2563 = vadd.xlane.f32.xlu0 %v9622_v48 }
 0x897   : > { %v2522_v7 = vpop.f32.mrf.mxu1 }
 0x898   : > { %v2544_v23 = vadd.f32 %v7817_v50, %v2522_v7 }
 0x89a   : > { %v9626_v19 = vadd.f32 %v7121_v61, %v2544_v23  ;;  %v2921_v23 = vld [vmem:[%s12773_s6 + $0x180] sm:$0xff] }
 0x89c   : > { %2565 = vadd.xlane.f32.xlu1 %v9626_v19 }
 0x89f   : > { %v2525_v60 = vpop.f32.mrf.mxu1 }
 0x8a0   : > { %v2545_v35 = vadd.f32 %v7818_v45, %v2525_v60  ;;  %v2922_v60 = vld [vmem:[%s12773_s6 + $0x188] sm:$0xff]  ;;  %v2917_v45 = vld [vmem:[%s12773_s6 + $0x160] sm:$0xff] }
 0x8a1   : > { %2991 = vmatpush.msrb.mxu1 %v2922_v60 }
 0x8a2   : > { %v9630_v8 = vadd.f32 %v7121_v61, %v2545_v35  ;;  %v2918_v35 = vld [vmem:[%s12773_s6 + $0x168] sm:$0xff] }
 0x8a3   : > { %2992 = vmatpush.msrb.mxu1 %v2918_v35 }
 0x8a4   : > { %2567 = vadd.xlane.f32.xlu2 %v9630_v8 }
 0x8a7   : > { %v2528_v14 = vpop.f32.mrf.mxu1 }
 0x8a8   : > { %v2546_v59 = vadd.f32 %v7819_v16, %v2528_v14  ;;  %v2913_v14 = vld [vmem:[%s12773_s6 + $0x140] sm:$0xff]  ;;  %v2914_v16 = vld [vmem:[%s12773_s6 + $0x148] sm:$0xff] }
 0x8a9   : > { %2993 = vmatpush.msrb.mxu1 %v2914_v16 }
 0x8aa   : > { %v9634_v44 = vadd.f32 %v7121_v61, %v2546_v59  ;;  %v2909_v59 = vld [vmem:[%s12773_s6 + $0x120] sm:$0xff] }
 0x8ac   : > { %2569 = vadd.xlane.f32.xlu0 %v9634_v44 }
 0x8af   : > { %v2531_v53 = vpop.f32.mrf.mxu1 }
 0x8b0   : > { %v2547_v18 = vadd.f32 %v7820_v47, %v2531_v53  ;;  %v2910_v53 = vld [vmem:[%s12773_s6 + $0x128] sm:$0xff] }
 0x8b1   : > { %2994 = vmatpush.msrb.mxu1 %v2910_v53 }
 0x8b2   : > { %v9638_v56 = vadd.f32 %v7121_v61, %v2547_v18 }
 0x8b4   : > { %2571 = vadd.xlane.f32.xlu1 %v9638_v56 }
 0x8b7   : > { %v2534_v37 = vpop.f32.mrf.mxu1 }
 0x8b8   : > { %v2548_v40 = vadd.f32 %v7821_v3, %v2534_v37 }
 0x8ba   : > { %v9642_v33 = vadd.f32 %v7121_v61, %v2548_v40 }
 0x8bc   : > { %2573 = vadd.xlane.f32.xlu2 %v9642_v33 }
 0x8bf   : > { %v2537_v13 = vpop.f32.mrf.mxu1 }
 0x8c0   : > { %v2549_v6 = vadd.f32 %v7822_v36, %v2537_v13  ;;  %v2905_v13 = vld [vmem:[%s12773_s6 + $0x100] sm:$0xff]  ;;  %v2906_v36 = vld [vmem:[%s12773_s6 + $0x108] sm:$0xff] }
 0x8c1   : > { %2995 = vmatpush.msrb.mxu1 %v2906_v36 }
 0x8c2   : > { %v9646_v17 = vadd.f32 %v7121_v61, %v2549_v6 }
 0x8c4   : > { %2575 = vadd.xlane.f32.xlu1 %v9646_v17 }
 0x8c7   : > { %v2540_v52 = vpop.f32.mrf.mxu1 }
 0x8c8   : > { %v2550_v15 = vadd.f32 %v7823_v39, %v2540_v52  ;;  %v2897_v39 = vld [vmem:[%s12773_s6 + $0xc0] sm:$0xff] }
 0x8ca   : > { %v9660_v31 = vadd.f32 %v7121_v61, %v2550_v15  ;;  %v2929_v61 = vld [vmem:[%s12773_s6 + $0x1c0] sm:$0xff]  ;;  %v2898_v15 = vld [vmem:[%s12773_s6 + $0xc8] sm:$0xff] }
 0x8cb   : > { %2948 = vmatpush.msrb.mxu2 %v2929_v61 }
 0x8cd   : > { %2949 = vmatpush.msrb.mxu2 %v2925_v34  ;;  %v2878_v34 = vld [vmem:[%s12773_s6 + $0x28] sm:$0xff] }
 0x8cf   : > { %2950 = vmatpush.msrb.mxu2 %v2921_v23 }
 0x8d1   : > { %2951 = vmatpush.msrb.mxu2 %v2917_v45 }
 0x8d3   : > { %2952 = vmatpush.msrb.mxu2 %v2913_v14  ;;  %v2874_v14 = vld [vmem:[%s12773_s6 + $0x8] sm:$0xff] }
 0x8d5   : > { %2953 = vmatpush.msrb.mxu2 %v2909_v59 }
 0x8d7   : > { %2954 = vmatpush.msrb.mxu2 %v2905_v13 }
 0x907   : > { %v2564_v24 = vpop.xlane.xlu0 %2563 }
 0x908   : > { %v2579_v41 = vmul.f32 %v2564_v24, %v12817_v58 }
 0x90a   : > { %v9651_v10 = vsub.f32 %v9622_v48, %v2579_v41  ;;  %v2901_v41 = vld [vmem:[%s12773_s6 + $0xe0] sm:$0xff] }
 0x90b   : > { %2955 = vmatpush.msrb.mxu2 %v2901_v41 }
 0x90c   : > { %v2595_v29 = vmul.f32 %v9651_v10, %v9651_v10 }
 0x90d   : > { %2956 = vmatpush.msrb.mxu2 %v2897_v39 }
 0x90e   : > { %2603 = vadd.xlane.f32.xlu0 %v2595_v29  ;;  %v2902_v29 = vld [vmem:[%s12773_s6 + $0xe8] sm:$0xff] }
 0x90f   : > { %v2566_v21 = vpop.xlane.xlu1 %2565  ;;  %2996 = vmatpush.msrb.mxu1 %v2902_v29 }
 0x910   : > { %v2580_v63 = vmul.f32 %v2566_v21, %v12817_v58 }
 0x911   : > { %2997 = vmatpush.msrb.mxu1 %v2898_v15 }
 0x912   : > { %v9658_v57 = vsub.f32 %v9626_v19, %v2580_v63 }
 0x914   : > { %v2596_v5 = vmul.f32 %v9658_v57, %v9658_v57 }
 0x916   : > { %2577 = vadd.xlane.f32.xlu0 %v9660_v31  ;;  %2605 = vadd.xlane.f32.xlu2 %v2596_v5  ;;  %v2893_v5 = vld [vmem:[%s12773_s6 + $0xa0] sm:$0xff] }
 0x917   : > { %v2568_v11 = vpop.xlane.xlu2 %2567  ;;  %2957 = vmatpush.msrb.mxu2 %v2893_v5 }
 0x918   : > { %v2581_v46 = vmul.f32 %v2568_v11, %v12817_v58  ;;  %v2894_v11 = vld [vmem:[%s12773_s6 + $0xa8] sm:$0xff] }
 0x919   : > { %2998 = vmatpush.msrb.mxu1 %v2894_v11 }
 0x91a   : > { %v9667_v49 = vsub.f32 %v9630_v8, %v2581_v46 }
 0x91c   : > { %v2597_v4 = vmul.f32 %v9667_v49, %v9667_v49 }
 0x91e   : > { %2607 = vadd.xlane.f32.xlu1 %v2597_v4 }
 0x91f   : > { %v2570_v32 = vpop.xlane.xlu0 %2569 }
 0x920   : > { %v2582_v26 = vmul.f32 %v2570_v32, %v12817_v58 }
 0x922   : > { %v9673_v43 = vsub.f32 %v9634_v44, %v2582_v26 }
 0x924   : > { %v2598_v1 = vmul.f32 %v9673_v43, %v9673_v43 }
 0x926   : > { %2609 = vadd.xlane.f32.xlu2 %v2598_v1  ;;  %v2889_v1 = vld [vmem:[%s12773_s6 + $0x80] sm:$0xff] }
 0x927   : > { %v2572_v30 = vpop.xlane.xlu1 %2571  ;;  %2958 = vmatpush.msrb.mxu2 %v2889_v1 }
 0x928   : > { %v2583_v28 = vmul.f32 %v2572_v30, %v12817_v58  ;;  %v2890_v30 = vld [vmem:[%s12773_s6 + $0x88] sm:$0xff] }
 0x929   : > { %2999 = vmatpush.msrb.mxu1 %v2890_v30 }
 0x92a   : > { %v9679_v27 = vsub.f32 %v9638_v56, %v2583_v28 }
 0x92c   : > { %v2599_v20 = vmul.f32 %v9679_v27, %v9679_v27 }
 0x92e   : > { %2611 = vadd.xlane.f32.xlu0 %v2599_v20 }
 0x92f   : > { %v2574_v0 = vpop.xlane.xlu2 %2573 }
 0x930   : > { %v2584_v62 = vmul.f32 %v2574_v0, %v12817_v58  ;;  %v2885_v0 = vld [vmem:[%s12773_s6 + $0x60] sm:$0xff] }
 0x931   : > { %2959 = vmatpush.msrb.mxu2 %v2885_v0 }
 0x932   : > { %v9685_v25 = vsub.f32 %v9642_v33, %v2584_v62  ;;  %v2886_v62 = vld [vmem:[%s12773_s6 + $0x68] sm:$0xff] }
 0x933   : > { %3000 = vmatpush.msrb.mxu1 %v2886_v62 }
 0x934   : > { %v2600_v42 = vmul.f32 %v9685_v25, %v9685_v25 }
 0x935   : > { %3001 = vmatpush.msrb.mxu1 %v2882_v2 }
 0x936   : > { %2613 = vadd.xlane.f32.xlu1 %v2600_v42 }
 0x937   : > { %v2576_v55 = vpop.xlane.xlu1 %2575  ;;  %3002 = vmatpush.msrb.mxu1 %v2878_v34 }
 0x938   : > { %v2585_v51 = vmul.f32 %v2576_v55, %v12817_v58 }
 0x939   : > { %3003 = vmatpush.msrb.mxu1 %v2874_v14 }
 0x93a   : > { %v9691_v9 = vsub.f32 %v9646_v17, %v2585_v51 }
 0x93c   : > { %v2601_v12 = vmul.f32 %v9691_v9, %v9691_v9 }
 0x93e   : > { %2615 = vadd.xlane.f32.xlu2 %v2601_v12  ;;  %v2881_v12 = vld [vmem:[%s12773_s6 + $0x40] sm:$0xff] }
 0x93f   : > { %2960 = vmatpush.msrb.mxu2 %v2881_v12 }
 0x941   : > { %2961 = vmatpush.msrb.mxu2 %v2877_v22 }
 0x981   : > { %v2604_v7 = vpop.xlane.xlu0 %2603 }
 0x982   : > { %v9713_v50 = vmul.f32 0.007874016, %v2604_v7 }
 0x984   : > { %7424 = vrsqrt.f32 %v9713_v50  ;;  %vm2645_vm2 = vcmp.eq.f32.partialorder %v9713_v50, inf  ;;  %v2648_v51 = vand.u32 2147483648, %v9713_v50  ;;  %vm2647_vm3 = vcmp.eq.f32.partialorder %v9713_v50, 0.0 }
 0x989   : > { %v2578_v47 = vpop.xlane.xlu0 %2577  ;;  %v2606_v18 = vpop.xlane.xlu2 %2605 }
 0x98a   : > { %v7425_v37 = vpop.eup %7424  ;;  %v2586_v3 = vmul.f32 %v2578_v47, %v12817_v58  ;;  %v9741_v40 = vmul.f32 0.007874016, %v2606_v18 }
 0x98b   : > { %v2639_v6 = vmul.f32 %v7425_v37, %v9713_v50 }
 0x98c   : > { %v9751_v24 = vsub.f32 %v9660_v31, %v2586_v3  ;;  %7426 = vrsqrt.f32 %v9741_v40  ;;  %vm2657_vm4 = vcmp.eq.f32.partialorder %v9741_v40, inf  ;;  %v2660_v18 = vand.u32 2147483648, %v9741_v40 }
 0x98d   : > { %v2640_v52 = vmul.f32 %v7425_v37, %v2639_v6  ;;  %vm2659_vm5 = vcmp.eq.f32.partialorder %v9741_v40, 0.0 }
 0x98e   : > { %v2602_v21 = vmul.f32 %v9751_v24, %v9751_v24 }
 0x98f   : > { %v2641_v63 = vmul.f32 0.5, %v2640_v52 }
 0x990   : > { %2617 = vadd.xlane.f32.xlu0 %v2602_v21 }
 0x991   : > { %v2642_v46 = vsub.f32 1.5, %v2641_v63  ;;  %v2608_v4 = vpop.xlane.xlu1 %2607 }
 0x992   : > { %v7427_v32 = vpop.eup %7426  ;;  %v9774_v26 = vmul.f32 0.007874016, %v2608_v4 }
 0x993   : > { %v2643_v28 = vmul.f32 %v7425_v37, %v2642_v46  ;;  %v2651_v20 = vmul.f32 %v7427_v32, %v9741_v40 }
 0x994   : > { %7428 = vrsqrt.f32 %v9774_v26  ;;  %vm2669_vm6 = vcmp.eq.f32.partialorder %v9774_v26, inf  ;;  %vm2671_vm7 = vcmp.eq.f32.partialorder %v9774_v26, 0.0  ;;  %v2672_v46 = vand.u32 2147483648, %v9774_v26 }
 0x995   : > { %v2644_v42 = vmul.f32 %v2643_v28, %v9713_v50  ;;  %v2652_v55 = vmul.f32 %v7427_v32, %v2651_v20  ;;  %v9837_v28 = vld [vmem:[%s12768_s1 + $0x2] ss:$0 sm:$0xff] }
 0x997   : > { %v2646_v38 = vsel %vm2645_vm2, %v9713_v50, %v2644_v42  ;;  %v2653_v61 = vmul.f32 0.5, %v2652_v55  ;;  %v2873_v50 = vld [vmem:[%s12773_s6] sm:$0xff] }
 0x998   : > { %v2649_v54 = vsel %vm2647_vm3, %v2648_v51, %v2646_v38  ;;  %2962 = vmatpush.msrb.mxu2 %v2873_v50 }
 0x999   : > { %v2654_v7 = vsub.f32 1.5, %v2653_v61  ;;  %v2610_v23 = vpop.xlane.xlu2 %2609  ;;  %v2734_v60 = vadd.f32 1e-06, %v2649_v54 }
 0x99a   : > { %v7429_v45 = vpop.eup %7428  ;;  %v9807_v35 = vmul.f32 0.007874016, %v2610_v23  ;;  %v9853_v23 = vld [vmem:[%s12768_s1 + $0x3] ss:$0 sm:$0xff] }
 0x99b   : > { %v2655_v16 = vmul.f32 %v7427_v32, %v2654_v7  ;;  %v2663_v59 = vmul.f32 %v7429_v45, %v9774_v26  ;;  %7430 = vrcp.f32 %v2734_v60  ;;  %v2753_v4 = vand.u32 2147483648, %v2734_v60 }
 0x99c   : > { %7432 = vrsqrt.f32 %v9807_v35  ;;  %v2751_v20 = vand.u32 2147483647, %v2734_v60  ;;  %vm2747_vm9 = vweird.f32 %v2734_v60  ;;  %v2630_v7 = vmul.f32 %v9837_v28, %v9651_v10 }
 0x99d   : > { %v2656_v53 = vmul.f32 %v2655_v16, %v9741_v40  ;;  %v2664_v47 = vmul.f32 %v7429_v45, %v2663_v59  ;;  %vm2681_vm11 = vcmp.eq.f32.partialorder %v9807_v35, inf  ;;  %vm2683_vm13 = vcmp.eq.f32.partialorder %v9807_v35, 0.0 }
 0x99e   : > { %vm2752_vm12 = vcmp.eq.f32.partialorder %v2751_v20, 8.507059e+37  ;;  %v2684_v16 = vand.u32 2147483648, %v9807_v35 }
 0x99f   : > { %v2658_v37 = vsel %vm2657_vm4, %v9741_v40, %v2656_v53  ;;  %v2665_v3 = vmul.f32 0.5, %v2664_v47 }
 0x9a0   : > { %v2661_v13 = vsel %vm2659_vm5, %v2660_v18, %v2658_v37 }
 0x9a1   : > { %v7431_v36 = vpop.eup %7430  ;;  %v2666_v6 = vsub.f32 1.5, %v2665_v3  ;;  %v2612_v41 = vpop.xlane.xlu0 %2611  ;;  %v9822_v29 = vadd.f32 1e-06, %v2661_v13 }
 0x9a2   : > { %v7433_v52 = vpop.eup %7432  ;;  %v9824_v21 = vmul.f32 0.007874016, %v2612_v41  ;;  %v2743_v39 = vmul.f32 %v7431_v36, %v2734_v60  ;;  %vm2748_vm8 = vweird.f32 %v7431_v36 }
 0x9a3   : > { %v2667_v15 = vmul.f32 %v7429_v45, %v2666_v6  ;;  %v2675_v63 = vmul.f32 %v7433_v52, %v9807_v35  ;;  %7434 = vrcp.f32 %v9822_v29  ;;  %vm2749_vm10 = vmor %vm2747_vm9, %vm2748_vm8  ;;  %v2768_v59 = vand.u32 2147483648, %v9822_v29 }
 0x9a4   : > { %7436 = vrsqrt.f32 %v9824_v21  ;;  %v2744_v11 = vsub.f32 1.0, %v2743_v39  ;;  %v2766_v3 = vand.u32 2147483647, %v9822_v29  ;;  %vm2762_vm15 = vweird.f32 %v9822_v29 }
 0x9a5   : > { %v2668_v40 = vmul.f32 %v2667_v15, %v9774_v26  ;;  %v2676_v5 = vmul.f32 %v7433_v52, %v2675_v63  ;;  %vm2693_vm2 = vcmp.eq.f32.partialorder %v9824_v21, inf  ;;  %vm2695_vm3 = vcmp.eq.f32.partialorder %v9824_v21, 0.0 }
 0x9a6   : > { %v2745_v30 = vmul.f32 %v7431_v36, %v2744_v11  ;;  %vm2767_vm4 = vcmp.eq.f32.partialorder %v2766_v3, 8.507059e+37 }
 0x9a7   : > { %v2670_v32 = vsel %vm2669_vm6, %v9774_v26, %v2668_v40  ;;  %v2677_v1 = vmul.f32 0.5, %v2676_v5  ;;  %v2754_v26 = vor.u32 1.1754944e-38, %v2753_v4  ;;  %v2769_v40 = vor.u32 1.1754944e-38, %v2768_v59 }
 0x9a8   : > { %v2673_v0 = vsel %vm2671_vm7, %v2672_v46, %v2670_v32  ;;  %v2746_v51 = vadd.f32 %v7431_v36, %v2745_v30  ;;  %v2696_v30 = vand.u32 2147483648, %v9824_v21 }
 0x9a9   : > { %v7435_v62 = vpop.eup %7434  ;;  %v2678_v42 = vsub.f32 1.5, %v2677_v1  ;;  %v2614_v55 = vpop.xlane.xlu1 %2613  ;;  %v9839_v12 = vadd.f32 1e-06, %v2673_v0 }
 0x9aa   : > { %v7437_v2 = vpop.eup %7436  ;;  %v9841_v38 = vmul.f32 0.007874016, %v2614_v55  ;;  %v2758_v61 = vmul.f32 %v7435_v62, %v9822_v29  ;;  %v2750_v54 = vsel %vm2749_vm10, %v7431_v36, %v2746_v51  ;;  %vm2763_vm14 = vweird.f32 %v7435_v62 }
 0x9ab   : > { %v2679_v22 = vmul.f32 %v7433_v52, %v2678_v42  ;;  %v2687_v34 = vmul.f32 %v7437_v2, %v9824_v21  ;;  %7438 = vrcp.f32 %v9839_v12  ;;  %v2755_v50 = vsel %vm2752_vm12, %v2754_v26, %v2750_v54  ;;  %vm2764_vm0 = vmor %vm2762_vm15, %vm2763_vm14 }
 0x9ac   : > { %7440 = vrsqrt.f32 %v9841_v38  ;;  %v2759_v14 = vsub.f32 1.0, %v2758_v61  ;;  %v2756_v10 = vmul.f32 %v2755_v50, %v2630_v7  ;;  %v2781_v0 = vand.u32 2147483647, %v9839_v12 }
 0x9ad   : > { %v2680_v60 = vmul.f32 %v2679_v22, %v9807_v35  ;;  %v2688_v45 = vmul.f32 %v7437_v2, %v2687_v34  ;;  %vm2777_vm6 = vweird.f32 %v9839_v12  ;;  %vm2705_vm9 = vcmp.eq.f32.partialorder %v9841_v38, inf }
 0x9ae   : > { %v2760_v18 = vmul.f32 %v7435_v62, %v2759_v14  ;;  %v9861_v37 = vadd.f32 %v9853_v23, %v2756_v10  ;;  %vm2782_vm8 = vcmp.eq.f32.partialorder %v2781_v0, 8.507059e+37 }
 0x9af   : > { %v2682_v53 = vsel %vm2681_vm11, %v9807_v35, %v2680_v60  ;;  %v2689_v47 = vmul.f32 0.5, %v2688_v45  ;;  %v2631_v35 = vmul.f32 %v9837_v28, %v9658_v57  ;;  %v2632_v60 = vmul.f32 %v9837_v28, %v9667_v49 }
 0x9b0   : > { %v2685_v13 = vsel %vm2683_vm13, %v2684_v16, %v2682_v53  ;;  %v2761_v52 = vadd.f32 %v7435_v62, %v2760_v18  ;;  %2963 = vmatmul.f32.vlgmr.msrb.gmra.mxu2 %v9861_v37  ;;  %3004 = vmatmul.f32.vlgmr.msrb.gmra.mxu1 %v9861_v37  ;;  %v2708_v18 = vand.u32 2147483648, %v9841_v38  ;;  %vm2707_vm11 = vcmp.eq.f32.partialorder %v9841_v38, 0.0 }
 0x9b1   : > { %v7439_v36 = vpop.eup %7438  ;;  %v2690_v6 = vsub.f32 1.5, %v2689_v47  ;;  %v2616_v41 = vpop.xlane.xlu2 %2615  ;;  %v9865_v39 = vadd.f32 1e-06, %v2685_v13 }
 0x9b2   : > { %v7441_v15 = vpop.eup %7440  ;;  %v9871_v63 = vmul.f32 0.007874016, %v2616_v41  ;;  %v2773_v5 = vmul.f32 %v7439_v36, %v9839_v12  ;;  %v2765_v46 = vsel %vm2764_vm0, %v7435_v62, %v2761_v52  ;;  %v2783_v62 = vand.u32 2147483648, %v9839_v12 }
 0x9b3   : > { %v2691_v11 = vmul.f32 %v7437_v2, %v2690_v6  ;;  %v2699_v29 = vmul.f32 %v7441_v15, %v9841_v38  ;;  %7442 = vrcp.f32 %v9865_v39  ;;  %v2770_v32 = vsel %vm2767_vm4, %v2769_v40, %v2765_v46 }
 0x9b4   : > { %7444 = vrsqrt.f32 %v9871_v63  ;;  %v2774_v1 = vsub.f32 1.0, %v2773_v5  ;;  %v2771_v20 = vmul.f32 %v2770_v32, %v2631_v35  ;;  %vm2778_vm5 = vweird.f32 %v7439_v36 }
 0x9b5   : > { %v2692_v57 = vmul.f32 %v2691_v11, %v9824_v21  ;;  %v2700_v4 = vmul.f32 %v7441_v15, %v2699_v29  ;;  %vm2779_vm7 = vmor %vm2777_vm6, %vm2778_vm5  ;;  %v2784_v45 = vor.u32 1.1754944e-38, %v2783_v62  ;;  %v2798_v47 = vand.u32 2147483648, %v9865_v39 }
 0x9b6   : > { %v2775_v51 = vmul.f32 %v7439_v36, %v2774_v1  ;;  %v9886_v2 = vadd.f32 %v9853_v23, %v2771_v20  ;;  %v2796_v13 = vand.u32 2147483647, %v9865_v39  ;;  %vm2792_vm12 = vweird.f32 %v9865_v39 }
 0x9b7   : > { %v2694_v42 = vsel %vm2693_vm2, %v9824_v21, %v2692_v57  ;;  %v2701_v55 = vmul.f32 0.5, %v2700_v4  ;;  %v2799_v5 = vor.u32 1.1754944e-38, %v2798_v47  ;;  %v2633_v29 = vmul.f32 %v9837_v28, %v9673_v43 }
 0x9b8   : > { %v2697_v26 = vsel %vm2695_vm3, %v2696_v30, %v2694_v42  ;;  %v2776_v34 = vadd.f32 %v7439_v36, %v2775_v51  ;;  %2966 = vmatmul.f32.gmra.mxu2 %v9886_v2  ;;  %3007 = vmatmul.f32.gmra.mxu1 %v9886_v2  ;;  %vm2797_vm14 = vcmp.eq.f32.partialorder %v2796_v13, 8.507059e+37  ;;  %vm2717_vm15 = vcmp.eq.f32.partialorder %v9871_v63, inf }
 0x9b9   : > { %v7443_v61 = vpop.eup %7442  ;;  %v2702_v22 = vsub.f32 1.5, %v2701_v55  ;;  %v9891_v54 = vadd.f32 1e-06, %v2697_v26  ;;  %v2720_v30 = vand.u32 2147483648, %v9871_v63  ;;  %vm2719_vm2 = vcmp.eq.f32.partialorder %v9871_v63, 0.0 }
 0x9ba   : > { %v7445_v7 = vpop.eup %7444  ;;  %v2788_v21 = vmul.f32 %v7443_v61, %v9865_v39  ;;  %v2780_v16 = vsel %vm2779_vm7, %v7439_v36, %v2776_v34  ;;  %vm2793_vm10 = vweird.f32 %v7443_v61  ;;  %v2634_v34 = vmul.f32 %v9837_v28, %v9679_v27 }
 0x9bb   : > { %v2703_v50 = vmul.f32 %v7441_v15, %v2702_v22  ;;  %v2711_v14 = vmul.f32 %v7445_v7, %v9871_v63  ;;  %7446 = vrcp.f32 %v9891_v54  ;;  %v2785_v12 = vsel %vm2782_vm8, %v2784_v45, %v2780_v16  ;;  %vm2794_vm13 = vmor %vm2792_vm12, %vm2793_vm10 }
 0x9bc   : > { %v2789_v10 = vsub.f32 1.0, %v2788_v21  ;;  %v2786_v53 = vmul.f32 %v2785_v12, %v2632_v60  ;;  %v2813_v43 = vand.u32 2147483648, %v9891_v54  ;;  %v2811_v62 = vand.u32 2147483647, %v9891_v54 }
 0x9bd   : > { %v2704_v49 = vmul.f32 %v2703_v50, %v9841_v38  ;;  %v2712_v59 = vmul.f32 %v7445_v7, %v2711_v14  ;;  %vm2807_vm3 = vweird.f32 %v9891_v54 }
 0x9be   : > { %v2790_v3 = vmul.f32 %v7443_v61, %v2789_v10  ;;  %v9908_v41 = vadd.f32 %v9853_v23, %v2786_v53  ;;  %vm2812_vm5 = vcmp.eq.f32.partialorder %v2811_v62, 8.507059e+37  ;;  %v2916_v62 = vld [vmem:[%s12773_s6 + $0x158] sm:$0xff] }
 0x9bf   : > { %v2706_v36 = vsel %vm2705_vm9, %v9841_v38, %v2704_v49  ;;  %v2713_v6 = vmul.f32 0.5, %v2712_v59  ;;  %v2635_v49 = vmul.f32 %v9837_v28, %v9685_v25 }
 0x9c0   : > { %v2791_v52 = vadd.f32 %v7443_v61, %v2790_v3  ;;  %v2709_v15 = vsel %vm2707_vm11, %v2708_v18, %v2706_v36  ;;  %2969 = vmatmul.f32.gmra.mxu2 %v9908_v41  ;;  %3010 = vmatmul.f32.gmra.mxu1 %v9908_v41 }
 0x9c1   : > { %v7447_v35 = vpop.eup %7446  ;;  %v2714_v40 = vsub.f32 1.5, %v2713_v6  ;;  %v2739_v11 = vadd.f32 1e-06, %v2709_v15 }
 0x9c2   : > { %v2795_v38 = vsel %vm2794_vm13, %v7443_v61, %v2791_v52  ;;  %v2803_v46 = vmul.f32 %v7447_v35, %v9891_v54  ;;  %vm2808_vm0 = vweird.f32 %v7447_v35  ;;  %v2814_v61 = vor.u32 1.1754944e-38, %v2813_v43  ;;  %v2920_v43 = vld [vmem:[%s12773_s6 + $0x178] sm:$0xff] }
 0x9c3   : > { %v2715_v57 = vmul.f32 %v7445_v7, %v2714_v40  ;;  %v2800_v4 = vsel %vm2797_vm14, %v2799_v5, %v2795_v38  ;;  %7448 = vrcp.f32 %v2739_v11  ;;  %vm2809_vm4 = vmor %vm2807_vm3, %vm2808_vm0  ;;  %v2828_v54 = vand.u32 2147483648, %v2739_v11  ;;  %v2935_v38 = vld [vmem:[%s12773_s6 + $0x1f0] sm:$0xff] }
 0x9c4   : > { %v2801_v39 = vmul.f32 %v2800_v4, %v2633_v29  ;;  %v2804_v32 = vsub.f32 1.0, %v2803_v46  ;;  %v2826_v16 = vand.u32 2147483647, %v2739_v11  ;;  %vm2822_vm7 = vweird.f32 %v2739_v11  ;;  %v2931_v46 = vld [vmem:[%s12773_s6 + $0x1d0] sm:$0xff]  ;;  %3029 = vmatpush.msra.mxu2 %v2935_v38 }
 0x9c5   : > { %v2716_v1 = vmul.f32 %v2715_v57, %v9871_v63  ;;  %v2829_v10 = vor.u32 1.1754944e-38, %v2828_v54  ;;  %v2932_v57 = vld [vmem:[%s12773_s6 + $0x1d8] sm:$0xff]  ;;  %v2927_v4 = vld [vmem:[%s12773_s6 + $0x1b0] sm:$0xff] }
 0x9c6   : > { %v9921_v20 = vadd.f32 %v9853_v23, %v2801_v39  ;;  %v2805_v0 = vmul.f32 %v7447_v35, %v2804_v32  ;;  %vm2827_vm9 = vcmp.eq.f32.partialorder %v2826_v16, 8.507059e+37  ;;  %v2928_v39 = vld [vmem:[%s12773_s6 + $0x1b8] sm:$0xff]  ;;  %3030 = vmatpush.msra.mxu2 %v2931_v46  ;;  %v2923_v32 = vld [vmem:[%s12773_s6 + $0x190] sm:$0xff] }
 0x9c7   : > { %v2718_v42 = vsel %vm2717_vm15, %v9871_v63, %v2716_v1  ;;  %v2924_v1 = vld [vmem:[%s12773_s6 + $0x198] sm:$0xff]  ;;  %v2899_v54 = vld [vmem:[%s12773_s6 + $0xd0] sm:$0xff] }
 0x9c8   : > { %v2806_v55 = vadd.f32 %v7447_v35, %v2805_v0  ;;  %v2721_v51 = vsel %vm2719_vm2, %v2720_v30, %v2718_v42  ;;  %2972 = vmatmul.f32.gmra.mxu2 %v9921_v20  ;;  %3013 = vmatmul.f32.gmra.mxu1 %v9921_v20  ;;  %v2919_v30 = vld [vmem:[%s12773_s6 + $0x170] sm:$0xff] }
 0x9c9   : > { %v7449_v26 = vpop.eup %7448  ;;  %v2740_v22 = vadd.f32 1e-06, %v2721_v51  ;;  %3031 = vmatpush.msra.mxu2 %v2927_v4  ;;  %v2915_v0 = vld [vmem:[%s12773_s6 + $0x150] sm:$0xff]  ;;  %v2912_v51 = vld [vmem:[%s12773_s6 + $0x138] sm:$0xff] }
 0x9ca   : > { %v2810_v7 = vsel %vm2809_vm4, %v7447_v35, %v2806_v55  ;;  %v2818_v60 = vmul.f32 %v7449_v26, %v2739_v11  ;;  %vm2823_vm6 = vweird.f32 %v7449_v26  ;;  %v2636_v35 = vmul.f32 %v9837_v28, %v9691_v9  ;;  %v2936_v9 = vld [vmem:[%s12773_s6 + $0x1f8] sm:$0xff]  ;;  %v2911_v55 = vld [vmem:[%s12773_s6 + $0x130] sm:$0xff] }
 0x9cb   : > { %v2815_v45 = vsel %vm2812_vm5, %v2814_v61, %v2810_v7  ;;  %7450 = vrcp.f32 %v2740_v22  ;;  %vm2824_vm8 = vmor %vm2822_vm7, %vm2823_vm6  ;;  %v2843_v13 = vand.u32 2147483648, %v2740_v22  ;;  %v2841_v52 = vand.u32 2147483647, %v2740_v22  ;;  %3070 = vmatpush.msra.mxu1 %v2936_v9  ;;  %3032 = vmatpush.msra.mxu2 %v2923_v32  ;;  %v2907_v61 = vld [vmem:[%s12773_s6 + $0x110] sm:$0xff]  ;;  %v2904_v7 = vld [vmem:[%s12773_s6 + $0xf8] sm:$0xff] }
 0x9cc   : > { %v2816_v63 = vmul.f32 %v2815_v45, %v2634_v34  ;;  %v2819_v21 = vsub.f32 1.0, %v2818_v60  ;;  %vm2837_vm11 = vweird.f32 %v2740_v22  ;;  %v2903_v34 = vld [vmem:[%s12773_s6 + $0xf0] sm:$0xff] }
 0x9cd   : > { %v2844_v25 = vor.u32 1.1754944e-38, %v2843_v13  ;;  %vm2842_vm13 = vcmp.eq.f32.partialorder %v2841_v52, 8.507059e+37  ;;  %3071 = vmatpush.msra.mxu1 %v2932_v57  ;;  %3033 = vmatpush.msra.mxu2 %v2919_v30  ;;  %v2895_v16 = vld [vmem:[%s12773_s6 + $0xb0] sm:$0xff]  ;;  %v2637_v30 = vmul.f32 %v9837_v28, %v9751_v24  ;;  %v3174_v24 = vld [vmem:[%s12775_s8 + $0xf8] sm:$0xff] }
 0x9ce   : > { %v9932_v50 = vadd.f32 %v9853_v23, %v2816_v63  ;;  %v2820_v14 = vmul.f32 %v7449_v26, %v2819_v21  ;;  %v2883_v52 = vld [vmem:[%s12773_s6 + $0x50] sm:$0xff] }
 0x9cf   : > { %3072 = vmatpush.msra.mxu1 %v2928_v39  ;;  %3034 = vmatpush.msra.mxu2 %v2915_v0  ;;  %v3157_v28 = vld [vmem:[%s12775_s8 + $0x70] sm:$0xff] }
 0x9d0   : > { %v2821_v12 = vadd.f32 %v7449_v26, %v2820_v14  ;;  %2975 = vmatmul.f32.gmra.mxu2 %v9932_v50  ;;  %3016 = vmatmul.f32.gmra.mxu1 %v9932_v50  ;;  %v2900_v14 = vld [vmem:[%s12773_s6 + $0xd8] sm:$0xff] }
 0x9d1   : > { %v7451_v27 = vpop.eup %7450  ;;  %3073 = vmatpush.msra.mxu1 %v2924_v1  ;;  %3035 = vmatpush.msra.mxu2 %v2911_v55  ;;  %v3158_v55 = vld [vmem:[%s12775_s8 + $0x78] sm:$0xff] }
 0x9d2   : > { %v2825_v59 = vsel %vm2824_vm8, %v7449_v26, %v2821_v12  ;;  %v2833_v53 = vmul.f32 %v7451_v27, %v2740_v22  ;;  %vm2838_vm10 = vweird.f32 %v7451_v27  ;;  %v2908_v22 = vld [vmem:[%s12773_s6 + $0x118] sm:$0xff] }
 0x9d3   : > { %v2830_v47 = vsel %vm2827_vm9, %v2829_v10, %v2825_v59  ;;  %vm2839_vm12 = vmor %vm2837_vm11, %vm2838_vm10  ;;  %3074 = vmatpush.msra.mxu1 %v2920_v43  ;;  %3036 = vmatpush.msra.mxu2 %v2907_v61  ;;  %v2891_v10 = vld [vmem:[%s12773_s6 + $0x90] sm:$0xff]  ;;  %v3154_v61 = vld [vmem:[%s12775_s8 + $0x58] sm:$0xff] }
 0x9d4   : > { %v2831_v18 = vmul.f32 %v2830_v47, %v2635_v49  ;;  %v2834_v3 = vsub.f32 1.0, %v2833_v53  ;;  %v2892_v49 = vld [vmem:[%s12773_s6 + $0x98] sm:$0xff] }
 0x9d5   : > { %3075 = vmatpush.msra.mxu1 %v2916_v62  ;;  %3037 = vmatpush.msra.mxu2 %v2903_v34  ;;  %v3153_v34 = vld [vmem:[%s12775_s8 + $0x50] sm:$0xff] }
 0x9d6   : > { %v9939_v36 = vadd.f32 %v9853_v23, %v2831_v18  ;;  %v2835_v6 = vmul.f32 %v7451_v27, %v2834_v3  ;;  %v2887_v18 = vld [vmem:[%s12773_s6 + $0x70] sm:$0xff]  ;;  %v2888_v3 = vld [vmem:[%s12773_s6 + $0x78] sm:$0xff] }
 0x9d7   : > { %3076 = vmatpush.msra.mxu1 %v2912_v51  ;;  %3038 = vmatpush.msra.mxu2 %v2899_v54  ;;  %v3172_v51 = vld [vmem:[%s12775_s8 + $0xe8] sm:$0xff]  ;;  %v3166_v54 = vld [vmem:[%s12775_s8 + $0xb8] sm:$0xff] }
 0x9d8   : > { %v2836_v15 = vadd.f32 %v7451_v27, %v2835_v6  ;;  %2978 = vmatmul.f32.gmra.mxu2 %v9939_v36  ;;  %3019 = vmatmul.f32.gmra.mxu1 %v9939_v36 }
 0x9d9   : > { %3077 = vmatpush.msra.mxu1 %v2908_v22  ;;  %3039 = vmatpush.msra.mxu2 %v2895_v16  ;;  %v3170_v22 = vld [vmem:[%s12775_s8 + $0xd8] sm:$0xff]  ;;  %v3165_v16 = vld [vmem:[%s12775_s8 + $0xb0] sm:$0xff] }
 0x9da   : > { %v2840_v40 = vsel %vm2839_vm12, %v7451_v27, %v2836_v15  ;;  %v2896_v27 = vld [vmem:[%s12773_s6 + $0xb8] sm:$0xff] }
 0x9db   : > { %v2845_v5 = vsel %vm2842_vm13, %v2844_v25, %v2840_v40  ;;  %3078 = vmatpush.msra.mxu1 %v2904_v7  ;;  %3040 = vmatpush.msra.mxu2 %v2891_v10  ;;  %v2884_v15 = vld [vmem:[%s12773_s6 + $0x58] sm:$0xff]  ;;  %v2879_v25 = vld [vmem:[%s12773_s6 + $0x30] sm:$0xff]  ;;  %v3147_v10 = vld [vmem:[%s12775_s8 + $0x20] sm:$0xff] }
 0x9dc   : > { %v2846_v11 = vmul.f32 %v2845_v5, %v2636_v35  ;;  %v2880_v40 = vld [vmem:[%s12773_s6 + $0x38] sm:$0xff]  ;;  %v2875_v5 = vld [vmem:[%s12773_s6 + $0x10] sm:$0xff] }
 0x9dd   : > { %3079 = vmatpush.msra.mxu1 %v2900_v14  ;;  %3041 = vmatpush.msra.mxu2 %v2887_v18  ;;  %v3169_v7 = vld [vmem:[%s12775_s8 + $0xd0] sm:$0xff]  ;;  %v3144_v18 = vld [vmem:[%s12775_s8 + $0x8] sm:$0xff] }
 0x9de   : > { %v9946_v29 = vadd.f32 %v9853_v23, %v2846_v11  ;;  %v2876_v11 = vld [vmem:[%s12773_s6 + $0x18] sm:$0xff]  ;;  %v3149_v14 = vld [vmem:[%s12775_s8 + $0x30] sm:$0xff] }
 0x9df   : > { %3080 = vmatpush.msra.mxu1 %v2896_v27  ;;  %3042 = vmatpush.msra.mxu2 %v2883_v52  ;;  %v3164_v27 = vld [vmem:[%s12775_s8 + $0xa8] sm:$0xff] }
 0x9e0   : > { %2981 = vmatmul.f32.gmra.mxu2 %v9946_v29  ;;  %3022 = vmatmul.f32.gmra.mxu1 %v9946_v29 }
 0x9e1   : > { %3081 = vmatpush.msra.mxu1 %v2892_v49  ;;  %3043 = vmatpush.msra.mxu2 %v2879_v25  ;;  %v3163_v49 = vld [vmem:[%s12775_s8 + $0xa0] sm:$0xff] }
 0x9e3   : > { %3082 = vmatpush.msra.mxu1 %v2888_v3  ;;  %3044 = vmatpush.msra.mxu2 %v2875_v5  ;;  %v3160_v3 = vld [vmem:[%s12775_s8 + $0x88] sm:$0xff] }
 0x9e5   : > { %3083 = vmatpush.msra.mxu1 %v2884_v15  ;;  %3207 = vmatpush.msrb.mxu2 %v3158_v55  ;;  %v10166_v15 = vld [vmem:[%s12774_s7] sm:$0xf] }
 0x9e6   : > { %v10172_v5 = vperm.slane %v10166_v15, 0 }
 0x9e7   : > { %3084 = vmatpush.msra.mxu1 %v2880_v40  ;;  %3208 = vmatpush.msrb.mxu2 %v3157_v28  ;;  %v10169_v40 = vperm.slane %v10166_v15, 1  ;;  %v3202_v28 = vld [vmem:[%s12775_s8 + $0x1d8] sm:$0xff] }
 0x9e9   : > { %3085 = vmatpush.msra.mxu1 %v2876_v11 }
 0x9eb   : > { %3248 = vmatpush.msrb.mxu1 %v3174_v24 }
 0xa03   : > { %v2618_v42 = vpop.xlane.xlu0 %2617 }
 0xa04   : > { %v2626_v26 = vmul.f32 0.007874016, %v2618_v42 }
 0xa06   : > { %7452 = vrsqrt.f32 %v2626_v26  ;;  %vm2729_vm14 = vcmp.eq.f32.partialorder %v2626_v26, inf  ;;  %v2732_v47 = vand.u32 2147483648, %v2626_v26  ;;  %vm2731_vm15 = vcmp.eq.f32.partialorder %v2626_v26, 0.0 }
 0xa0c   : > { %v7453_v60 = vpop.eup %7452 }
 0xa0d   : > { %v2723_v45 = vmul.f32 %v7453_v60, %v2626_v26 }
 0xa0f   : > { %v2724_v63 = vmul.f32 %v7453_v60, %v2723_v45  ;;  %v3168_v45 = vld [vmem:[%s12775_s8 + $0xc8] sm:$0xff] }
 0xa11   : > { %v2725_v21 = vmul.f32 0.5, %v2724_v63  ;;  %v3151_v63 = vld [vmem:[%s12775_s8 + $0x40] sm:$0xff] }
 0xa13   : > { %v2726_v12 = vsub.f32 1.5, %v2725_v21  ;;  %v3167_v21 = vld [vmem:[%s12775_s8 + $0xc0] sm:$0xff] }
 0xa15   : > { %v2727_v59 = vmul.f32 %v7453_v60, %v2726_v12  ;;  %v3152_v60 = vld [vmem:[%s12775_s8 + $0x48] sm:$0xff] }
 0xa16   : > { %v3148_v12 = vld [vmem:[%s12775_s8 + $0x28] sm:$0xff] }
 0xa17   : > { %v2728_v53 = vmul.f32 %v2727_v59, %v2626_v26  ;;  %v3162_v59 = vld [vmem:[%s12775_s8 + $0x98] sm:$0xff] }
 0xa19   : > { %v2730_v13 = vsel %vm2729_vm14, %v2626_v26, %v2728_v53  ;;  %v3171_v26 = vld [vmem:[%s12775_s8 + $0xe0] sm:$0xff]  ;;  %v3145_v53 = vld [vmem:[%s12775_s8 + $0x10] sm:$0xff] }
 0xa1a   : > { %v2733_v6 = vsel %vm2731_vm15, %v2732_v47, %v2730_v13  ;;  %v3161_v47 = vld [vmem:[%s12775_s8 + $0x90] sm:$0xff]  ;;  %v3143_v13 = vld [vmem:[%s12775_s8] sm:$0xff] }
 0xa1b   : > { %v2741_v35 = vadd.f32 1e-06, %v2733_v6  ;;  %v3159_v6 = vld [vmem:[%s12775_s8 + $0x80] sm:$0xff] }
 0xa1d   : > { %7454 = vrcp.f32 %v2741_v35  ;;  %v2858_v57 = vand.u32 2147483648, %v2741_v35  ;;  %v2856_v39 = vand.u32 2147483647, %v2741_v35  ;;  %vm2852_vm2 = vweird.f32 %v2741_v35 }
 0xa1f   : > { %v2859_v1 = vor.u32 1.1754944e-38, %v2858_v57  ;;  %vm2857_vm4 = vcmp.eq.f32.partialorder %v2856_v39, 8.507059e+37  ;;  %v3206_v57 = vld [vmem:[%s12775_s8 + $0x1f8] sm:$0xff] }
 0xa23   : > { %v7455_v38 = vpop.eup %7454 }
 0xa24   : > { %v2848_v9 = vmul.f32 %v7455_v38, %v2741_v35  ;;  %vm2853_vm0 = vweird.f32 %v7455_v38 }
 0xa25   : > { %vm2854_vm3 = vmor %vm2852_vm2, %vm2853_vm0 }
 0xa26   : > { %v2849_v46 = vsub.f32 1.0, %v2848_v9 }
 0xa28   : > { %v2850_v4 = vmul.f32 %v7455_v38, %v2849_v46 }
 0xa2a   : > { %v2851_v32 = vadd.f32 %v7455_v38, %v2850_v4  ;;  %v3205_v4 = vld [vmem:[%s12775_s8 + $0x1f0] sm:$0xff] }
 0xa2c   : > { %v2855_v43 = vsel %vm2854_vm3, %v7455_v38, %v2851_v32 }
 0xa2d   : > { %v2860_v0 = vsel %vm2857_vm4, %v2859_v1, %v2855_v43  ;;  %v3204_v1 = vld [vmem:[%s12775_s8 + $0x1e8] sm:$0xff] }
 0xa2e   : > { %v2861_v62 = vmul.f32 %v2860_v0, %v2637_v30  ;;  %v3190_v0 = vld [vmem:[%s12775_s8 + $0x178] sm:$0xff] }
 0xa30   : > { %v10049_v42 = vadd.f32 %v9853_v23, %v2861_v62  ;;  %v3173_v23 = vld [vmem:[%s12775_s8 + $0xf0] sm:$0xff]  ;;  %v3203_v62 = vld [vmem:[%s12775_s8 + $0x1e0] sm:$0xff] }
 0xa31   : > { %3249 = vmatpush.msrb.mxu1 %v3173_v23 }
 0xa32   : > { %2984 = vmatmul.f32.gmra.mxu2 %v10049_v42  ;;  %3025 = vmatmul.f32.gmra.mxu1 %v10049_v42 }
 0xa33   : > { %3250 = vmatpush.msrb.mxu1 %v3172_v51  ;;  %v2964_v52 = vpop.f32.mrf.mxu2  ;;  %v3188_v51 = vld [vmem:[%s12775_s8 + $0x168] sm:$0xff] }
 0xa35   : > { %3251 = vmatpush.msrb.mxu1 %v3171_v26  ;;  %v3187_v26 = vld [vmem:[%s12775_s8 + $0x160] sm:$0xff] }
 0xa37   : > { %3252 = vmatpush.msrb.mxu1 %v3170_v22 }
 0xa39   : > { %3253 = vmatpush.msrb.mxu1 %v3169_v7  ;;  %v3186_v7 = vld [vmem:[%s12775_s8 + $0x158] sm:$0xff] }
 0xa3a   : > { %3045 = vmatmul.f32.vlgmr.msra.gmra.mxu2 %v9861_v37  ;;  %3086 = vmatmul.f32.vlgmr.msra.gmra.mxu1 %v9861_v37  ;;  %v3156_v37 = vld [vmem:[%s12775_s8 + $0x68] sm:$0xff] }
 0xa3b   : > { %3209 = vmatpush.msrb.mxu2 %v3156_v37  ;;  %3254 = vmatpush.msrb.mxu1 %v3168_v45  ;;  %v2967_v35 = vpop.f32.mrf.mxu2  ;;  %v3185_v45 = vld [vmem:[%s12775_s8 + $0x150] sm:$0xff] }
 0xa3c   : > { %v2968_v32 = vadd.f32 %v2967_v35, %v10172_v5  ;;  %v3180_v35 = vld [vmem:[%s12775_s8 + $0x128] sm:$0xff] }
 0xa3d   : > { %3255 = vmatpush.msrb.mxu1 %v3167_v21 }
 0xa3e   : > { %v3115_v43 = vmax.f32 %v2968_v32, 0.0  ;;  %v3177_v32 = vld [vmem:[%s12775_s8 + $0x110] sm:$0xff] }
 0xa3f   : > { %3256 = vmatpush.msrb.mxu1 %v3166_v54 }
 0xa41   : > { %3257 = vmatpush.msrb.mxu1 %v3165_v16 }
 0xa42   : > { %3048 = vmatmul.f32.gmra.mxu2 %v9886_v2  ;;  %3089 = vmatmul.f32.gmra.mxu1 %v9886_v2  ;;  %v3155_v2 = vld [vmem:[%s12775_s8 + $0x60] sm:$0xff] }
 0xa43   : > { %3210 = vmatpush.msrb.mxu2 %v3155_v2  ;;  %3258 = vmatpush.msrb.mxu1 %v3164_v27  ;;  %v2970_v46 = vpop.f32.mrf.mxu2  ;;  %v3201_v2 = vld [vmem:[%s12775_s8 + $0x1d0] sm:$0xff]  ;;  %v3184_v27 = vld [vmem:[%s12775_s8 + $0x148] sm:$0xff] }
 0xa44   : > { %v2971_v37 = vadd.f32 %v2970_v46, %v10172_v5  ;;  %v3178_v46 = vld [vmem:[%s12775_s8 + $0x118] sm:$0xff] }
 0xa45   : > { %3211 = vmatpush.msrb.mxu2 %v3154_v61  ;;  %3259 = vmatpush.msrb.mxu1 %v3163_v49  ;;  %v3200_v61 = vld [vmem:[%s12775_s8 + $0x1c8] sm:$0xff]  ;;  %v3183_v49 = vld [vmem:[%s12775_s8 + $0x140] sm:$0xff] }
 0xa47   : > { %3212 = vmatpush.msrb.mxu2 %v3153_v34  ;;  %3260 = vmatpush.msrb.mxu1 %v3162_v59  ;;  %v3119_v34 = vmax.f32 %v2971_v37, 0.0 }
 0xa49   : > { %3213 = vmatpush.msrb.mxu2 %v3152_v60  ;;  %3261 = vmatpush.msrb.mxu1 %v3161_v47  ;;  %v3199_v60 = vld [vmem:[%s12775_s8 + $0x1c0] sm:$0xff]  ;;  %v3182_v47 = vld [vmem:[%s12775_s8 + $0x138] sm:$0xff] }
 0xa4a   : > { %3051 = vmatmul.f32.gmra.mxu2 %v9908_v41  ;;  %3092 = vmatmul.f32.gmra.mxu1 %v9908_v41  ;;  %v3150_v41 = vld [vmem:[%s12775_s8 + $0x38] sm:$0xff] }
 0xa4b   : > { %3214 = vmatpush.msrb.mxu2 %v3151_v63  ;;  %3262 = vmatpush.msrb.mxu1 %v3160_v3  ;;  %v2973_v24 = vpop.f32.mrf.mxu2  ;;  %v3198_v63 = vld [vmem:[%s12775_s8 + $0x1b8] sm:$0xff] }
 0xa4d   : > { %3215 = vmatpush.msrb.mxu2 %v3150_v41  ;;  %3263 = vmatpush.msrb.mxu1 %v3159_v6  ;;  %v2974_v41 = vadd.f32 %v2973_v24, %v10172_v5 }
 0xa4f   : > { %3216 = vmatpush.msrb.mxu2 %v3149_v14  ;;  %3330 = vmatpush.msra.mxu1 %v3206_v57  ;;  %v3191_v57 = vld [vmem:[%s12775_s8 + $0x180] sm:$0xff] }
 0xa51   : > { %3217 = vmatpush.msrb.mxu2 %v3148_v12  ;;  %3331 = vmatpush.msra.mxu1 %v3205_v4  ;;  %v3123_v12 = vmax.f32 %v2974_v41, 0.0 }
 0xa52   : > { %3054 = vmatmul.f32.gmra.mxu2 %v9921_v20  ;;  %3095 = vmatmul.f32.gmra.mxu1 %v9921_v20  ;;  %v3146_v20 = vld [vmem:[%s12775_s8 + $0x18] sm:$0xff] }
 0xa53   : > { %3218 = vmatpush.msrb.mxu2 %v3147_v10  ;;  %3332 = vmatpush.msra.mxu1 %v3204_v1  ;;  %v2976_v14 = vpop.f32.mrf.mxu2  ;;  %v3197_v10 = vld [vmem:[%s12775_s8 + $0x1b0] sm:$0xff] }
 0xa55   : > { %3219 = vmatpush.msrb.mxu2 %v3146_v20  ;;  %3333 = vmatpush.msra.mxu1 %v3203_v62  ;;  %v3196_v20 = vld [vmem:[%s12775_s8 + $0x1a8] sm:$0xff] }
 0xa57   : > { %3220 = vmatpush.msrb.mxu2 %v3145_v53  ;;  %3334 = vmatpush.msra.mxu1 %v3202_v28  ;;  %v2977_v53 = vadd.f32 %v2976_v14, %v10172_v5 }
 0xa59   : > { %3221 = vmatpush.msrb.mxu2 %v3144_v18  ;;  %3335 = vmatpush.msra.mxu1 %v3201_v2  ;;  %v3195_v18 = vld [vmem:[%s12775_s8 + $0x1a0] sm:$0xff] }
 0xa5a   : > { %3057 = vmatmul.f32.gmra.mxu2 %v9932_v50  ;;  %3098 = vmatmul.f32.gmra.mxu1 %v9932_v50  ;;  %v3005_v50 = vpop.f32.mrf.mxu1 }
 0xa5b   : > { %3222 = vmatpush.msrb.mxu2 %v3143_v13  ;;  %3336 = vmatpush.msra.mxu1 %v3200_v61  ;;  %v2979_v13 = vpop.f32.mrf.mxu2 }
 0xa5d   : > { %3289 = vmatpush.msra.mxu2 %v3190_v0  ;;  %3337 = vmatpush.msra.mxu1 %v3199_v60  ;;  %v3175_v0 = vld [vmem:[%s12775_s8 + $0x100] sm:$0xff]  ;;  %v2941_v60 = vperm.slane %v10166_v15, 2 }
 0xa5f   : > { %3338 = vmatpush.msra.mxu1 %v3198_v63 }
 0xa61   : > { %3339 = vmatpush.msra.mxu1 %v3197_v10 }
 0xa62   : > { %3060 = vmatmul.f32.gmra.mxu2 %v9939_v36  ;;  %3101 = vmatmul.f32.gmra.mxu1 %v9939_v36  ;;  %v3008_v25 = vpop.f32.mrf.mxu1  ;;  %v3006_v36 = vadd.f32 %v3005_v50, %v10169_v40  ;;  %v3127_v50 = vmax.f32 %v2977_v53, 0.0 }
 0xa63   : > { %v3009_v39 = vadd.f32 %v3008_v25, %v10169_v40  ;;  %3340 = vmatpush.msra.mxu1 %v3196_v20  ;;  %v3194_v25 = vld [vmem:[%s12775_s8 + $0x198] sm:$0xff] }
 0xa64   : > { %v3112_v11 = vmax.f32 %v3006_v36, 0.0  ;;  %v3193_v36 = vld [vmem:[%s12775_s8 + $0x190] sm:$0xff] }
 0xa65   : > { %v3116_v30 = vmax.f32 %v3009_v39, 0.0  ;;  %3341 = vmatpush.msra.mxu1 %v3195_v18 }
 0xa67   : > { %3342 = vmatpush.msra.mxu1 %v3194_v25 }
 0xa69   : > { %3343 = vmatpush.msra.mxu1 %v3193_v36 }
 0xa6a   : > { %3063 = vmatmul.f32.gmra.mxu2 %v9946_v29  ;;  %3104 = vmatmul.f32.gmra.mxu1 %v9946_v29  ;;  %v2965_v29 = vadd.f32 %v2964_v52, %v10172_v5  ;;  %v3011_v9 = vpop.f32.mrf.mxu1  ;;  %v3181_v52 = vld [vmem:[%s12775_s8 + $0x130] sm:$0xff] }
 0xa6b   : > { %v3012_v23 = vadd.f32 %v3011_v9, %v10169_v40  ;;  %v2980_v9 = vadd.f32 %v2979_v13, %v10172_v5 }
 0xa6c   : > { %v3111_v38 = vmax.f32 %v2965_v29, 0.0  ;;  %v3179_v29 = vld [vmem:[%s12775_s8 + $0x120] sm:$0xff] }
 0xa6d   : > { %v3120_v22 = vmax.f32 %v3012_v23, 0.0  ;;  %v3131_v39 = vmax.f32 %v2980_v9, 0.0 }
 0xa72   : > { %3066 = vmatmul.f32.gmra.mxu2 %v10049_v42  ;;  %3107 = vmatmul.f32.gmra.mxu1 %v10049_v42  ;;  %v3189_v42 = vld [vmem:[%s12775_s8 + $0x170] sm:$0xff]  ;;  %v3014_v55 = vpop.f32.mrf.mxu1 }
 0xa73   : > { %3290 = vmatpush.msra.mxu2 %v3189_v42  ;;  %v3015_v21 = vadd.f32 %v3014_v55, %v10169_v40 }
 0xa75   : > { %3291 = vmatpush.msra.mxu2 %v3188_v51  ;;  %v3124_v16 = vmax.f32 %v3015_v21, 0.0  ;;  %v2942_v51 = vperm.slane %v10166_v15, 3 }
 0xa77   : > { %3292 = vmatpush.msra.mxu2 %v3187_v26 }
 0xa79   : > { %3293 = vmatpush.msra.mxu2 %v3186_v7 }
 0xa7a   : > { %3223 = vmatmul.f32.vlgmr.msrb.gmra.mxu2 %v3111_v38  ;;  %3264 = vmatmul.f32.vlgmr.msrb.gmra.mxu1 %v3112_v11  ;;  %v3017_v54 = vpop.f32.mrf.mxu1  ;;  %v3192_v11 = vld [vmem:[%s12775_s8 + $0x188] sm:$0xff] }
 0xa7b   : > { %3294 = vmatpush.msra.mxu2 %v3185_v45  ;;  %v3018_v59 = vadd.f32 %v3017_v54, %v10169_v40  ;;  %3344 = vmatpush.msra.mxu1 %v3192_v11 }
 0xa7d   : > { %3295 = vmatpush.msra.mxu2 %v3184_v27  ;;  %v3128_v6 = vmax.f32 %v3018_v59, 0.0  ;;  %3345 = vmatpush.msra.mxu1 %v3191_v57 }
 0xa7f   : > { %3296 = vmatpush.msra.mxu2 %v3183_v49 }
 0xa81   : > { %3297 = vmatpush.msra.mxu2 %v3182_v47 }
 0xa82   : > { %3226 = vmatmul.f32.gmra.mxu2 %v3115_v43  ;;  %3267 = vmatmul.f32.gmra.mxu1 %v3116_v30  ;;  %v3020_v3 = vpop.f32.mrf.mxu1  ;;  %v2982_v30 = vpop.f32.mrf.mxu2  ;;  %v3176_v43 = vld [vmem:[%s12775_s8 + $0x108] sm:$0xff] }
 0xa83   : > { %3298 = vmatpush.msra.mxu2 %v3181_v52  ;;  %v3021_v38 = vadd.f32 %v3020_v3, %v10169_v40  ;;  %v2983_v42 = vadd.f32 %v2982_v30, %v10172_v5 }
 0xa85   : > { %3299 = vmatpush.msra.mxu2 %v3180_v35  ;;  %v3132_v4 = vmax.f32 %v3021_v38, 0.0  ;;  %v3135_v24 = vmax.f32 %v2983_v42, 0.0 }
 0xa87   : > { %3300 = vmatpush.msra.mxu2 %v3179_v29 }
 0xa89   : > { %3301 = vmatpush.msra.mxu2 %v3178_v46 }
 0xa8a   : > { %3229 = vmatmul.f32.gmra.mxu2 %v3119_v34  ;;  %3270 = vmatmul.f32.gmra.mxu1 %v3120_v22  ;;  %v3023_v1 = vpop.f32.mrf.mxu1 }
 0xa8b   : > { %3302 = vmatpush.msra.mxu2 %v3177_v32  ;;  %v3024_v62 = vadd.f32 %v3023_v1, %v10169_v40 }
 0xa8d   : > { %3303 = vmatpush.msra.mxu2 %v3176_v43  ;;  %v3136_v55 = vmax.f32 %v3024_v62, 0.0 }
 0xa8f   : > { %3304 = vmatpush.msra.mxu2 %v3175_v0 }
 0xa92   : > { %3232 = vmatmul.f32.gmra.mxu2 %v3123_v12  ;;  %3273 = vmatmul.f32.gmra.mxu1 %v3124_v16 }
 0xa9a   : > { %3235 = vmatmul.f32.gmra.mxu2 %v3127_v50  ;;  %3276 = vmatmul.f32.gmra.mxu1 %v3128_v6 }
 0xaa2   : > { %3238 = vmatmul.f32.gmra.mxu2 %v3131_v39  ;;  %3279 = vmatmul.f32.gmra.mxu1 %v3132_v4 }
 0xaaa   : > { %3241 = vmatmul.f32.gmra.mxu2 %v3135_v24  ;;  %3282 = vmatmul.f32.gmra.mxu1 %v3136_v55 }
 0xaaf   : > { %v3026_v28 = vpop.f32.mrf.mxu1 }
 0xab0   : > { %v3027_v23 = vadd.f32 %v3026_v28, %v10169_v40 }
 0xab2   : > { %v3140_v37 = vmax.f32 %v3027_v23, 0.0 }
 0xab4   : > { %3285 = vmatmul.f32.gmra.mxu1 %v3140_v37 }
 0xab5   : > { %v2985_v2 = vpop.f32.mrf.mxu2 }
 0xab6   : > { %v2986_v26 = vadd.f32 %v2985_v2, %v10172_v5 }
 0xab7   : > { %v3087_v61 = vpop.f32.mrf.mxu1 }
 0xab8   : > { %v3139_v22 = vmax.f32 %v2986_v26, 0.0  ;;  %v3088_v34 = vadd.f32 %v3087_v61, %v2942_v51 }
 0xaba   : > { %v3114_v7 = vmax.f32 %v3088_v34, 0.0  ;;  %3244 = vmatmul.f32.gmra.mxu2 %v3139_v22 }
 0xabc   : > { %3346 = vmatmul.f32.vlgmr.msra.gmra.mxu1 %v3114_v7 }
 0xabd   : > { %v3046_v45 = vpop.f32.mrf.mxu2 }
 0xabe   : > { %v3047_v63 = vadd.f32 %v3046_v45, %v2941_v60 }
 0xabf   : > { %v3090_v21 = vpop.f32.mrf.mxu1 }
 0xac0   : > { %v3113_v41 = vmax.f32 %v3047_v63, 0.0  ;;  %v3091_v40 = vadd.f32 %v3090_v21, %v2942_v51 }
 0xac2   : > { %v3118_v54 = vmax.f32 %v3091_v40, 0.0  ;;  %3305 = vmatmul.f32.vlgmr.msra.gmra.mxu2 %v3113_v41 }
 0xac4   : > { %3349 = vmatmul.f32.gmra.mxu1 %v3118_v54 }
 0xac5   : > { %v3049_v14 = vpop.f32.mrf.mxu2 }
 0xac6   : > { %v3050_v16 = vadd.f32 %v3049_v14, %v2941_v60 }
 0xac7   : > { %v3093_v12 = vpop.f32.mrf.mxu1 }
 0xac8   : > { %v3117_v5 = vmax.f32 %v3050_v16, 0.0  ;;  %v3094_v27 = vadd.f32 %v3093_v12, %v2942_v51 }
 0xaca   : > { %v3122_v10 = vmax.f32 %v3094_v27, 0.0  ;;  %3308 = vmatmul.f32.gmra.mxu2 %v3117_v5 }
 0xacc   : > { %3352 = vmatmul.f32.gmra.mxu1 %v3122_v10 }
 0xacd   : > { %v3052_v49 = vpop.f32.mrf.mxu2 }
 0xace   : > { %v3053_v20 = vadd.f32 %v3052_v49, %v2941_v60  ;;  %v10293_v49 = vld [vmem:[%s12776_s9] ss:$0 sm:$0xff] }
 0xacf   : > { %v3096_v15 = vpop.f32.mrf.mxu1 }
 0xad0   : > { %v3121_v59 = vmax.f32 %v3053_v20, 0.0  ;;  %v3097_v53 = vadd.f32 %v3096_v15, %v2942_v51 }
 0xad2   : > { %v3126_v47 = vmax.f32 %v3097_v53, 0.0  ;;  %3311 = vmatmul.f32.gmra.mxu2 %v3121_v59 }
 0xad4   : > { %3355 = vmatmul.f32.gmra.mxu1 %v3126_v47 }
 0xad5   : > { %v3055_v18 = vpop.f32.mrf.mxu2 }
 0xad6   : > { %v3056_v3 = vadd.f32 %v3055_v18, %v2941_v60 }
 0xad7   : > { %v3099_v13 = vpop.f32.mrf.mxu1 }
 0xad8   : > { %v3125_v6 = vmax.f32 %v3056_v3, 0.0  ;;  %v3100_v50 = vadd.f32 %v3099_v13, %v2942_v51 }
 0xada   : > { %v3130_v52 = vmax.f32 %v3100_v50, 0.0  ;;  %3314 = vmatmul.f32.gmra.mxu2 %v3125_v6 }
 0xadc   : > { %3358 = vmatmul.f32.gmra.mxu1 %v3130_v52 }
 0xadd   : > { %v3058_v25 = vpop.f32.mrf.mxu2 }
 0xade   : > { %v3059_v35 = vadd.f32 %v3058_v25, %v2941_v60 }
 0xadf   : > { %v3102_v36 = vpop.f32.mrf.mxu1 }
 0xae0   : > { %v3129_v29 = vmax.f32 %v3059_v35, 0.0  ;;  %v3103_v11 = vadd.f32 %v3102_v36, %v2942_v51 }
 0xae2   : > { %v3134_v38 = vmax.f32 %v3103_v11, 0.0  ;;  %3317 = vmatmul.f32.gmra.mxu2 %v3129_v29 }
 0xae4   : > { %3361 = vmatmul.f32.gmra.mxu1 %v3134_v38 }
 0xae5   : > { %v3061_v9 = vpop.f32.mrf.mxu2 }
 0xae6   : > { %v3062_v46 = vadd.f32 %v3061_v9, %v2941_v60 }
 0xae7   : > { %v3105_v57 = vpop.f32.mrf.mxu1 }
 0xae8   : > { %v3133_v4 = vmax.f32 %v3062_v46, 0.0  ;;  %v3106_v39 = vadd.f32 %v3105_v57, %v2942_v51 }
 0xaea   : > { %v3138_v32 = vmax.f32 %v3106_v39, 0.0  ;;  %3320 = vmatmul.f32.gmra.mxu2 %v3133_v4 }
 0xaec   : > { %3364 = vmatmul.f32.gmra.mxu1 %v3138_v32 }
 0xaed   : > { %v3064_v1 = vpop.f32.mrf.mxu2 }
 0xaee   : > { %v3065_v30 = vadd.f32 %v3064_v1, %v2941_v60 }
 0xaef   : > { %v3108_v43 = vpop.f32.mrf.mxu1 }
 0xaf0   : > { %v3137_v0 = vmax.f32 %v3065_v30, 0.0  ;;  %v3109_v62 = vadd.f32 %v3108_v43, %v2942_v51 }
 0xaf2   : > { %v3142_v42 = vmax.f32 %v3109_v62, 0.0  ;;  %3323 = vmatmul.f32.gmra.mxu2 %v3137_v0 }
 0xaf4   : > { %3367 = vmatmul.f32.gmra.mxu1 %v3142_v42 }
 0xaf5   : > { %v3067_v55 = vpop.f32.mrf.mxu2 }
 0xaf6   : > { %v3068_v24 = vadd.f32 %v3067_v55, %v2941_v60 }
 0xaf7   : > { %v3265_v28 = vpop.f32.mrf.mxu1 }
 0xaf8   : > { %v3141_v23 = vmax.f32 %v3068_v24, 0.0 }
 0xafa   : > { %3326 = vmatmul.f32.gmra.mxu2 %v3141_v23 }
 0xafd   : > { %v3224_v37 = vpop.f32.mrf.mxu2 }
 0xafe   : > { %v3266_v60 = vadd.f32 %v3265_v28, %v3224_v37 }
 0xaff   : > { %v3268_v2 = vpop.f32.mrf.mxu1 }
 0xb05   : > { %v3227_v26 = vpop.f32.mrf.mxu2 }
 0xb06   : > { %v3269_v15 = vadd.f32 %v3268_v2, %v3227_v26 }
 0xb07   : > { %v3271_v61 = vpop.f32.mrf.mxu1 }
 0xb0d   : > { %v3230_v22 = vpop.f32.mrf.mxu2 }
 0xb0e   : > { %v3272_v6 = vadd.f32 %v3271_v61, %v3230_v22 }
 0xb0f   : > { %v3274_v34 = vpop.f32.mrf.mxu1 }
 0xb15   : > { %v3233_v7 = vpop.f32.mrf.mxu2 }
 0xb16   : > { %v3275_v29 = vadd.f32 %v3274_v34, %v3233_v7 }
 0xb17   : > { %v3277_v45 = vpop.f32.mrf.mxu1 }
 0xb1d   : > { %v3236_v21 = vpop.f32.mrf.mxu2 }
 0xb1e   : > { %v3278_v4 = vadd.f32 %v3277_v45, %v3236_v21 }
 0xb1f   : > { %v3280_v63 = vpop.f32.mrf.mxu1 }
 0xb25   : > { %v3239_v51 = vpop.f32.mrf.mxu2 }
 0xb26   : > { %v3281_v43 = vadd.f32 %v3280_v63, %v3239_v51 }
 0xb27   : > { %v3283_v41 = vpop.f32.mrf.mxu1 }
 0xb2d   : > { %v3242_v54 = vpop.f32.mrf.mxu2 }
 0xb2e   : > { %v3284_v28 = vadd.f32 %v3283_v41, %v3242_v54 }
 0xb31   : > { %v3286_v40 = vpop.f32.mrf.mxu1 }
 0xb39   : > { %v3347_v14 = vpop.f32.mrf.mxu1 }
 0xb3d   : > { %v3245_v16 = vpop.f32.mrf.mxu2 }
 0xb3e   : > { %v3287_v7 = vadd.f32 %v3286_v40, %v3245_v16 }
 0xb41   : > { %v3350_v12 = vpop.f32.mrf.mxu1 }
 0xb45   : > { %v3306_v5 = vpop.f32.mrf.mxu2 }
 0xb46   : > { %v3307_v27 = vadd.f32 %v3306_v5, %v3266_v60 }
 0xb48   : > { %v3348_v10 = vadd.f32 %v3347_v14, %v3307_v27 }
 0xb49   : > { %v3353_v18 = vpop.f32.mrf.mxu1 }
 0xb4a   : > { %v3371_v20 = vadd.f32 %v3348_v10, %v9622_v48 }
 0xb4c   : > { %v10297_v59 = vadd.f32 %v10293_v49, %v3371_v20 }
 0xb4d   : > { %v3309_v53 = vpop.f32.mrf.mxu2 }
 0xb4e   : > { %12818 = vst [vmem:[#allocation6_spill] sm:$0xff] %v10297_v59  ;;  %v3310_v47 = vadd.f32 %v3309_v53, %v3269_v15  ;;  %3391 = vadd.xlane.f32.xlu1 %v10297_v59 }
 0xb50   : > { %v3351_v3 = vadd.f32 %v3350_v12, %v3310_v47 }
 0xb51   : > { %v3356_v35 = vpop.f32.mrf.mxu1 }
 0xb52   : > { %v3372_v13 = vadd.f32 %v3351_v3, %v9626_v19 }
 0xb54   : > { %v10302_v50 = vadd.f32 %v10293_v49, %v3372_v13 }
 0xb55   : > { %v3312_v52 = vpop.f32.mrf.mxu2 }
 0xb56   : > { %12819 = vst [vmem:[#allocation3_spill] sm:$0xff] %v10302_v50  ;;  %v3313_v25 = vadd.f32 %v3312_v52, %v3272_v6  ;;  %3393 = vadd.xlane.f32.xlu2 %v10302_v50 }
 0xb58   : > { %v3354_v48 = vadd.f32 %v3353_v18, %v3313_v25 }
 0xb59   : > { %v3359_v57 = vpop.f32.mrf.mxu1 }
 0xb5a   : > { %v3373_v36 = vadd.f32 %v3354_v48, %v9630_v8 }
 0xb5c   : > { %v10307_v11 = vadd.f32 %v10293_v49, %v3373_v36 }
 0xb5d   : > { %v3315_v38 = vpop.f32.mrf.mxu2 }
 0xb5e   : > { %12820 = vst [vmem:[#allocation4_spill] sm:$0xff] %v10307_v11  ;;  %v3316_v9 = vadd.f32 %v3315_v38, %v3275_v29  ;;  %3395 = vadd.xlane.f32.xlu0 %v10307_v11 }
 0xb60   : > { %v3357_v19 = vadd.f32 %v3356_v35, %v3316_v9  ;;  %v6851_v9 = vld [vmem:[%s12769_s2 + $0x2e8] sm:$0xff] }
 0xb61   : > { %v3362_v62 = vpop.f32.mrf.mxu1  ;;  %3759 = vmatpush.msrb.mxu2 %v6851_v9  ;;  %v6813_v9 = vld [vmem:[%s12769_s2 + $0x1b8] sm:$0xff] }
 0xb62   : > { %v3374_v46 = vadd.f32 %v3357_v19, %v9634_v44  ;;  %v6852_v19 = vld [vmem:[%s12769_s2 + $0x2f0] sm:$0xff] }
 0xb63   : > { %3800 = vmatpush.msrb.mxu1 %v6852_v19 }
 0xb64   : > { %v10312_v39 = vadd.f32 %v10293_v49, %v3374_v46  ;;  %v6848_v46 = vld [vmem:[%s12769_s2 + $0x2d0] sm:$0xff] }
 0xb65   : > { %v3318_v32 = vpop.f32.mrf.mxu2  ;;  %3760 = vmatpush.msrb.mxu2 %v6848_v46 }
 0xb66   : > { %12821 = vst [vmem:[#allocation5_spill] sm:$0xff] %v10312_v39  ;;  %v3319_v1 = vadd.f32 %v3318_v32, %v3278_v4  ;;  %3397 = vadd.xlane.f32.xlu1 %v10312_v39  ;;  %v6845_v4 = vld [vmem:[%s12769_s2 + $0x2b8] sm:$0xff]  ;;  %v6846_v32 = vld [vmem:[%s12769_s2 + $0x2c0] sm:$0xff] }
 0xb67   : > { %3761 = vmatpush.msrb.mxu2 %v6845_v4  ;;  %v6809_v4 = vld [vmem:[%s12769_s2 + $0x198] sm:$0xff] }
 0xb68   : > { %v3360_v8 = vadd.f32 %v3359_v57, %v3319_v1  ;;  %v6849_v57 = vld [vmem:[%s12769_s2 + $0x2d8] sm:$0xff] }
 0xb69   : > { %3801 = vmatpush.msrb.mxu1 %v6849_v57 }
 0xb6a   : > { %v3375_v30 = vadd.f32 %v3360_v8, %v9638_v56  ;;  %v3365_v56 = vpop.f32.mrf.mxu1 }
 0xb6b   : > { %3802 = vmatpush.msrb.mxu1 %v6846_v32  ;;  %v6810_v32 = vld [vmem:[%s12769_s2 + $0x1a0] sm:$0xff] }
 0xb6c   : > { %v10317_v0 = vadd.f32 %v10293_v49, %v3375_v30  ;;  %v6842_v30 = vld [vmem:[%s12769_s2 + $0x2a0] sm:$0xff] }
 0xb6d   : > { %v3321_v42 = vpop.f32.mrf.mxu2  ;;  %3762 = vmatpush.msrb.mxu2 %v6842_v30 }
 0xb6e   : > { %12822 = vst [vmem:[#allocation7_spill] sm:$0xff] %v10317_v0  ;;  %v3322_v55 = vadd.f32 %v3321_v42, %v3281_v43  ;;  %3399 = vadd.xlane.f32.xlu2 %v10317_v0  ;;  %v6843_v43 = vld [vmem:[%s12769_s2 + $0x2a8] sm:$0xff]  ;;  %v6840_v42 = vld [vmem:[%s12769_s2 + $0x290] sm:$0xff] }
 0xb6f   : > { %3803 = vmatpush.msrb.mxu1 %v6843_v43 }
 0xb70   : > { %v3363_v44 = vadd.f32 %v3362_v62, %v3322_v55  ;;  %v6839_v62 = vld [vmem:[%s12769_s2 + $0x288] sm:$0xff]  ;;  %v6836_v55 = vld [vmem:[%s12769_s2 + $0x270] sm:$0xff] }
 0xb71   : > { %3763 = vmatpush.msrb.mxu2 %v6839_v62  ;;  %3804 = vmatpush.msrb.mxu1 %v6840_v42 }
 0xb72   : > { %v3376_v24 = vadd.f32 %v3363_v44, %v9642_v33  ;;  %v3368_v41 = vpop.f32.mrf.mxu1  ;;  %v6837_v44 = vld [vmem:[%s12769_s2 + $0x278] sm:$0xff] }
 0xb73   : > { %3764 = vmatpush.msrb.mxu2 %v6836_v55  ;;  %3805 = vmatpush.msrb.mxu1 %v6837_v44  ;;  %v6807_v55 = vld [vmem:[%s12769_s2 + $0x188] sm:$0xff] }
 0xb74   : > { %v10322_v23 = vadd.f32 %v10293_v49, %v3376_v24  ;;  %v6833_v24 = vld [vmem:[%s12769_s2 + $0x258] sm:$0xff] }
 0xb75   : > { %v3324_v37 = vpop.f32.mrf.mxu2  ;;  %3765 = vmatpush.msrb.mxu2 %v6833_v24 }
 0xb76   : > { %12823 = vst [vmem:[#allocation8_spill] sm:$0xff] %v10322_v23  ;;  %v3325_v2 = vadd.f32 %v3324_v37, %v3284_v28  ;;  %3401 = vadd.xlane.f32.xlu0 %v10322_v23  ;;  %v6834_v28 = vld [vmem:[%s12769_s2 + $0x260] sm:$0xff] }
 0xb77   : > { %3806 = vmatpush.msrb.mxu1 %v6834_v28 }
 0xb78   : > { %v3366_v26 = vadd.f32 %v3365_v56, %v3325_v2 }
 0xb7a   : > { %v3377_v61 = vadd.f32 %v3366_v26, %v9646_v17 }
 0xb7c   : > { %v10327_v22 = vadd.f32 %v10293_v49, %v3377_v61 }
 0xb7d   : > { %v3327_v34 = vpop.f32.mrf.mxu2 }
 0xb7e   : > { %12824 = vst [vmem:[#allocation9_spill] sm:$0xff] %v10327_v22  ;;  %3403 = vadd.xlane.f32.xlu2 %v10327_v22  ;;  %v3328_v45 = vadd.f32 %v3327_v34, %v3287_v7  ;;  %v6830_v34 = vld [vmem:[%s12769_s2 + $0x240] sm:$0xff]  ;;  %v6831_v7 = vld [vmem:[%s12769_s2 + $0x248] sm:$0xff] }
 0xb7f   : > { %3766 = vmatpush.msrb.mxu2 %v6830_v34  ;;  %3807 = vmatpush.msrb.mxu1 %v6831_v7 }
 0xb80   : > { %v3369_v51 = vadd.f32 %v3368_v41, %v3328_v45  ;;  %v6828_v41 = vld [vmem:[%s12769_s2 + $0x230] sm:$0xff] }
 0xb81   : > { %3808 = vmatpush.msrb.mxu1 %v6828_v41 }
 0xb82   : > { %v3378_v14 = vadd.f32 %v3369_v51, %v9660_v31 }
 0xb84   : > { %v10344_v12 = vadd.f32 %v10293_v49, %v3378_v14  ;;  %v6825_v14 = vld [vmem:[%s12769_s2 + $0x218] sm:$0xff] }
 0xb85   : > { %3809 = vmatpush.msrb.mxu1 %v6825_v14 }
 0xb86   : > { %12825 = vst [vmem:[#allocation10_spill] sm:$0xff] %v10344_v12 }
 0xbc1   : > { %v3392_v33 = vpop.xlane.xlu1 %3391 }
 0xbc2   : > { %v3407_v63 = vmul.f32 %v3392_v33, %v12817_v58 }
 0xbc4   : > { %v10332_v21 = vsub.f32 %v10297_v59, %v3407_v63  ;;  %v6827_v63 = vld [vmem:[%s12769_s2 + $0x228] sm:$0xff] }
 0xbc5   : > { %3767 = vmatpush.msrb.mxu2 %v6827_v63 }
 0xbc6   : > { %v3423_v54 = vmul.f32 %v10332_v21, %v10332_v21 }
 0xbc8   : > { %3431 = vadd.xlane.f32.xlu1 %v3423_v54 }
 0xbc9   : > { %v3394_v17 = vpop.xlane.xlu2 %3393 }
 0xbca   : > { %v3408_v60 = vmul.f32 %v3394_v17, %v12817_v58  ;;  %v6824_v17 = vld [vmem:[%s12769_s2 + $0x210] sm:$0xff] }
 0xbcb   : > { %3768 = vmatpush.msrb.mxu2 %v6824_v17 }
 0xbcc   : > { %v10339_v40 = vsub.f32 %v10302_v50, %v3408_v60 }
 0xbce   : > { %v3424_v16 = vmul.f32 %v10339_v40, %v10339_v40 }
 0xbd0   : > { %3433 = vadd.xlane.f32.xlu0 %v3424_v16  ;;  %3405 = vadd.xlane.f32.xlu1 %v10344_v12  ;;  %v6821_v16 = vld [vmem:[%s12769_s2 + $0x1f8] sm:$0xff] }
 0xbd1   : > { %v3396_v5 = vpop.xlane.xlu0 %3395  ;;  %3769 = vmatpush.msrb.mxu2 %v6821_v16 }
 0xbd2   : > { %v3409_v27 = vmul.f32 %v3396_v5, %v12817_v58  ;;  %v6822_v5 = vld [vmem:[%s12769_s2 + $0x200] sm:$0xff] }
 0xbd3   : > { %3810 = vmatpush.msrb.mxu1 %v6822_v5 }
 0xbd4   : > { %v10349_v10 = vsub.f32 %v10307_v11, %v3409_v27 }
 0xbd6   : > { %v3425_v31 = vmul.f32 %v10349_v10, %v10349_v10 }
 0xbd8   : > { %3435 = vadd.xlane.f32.xlu2 %v3425_v31 }
 0xbd9   : > { %v3398_v20 = vpop.xlane.xlu1 %3397 }
 0xbda   : > { %v3410_v15 = vmul.f32 %v3398_v20, %v12817_v58 }
 0xbdc   : > { %v10355_v53 = vsub.f32 %v10312_v39, %v3410_v15 }
 0xbde   : > { %v3426_v49 = vmul.f32 %v10355_v53, %v10355_v53 }
 0xbe0   : > { %3437 = vadd.xlane.f32.xlu0 %v3426_v49  ;;  %v6818_v49 = vld [vmem:[%s12769_s2 + $0x1e0] sm:$0xff] }
 0xbe1   : > { %v3400_v47 = vpop.xlane.xlu2 %3399  ;;  %3770 = vmatpush.msrb.mxu2 %v6818_v49 }
 0xbe2   : > { %v3411_v18 = vmul.f32 %v3400_v47, %v12817_v58  ;;  %v6819_v47 = vld [vmem:[%s12769_s2 + $0x1e8] sm:$0xff] }
 0xbe3   : > { %3811 = vmatpush.msrb.mxu1 %v6819_v47 }
 0xbe4   : > { %v10361_v3 = vsub.f32 %v10317_v0, %v3411_v18 }
 0xbe6   : > { %v3427_v13 = vmul.f32 %v10361_v3, %v10361_v3 }
 0xbe8   : > { %3439 = vadd.xlane.f32.xlu1 %v3427_v13 }
 0xbe9   : > { %v3402_v6 = vpop.xlane.xlu0 %3401 }
 0xbea   : > { %v3412_v52 = vmul.f32 %v3402_v6, %v12817_v58  ;;  %v6815_v6 = vld [vmem:[%s12769_s2 + $0x1c8] sm:$0xff] }
 0xbeb   : > { %3771 = vmatpush.msrb.mxu2 %v6815_v6 }
 0xbec   : > { %v10367_v25 = vsub.f32 %v10322_v23, %v3412_v52  ;;  %v6816_v52 = vld [vmem:[%s12769_s2 + $0x1d0] sm:$0xff] }
 0xbed   : > { %3812 = vmatpush.msrb.mxu1 %v6816_v52 }
 0xbee   : > { %v3428_v48 = vmul.f32 %v10367_v25, %v10367_v25 }
 0xbef   : > { %3813 = vmatpush.msrb.mxu1 %v6813_v9 }
 0xbf0   : > { %3441 = vadd.xlane.f32.xlu2 %v3428_v48 }
 0xbf1   : > { %v3404_v35 = vpop.xlane.xlu2 %3403  ;;  %3814 = vmatpush.msrb.mxu1 %v6810_v32 }
 0xbf2   : > { %v3413_v36 = vmul.f32 %v3404_v35, %v12817_v58 }
 0xbf3   : > { %3815 = vmatpush.msrb.mxu1 %v6807_v55 }
 0xbf4   : > { %v10373_v29 = vsub.f32 %v10327_v22, %v3413_v36 }
 0xbf6   : > { %v3429_v38 = vmul.f32 %v10373_v29, %v10373_v29 }
 0xbf8   : > { %3443 = vadd.xlane.f32.xlu0 %v3429_v38  ;;  %v6812_v38 = vld [vmem:[%s12769_s2 + $0x1b0] sm:$0xff] }
 0xbf9   : > { %3772 = vmatpush.msrb.mxu2 %v6812_v38 }
 0xbfb   : > { %3773 = vmatpush.msrb.mxu2 %v6809_v4 }
 0xc3b   : > { %v3432_v1 = vpop.xlane.xlu1 %3431 }
 0xc3c   : > { %v10395_v8 = vmul.f32 0.007874016, %v3432_v1 }
 0xc3e   : > { %7456 = vrsqrt.f32 %v10395_v8  ;;  %vm3473_vm5 = vcmp.eq.f32.partialorder %v10395_v8, inf  ;;  %v3476_v36 = vand.u32 2147483648, %v10395_v8  ;;  %vm3475_vm6 = vcmp.eq.f32.partialorder %v10395_v8, 0.0 }
 0xc43   : > { %v3434_v37 = vpop.xlane.xlu0 %3433  ;;  %v3406_v2 = vpop.xlane.xlu1 %3405 }
 0xc44   : > { %v7457_v56 = vpop.eup %7456  ;;  %v10422_v26 = vmul.f32 0.007874016, %v3434_v37  ;;  %v3414_v61 = vmul.f32 %v3406_v2, %v12817_v58 }
 0xc45   : > { %v3467_v33 = vmul.f32 %v7457_v56, %v10395_v8 }
 0xc46   : > { %7458 = vrsqrt.f32 %v10422_v26  ;;  %v10434_v45 = vsub.f32 %v10344_v12, %v3414_v61  ;;  %vm3485_vm7 = vcmp.eq.f32.partialorder %v10422_v26, inf  ;;  %v3488_v2 = vand.u32 2147483648, %v10422_v26 }
 0xc47   : > { %v3468_v51 = vmul.f32 %v7457_v56, %v3467_v33  ;;  %vm3487_vm8 = vcmp.eq.f32.partialorder %v10422_v26, 0.0 }
 0xc48   : > { %v3430_v54 = vmul.f32 %v10434_v45, %v10434_v45 }
 0xc49   : > { %v3469_v60 = vmul.f32 0.5, %v3468_v51 }
 0xc4a   : > { %3445 = vadd.xlane.f32.xlu1 %v3430_v54 }
 0xc4b   : > { %v3470_v27 = vsub.f32 1.5, %v3469_v60  ;;  %v3436_v31 = vpop.xlane.xlu2 %3435 }
 0xc4c   : > { %v7459_v20 = vpop.eup %7458  ;;  %v10456_v15 = vmul.f32 0.007874016, %v3436_v31 }
 0xc4d   : > { %v3471_v18 = vmul.f32 %v7457_v56, %v3470_v27  ;;  %v3479_v13 = vmul.f32 %v7459_v20, %v10422_v26 }
 0xc4e   : > { %7460 = vrsqrt.f32 %v10456_v15  ;;  %vm3497_vm9 = vcmp.eq.f32.partialorder %v10456_v15, inf  ;;  %vm3499_vm11 = vcmp.eq.f32.partialorder %v10456_v15, 0.0 }
 0xc4f   : > { %v3472_v48 = vmul.f32 %v3471_v18, %v10395_v8  ;;  %v3480_v35 = vmul.f32 %v7459_v20, %v3479_v13 }
 0xc51   : > { %v3474_v19 = vsel %vm3473_vm5, %v10395_v8, %v3472_v48  ;;  %v3481_v46 = vmul.f32 0.5, %v3480_v35  ;;  %v6806_v8 = vld [vmem:[%s12769_s2 + $0x180] sm:$0xff] }
 0xc52   : > { %v3477_v57 = vsel %vm3475_vm6, %v3476_v36, %v3474_v19  ;;  %3774 = vmatpush.msrb.mxu2 %v6806_v8 }
 0xc53   : > { %v3562_v1 = vadd.f32 1e-06, %v3477_v57  ;;  %v3482_v30 = vsub.f32 1.5, %v3481_v46  ;;  %v3438_v43 = vpop.xlane.xlu0 %3437 }
 0xc54   : > { %v7461_v62 = vpop.eup %7460  ;;  %v10489_v42 = vmul.f32 0.007874016, %v3438_v43 }
 0xc55   : > { %7462 = vrcp.f32 %v3562_v1  ;;  %v3483_v44 = vmul.f32 %v7459_v20, %v3482_v30  ;;  %v3491_v24 = vmul.f32 %v7461_v62, %v10456_v15  ;;  %v3581_v31 = vand.u32 2147483648, %v3562_v1 }
 0xc56   : > { %7464 = vrsqrt.f32 %v10489_v42  ;;  %v3500_v20 = vand.u32 2147483648, %v10456_v15  ;;  %v3579_v47 = vand.u32 2147483647, %v3562_v1  ;;  %vm3575_vm12 = vweird.f32 %v3562_v1 }
 0xc57   : > { %v3484_v28 = vmul.f32 %v3483_v44, %v10422_v26  ;;  %v3492_v37 = vmul.f32 %v7461_v62, %v3491_v24  ;;  %v3582_v9 = vor.u32 1.1754944e-38, %v3581_v31  ;;  %vm3509_vm15 = vcmp.eq.f32.partialorder %v10489_v42, inf }
 0xc58   : > { %vm3580_vm14 = vcmp.eq.f32.partialorder %v3579_v47, 8.507059e+37  ;;  %v3512_v8 = vand.u32 2147483648, %v10489_v42  ;;  %vm3511_vm0 = vcmp.eq.f32.partialorder %v10489_v42, 0.0 }
 0xc59   : > { %v3493_v56 = vmul.f32 0.5, %v3492_v37  ;;  %v3486_v61 = vsel %vm3485_vm7, %v10422_v26, %v3484_v28  ;;  %v10514_v26 = vld [vmem:[%s12768_s1 + $0x4] ss:$0 sm:$0xff] }
 0xc5a   : > { %v3489_v34 = vsel %vm3487_vm8, %v3488_v2, %v3486_v61  ;;  %v3458_v35 = vmul.f32 %v10514_v26, %v10332_v21 }
 0xc5b   : > { %v7463_v7 = vpop.eup %7462  ;;  %v3494_v33 = vsub.f32 1.5, %v3493_v56  ;;  %v3440_v63 = vpop.xlane.xlu1 %3439  ;;  %v10504_v41 = vadd.f32 1e-06, %v3489_v34  ;;  %v3459_v34 = vmul.f32 %v10514_v26, %v10339_v40 }
 0xc5c   : > { %v7465_v51 = vpop.eup %7464  ;;  %v10506_v54 = vmul.f32 0.007874016, %v3440_v63  ;;  %v3571_v17 = vmul.f32 %v7463_v7, %v3562_v1  ;;  %vm3576_vm10 = vweird.f32 %v7463_v7 }
 0xc5d   : > { %v3495_v14 = vmul.f32 %v7461_v62, %v3494_v33  ;;  %v3503_v60 = vmul.f32 %v7465_v51, %v10489_v42  ;;  %7466 = vrcp.f32 %v10504_v41  ;;  %vm3577_vm13 = vmor %vm3575_vm12, %vm3576_vm10  ;;  %v3594_v28 = vand.u32 2147483647, %v10504_v41 }
 0xc5e   : > { %7468 = vrsqrt.f32 %v10506_v54  ;;  %v3572_v16 = vsub.f32 1.0, %v3571_v17  ;;  %v3596_v37 = vand.u32 2147483648, %v10504_v41  ;;  %vm3590_vm3 = vweird.f32 %v10504_v41 }
 0xc5f   : > { %v3496_v5 = vmul.f32 %v3495_v14, %v10456_v15  ;;  %v3504_v27 = vmul.f32 %v7465_v51, %v3503_v60  ;;  %vm3595_vm5 = vcmp.eq.f32.partialorder %v3594_v28, 8.507059e+37  ;;  %vm3521_vm6 = vcmp.eq.f32.partialorder %v10506_v54, inf }
 0xc60   : > { %v3573_v49 = vmul.f32 %v7463_v7, %v3572_v16  ;;  %vm3523_vm8 = vcmp.eq.f32.partialorder %v10506_v54, 0.0 }
 0xc61   : > { %v3505_v18 = vmul.f32 0.5, %v3504_v27  ;;  %v3498_v13 = vsel %vm3497_vm9, %v10456_v15, %v3496_v5  ;;  %v10530_v15 = vld [vmem:[%s12768_s1 + $0x5] ss:$0 sm:$0xff] }
 0xc62   : > { %v3574_v6 = vadd.f32 %v7463_v7, %v3573_v49  ;;  %v3501_v52 = vsel %vm3499_vm11, %v3500_v20, %v3498_v13 }
 0xc63   : > { %v7467_v48 = vpop.eup %7466  ;;  %v3506_v36 = vsub.f32 1.5, %v3505_v18  ;;  %v3442_v38 = vpop.xlane.xlu2 %3441  ;;  %v10523_v19 = vadd.f32 1e-06, %v3501_v52 }
 0xc64   : > { %v7469_v46 = vpop.eup %7468  ;;  %v10525_v57 = vmul.f32 0.007874016, %v3442_v38  ;;  %v3578_v4 = vsel %vm3577_vm13, %v7463_v7, %v3574_v6  ;;  %v3586_v32 = vmul.f32 %v7467_v48, %v10504_v41  ;;  %vm3591_vm2 = vweird.f32 %v7467_v48 }
 0xc65   : > { %v3507_v1 = vmul.f32 %v7465_v51, %v3506_v36  ;;  %v3515_v21 = vmul.f32 %v7469_v46, %v10506_v54  ;;  %v3583_v30 = vsel %vm3580_vm14, %v3582_v9, %v3578_v4  ;;  %7470 = vrcp.f32 %v10523_v19  ;;  %vm3592_vm4 = vmor %vm3590_vm3, %vm3591_vm2 }
 0xc66   : > { %7472 = vrsqrt.f32 %v10525_v57  ;;  %v3584_v43 = vmul.f32 %v3583_v30, %v3458_v35  ;;  %v3587_v44 = vsub.f32 1.0, %v3586_v32  ;;  %v3524_v41 = vand.u32 2147483648, %v10506_v54 }
 0xc67   : > { %v3508_v62 = vmul.f32 %v3507_v1, %v10489_v42  ;;  %v3516_v55 = vmul.f32 %v7469_v46, %v3515_v21  ;;  %v3609_v6 = vand.u32 2147483647, %v10523_v19  ;;  %v3611_v52 = vand.u32 2147483648, %v10523_v19 }
 0xc68   : > { %v10540_v24 = vadd.f32 %v10530_v15, %v3584_v43  ;;  %v3588_v56 = vmul.f32 %v7467_v48, %v3587_v44  ;;  %vm3605_vm9 = vweird.f32 %v10523_v19  ;;  %v3460_v30 = vmul.f32 %v10514_v26, %v10349_v10 }
 0xc69   : > { %v3517_v2 = vmul.f32 0.5, %v3516_v55  ;;  %v3510_v61 = vsel %vm3509_vm15, %v10489_v42, %v3508_v62  ;;  %v3597_v42 = vor.u32 1.1754944e-38, %v3596_v37  ;;  %vm3610_vm11 = vcmp.eq.f32.partialorder %v3609_v6, 8.507059e+37 }
 0xc6a   : > { %3775 = vmatmul.f32.vlgmr.msrb.gmra.mxu2 %v10540_v24  ;;  %3816 = vmatmul.f32.vlgmr.msrb.gmra.mxu1 %v10540_v24  ;;  %v3513_v7 = vsel %vm3511_vm0, %v3512_v8, %v3510_v61  ;;  %v3589_v17 = vadd.f32 %v7467_v48, %v3588_v56  ;;  %vm3533_vm12 = vcmp.eq.f32.partialorder %v10525_v57, inf  ;;  %v3536_v56 = vand.u32 2147483648, %v10525_v57 }
 0xc6b   : > { %v7471_v33 = vpop.eup %7470  ;;  %v3518_v63 = vsub.f32 1.5, %v3517_v2  ;;  %v3444_v51 = vpop.xlane.xlu0 %3443  ;;  %v10551_v14 = vadd.f32 1e-06, %v3513_v7  ;;  %vm3535_vm14 = vcmp.eq.f32.partialorder %v10525_v57, 0.0 }
 0xc6c   : > { %v7473_v60 = vpop.eup %7472  ;;  %v10553_v16 = vmul.f32 0.007874016, %v3444_v51  ;;  %v3601_v40 = vmul.f32 %v7471_v33, %v10523_v19  ;;  %v3593_v31 = vsel %vm3592_vm4, %v7467_v48, %v3589_v17  ;;  %vm3606_vm7 = vweird.f32 %v7471_v33 }
 0xc6d   : > { %v3519_v5 = vmul.f32 %v7469_v46, %v3518_v63  ;;  %v3527_v27 = vmul.f32 %v7473_v60, %v10525_v57  ;;  %7474 = vrcp.f32 %v10551_v14  ;;  %v3598_v20 = vsel %vm3595_vm5, %v3597_v42, %v3593_v31  ;;  %vm3607_vm10 = vmor %vm3605_vm9, %vm3606_vm7 }
 0xc6e   : > { %7476 = vrsqrt.f32 %v10553_v16  ;;  %v3599_v18 = vmul.f32 %v3598_v20, %v3459_v34  ;;  %v3602_v13 = vsub.f32 1.0, %v3601_v40  ;;  %v3626_v2 = vand.u32 2147483648, %v10551_v14 }
 0xc6f   : > { %v3520_v49 = vmul.f32 %v3519_v5, %v10506_v54  ;;  %v3528_v47 = vmul.f32 %v7473_v60, %v3527_v27  ;;  %v3624_v34 = vand.u32 2147483647, %v10551_v14  ;;  %vm3620_vm15 = vweird.f32 %v10551_v14 }
 0xc70   : > { %v10566_v35 = vadd.f32 %v10530_v15, %v3599_v18  ;;  %v3603_v36 = vmul.f32 %v7471_v33, %v3602_v13  ;;  %v3627_v40 = vor.u32 1.1754944e-38, %v3626_v2  ;;  %v3461_v27 = vmul.f32 %v10514_v26, %v10355_v53 }
 0xc71   : > { %v3529_v48 = vmul.f32 0.5, %v3528_v47  ;;  %v3522_v38 = vsel %vm3521_vm6, %v10506_v54, %v3520_v49  ;;  %v3612_v54 = vor.u32 1.1754944e-38, %v3611_v52  ;;  %vm3625_vm2 = vcmp.eq.f32.partialorder %v3624_v34, 8.507059e+37 }
 0xc72   : > { %v3525_v9 = vsel %vm3523_vm8, %v3524_v41, %v3522_v38  ;;  %3778 = vmatmul.f32.gmra.mxu2 %v10566_v35  ;;  %3819 = vmatmul.f32.gmra.mxu1 %v10566_v35  ;;  %v3604_v32 = vadd.f32 %v7471_v33, %v3603_v36  ;;  %vm3545_vm3 = vcmp.eq.f32.partialorder %v10553_v16, inf  ;;  %v3548_v18 = vand.u32 2147483648, %v10553_v16 }
 0xc73   : > { %v7475_v46 = vpop.eup %7474  ;;  %v3530_v4 = vsub.f32 1.5, %v3529_v48  ;;  %v10572_v1 = vadd.f32 1e-06, %v3525_v9  ;;  %vm3547_vm5 = vcmp.eq.f32.partialorder %v10553_v16, 0.0 }
 0xc74   : > { %v7477_v21 = vpop.eup %7476  ;;  %v3616_v43 = vmul.f32 %v7475_v46, %v10551_v14  ;;  %v3608_v55 = vsel %vm3607_vm10, %v7471_v33, %v3604_v32  ;;  %vm3621_vm13 = vweird.f32 %v7475_v46  ;;  %v3462_v32 = vmul.f32 %v10514_v26, %v10361_v3 }
 0xc75   : > { %v3531_v62 = vmul.f32 %v7473_v60, %v3530_v4  ;;  %v3539_v8 = vmul.f32 %v7477_v21, %v10553_v16  ;;  %7478 = vrcp.f32 %v10572_v1  ;;  %v3613_v19 = vsel %vm3610_vm11, %v3612_v54, %v3608_v55  ;;  %vm3622_vm0 = vmor %vm3620_vm15, %vm3621_vm13 }
 0xc76   : > { %v3617_v44 = vsub.f32 1.0, %v3616_v43  ;;  %v3614_v10 = vmul.f32 %v3613_v19, %v3460_v30  ;;  %v3641_v13 = vand.u32 2147483648, %v10572_v1  ;;  %v3639_v52 = vand.u32 2147483647, %v10572_v1 }
 0xc77   : > { %v3532_v28 = vmul.f32 %v3531_v62, %v10525_v57  ;;  %v3540_v37 = vmul.f32 %v7477_v21, %v3539_v8  ;;  %vm3635_vm6 = vweird.f32 %v10572_v1 }
 0xc78   : > { %v3618_v61 = vmul.f32 %v7475_v46, %v3617_v44  ;;  %v10586_v33 = vadd.f32 %v10530_v15, %v3614_v10  ;;  %vm3640_vm8 = vcmp.eq.f32.partialorder %v3639_v52, 8.507059e+37 }
 0xc79   : > { %v3541_v7 = vmul.f32 0.5, %v3540_v37  ;;  %v3534_v63 = vsel %vm3533_vm12, %v10525_v57, %v3532_v28  ;;  %v3463_v28 = vmul.f32 %v10514_v26, %v10367_v25 }
 0xc7a   : > { %v3619_v51 = vadd.f32 %v7475_v46, %v3618_v61  ;;  %v3537_v17 = vsel %vm3535_vm14, %v3536_v56, %v3534_v63  ;;  %3781 = vmatmul.f32.gmra.mxu2 %v10586_v33  ;;  %3822 = vmatmul.f32.gmra.mxu1 %v10586_v33 }
 0xc7b   : > { %v7479_v60 = vpop.eup %7478  ;;  %v3542_v42 = vsub.f32 1.5, %v3541_v7  ;;  %v3567_v5 = vadd.f32 1e-06, %v3537_v17 }
 0xc7c   : > { %v3623_v31 = vsel %vm3622_vm0, %v7475_v46, %v3619_v51  ;;  %v3631_v57 = vmul.f32 %v7479_v60, %v10572_v1  ;;  %vm3636_vm4 = vweird.f32 %v7479_v60  ;;  %v3642_v46 = vor.u32 1.1754944e-38, %v3641_v13 }
 0xc7d   : > { %v3543_v41 = vmul.f32 %v7477_v21, %v3542_v42  ;;  %v3628_v20 = vsel %vm3625_vm2, %v3627_v40, %v3623_v31  ;;  %7480 = vrcp.f32 %v3567_v5  ;;  %vm3637_vm7 = vmor %vm3635_vm6, %vm3636_vm4  ;;  %v3656_v1 = vand.u32 2147483648, %v3567_v5  ;;  %v6853_v31 = vld [vmem:[%s12769_s2 + $0x2f8] sm:$0xff] }
 0xc7e   : > { %v3629_v14 = vmul.f32 %v3628_v20, %v3461_v27  ;;  %v3632_v49 = vsub.f32 1.0, %v3631_v57  ;;  %v3654_v55 = vand.u32 2147483647, %v3567_v5  ;;  %vm3650_vm10 = vweird.f32 %v3567_v5  ;;  %v6850_v57 = vld [vmem:[%s12769_s2 + $0x2e0] sm:$0xff]  ;;  %3841 = vmatpush.msra.mxu2 %v6853_v31  ;;  %v6841_v20 = vld [vmem:[%s12769_s2 + $0x298] sm:$0xff] }
 0xc7f   : > { %v3544_v47 = vmul.f32 %v3543_v41, %v10553_v16  ;;  %v3657_v3 = vor.u32 1.1754944e-38, %v3656_v1  ;;  %v6844_v41 = vld [vmem:[%s12769_s2 + $0x2b0] sm:$0xff] }
 0xc80   : > { %v10601_v6 = vadd.f32 %v10530_v15, %v3629_v14  ;;  %v3633_v53 = vmul.f32 %v7479_v60, %v3632_v49  ;;  %vm3655_vm12 = vcmp.eq.f32.partialorder %v3654_v55, 8.507059e+37  ;;  %3842 = vmatpush.msra.mxu2 %v6850_v57  ;;  %v6838_v14 = vld [vmem:[%s12769_s2 + $0x280] sm:$0xff]  ;;  %v6835_v49 = vld [vmem:[%s12769_s2 + $0x268] sm:$0xff]  ;;  %v6808_v55 = vld [vmem:[%s12769_s2 + $0x190] sm:$0xff] }
 0xc81   : > { %v3546_v48 = vsel %vm3545_vm3, %v10553_v16, %v3544_v47 }
 0xc82   : > { %v3634_v36 = vadd.f32 %v7479_v60, %v3633_v53  ;;  %v3549_v38 = vsel %vm3547_vm5, %v3548_v18, %v3546_v48  ;;  %3784 = vmatmul.f32.gmra.mxu2 %v10601_v6  ;;  %3825 = vmatmul.f32.gmra.mxu1 %v10601_v6  ;;  %v6832_v18 = vld [vmem:[%s12769_s2 + $0x250] sm:$0xff]  ;;  %v6829_v53 = vld [vmem:[%s12769_s2 + $0x238] sm:$0xff] }
 0xc83   : > { %v7481_v9 = vpop.eup %7480  ;;  %v3568_v4 = vadd.f32 1e-06, %v3549_v38  ;;  %v6823_v38 = vld [vmem:[%s12769_s2 + $0x208] sm:$0xff] }
 0xc84   : > { %v3638_v21 = vsel %vm3637_vm7, %v7479_v60, %v3634_v36  ;;  %v3646_v30 = vmul.f32 %v7481_v9, %v3567_v5  ;;  %vm3651_vm9 = vweird.f32 %v7481_v9  ;;  %v3464_v60 = vmul.f32 %v10514_v26, %v10373_v29  ;;  %v6847_v29 = vld [vmem:[%s12769_s2 + $0x2c8] sm:$0xff]  ;;  %v6826_v36 = vld [vmem:[%s12769_s2 + $0x220] sm:$0xff] }
 0xc85   : > { %v3643_v54 = vsel %vm3640_vm8, %v3642_v46, %v3638_v21  ;;  %7482 = vrcp.f32 %v3568_v4  ;;  %vm3652_vm11 = vmor %vm3650_vm10, %vm3651_vm9  ;;  %v3671_v34 = vand.u32 2147483648, %v3568_v4  ;;  %v3669_v51 = vand.u32 2147483647, %v3568_v4  ;;  %3843 = vmatpush.msra.mxu2 %v6847_v29  ;;  %v6820_v46 = vld [vmem:[%s12769_s2 + $0x1f0] sm:$0xff]  ;;  %v6817_v21 = vld [vmem:[%s12769_s2 + $0x1d8] sm:$0xff] }
 0xc86   : > { %v3644_v16 = vmul.f32 %v3643_v54, %v3462_v32  ;;  %v3647_v43 = vsub.f32 1.0, %v3646_v30  ;;  %vm3665_vm14 = vweird.f32 %v3568_v4 }
 0xc87   : > { %v3672_v25 = vor.u32 1.1754944e-38, %v3671_v34  ;;  %vm3670_vm0 = vcmp.eq.f32.partialorder %v3669_v51, 8.507059e+37  ;;  %3844 = vmatpush.msra.mxu2 %v6844_v41 }
 0xc88   : > { %v10612_v62 = vadd.f32 %v10530_v15, %v3644_v16  ;;  %v3648_v8 = vmul.f32 %v7481_v9, %v3647_v43  ;;  %v6814_v16 = vld [vmem:[%s12769_s2 + $0x1c0] sm:$0xff]  ;;  %v6811_v43 = vld [vmem:[%s12769_s2 + $0x1a8] sm:$0xff] }
 0xc89   : > { %3845 = vmatpush.msra.mxu2 %v6841_v20 }
 0xc8a   : > { %v3649_v19 = vadd.f32 %v7481_v9, %v3648_v8  ;;  %3787 = vmatmul.f32.gmra.mxu2 %v10612_v62  ;;  %3828 = vmatmul.f32.gmra.mxu1 %v10612_v62 }
 0xc8b   : > { %v7483_v44 = vpop.eup %7482  ;;  %3846 = vmatpush.msra.mxu2 %v6838_v14 }
 0xc8c   : > { %v3653_v37 = vsel %vm3652_vm11, %v7481_v9, %v3649_v19  ;;  %v3661_v10 = vmul.f32 %v7483_v44, %v3568_v4  ;;  %vm3666_vm13 = vweird.f32 %v7483_v44 }
 0xc8d   : > { %v3658_v2 = vsel %vm3655_vm12, %v3657_v3, %v3653_v37  ;;  %vm3667_vm15 = vmor %vm3665_vm14, %vm3666_vm13  ;;  %3847 = vmatpush.msra.mxu2 %v6835_v49 }
 0xc8e   : > { %v3659_v56 = vmul.f32 %v3658_v2, %v3463_v28  ;;  %v3662_v61 = vsub.f32 1.0, %v3661_v10 }
 0xc8f   : > { %3848 = vmatpush.msra.mxu2 %v6832_v18 }
 0xc90   : > { %v10619_v7 = vadd.f32 %v10530_v15, %v3659_v56  ;;  %v3663_v63 = vmul.f32 %v7483_v44, %v3662_v61 }
 0xc91   : > { %3849 = vmatpush.msra.mxu2 %v6829_v53 }
 0xc92   : > { %v3664_v17 = vadd.f32 %v7483_v44, %v3663_v63  ;;  %3790 = vmatmul.f32.gmra.mxu2 %v10619_v7  ;;  %3831 = vmatmul.f32.gmra.mxu1 %v10619_v7  ;;  %v3465_v63 = vmul.f32 %v10514_v26, %v10434_v45 }
 0xc93   : > { %3850 = vmatpush.msra.mxu2 %v6826_v36 }
 0xc94   : > { %v3668_v42 = vsel %vm3667_vm15, %v7483_v44, %v3664_v17 }
 0xc95   : > { %v3673_v40 = vsel %vm3670_vm0, %v3672_v25, %v3668_v42  ;;  %3851 = vmatpush.msra.mxu2 %v6823_v38 }
 0xc96   : > { %v3674_v5 = vmul.f32 %v3673_v40, %v3464_v60 }
 0xc97   : > { %3852 = vmatpush.msra.mxu2 %v6820_v46 }
 0xc98   : > { %v10626_v27 = vadd.f32 %v10530_v15, %v3674_v5 }
 0xc99   : > { %3853 = vmatpush.msra.mxu2 %v6817_v21 }
 0xc9a   : > { %3793 = vmatmul.f32.gmra.mxu2 %v10626_v27  ;;  %3834 = vmatmul.f32.gmra.mxu1 %v10626_v27 }
 0xc9b   : > { %3854 = vmatpush.msra.mxu2 %v6814_v16 }
 0xc9d   : > { %3855 = vmatpush.msra.mxu2 %v6811_v43 }
 0xc9f   : > { %3856 = vmatpush.msra.mxu2 %v6808_v55 }
 0xcbd   : > { %v3446_v47 = vpop.xlane.xlu1 %3445 }
 0xcbe   : > { %v3454_v13 = vmul.f32 0.007874016, %v3446_v47 }
 0xcc0   : > { %7484 = vrsqrt.f32 %v3454_v13  ;;  %vm3557_vm2 = vcmp.eq.f32.partialorder %v3454_v13, inf  ;;  %v3560_v1 = vand.u32 2147483648, %v3454_v13  ;;  %vm3559_vm3 = vcmp.eq.f32.partialorder %v3454_v13, 0.0 }
 0xcc6   : > { %v7485_v52 = vpop.eup %7484 }
 0xcc7   : > { %v3551_v48 = vmul.f32 %v7485_v52, %v3454_v13 }
 0xcc9   : > { %v3552_v9 = vmul.f32 %v7485_v52, %v3551_v48 }
 0xccb   : > { %v3553_v4 = vmul.f32 0.5, %v3552_v9 }
 0xccd   : > { %v3554_v32 = vsub.f32 1.5, %v3553_v4 }
 0xccf   : > { %v3555_v30 = vmul.f32 %v7485_v52, %v3554_v32  ;;  %v7824_v32 = vld [vmem:[%s12779_s12] ss:$0 sm:$0xff] }
 0xcd1   : > { %v3556_v54 = vmul.f32 %v3555_v30, %v3454_v13 }
 0xcd3   : > { %v3558_v8 = vsel %vm3557_vm2, %v3454_v13, %v3556_v54 }
 0xcd4   : > { %v3561_v19 = vsel %vm3559_vm3, %v3560_v1, %v3558_v8 }
 0xcd5   : > { %v3569_v44 = vadd.f32 1e-06, %v3561_v19 }
 0xcd7   : > { %7486 = vrcp.f32 %v3569_v44  ;;  %v3686_v10 = vand.u32 2147483648, %v3569_v44  ;;  %v3684_v56 = vand.u32 2147483647, %v3569_v44  ;;  %vm3680_vm5 = vweird.f32 %v3569_v44 }
 0xcd9   : > { %v3687_v34 = vor.u32 1.1754944e-38, %v3686_v10  ;;  %vm3685_vm7 = vcmp.eq.f32.partialorder %v3684_v56, 8.507059e+37 }
 0xcdd   : > { %v7487_v3 = vpop.eup %7486 }
 0xcde   : > { %v3676_v28 = vmul.f32 %v7487_v3, %v3569_v44  ;;  %vm3681_vm4 = vweird.f32 %v7487_v3 }
 0xcdf   : > { %vm3682_vm6 = vmor %vm3680_vm5, %vm3681_vm4 }
 0xce0   : > { %v3677_v37 = vsub.f32 1.0, %v3676_v28 }
 0xce2   : > { %v3678_v2 = vmul.f32 %v7487_v3, %v3677_v37 }
 0xce4   : > { %v3679_v61 = vadd.f32 %v7487_v3, %v3678_v2 }
 0xce6   : > { %v3683_v51 = vsel %vm3682_vm6, %v7487_v3, %v3679_v61 }
 0xce7   : > { %v3688_v17 = vsel %vm3685_vm7, %v3687_v34, %v3683_v51  ;;  %v3817_v45 = vpop.f32.mrf.mxu1 }
 0xce8   : > { %v3689_v25 = vmul.f32 %v3688_v17, %v3465_v63 }
 0xcea   : > { %v3700_v60 = vadd.f32 %v10530_v15, %v3689_v25 }
 0xcec   : > { %3796 = vmatmul.f32.gmra.mxu2 %v3700_v60  ;;  %3837 = vmatmul.f32.gmra.mxu1 %v3700_v60 }
 0xced   : > { %v3776_v26 = vpop.f32.mrf.mxu2 }
 0xcef   : > { %v3820_v15 = vpop.f32.mrf.mxu1 }
 0xcf4   : > { %3857 = vmatmul.f32.vlgmr.msra.gmra.mxu2 %v10540_v24 }
 0xcf5   : > { %v3779_v42 = vpop.f32.mrf.mxu2 }
 0xcf7   : > { %v3823_v40 = vpop.f32.mrf.mxu1 }
 0xcfc   : > { %3860 = vmatmul.f32.gmra.mxu2 %v10566_v35 }
 0xcfd   : > { %v3782_v5 = vpop.f32.mrf.mxu2 }
 0xcff   : > { %v3826_v24 = vpop.f32.mrf.mxu1 }
 0xd04   : > { %3863 = vmatmul.f32.gmra.mxu2 %v10586_v33 }
 0xd05   : > { %v3785_v31 = vpop.f32.mrf.mxu2 }
 0xd07   : > { %v3829_v35 = vpop.f32.mrf.mxu1 }
 0xd0c   : > { %3866 = vmatmul.f32.gmra.mxu2 %v10601_v6 }
 0xd0d   : > { %v3788_v57 = vpop.f32.mrf.mxu2 }
 0xd0f   : > { %v3832_v33 = vpop.f32.mrf.mxu1 }
 0xd14   : > { %3869 = vmatmul.f32.gmra.mxu2 %v10612_v62  ;;  %v6854_v62 = vld [vmem:[%s12770_s3 + $0x3] sm:$0x7] }
 0xd15   : > { %v3791_v29 = vpop.f32.mrf.mxu2  ;;  %v3753_v36 = vperm.slane %v6854_v62, 0  ;;  %v3755_v2 = vperm.slane %v6854_v62, 2 }
 0xd17   : > { %v3835_v6 = vpop.f32.mrf.mxu1  ;;  %v10691_v9 = vadd.f32 %v3776_v26, %v3753_v36  ;;  %v10697_v30 = vadd.f32 %v3779_v42, %v3753_v36  ;;  %v10700_v43 = vadd.f32 %v3782_v5, %v3753_v36  ;;  %v10703_v55 = vadd.f32 %v3785_v31, %v3753_v36 }
 0xd18   : > { %v10706_v3 = vadd.f32 %v3788_v57, %v3753_v36  ;;  %v10709_v10 = vadd.f32 %v3791_v29, %v3753_v36 }
 0xd19   : > { %v3882_v21 = vmul.f32 %v7824_v32, %v10691_v9  ;;  %v3883_v16 = vmul.f32 %v7824_v32, %v10697_v30  ;;  %v3884_v8 = vmul.f32 %v7824_v32, %v10700_v43  ;;  %v3885_v44 = vmul.f32 %v7824_v32, %v10703_v55 }
 0xd1a   : > { %v3886_v37 = vmul.f32 %v7824_v32, %v10706_v3  ;;  %v3887_v34 = vmul.f32 %v7824_v32, %v10709_v10 }
 0xd1c   : > { %3872 = vmatmul.f32.gmra.mxu2 %v10619_v7 }
 0xd1d   : > { %v3794_v7 = vpop.f32.mrf.mxu2 }
 0xd1e   : > { %v10712_v17 = vadd.f32 %v3794_v7, %v3753_v36 }
 0xd24   : > { %3875 = vmatmul.f32.gmra.mxu2 %v10626_v27  ;;  %v3754_v27 = vperm.slane %v6854_v62, 1 }
 0xd26   : > { %v3836_v14 = vadd.f32 %v3835_v6, %v3754_v27  ;;  %v3833_v47 = vadd.f32 %v3832_v33, %v3754_v27  ;;  %v3830_v18 = vadd.f32 %v3829_v35, %v3754_v27  ;;  %v3827_v53 = vadd.f32 %v3826_v24, %v3754_v27  ;;  %v7825_v24 = vld [vmem:[%s12779_s12 + $0x1] ss:$0 sm:$0xff] }
 0xd27   : > { %v3824_v52 = vadd.f32 %v3823_v40, %v3754_v27  ;;  %v3821_v38 = vadd.f32 %v3820_v15, %v3754_v27  ;;  %v3818_v46 = vadd.f32 %v3817_v45, %v3754_v27  ;;  %v3888_v45 = vmul.f32 %v7824_v32, %v10712_v17 }
 0xd28   : > { %v3890_v31 = vmul.f32 %v7825_v24, %v10691_v9  ;;  %v3891_v35 = vmul.f32 %v7825_v24, %v10697_v30  ;;  %v3892_v57 = vmul.f32 %v7825_v24, %v10700_v43  ;;  %v3893_v33 = vmul.f32 %v7825_v24, %v10703_v55 }
 0xd29   : > { %v3894_v29 = vmul.f32 %v7825_v24, %v10706_v3  ;;  %v3895_v6 = vmul.f32 %v7825_v24, %v10709_v10  ;;  %v3896_v62 = vmul.f32 %v7825_v24, %v10712_v17 }
 0xd2c   : > { %3878 = vmatmul.f32.gmra.mxu2 %v3700_v60 }
 0xd69   : > { %v3838_v41 = vpop.f32.mrf.mxu1 }
 0xd6a   : > { %v3839_v20 = vadd.f32 %v3838_v41, %v3754_v27 }
 0xd6c   : > { %3954 = vmatpush.xpose.msra.mxu1 %v3839_v20  ;;  %v7826_v20 = vld [vmem:[%s12779_s12 + $0x2] ss:$0 sm:$0xff] }
 0xd6f   : > { %v3797_v49 = vpop.f32.mrf.mxu2 }
 0xd70   : > { %3955 = vmatpush.xpose.msra.mxu1 %v3836_v14  ;;  %v10715_v42 = vadd.f32 %v3797_v49, %v3753_v36  ;;  %v3898_v14 = vmul.f32 %v7826_v20, %v10691_v9 }
 0xd72   : > { %v3889_v5 = vmul.f32 %v7824_v32, %v10715_v42  ;;  %v3897_v7 = vmul.f32 %v7825_v24, %v10715_v42  ;;  %v3902_v32 = vmul.f32 %v7826_v20, %v10706_v3 }
 0xd74   : > { %3956 = vmatpush.xpose.msra.mxu1 %v3833_v47 }
 0xd77   : > { %v3858_v13 = vpop.f32.mrf.mxu2 }
 0xd78   : > { %3957 = vmatpush.xpose.msra.mxu1 %v3830_v18  ;;  %v3859_v40 = vadd.f32 %v3858_v13, %v3755_v2  ;;  %v3899_v18 = vmul.f32 %v7826_v20, %v10697_v30 }
 0xd7c   : > { %3958 = vmatpush.xpose.msra.mxu1 %v3827_v53 }
 0xd7f   : > { %v3861_v48 = vpop.f32.mrf.mxu2 }
 0xd80   : > { %3959 = vmatpush.xpose.msra.mxu1 %v3824_v52  ;;  %v3862_v15 = vadd.f32 %v3861_v48, %v3755_v2  ;;  %v3900_v52 = vmul.f32 %v7826_v20, %v10700_v43 }
 0xd84   : > { %3960 = vmatpush.xpose.msra.mxu1 %v3821_v38  ;;  %v3901_v38 = vmul.f32 %v7826_v20, %v10703_v55 }
 0xd87   : > { %v3864_v4 = vpop.f32.mrf.mxu2 }
 0xd88   : > { %3961 = vmatpush.xpose.msra.mxu1 %v3818_v46  ;;  %v3865_v26 = vadd.f32 %v3864_v4, %v3755_v2 }
 0xd8b   : > { %3962 = vmatmul.f32.vlgmr.msra.gmra.mxu1 %v3882_v21 }
 0xd8f   : > { %v3867_v54 = vpop.f32.mrf.mxu2 }
 0xd90   : > { %v3868_v60 = vadd.f32 %v3867_v54, %v3755_v2 }
 0xd93   : > { %3965 = vmatmul.f32.gmra.mxu1 %v3883_v16  ;;  %v3903_v16 = vmul.f32 %v7826_v20, %v10709_v10 }
 0xd97   : > { %v3870_v1 = vpop.f32.mrf.mxu2 }
 0xd98   : > { %v3871_v25 = vadd.f32 %v3870_v1, %v3755_v2 }
 0xd9b   : > { %3968 = vmatmul.f32.gmra.mxu1 %v3884_v8 }
 0xd9f   : > { %v3873_v19 = vpop.f32.mrf.mxu2 }
 0xda0   : > { %v3874_v51 = vadd.f32 %v3873_v19, %v3755_v2  ;;  %v3904_v19 = vmul.f32 %v7826_v20, %v10712_v17 }
 0xda3   : > { %3971 = vmatmul.f32.gmra.mxu1 %v3885_v44 }
 0xda7   : > { %v3876_v28 = vpop.f32.mrf.mxu2 }
 0xda8   : > { %v3877_v63 = vadd.f32 %v3876_v28, %v3755_v2 }
 0xdab   : > { %3974 = vmatmul.f32.gmra.mxu1 %v3886_v37  ;;  %v3905_v37 = vmul.f32 %v7826_v20, %v10715_v42 }
 0xdaf   : > { %v3879_v56 = vpop.f32.mrf.mxu2 }
 0xdb0   : > { %v3880_v61 = vadd.f32 %v3879_v56, %v3755_v2  ;;  %v7827_v2 = vld [vmem:[%s12779_s12 + $0x3] ss:$0 sm:$0xff] }
 0xdb1   : > { %v3906_v56 = vmul.f32 %v7827_v2, %v10691_v9 }
 0xdb2   : > { %5059 = vmatpush.msrb.mxu2 %v3880_v61 }
 0xdb3   : > { %3977 = vmatmul.f32.gmra.mxu1 %v3887_v34  ;;  %v3907_v34 = vmul.f32 %v7827_v2, %v10697_v30 }
 0xdb4   : > { %5060 = vmatpush.msrb.mxu2 %v3877_v63 }
 0xdb6   : > { %5061 = vmatpush.msrb.mxu2 %v3874_v51  ;;  %v3908_v51 = vmul.f32 %v7827_v2, %v10700_v43 }
 0xdb8   : > { %5062 = vmatpush.msrb.mxu2 %v3871_v25 }
 0xdba   : > { %5063 = vmatpush.msrb.mxu2 %v3868_v60  ;;  %v3909_v60 = vmul.f32 %v7827_v2, %v10703_v55 }
 0xdbb   : > { %3980 = vmatmul.f32.gmra.mxu1 %v3888_v45  ;;  %v3910_v45 = vmul.f32 %v7827_v2, %v10706_v3 }
 0xdbc   : > { %5064 = vmatpush.msrb.mxu2 %v3865_v26 }
 0xdbe   : > { %5065 = vmatpush.msrb.mxu2 %v3862_v15  ;;  %v3911_v15 = vmul.f32 %v7827_v2, %v10709_v10 }
 0xdc0   : > { %5066 = vmatpush.msrb.mxu2 %v3859_v40 }
 0xdc3   : > { %3983 = vmatmul.f32.gmra.mxu1 %v3889_v5  ;;  %v3912_v5 = vmul.f32 %v7827_v2, %v10712_v17 }
 0xdcb   : > { %3986 = vmatmul.f32.gmra.mxu1 %v3890_v31 }
 0xdd3   : > { %3989 = vmatmul.f32.gmra.mxu1 %v3891_v35 }
 0xddb   : > { %3992 = vmatmul.f32.gmra.mxu1 %v3892_v57 }
 0xde3   : > { %3995 = vmatmul.f32.gmra.mxu1 %v3893_v33  ;;  %v3913_v33 = vmul.f32 %v7827_v2, %v10715_v42 }
 0xdeb   : > { %3998 = vmatmul.f32.gmra.mxu1 %v3894_v29 }
 0xdf3   : > { %4001 = vmatmul.f32.gmra.mxu1 %v3895_v6 }
 0xdfb   : > { %4004 = vmatmul.f32.gmra.mxu1 %v3896_v62 }
 0xe03   : > { %4007 = vmatmul.f32.gmra.mxu1 %v3897_v7 }
 0xe08   : > { %v10729_v27 = vpop.f32.mrf.mxu1 }
 0xe09   : > { %v4155_v41 = vsel %vm1260_vm1, %v10729_v27, -inf }
 0xe0a   : > { %4156 = vmax.xlane.f32.xlu2 %v4155_v41 }
 0xe0b   : > { %4010 = vmatmul.f32.gmra.mxu1 %v3898_v14 }
 0xe10   : > { %v10737_v49 = vpop.f32.mrf.mxu1 }
 0xe11   : > { %v4158_v47 = vsel %vm1260_vm1, %v10737_v49, -inf }
 0xe12   : > { %4159 = vmax.xlane.f32.xlu0 %v4158_v47 }
 0xe13   : > { %4013 = vmatmul.f32.gmra.mxu1 %v3899_v18 }
 0xe18   : > { %v10742_v13 = vpop.f32.mrf.mxu1 }
 0xe19   : > { %v4161_v53 = vsel %vm1260_vm1, %v10742_v13, -inf }
 0xe1a   : > { %4162 = vmax.xlane.f32.xlu1 %v4161_v53 }
 0xe1b   : > { %4016 = vmatmul.f32.gmra.mxu1 %v3900_v52 }
 0xe20   : > { %v10747_v48 = vpop.f32.mrf.mxu1 }
 0xe21   : > { %v4164_v36 = vsel %vm1260_vm1, %v10747_v48, -inf }
 0xe22   : > { %4165 = vmax.xlane.f32.xlu2 %v4164_v36 }
 0xe23   : > { %4019 = vmatmul.f32.gmra.mxu1 %v3901_v38 }
 0xe28   : > { %v10752_v46 = vpop.f32.mrf.mxu1 }
 0xe29   : > { %v4167_v4 = vsel %vm1260_vm1, %v10752_v46, -inf }
 0xe2a   : > { %4168 = vmax.xlane.f32.xlu0 %v4167_v4 }
 0xe2b   : > { %4022 = vmatmul.f32.gmra.mxu1 %v3902_v32 }
 0xe30   : > { %v10757_v21 = vpop.f32.mrf.mxu1 }
 0xe31   : > { %v4170_v54 = vsel %vm1260_vm1, %v10757_v21, -inf }
 0xe32   : > { %4171 = vmax.xlane.f32.xlu1 %v4170_v54 }
 0xe33   : > { %4025 = vmatmul.f32.gmra.mxu1 %v3903_v16 }
 0xe38   : > { %v10762_v1 = vpop.f32.mrf.mxu1 }
 0xe39   : > { %v4173_v8 = vsel %vm1260_vm1, %v10762_v1, -inf }
 0xe3a   : > { %4174 = vmax.xlane.f32.xlu2 %v4173_v8 }
 0xe3b   : > { %4028 = vmatmul.f32.gmra.mxu1 %v3904_v19 }
 0xe40   : > { %v10767_v44 = vpop.f32.mrf.mxu1 }
 0xe41   : > { %v4176_v28 = vsel %vm1260_vm1, %v10767_v44, -inf }
 0xe42   : > { %4177 = vmax.xlane.f32.xlu1 %v4176_v28 }
 0xe43   : > { %4031 = vmatmul.f32.gmra.mxu1 %v3905_v37 }
 0xe48   : > { %v10776_v61 = vpop.f32.mrf.mxu1 }
 0xe49   : > { %v4179_v36 = vsel %vm1260_vm1, %v10776_v61, -inf }
 0xe4b   : > { %4034 = vmatmul.f32.gmra.mxu1 %v3906_v56 }
 0xe50   : > { %v10779_v63 = vpop.f32.mrf.mxu1 }
 0xe51   : > { %v4182_v19 = vsel %vm1260_vm1, %v10779_v63, -inf }
 0xe53   : > { %4037 = vmatmul.f32.gmra.mxu1 %v3907_v34 }
 0xe58   : > { %v10782_v25 = vpop.f32.mrf.mxu1 }
 0xe5b   : > { %4040 = vmatmul.f32.gmra.mxu1 %v3908_v51 }
 0xe60   : > { %v10786_v26 = vpop.f32.mrf.mxu1 }
 0xe63   : > { %4043 = vmatmul.f32.gmra.mxu1 %v3909_v60  ;;  %v4185_v60 = vsel %vm1260_vm1, %v10782_v25, -inf }
 0xe68   : > { %v10789_v40 = vpop.f32.mrf.mxu1 }
 0xe6b   : > { %4046 = vmatmul.f32.gmra.mxu1 %v3910_v45 }
 0xe70   : > { %v10792_v31 = vpop.f32.mrf.mxu1 }
 0xe73   : > { %4049 = vmatmul.f32.gmra.mxu1 %v3911_v15 }
 0xe78   : > { %v10799_v7 = vpop.f32.mrf.mxu1 }
 0xe7b   : > { %4052 = vmatmul.f32.gmra.mxu1 %v3912_v5 }
 0xe7d   : > { %v4157_v24 = vpop.xlane.xlu2 %4156 }
 0xe7e   : > { %v4347_v35 = vsub.f32 %v10729_v27, %v4157_v24  ;;  %v10806_v27 = vld [vmem:[%s12779_s12 + $0x4] ss:$0 sm:$0xff] }
 0xe7f   : > { %v3914_v14 = vmul.f32 %v10806_v27, %v10691_v9  ;;  %v3915_v38 = vmul.f32 %v10806_v27, %v10697_v30  ;;  %v3916_v28 = vmul.f32 %v10806_v27, %v10700_v43  ;;  %v3917_v45 = vmul.f32 %v10806_v27, %v10703_v55 }
 0xe80   : > { %v4411_v57 = vmul.f32 1.442695, %v4347_v35  ;;  %v10819_v4 = vpop.f32.mrf.mxu1 }
 0xe82   : > { %7488 = vpow2.f32 %v4411_v57 }
 0xe83   : > { %4055 = vmatmul.f32.gmra.mxu1 %v3913_v33  ;;  %v4188_v33 = vsel %vm1260_vm1, %v10786_v26, -inf }
 0xe85   : > { %v4160_v29 = vpop.xlane.xlu0 %4159 }
 0xe86   : > { %v4348_v6 = vsub.f32 %v10737_v49, %v4160_v29  ;;  %v3918_v29 = vmul.f32 %v10806_v27, %v10706_v3 }
 0xe88   : > { %v10797_v62 = vpop.eup %7488  ;;  %v4413_v41 = vmul.f32 1.442695, %v4348_v6  ;;  %v10830_v37 = vpop.f32.mrf.mxu1 }
 0xe89   : > { %v4539_v20 = vsel %vm1260_vm1, %v10797_v62, 0.0 }
 0xe8a   : > { %7490 = vpow2.f32 %v4413_v41  ;;  %4540 = vadd.xlane.f32.xlu0 %v4539_v20 }
 0xe8b   : > { %4058 = vmatmul.f32.gmra.mxu1 %v3914_v14 }
 0xe8d   : > { %v4163_v49 = vpop.xlane.xlu1 %4162 }
 0xe8e   : > { %v4349_v47 = vsub.f32 %v10742_v13, %v4163_v49 }
 0xe90   : > { %v10811_v18 = vpop.eup %7490  ;;  %v4415_v53 = vmul.f32 1.442695, %v4349_v47  ;;  %v10841_v5 = vpop.f32.mrf.mxu1  ;;  %v4191_v47 = vsel %vm1260_vm1, %v10789_v40, -inf }
 0xe91   : > { %v4542_v52 = vsel %vm1260_vm1, %v10811_v18, 0.0 }
 0xe92   : > { %7492 = vpow2.f32 %v4415_v53  ;;  %4543 = vadd.xlane.f32.xlu2 %v4542_v52  ;;  %4180 = vmax.xlane.f32.xlu0 %v4179_v36  ;;  %v3919_v53 = vmul.f32 %v10806_v27, %v10709_v10 }
 0xe93   : > { %4061 = vmatmul.f32.gmra.mxu1 %v3915_v38 }
 0xe95   : > { %v4166_v32 = vpop.xlane.xlu2 %4165 }
 0xe96   : > { %v4350_v13 = vsub.f32 %v10747_v48, %v4166_v32 }
 0xe98   : > { %v10822_v54 = vpop.eup %7492  ;;  %v4417_v16 = vmul.f32 1.442695, %v4350_v13  ;;  %v10855_v20 = vpop.f32.mrf.mxu1  ;;  %v4194_v13 = vsel %vm1260_vm1, %v10792_v31, -inf }
 0xe99   : > { %v4545_v8 = vsel %vm1260_vm1, %v10822_v54, 0.0 }
 0xe9a   : > { %7494 = vpow2.f32 %v4417_v16  ;;  %4546 = vadd.xlane.f32.xlu1 %v4545_v8  ;;  %4183 = vmax.xlane.f32.xlu2 %v4182_v19  ;;  %v3920_v16 = vmul.f32 %v10806_v27, %v10712_v17 }
 0xe9b   : > { %4064 = vmatmul.f32.gmra.mxu1 %v3916_v28  ;;  %v4197_v28 = vsel %vm1260_vm1, %v10799_v7, -inf }
 0xe9d   : > { %v4169_v2 = vpop.xlane.xlu0 %4168 }
 0xe9e   : > { %v4351_v48 = vsub.f32 %v10752_v46, %v4169_v2  ;;  %v3921_v2 = vmul.f32 %v10806_v27, %v10715_v42 }
 0xea0   : > { %v10833_v56 = vpop.eup %7494  ;;  %v4419_v34 = vmul.f32 1.442695, %v4351_v48  ;;  %v10872_v8 = vpop.f32.mrf.mxu1 }
 0xea1   : > { %v4548_v51 = vsel %vm1260_vm1, %v10833_v56, 0.0 }
 0xea2   : > { %7496 = vpow2.f32 %v4419_v34  ;;  %4549 = vadd.xlane.f32.xlu0 %v4548_v51  ;;  %4186 = vmax.xlane.f32.xlu1 %v4185_v60  ;;  %v4200_v34 = vsel %vm1260_vm1, %v10819_v4, -inf  ;;  %v7829_v51 = vld [vmem:[%s12779_s12 + $0x5] ss:$0 sm:$0xff] }
 0xea3   : > { %4067 = vmatmul.f32.gmra.mxu1 %v3917_v45  ;;  %v3922_v60 = vmul.f32 %v7829_v51, %v10691_v9  ;;  %v3923_v27 = vmul.f32 %v7829_v51, %v10697_v30 }
 0xea5   : > { %v4172_v15 = vpop.xlane.xlu1 %4171 }
 0xea6   : > { %v4352_v46 = vsub.f32 %v10757_v21, %v4172_v15 }
 0xea8   : > { %v10844_v24 = vpop.eup %7496  ;;  %v4421_v35 = vmul.f32 1.442695, %v4352_v46  ;;  %v10882_v48 = vpop.f32.mrf.mxu1  ;;  %v3924_v46 = vmul.f32 %v7829_v51, %v10700_v43 }
 0xea9   : > { %v4551_v57 = vsel %vm1260_vm1, %v10844_v24, 0.0 }
 0xeaa   : > { %7498 = vpow2.f32 %v4421_v35  ;;  %4552 = vadd.xlane.f32.xlu2 %v4551_v57  ;;  %4189 = vmax.xlane.f32.xlu0 %v4188_v33  ;;  %v3925_v35 = vmul.f32 %v7829_v51, %v10703_v55  ;;  %v3926_v33 = vmul.f32 %v7829_v51, %v10706_v3 }
 0xeab   : > { %4070 = vmatmul.f32.gmra.mxu1 %v3918_v29 }
 0xead   : > { %v4175_v6 = vpop.xlane.xlu2 %4174 }
 0xeae   : > { %v4353_v41 = vsub.f32 %v10762_v1, %v4175_v6  ;;  %v3927_v6 = vmul.f32 %v7829_v51, %v10709_v10 }
 0xeb0   : > { %v10853_v21 = vpop.eup %7498  ;;  %v4423_v14 = vmul.f32 1.442695, %v4353_v41  ;;  %v10890_v45 = vpop.f32.mrf.mxu1 }
 0xeb1   : > { %v4554_v49 = vsel %vm1260_vm1, %v10853_v21, 0.0 }
 0xeb2   : > { %7500 = vpow2.f32 %v4423_v14  ;;  %4555 = vadd.xlane.f32.xlu1 %v4554_v49  ;;  %4192 = vmax.xlane.f32.xlu2 %v4191_v47  ;;  %v3928_v14 = vmul.f32 %v7829_v51, %v10712_v17 }
 0xeb3   : > { %4073 = vmatmul.f32.gmra.mxu1 %v3919_v53  ;;  %v3929_v53 = vmul.f32 %v7829_v51, %v10715_v42 }
 0xeb5   : > { %v4178_v52 = vpop.xlane.xlu1 %4177 }
 0xeb6   : > { %v4354_v1 = vsub.f32 %v10767_v44, %v4178_v52 }
 0xeb8   : > { %v10864_v36 = vpop.eup %7500  ;;  %v4425_v38 = vmul.f32 1.442695, %v4354_v1  ;;  %v10893_v15 = vpop.f32.mrf.mxu1 }
 0xeb9   : > { %v4557_v32 = vsel %vm1260_vm1, %v10864_v36, 0.0 }
 0xeba   : > { %7502 = vpow2.f32 %v4425_v38  ;;  %4558 = vadd.xlane.f32.xlu0 %v4557_v32  ;;  %4195 = vmax.xlane.f32.xlu1 %v4194_v13 }
 0xebb   : > { %4076 = vmatmul.f32.gmra.mxu1 %v3920_v16 }
 0xec0   : > { %v10874_v19 = vpop.eup %7502  ;;  %v10897_v57 = vpop.f32.mrf.mxu1 }
 0xec1   : > { %v4560_v44 = vsel %vm1260_vm1, %v10874_v19, 0.0 }
 0xec2   : > { %4561 = vadd.xlane.f32.xlu2 %v4560_v44  ;;  %4198 = vmax.xlane.f32.xlu0 %v4197_v28  ;;  %v10915_v44 = vld [vmem:[%s12779_s12 + $0x6] ss:$0 sm:$0xff] }
 0xec3   : > { %4079 = vmatmul.f32.gmra.mxu1 %v3921_v2  ;;  %v3930_v28 = vmul.f32 %v10915_v44, %v10691_v9 }
 0xec8   : > { %v10900_v29 = vpop.f32.mrf.mxu1 }
 0xeca   : > { %4201 = vmax.xlane.f32.xlu2 %v4200_v34 }
 0xecb   : > { %4082 = vmatmul.f32.gmra.mxu1 %v3922_v60 }
 0xed0   : > { %v10903_v41 = vpop.f32.mrf.mxu1 }
 0xed3   : > { %4085 = vmatmul.f32.gmra.mxu1 %v3923_v27 }
 0xed8   : > { %v10906_v47 = vpop.f32.mrf.mxu1 }
 0xedb   : > { %4088 = vmatmul.f32.gmra.mxu1 %v3924_v46 }
 0xee0   : > { %v10919_v2 = vpop.f32.mrf.mxu1 }
 0xee3   : > { %4091 = vmatmul.f32.gmra.mxu1 %v3925_v35 }
 0xeeb   : > { %4094 = vmatmul.f32.gmra.mxu1 %v3926_v33  ;;  %v3931_v33 = vmul.f32 %v10915_v44, %v10697_v30 }
 0xef3   : > { %4097 = vmatmul.f32.gmra.mxu1 %v3927_v6 }
 0xefb   : > { %4100 = vmatmul.f32.gmra.mxu1 %v3928_v14  ;;  %v10930_v14 = vpop.f32.mrf.mxu1 }
 0xefd   : > { %v4541_v49 = vpop.xlane.xlu0 %4540 }
 0xefe   : > { %7504 = vrcp.f32 %v4541_v49 }
 0xf03   : > { %4103 = vmatmul.f32.gmra.mxu1 %v3929_v53 }
 0xf04   : > { %v7505_v52 = vpop.eup %7504 }
 0xf05   : > { %v4795_v1 = vmul.f32 %v7505_v52, %v10797_v62  ;;  %v4544_v38 = vpop.xlane.xlu2 %4543  ;;  %v4181_v32 = vpop.xlane.xlu0 %4180 }
 0xf06   : > { %7506 = vrcp.f32 %v4544_v38  ;;  %v4355_v13 = vsub.f32 %v10776_v61, %v4181_v32  ;;  %v4203_v32 = vsel %vm1260_vm1, %v10830_v37, -inf }
 0xf07   : > { %6855 = vmatmul.msk.f32.vlgmr.msrb.gmra.mxu2 %vm1260_vm1, %v4795_v1 }
 0xf08   : > { %v4427_v16 = vmul.f32 1.442695, %v4355_v13  ;;  %v3932_v13 = vmul.f32 %v10915_v44, %v10700_v43 }
 0xf0a   : > { %7508 = vpow2.f32 %v4427_v16 }
 0xf0b   : > { %4106 = vmatmul.f32.gmra.mxu1 %v3930_v28 }
 0xf0c   : > { %v7507_v62 = vpop.eup %7506 }
 0xf0d   : > { %v4547_v34 = vpop.xlane.xlu1 %4546  ;;  %v4184_v51 = vpop.xlane.xlu2 %4183  ;;  %v4796_v61 = vmul.f32 %v7507_v62, %v10811_v18 }
 0xf0e   : > { %7510 = vrcp.f32 %v4547_v34  ;;  %v4356_v60 = vsub.f32 %v10779_v63, %v4184_v51  ;;  %v10945_v34 = vpop.f32.mrf.mxu1 }
 0xf0f   : > { %6856 = vmatmul.msk.f32.gmra.mxu2 %vm1260_vm1, %v4796_v61 }
 0xf10   : > { %v10924_v27 = vpop.eup %7508  ;;  %v4429_v46 = vmul.f32 1.442695, %v4356_v60 }
 0xf11   : > { %v4563_v35 = vsel %vm1260_vm1, %v10924_v27, 0.0 }
 0xf12   : > { %7512 = vpow2.f32 %v4429_v46  ;;  %4564 = vadd.xlane.f32.xlu1 %v4563_v35  ;;  %v4206_v46 = vsel %vm1260_vm1, %v10841_v5, -inf  ;;  %v3933_v35 = vmul.f32 %v10915_v44, %v10703_v55 }
 0xf13   : > { %4109 = vmatmul.f32.gmra.mxu1 %v3931_v33 }
 0xf14   : > { %v7511_v6 = vpop.eup %7510 }
 0xf15   : > { %v4550_v18 = vpop.xlane.xlu0 %4549  ;;  %v4187_v49 = vpop.xlane.xlu1 %4186  ;;  %v4797_v63 = vmul.f32 %v7511_v6, %v10822_v54 }
 0xf16   : > { %7514 = vrcp.f32 %v4550_v18  ;;  %v4357_v53 = vsub.f32 %v10782_v25, %v4187_v49 }
 0xf17   : > { %6857 = vmatmul.msk.f32.gmra.mxu2 %vm1260_vm1, %v4797_v63 }
 0xf18   : > { %v10935_v52 = vpop.eup %7512  ;;  %v4431_v1 = vmul.f32 1.442695, %v4357_v53  ;;  %v10961_v53 = vpop.f32.mrf.mxu1 }
 0xf19   : > { %v4566_v38 = vsel %vm1260_vm1, %v10935_v52, 0.0 }
 0xf1a   : > { %7516 = vpow2.f32 %v4431_v1  ;;  %4567 = vadd.xlane.f32.xlu0 %v4566_v38  ;;  %4204 = vmax.xlane.f32.xlu1 %v4203_v32  ;;  %v4209_v38 = vsel %vm1260_vm1, %v10855_v20, -inf  ;;  %v3934_v32 = vmul.f32 %v10915_v44, %v10706_v3 }
 0xf1b   : > { %4112 = vmatmul.f32.gmra.mxu1 %v3932_v13 }
 0xf1c   : > { %v7515_v54 = vpop.eup %7514 }
 0xf1d   : > { %v4553_v25 = vpop.xlane.xlu2 %4552  ;;  %v4190_v16 = vpop.xlane.xlu0 %4189  ;;  %v4798_v28 = vmul.f32 %v7515_v54, %v10833_v56 }
 0xf1e   : > { %7518 = vrcp.f32 %v4553_v25  ;;  %v4358_v62 = vsub.f32 %v10786_v26, %v4190_v16 }
 0xf1f   : > { %6858 = vmatmul.msk.f32.gmra.mxu2 %vm1260_vm1, %v4798_v28 }
 0xf20   : > { %v10948_v51 = vpop.eup %7516  ;;  %v4433_v61 = vmul.f32 1.442695, %v4358_v62 }
 0xf21   : > { %v4569_v60 = vsel %vm1260_vm1, %v10948_v51, 0.0 }
 0xf22   : > { %7520 = vpow2.f32 %v4433_v61  ;;  %4570 = vadd.xlane.f32.xlu2 %v4569_v60  ;;  %4207 = vmax.xlane.f32.xlu0 %v4206_v46  ;;  %v4212_v61 = vsel %vm1260_vm1, %v10872_v8, -inf  ;;  %v3935_v60 = vmul.f32 %v10915_v44, %v10709_v10 }
 0xf23   : > { %4115 = vmatmul.f32.gmra.mxu1 %v3933_v35 }
 0xf24   : > { %v7519_v26 = vpop.eup %7518 }
 0xf25   : > { %v4556_v56 = vpop.xlane.xlu1 %4555  ;;  %v4193_v33 = vpop.xlane.xlu2 %4192  ;;  %v4799_v6 = vmul.f32 %v7519_v26, %v10844_v24 }
 0xf26   : > { %7522 = vrcp.f32 %v4556_v56  ;;  %v4359_v18 = vsub.f32 %v10789_v40, %v4193_v33 }
 0xf27   : > { %6859 = vmatmul.msk.f32.gmra.mxu2 %vm1260_vm1, %v4799_v6 }
 0xf28   : > { %v10959_v49 = vpop.eup %7520  ;;  %v4435_v63 = vmul.f32 1.442695, %v4359_v18 }
 0xf29   : > { %v4572_v1 = vsel %vm1260_vm1, %v10959_v49, 0.0 }
 0xf2a   : > { %7524 = vpow2.f32 %v4435_v63  ;;  %4573 = vadd.xlane.f32.xlu1 %v4572_v1  ;;  %4210 = vmax.xlane.f32.xlu2 %v4209_v38  ;;  %v4215_v63 = vsel %vm1260_vm1, %v10882_v48, -inf  ;;  %v3936_v1 = vmul.f32 %v10915_v44, %v10712_v17 }
 0xf2b   : > { %4118 = vmatmul.f32.gmra.mxu1 %v3934_v32 }
 0xf2c   : > { %v7523_v40 = vpop.eup %7522 }
 0xf2d   : > { %v4559_v24 = vpop.xlane.xlu0 %4558  ;;  %v4196_v13 = vpop.xlane.xlu1 %4195  ;;  %v4800_v54 = vmul.f32 %v7523_v40, %v10853_v21 }
 0xf2e   : > { %7526 = vrcp.f32 %v4559_v24  ;;  %v4360_v25 = vsub.f32 %v10792_v31, %v4196_v13  ;;  %v10980_v21 = vpop.f32.mrf.mxu1 }
 0xf2f   : > { %6860 = vmatmul.msk.f32.gmra.mxu2 %vm1260_vm1, %v4800_v54 }
 0xf30   : > { %v10972_v16 = vpop.eup %7524  ;;  %v4437_v28 = vmul.f32 1.442695, %v4360_v25  ;;  %v4218_v25 = vsel %vm1260_vm1, %v10890_v45, -inf }
 0xf31   : > { %v4575_v62 = vsel %vm1260_vm1, %v10972_v16, 0.0 }
 0xf32   : > { %7528 = vpow2.f32 %v4437_v28  ;;  %4576 = vadd.xlane.f32.xlu0 %v4575_v62  ;;  %4213 = vmax.xlane.f32.xlu1 %v4212_v61  ;;  %v3937_v28 = vmul.f32 %v10915_v44, %v10715_v42  ;;  %v4221_v61 = vsel %vm1260_vm1, %v10893_v15, -inf }
 0xf33   : > { %4121 = vmatmul.f32.gmra.mxu1 %v3935_v60  ;;  %v7831_v60 = vld [vmem:[%s12779_s12 + $0x7] ss:$0 sm:$0xff] }
 0xf34   : > { %v7527_v31 = vpop.eup %7526  ;;  %v3938_v44 = vmul.f32 %v7831_v60, %v10691_v9 }
 0xf35   : > { %v4562_v46 = vpop.xlane.xlu2 %4561  ;;  %v4199_v35 = vpop.xlane.xlu0 %4198  ;;  %v4801_v26 = vmul.f32 %v7527_v31, %v10864_v36 }
 0xf36   : > { %7530 = vrcp.f32 %v4562_v46  ;;  %v4361_v56 = vsub.f32 %v10799_v7, %v4199_v35  ;;  %v10993_v7 = vpop.f32.mrf.mxu1  ;;  %v4224_v46 = vsel %vm1260_vm1, %v10897_v57, -inf  ;;  %v3939_v35 = vmul.f32 %v7831_v60, %v10697_v30 }
 0xf37   : > { %6861 = vmatmul.msk.f32.gmra.mxu2 %vm1260_vm1, %v4801_v26  ;;  %v3940_v26 = vmul.f32 %v7831_v60, %v10700_v43  ;;  %v3944_v43 = vmul.f32 %v7831_v60, %v10712_v17 }
 0xf38   : > { %v10985_v33 = vpop.eup %7528  ;;  %v4439_v6 = vmul.f32 1.442695, %v4361_v56 }
 0xf39   : > { %v4578_v18 = vsel %vm1260_vm1, %v10985_v33, 0.0 }
 0xf3a   : > { %7532 = vpow2.f32 %v4439_v6  ;;  %4579 = vadd.xlane.f32.xlu2 %v4578_v18  ;;  %4216 = vmax.xlane.f32.xlu0 %v4215_v63  ;;  %v3941_v6 = vmul.f32 %v7831_v60, %v10703_v55  ;;  %v3942_v18 = vmul.f32 %v7831_v60, %v10706_v3 }
 0xf3b   : > { %4124 = vmatmul.f32.gmra.mxu1 %v3936_v1  ;;  %v3943_v1 = vmul.f32 %v7831_v60, %v10709_v10 }
 0xf3c   : > { %v7531_v36 = vpop.eup %7530 }
 0xf3d   : > { %v4202_v38 = vpop.xlane.xlu2 %4201  ;;  %v4802_v32 = vmul.f32 %v7531_v36, %v10874_v19  ;;  %v3945_v36 = vmul.f32 %v7831_v60, %v10715_v42 }
 0xf3e   : > { %v4362_v40 = vsub.f32 %v10819_v4, %v4202_v38  ;;  %v11006_v19 = vpop.f32.mrf.mxu1 }
 0xf3f   : > { %6862 = vmatmul.msk.f32.gmra.mxu2 %vm1260_vm1, %v4802_v32 }
 0xf40   : > { %v10998_v24 = vpop.eup %7532  ;;  %v4441_v13 = vmul.f32 1.442695, %v4362_v40 }
 0xf41   : > { %v4581_v54 = vsel %vm1260_vm1, %v10998_v24, 0.0 }
 0xf42   : > { %7534 = vpow2.f32 %v4441_v13  ;;  %4582 = vadd.xlane.f32.xlu1 %v4581_v54  ;;  %4219 = vmax.xlane.f32.xlu2 %v4218_v25 }
 0xf43   : > { %4127 = vmatmul.f32.gmra.mxu1 %v3937_v28 }
 0xf46   : > { %v11018_v31 = vpop.f32.mrf.mxu1 }
 0xf48   : > { %v11008_v4 = vpop.eup %7534 }
 0xf49   : > { %v4584_v62 = vsel %vm1260_vm1, %v11008_v4, 0.0 }
 0xf4a   : > { %4585 = vadd.xlane.f32.xlu0 %v4584_v62  ;;  %4222 = vmax.xlane.f32.xlu1 %v4221_v61 }
 0xf4b   : > { %4130 = vmatmul.f32.gmra.mxu1 %v3938_v44 }
 0xf4e   : > { %v11024_v56 = vpop.f32.mrf.mxu1 }
 0xf52   : > { %4225 = vmax.xlane.f32.xlu0 %v4224_v46 }
 0xf53   : > { %4133 = vmatmul.f32.gmra.mxu1 %v3939_v35 }
 0xf56   : > { %v11027_v9 = vpop.f32.mrf.mxu1 }
 0xf5b   : > { %4136 = vmatmul.f32.gmra.mxu1 %v3940_v26 }
 0xf5e   : > { %v11030_v63 = vpop.f32.mrf.mxu1 }
 0xf63   : > { %4139 = vmatmul.f32.gmra.mxu1 %v3941_v6 }
 0xf66   : > { %v11033_v30 = vpop.f32.mrf.mxu1 }
 0xf6b   : > { %4142 = vmatmul.f32.gmra.mxu1 %v3942_v18  ;;  %v4227_v18 = vsel %vm1260_vm1, %v10900_v29, -inf }
 0xf6e   : > { %v11037_v38 = vpop.f32.mrf.mxu1 }
 0xf73   : > { %4145 = vmatmul.f32.gmra.mxu1 %v3943_v1 }
 0xf7b   : > { %4148 = vmatmul.f32.gmra.mxu1 %v3944_v43 }
 0xf83   : > { %4151 = vmatmul.f32.gmra.mxu1 %v3945_v36 }
 0xf85   : > { %v4565_v55 = vpop.xlane.xlu1 %4564 }
 0xf86   : > { %7536 = vrcp.f32 %v4565_v55 }
 0xf8c   : > { %v7537_v32 = vpop.eup %7536 }
 0xf8d   : > { %v4568_v3 = vpop.xlane.xlu0 %4567  ;;  %v4205_v40 = vpop.xlane.xlu1 %4204  ;;  %v4803_v13 = vmul.f32 %v7537_v32, %v10924_v27 }
 0xf8e   : > { %7538 = vrcp.f32 %v4568_v3  ;;  %v4363_v10 = vsub.f32 %v10830_v37, %v4205_v40  ;;  %v4230_v40 = vsel %vm1260_vm1, %v10903_v41, -inf }
 0xf8f   : > { %6863 = vmatmul.msk.f32.gmra.mxu2 %vm1260_vm1, %v4803_v13 }
 0xf90   : > { %v4443_v54 = vmul.f32 1.442695, %v4363_v10 }
 0xf92   : > { %7540 = vpow2.f32 %v4443_v54 }
 0xf94   : > { %v7539_v17 = vpop.eup %7538 }
 0xf95   : > { %v4571_v25 = vpop.xlane.xlu2 %4570  ;;  %v4208_v42 = vpop.xlane.xlu0 %4207  ;;  %v4804_v28 = vmul.f32 %v7539_v17, %v10935_v52 }
 0xf96   : > { %7542 = vrcp.f32 %v4571_v25  ;;  %v4364_v62 = vsub.f32 %v10841_v5, %v4208_v42 }
 0xf97   : > { %6864 = vmatmul.msk.f32.gmra.mxu2 %vm1260_vm1, %v4804_v28  ;;  %v4233_v28 = vsel %vm1260_vm1, %v10906_v47, -inf }
 0xf98   : > { %v11045_v61 = vpop.eup %7540  ;;  %v4445_v27 = vmul.f32 1.442695, %v4364_v62 }
 0xf99   : > { %v4587_v37 = vsel %vm1260_vm1, %v11045_v61, 0.0 }
 0xf9a   : > { %7544 = vpow2.f32 %v4445_v27  ;;  %4588 = vadd.xlane.f32.xlu2 %v4587_v37 }
 0xf9c   : > { %v7543_v60 = vpop.eup %7542 }
 0xf9d   : > { %v4574_v44 = vpop.xlane.xlu1 %4573  ;;  %v4211_v46 = vpop.xlane.xlu2 %4210  ;;  %v4805_v35 = vmul.f32 %v7543_v60, %v10948_v51 }
 0xf9e   : > { %7546 = vrcp.f32 %v4574_v44  ;;  %v4365_v52 = vsub.f32 %v10855_v20, %v4211_v46 }
 0xf9f   : > { %6865 = vmatmul.msk.f32.gmra.mxu2 %vm1260_vm1, %v4805_v35  ;;  %v4236_v35 = vsel %vm1260_vm1, %v10919_v2, -inf }
 0xfa0   : > { %v11052_v5 = vpop.eup %7544  ;;  %v4447_v26 = vmul.f32 1.442695, %v4365_v52 }
 0xfa1   : > { %v4590_v6 = vsel %vm1260_vm1, %v11052_v5, 0.0 }
 0xfa2   : > { %7548 = vpow2.f32 %v4447_v26  ;;  %4591 = vadd.xlane.f32.xlu1 %v4590_v6  ;;  %4228 = vmax.xlane.f32.xlu2 %v4227_v18 }
 0xfa4   : > { %v7547_v1 = vpop.eup %7546 }
 0xfa5   : > { %v4577_v43 = vpop.xlane.xlu0 %4576  ;;  %v4214_v51 = vpop.xlane.xlu1 %4213  ;;  %v4806_v36 = vmul.f32 %v7547_v1, %v10959_v49 }
 0xfa6   : > { %7550 = vrcp.f32 %v4577_v43  ;;  %v4366_v20 = vsub.f32 %v10872_v8, %v4214_v51  ;;  %v4239_v51 = vsel %vm1260_vm1, %v10930_v14, -inf }
 0xfa7   : > { %6866 = vmatmul.msk.f32.gmra.mxu2 %vm1260_vm1, %v4806_v36 }
 0xfa8   : > { %v11061_v55 = vpop.eup %7548  ;;  %v4449_v32 = vmul.f32 1.442695, %v4366_v20 }
 0xfa9   : > { %v4593_v3 = vsel %vm1260_vm1, %v11061_v55, 0.0 }
 0xfaa   : > { %7552 = vpow2.f32 %v4449_v32  ;;  %4594 = vadd.xlane.f32.xlu0 %v4593_v3  ;;  %4231 = vmax.xlane.f32.xlu1 %v4230_v40 }
 0xfac   : > { %v7551_v13 = vpop.eup %7550 }
 0xfad   : > { %v4580_v10 = vpop.xlane.xlu2 %4579  ;;  %v4217_v49 = vpop.xlane.xlu0 %4216  ;;  %v4807_v54 = vmul.f32 %v7551_v13, %v10972_v16  ;;  %v4242_v13 = vsel %vm1260_vm1, %v10945_v34, -inf }
 0xfae   : > { %7554 = vrcp.f32 %v4580_v10  ;;  %v4367_v8 = vsub.f32 %v10882_v48, %v4217_v49  ;;  %v4248_v49 = vsel %vm1260_vm1, %v10980_v21, -inf }
 0xfaf   : > { %6867 = vmatmul.msk.f32.gmra.mxu2 %vm1260_vm1, %v4807_v54 }
 0xfb0   : > { %v11070_v17 = vpop.eup %7552  ;;  %v4451_v25 = vmul.f32 1.442695, %v4367_v8 }
 0xfb1   : > { %v4596_v42 = vsel %vm1260_vm1, %v11070_v17, 0.0 }
 0xfb2   : > { %7556 = vpow2.f32 %v4451_v25  ;;  %4597 = vadd.xlane.f32.xlu2 %v4596_v42  ;;  %4234 = vmax.xlane.f32.xlu0 %v4233_v28 }
 0xfb4   : > { %v7555_v62 = vpop.eup %7554 }
 0xfb5   : > { %v4583_v27 = vpop.xlane.xlu1 %4582  ;;  %v4220_v16 = vpop.xlane.xlu2 %4219  ;;  %v4808_v37 = vmul.f32 %v7555_v62, %v10985_v33 }
 0xfb6   : > { %7558 = vrcp.f32 %v4583_v27  ;;  %v4368_v48 = vsub.f32 %v10890_v45, %v4220_v16 }
 0xfb7   : > { %6868 = vmatmul.msk.f32.gmra.mxu2 %vm1260_vm1, %v4808_v37 }
 0xfb8   : > { %v11079_v60 = vpop.eup %7556  ;;  %v4453_v44 = vmul.f32 1.442695, %v4368_v48 }
 0xfb9   : > { %v4599_v46 = vsel %vm1260_vm1, %v11079_v60, 0.0 }
 0xfba   : > { %7560 = vpow2.f32 %v4453_v44  ;;  %4600 = vadd.xlane.f32.xlu1 %v4599_v46  ;;  %4237 = vmax.xlane.f32.xlu2 %v4236_v35 }
 0xfbc   : > { %v7559_v52 = vpop.eup %7558 }
 0xfbd   : > { %v4586_v26 = vpop.xlane.xlu0 %4585  ;;  %v4223_v33 = vpop.xlane.xlu1 %4222  ;;  %v4809_v6 = vmul.f32 %v7559_v52, %v10998_v24 }
 0xfbe   : > { %7562 = vrcp.f32 %v4586_v26  ;;  %v4369_v45 = vsub.f32 %v10893_v15, %v4223_v33 }
 0xfbf   : > { %6869 = vmatmul.msk.f32.gmra.mxu2 %vm1260_vm1, %v4809_v6 }
 0xfc0   : > { %v11088_v18 = vpop.eup %7560  ;;  %v4455_v1 = vmul.f32 1.442695, %v4369_v45 }
 0xfc1   : > { %v4602_v43 = vsel %vm1260_vm1, %v11088_v18, 0.0 }
 0xfc2   : > { %7564 = vpow2.f32 %v4455_v1  ;;  %4603 = vadd.xlane.f32.xlu0 %v4602_v43  ;;  %4240 = vmax.xlane.f32.xlu1 %v4239_v51  ;;  %v4251_v43 = vsel %vm1260_vm1, %v10993_v7, -inf }
 0xfc4   : > { %v7563_v36 = vpop.eup %7562 }
 0xfc5   : > { %v4226_v20 = vpop.xlane.xlu0 %4225  ;;  %v4810_v24 = vmul.f32 %v7563_v36, %v11008_v4 }
 0xfc6   : > { %v4370_v15 = vsub.f32 %v10897_v57, %v4226_v20  ;;  %v4245_v57 = vsel %vm1260_vm1, %v10961_v53, -inf }
 0xfc7   : > { %6870 = vmatmul.msk.f32.gmra.mxu2 %vm1260_vm1, %v4810_v24 }
 0xfc8   : > { %v11097_v32 = vpop.eup %7564  ;;  %v4457_v3 = vmul.f32 1.442695, %v4370_v15 }
 0xfc9   : > { %v4605_v40 = vsel %vm1260_vm1, %v11097_v32, 0.0 }
 0xfca   : > { %7566 = vpow2.f32 %v4457_v3  ;;  %4606 = vadd.xlane.f32.xlu2 %v4605_v40  ;;  %4243 = vmax.xlane.f32.xlu0 %v4242_v13  ;;  %v4254_v40 = vsel %vm1260_vm1, %v11006_v19, -inf }
 0xfd0   : > { %v11103_v10 = vpop.eup %7566 }
 0xfd1   : > { %v4608_v4 = vsel %vm1260_vm1, %v11103_v10, 0.0 }
 0xfd2   : > { %4609 = vadd.xlane.f32.xlu1 %v4608_v4  ;;  %4246 = vmax.xlane.f32.xlu2 %v4245_v57 }
 0xfda   : > { %4249 = vmax.xlane.f32.xlu1 %v4248_v49 }
0x100d   : > { %v4589_v54 = vpop.xlane.xlu2 %4588 }
0x100e   : > { %7568 = vrcp.f32 %v4589_v54 }
0x1014   : > { %v7569_v8 = vpop.eup %7568 }
0x1015   : > { %v4592_v25 = vpop.xlane.xlu1 %4591  ;;  %v4229_v42 = vpop.xlane.xlu2 %4228  ;;  %v4811_v28 = vmul.f32 %v7569_v8, %v11045_v61 }
0x1016   : > { %7570 = vrcp.f32 %v4592_v25  ;;  %v4371_v62 = vsub.f32 %v10900_v29, %v4229_v42  ;;  %v4257_v25 = vsel %vm1260_vm1, %v11018_v31, -inf }
0x1017   : > { %6871 = vmatmul.msk.f32.gmra.mxu2 %vm1260_vm1, %v4811_v28 }
0x1018   : > { %v4459_v27 = vmul.f32 1.442695, %v4371_v62 }
0x101a   : > { %7572 = vpow2.f32 %v4459_v27 }
0x101c   : > { %v7571_v16 = vpop.eup %7570 }
0x101d   : > { %v4595_v37 = vpop.xlane.xlu0 %4594  ;;  %v4232_v48 = vpop.xlane.xlu1 %4231  ;;  %v4812_v44 = vmul.f32 %v7571_v16, %v11052_v5 }
0x101e   : > { %7574 = vrcp.f32 %v4595_v37  ;;  %v4372_v46 = vsub.f32 %v10903_v41, %v4232_v48  ;;  %v4260_v48 = vsel %vm1260_vm1, %v11024_v56, -inf }
0x101f   : > { %6872 = vmatmul.msk.f32.gmra.mxu2 %vm1260_vm1, %v4812_v44 }
0x1020   : > { %v11117_v35 = vpop.eup %7572  ;;  %v4461_v61 = vmul.f32 1.442695, %v4372_v46 }
0x1021   : > { %v4611_v29 = vsel %vm1260_vm1, %v11117_v35, 0.0 }
0x1022   : > { %7576 = vpow2.f32 %v4461_v61  ;;  %4612 = vadd.xlane.f32.xlu0 %v4611_v29 }
0x1024   : > { %v7575_v52 = vpop.eup %7574 }
0x1025   : > { %v4598_v26 = vpop.xlane.xlu2 %4597  ;;  %v4235_v33 = vpop.xlane.xlu0 %4234  ;;  %v4813_v6 = vmul.f32 %v7575_v52, %v11061_v55 }
0x1026   : > { %7578 = vrcp.f32 %v4598_v26  ;;  %v4373_v5 = vsub.f32 %v10906_v47, %v4235_v33  ;;  %v4263_v33 = vsel %vm1260_vm1, %v11027_v9, -inf }
0x1027   : > { %6873 = vmatmul.msk.f32.gmra.mxu2 %vm1260_vm1, %v4813_v6 }
0x1028   : > { %v11124_v41 = vpop.eup %7576  ;;  %v4463_v45 = vmul.f32 1.442695, %v4373_v5 }
0x1029   : > { %v4614_v1 = vsel %vm1260_vm1, %v11124_v41, 0.0 }
0x102a   : > { %7580 = vpow2.f32 %v4463_v45  ;;  %4615 = vadd.xlane.f32.xlu2 %v4614_v1  ;;  %4252 = vmax.xlane.f32.xlu0 %v4251_v43 }
0x102c   : > { %v7579_v51 = vpop.eup %7578 }
0x102d   : > { %v4601_v36 = vpop.xlane.xlu1 %4600  ;;  %v4238_v55 = vpop.xlane.xlu2 %4237  ;;  %v4814_v20 = vmul.f32 %v7579_v51, %v11070_v17  ;;  %v4266_v51 = vsel %vm1260_vm1, %v11030_v63, -inf }
0x102e   : > { %7582 = vrcp.f32 %v4601_v36  ;;  %v4374_v47 = vsub.f32 %v10919_v2, %v4238_v55  ;;  %v4272_v55 = vsel %vm1260_vm1, %v11037_v38, -inf }
0x102f   : > { %6874 = vmatmul.msk.f32.gmra.mxu2 %vm1260_vm1, %v4814_v20  ;;  %v11183_v20 = vpop.f32.mrf.mxu2 }
0x1030   : > { %v11133_v24 = vpop.eup %7580  ;;  %v4465_v15 = vmul.f32 1.442695, %v4374_v47 }
0x1031   : > { %v4617_v3 = vsel %vm1260_vm1, %v11133_v24, 0.0 }
0x1032   : > { %7584 = vpow2.f32 %v4465_v15  ;;  %4618 = vadd.xlane.f32.xlu1 %v4617_v3  ;;  %4255 = vmax.xlane.f32.xlu2 %v4254_v40 }
0x1034   : > { %v7583_v13 = vpop.eup %7582 }
0x1035   : > { %v4604_v4 = vpop.xlane.xlu0 %4603  ;;  %v4241_v17 = vpop.xlane.xlu1 %4240  ;;  %v4815_v57 = vmul.f32 %v7583_v13, %v11079_v60 }
0x1036   : > { %7586 = vrcp.f32 %v4604_v4  ;;  %v4375_v2 = vsub.f32 %v10930_v14, %v4241_v17 }
0x1037   : > { %6875 = vmatmul.msk.f32.gmra.mxu2 %vm1260_vm1, %v4815_v57  ;;  %v11185_v15 = vpop.f32.mrf.mxu2  ;;  %v11190_v57 = vpop.f32.mrf.mxu1 }
0x1038   : > { %v11142_v49 = vpop.eup %7584  ;;  %v4467_v54 = vmul.f32 1.442695, %v4375_v2 }
0x1039   : > { %v4620_v8 = vsel %vm1260_vm1, %v11142_v49, 0.0 }
0x103a   : > { %7588 = vpow2.f32 %v4467_v54  ;;  %4621 = vadd.xlane.f32.xlu0 %v4620_v8  ;;  %4258 = vmax.xlane.f32.xlu1 %v4257_v25 }
0x103c   : > { %v7587_v42 = vpop.eup %7586 }
0x103d   : > { %v4607_v28 = vpop.xlane.xlu2 %4606  ;;  %v4244_v60 = vpop.xlane.xlu0 %4243  ;;  %v4816_v62 = vmul.f32 %v7587_v42, %v11088_v18 }
0x103e   : > { %7590 = vrcp.f32 %v4607_v28  ;;  %v4376_v14 = vsub.f32 %v10945_v34, %v4244_v60 }
0x103f   : > { %6876 = vmatmul.msk.f32.gmra.mxu2 %vm1260_vm1, %v4816_v62  ;;  %v11192_v8 = vpop.f32.mrf.mxu2 }
0x1040   : > { %v11151_v27 = vpop.eup %7588  ;;  %v4469_v16 = vmul.f32 1.442695, %v4376_v14  ;;  %v11201_v14 = vpop.f32.mrf.mxu1 }
0x1041   : > { %v4623_v37 = vsel %vm1260_vm1, %v11151_v27, 0.0 }
0x1042   : > { %7592 = vpow2.f32 %v4469_v16  ;;  %4624 = vadd.xlane.f32.xlu2 %v4623_v37  ;;  %4261 = vmax.xlane.f32.xlu0 %v4260_v48 }
0x1044   : > { %v7591_v44 = vpop.eup %7590 }
0x1045   : > { %v4610_v46 = vpop.xlane.xlu1 %4609  ;;  %v4247_v18 = vpop.xlane.xlu2 %4246  ;;  %v4817_v61 = vmul.f32 %v7591_v44, %v11097_v32 }
0x1046   : > { %7594 = vrcp.f32 %v4610_v46  ;;  %v4377_v34 = vsub.f32 %v10961_v53, %v4247_v18 }
0x1047   : > { %6877 = vmatmul.msk.f32.gmra.mxu2 %vm1260_vm1, %v4817_v61  ;;  %v11204_v44 = vpop.f32.mrf.mxu2 }
0x1048   : > { %v11160_v29 = vpop.eup %7592  ;;  %v4471_v52 = vmul.f32 1.442695, %v4377_v34  ;;  %v4275_v34 = vsel %vm1260_vm1, %v11190_v57, -inf }
0x1049   : > { %v4626_v26 = vsel %vm1260_vm1, %v11160_v29, 0.0 }
0x104a   : > { %7596 = vpow2.f32 %v4471_v52  ;;  %4627 = vadd.xlane.f32.xlu1 %v4626_v26  ;;  %4264 = vmax.xlane.f32.xlu2 %v4263_v33  ;;  %v11214_v52 = vpop.f32.mrf.mxu1 }
0x104c   : > { %v7595_v6 = vpop.eup %7594 }
0x104d   : > { %v4250_v5 = vpop.xlane.xlu1 %4249  ;;  %v4818_v32 = vmul.f32 %v7595_v6, %v11103_v10 }
0x104e   : > { %v4378_v53 = vsub.f32 %v10980_v21, %v4250_v5  ;;  %v4269_v21 = vsel %vm1260_vm1, %v11033_v30, -inf }
0x104f   : > { %6878 = vmatmul.msk.f32.gmra.mxu2 %vm1260_vm1, %v4818_v32  ;;  %v11221_v32 = vpop.f32.mrf.mxu2 }
0x1050   : > { %v11169_v45 = vpop.eup %7596  ;;  %v4473_v1 = vmul.f32 1.442695, %v4378_v53 }
0x1051   : > { %v4629_v43 = vsel %vm1260_vm1, %v11169_v45, 0.0 }
0x1052   : > { %7598 = vpow2.f32 %v4473_v1  ;;  %4630 = vadd.xlane.f32.xlu0 %v4629_v43  ;;  %4267 = vmax.xlane.f32.xlu1 %v4266_v51  ;;  %v4278_v43 = vsel %vm1260_vm1, %v11201_v14, -inf }
0x1058   : > { %v11175_v36 = vpop.eup %7598 }
0x1059   : > { %v4632_v10 = vsel %vm1260_vm1, %v11175_v36, 0.0 }
0x105a   : > { %4633 = vadd.xlane.f32.xlu2 %v4632_v10  ;;  %4270 = vmax.xlane.f32.xlu0 %v4269_v21  ;;  %v11228_v21 = vpop.f32.mrf.mxu1 }
0x1062   : > { %4273 = vmax.xlane.f32.xlu2 %v4272_v55 }
0x1095   : > { %v4613_v47 = vpop.xlane.xlu0 %4612 }
0x1096   : > { %7600 = vrcp.f32 %v4613_v47 }
0x109c   : > { %v7601_v3 = vpop.eup %7600 }
0x109d   : > { %v4616_v40 = vpop.xlane.xlu2 %4615  ;;  %v4253_v13 = vpop.xlane.xlu0 %4252  ;;  %v4819_v4 = vmul.f32 %v7601_v3, %v11117_v35 }
0x109e   : > { %7602 = vrcp.f32 %v4616_v40  ;;  %v4379_v17 = vsub.f32 %v10993_v7, %v4253_v13  ;;  %v4281_v13 = vsel %vm1260_vm1, %v11214_v52, -inf }
0x109f   : > { %6879 = vmatmul.msk.f32.gmra.mxu2 %vm1260_vm1, %v4819_v4  ;;  %v11238_v4 = vpop.f32.mrf.mxu2 }
0x10a0   : > { %v4475_v2 = vmul.f32 1.442695, %v4379_v17 }
0x10a2   : > { %7604 = vpow2.f32 %v4475_v2 }
0x10a4   : > { %v7603_v54 = vpop.eup %7602 }
0x10a5   : > { %v4619_v25 = vpop.xlane.xlu1 %4618  ;;  %v4256_v42 = vpop.xlane.xlu2 %4255  ;;  %v4820_v28 = vmul.f32 %v7603_v54, %v11124_v41 }
0x10a6   : > { %7606 = vrcp.f32 %v4619_v25  ;;  %v4380_v60 = vsub.f32 %v11006_v19, %v4256_v42  ;;  %v11245_v42 = vpop.f32.mrf.mxu1 }
0x10a7   : > { %6880 = vmatmul.msk.f32.gmra.mxu2 %vm1260_vm1, %v4820_v28 }
0x10a8   : > { %v11197_v35 = vpop.eup %7604  ;;  %v4477_v7 = vmul.f32 1.442695, %v4380_v60 }
0x10a9   : > { %v4635_v62 = vsel %vm1260_vm1, %v11197_v35, 0.0 }
0x10aa   : > { %7608 = vpow2.f32 %v4477_v7  ;;  %4636 = vadd.xlane.f32.xlu1 %v4635_v62  ;;  %v4284_v7 = vsel %vm1260_vm1, %v11228_v21, -inf  ;;  %v11251_v62 = vpop.f32.mrf.mxu2 }
0x10ac   : > { %v7607_v16 = vpop.eup %7606 }
0x10ad   : > { %v4622_v37 = vpop.xlane.xlu0 %4621  ;;  %v4259_v48 = vpop.xlane.xlu1 %4258  ;;  %v4821_v41 = vmul.f32 %v7607_v16, %v11133_v24 }
0x10ae   : > { %7610 = vrcp.f32 %v4622_v37  ;;  %v4381_v19 = vsub.f32 %v11018_v31, %v4259_v48 }
0x10af   : > { %6881 = vmatmul.msk.f32.gmra.mxu2 %vm1260_vm1, %v4821_v41 }
0x10b0   : > { %v11208_v46 = vpop.eup %7608  ;;  %v4479_v18 = vmul.f32 1.442695, %v4381_v19 }
0x10b1   : > { %v4638_v61 = vsel %vm1260_vm1, %v11208_v46, 0.0 }
0x10b2   : > { %7612 = vpow2.f32 %v4479_v18  ;;  %4639 = vadd.xlane.f32.xlu0 %v4638_v61  ;;  %4276 = vmax.xlane.f32.xlu1 %v4275_v34  ;;  %v4287_v61 = vsel %vm1260_vm1, %v11245_v42, -inf  ;;  %v11262_v34 = vpop.f32.mrf.mxu1 }
0x10b4   : > { %v7611_v24 = vpop.eup %7610 }
0x10b5   : > { %v4625_v26 = vpop.xlane.xlu2 %4624  ;;  %v4262_v33 = vpop.xlane.xlu0 %4261  ;;  %v4822_v31 = vmul.f32 %v7611_v24, %v11142_v49 }
0x10b6   : > { %7614 = vrcp.f32 %v4625_v26  ;;  %v4382_v6 = vsub.f32 %v11024_v56, %v4262_v33  ;;  %v11266_v33 = vpop.f32.mrf.mxu2 }
0x10b7   : > { %6882 = vmatmul.msk.f32.gmra.mxu2 %vm1260_vm1, %v4822_v31 }
0x10b8   : > { %v11219_v5 = vpop.eup %7612  ;;  %v4481_v53 = vmul.f32 1.442695, %v4382_v6 }
0x10b9   : > { %v4641_v1 = vsel %vm1260_vm1, %v11219_v5, 0.0 }
0x10ba   : > { %7616 = vpow2.f32 %v4481_v53  ;;  %4642 = vadd.xlane.f32.xlu2 %v4641_v1  ;;  %4279 = vmax.xlane.f32.xlu0 %v4278_v43  ;;  %v4290_v1 = vsel %vm1260_vm1, %v11262_v34, -inf  ;;  %v11275_v43 = vpop.f32.mrf.mxu1 }
0x10bc   : > { %v7615_v49 = vpop.eup %7614 }
0x10bd   : > { %v4628_v51 = vpop.xlane.xlu1 %4627  ;;  %v4265_v10 = vpop.xlane.xlu2 %4264  ;;  %v4823_v56 = vmul.f32 %v7615_v49, %v11151_v27  ;;  %v4293_v49 = vsel %vm1260_vm1, %v11275_v43, -inf }
0x10be   : > { %7618 = vrcp.f32 %v4628_v51  ;;  %v4383_v55 = vsub.f32 %v11027_v9, %v4265_v10 }
0x10bf   : > { %6883 = vmatmul.msk.f32.gmra.mxu2 %vm1260_vm1, %v4823_v56  ;;  %v11287_v56 = vpop.f32.mrf.mxu2 }
0x10c0   : > { %v11232_v47 = vpop.eup %7616  ;;  %v4483_v3 = vmul.f32 1.442695, %v4383_v55 }
0x10c1   : > { %v4644_v40 = vsel %vm1260_vm1, %v11232_v47, 0.0 }
0x10c2   : > { %7620 = vpow2.f32 %v4483_v3  ;;  %4645 = vadd.xlane.f32.xlu1 %v4644_v40  ;;  %4282 = vmax.xlane.f32.xlu2 %v4281_v13  ;;  %v11283_v51 = vpop.f32.mrf.mxu1 }
0x10c3   : > { %v4296_v10 = vsel %vm1260_vm1, %v11283_v51, -inf }
0x10c4   : > { %v7619_v27 = vpop.eup %7618 }
0x10c5   : > { %v4631_v17 = vpop.xlane.xlu0 %4630  ;;  %v4268_v2 = vpop.xlane.xlu1 %4267  ;;  %v4824_v9 = vmul.f32 %v7619_v27, %v11160_v29 }
0x10c6   : > { %7622 = vrcp.f32 %v4631_v17  ;;  %v4384_v54 = vsub.f32 %v11030_v63, %v4268_v2 }
0x10c7   : > { %6884 = vmatmul.msk.f32.gmra.mxu2 %vm1260_vm1, %v4824_v9  ;;  %v11289_v3 = vpop.f32.mrf.mxu2 }
0x10c8   : > { %v11243_v25 = vpop.eup %7620  ;;  %v4485_v28 = vmul.f32 1.442695, %v4384_v54 }
0x10c9   : > { %v4647_v60 = vsel %vm1260_vm1, %v11243_v25, 0.0 }
0x10ca   : > { %7624 = vpow2.f32 %v4485_v28  ;;  %4648 = vadd.xlane.f32.xlu0 %v4647_v60  ;;  %4285 = vmax.xlane.f32.xlu1 %v4284_v7  ;;  %v11294_v9 = vpop.f32.mrf.mxu1 }
0x10cc   : > { %v7623_v29 = vpop.eup %7622 }
0x10cd   : > { %v4634_v63 = vpop.xlane.xlu2 %4633  ;;  %v4271_v16 = vpop.xlane.xlu0 %4270  ;;  %v4825_v37 = vmul.f32 %v7623_v29, %v11169_v45 }
0x10ce   : > { %7626 = vrcp.f32 %v4634_v63  ;;  %v4385_v48 = vsub.f32 %v11033_v30, %v4271_v16 }
0x10cf   : > { %6885 = vmatmul.msk.f32.gmra.mxu2 %vm1260_vm1, %v4825_v37  ;;  %v11296_v60 = vpop.f32.mrf.mxu2 }
0x10d0   : > { %v11256_v41 = vpop.eup %7624  ;;  %v4487_v19 = vmul.f32 1.442695, %v4385_v48 }
0x10d1   : > { %v4650_v18 = vsel %vm1260_vm1, %v11256_v41, 0.0 }
0x10d2   : > { %7628 = vpow2.f32 %v4487_v19  ;;  %4651 = vadd.xlane.f32.xlu2 %v4650_v18  ;;  %4288 = vmax.xlane.f32.xlu0 %v4287_v61  ;;  %v11305_v48 = vpop.f32.mrf.mxu1 }
0x10d4   : > { %v7627_v45 = vpop.eup %7626 }
0x10d5   : > { %v4274_v24 = vpop.xlane.xlu2 %4273  ;;  %v4826_v30 = vmul.f32 %v7627_v45, %v11175_v36 }
0x10d6   : > { %v4386_v26 = vsub.f32 %v11037_v38, %v4274_v24 }
0x10d7   : > { %6886 = vmatmul.msk.f32.gmra.mxu2 %vm1260_vm1, %v4826_v30  ;;  %v11308_v45 = vpop.f32.mrf.mxu2 }
0x10d8   : > { %v11269_v31 = vpop.eup %7628  ;;  %v4489_v6 = vmul.f32 1.442695, %v4386_v26 }
0x10d9   : > { %v4653_v53 = vsel %vm1260_vm1, %v11269_v31, 0.0 }
0x10da   : > { %7630 = vpow2.f32 %v4489_v6  ;;  %4654 = vadd.xlane.f32.xlu1 %v4653_v53  ;;  %4291 = vmax.xlane.f32.xlu2 %v4290_v1  ;;  %v4299_v6 = vsel %vm1260_vm1, %v11294_v9, -inf  ;;  %v11318_v53 = vpop.f32.mrf.mxu1 }
0x10e0   : > { %v11277_v36 = vpop.eup %7630 }
0x10e1   : > { %v4656_v38 = vsel %vm1260_vm1, %v11277_v36, 0.0 }
0x10e2   : > { %4657 = vadd.xlane.f32.xlu0 %v4656_v38  ;;  %4294 = vmax.xlane.f32.xlu1 %v4293_v49 }
0x10ea   : > { %4297 = vmax.xlane.f32.xlu0 %v4296_v10 }
0x111d   : > { %v4637_v55 = vpop.xlane.xlu1 %4636 }
0x111e   : > { %7632 = vrcp.f32 %v4637_v55  ;;  %v11325_v55 = vpop.f32.mrf.mxu2 }
0x1124   : > { %v7633_v40 = vpop.eup %7632 }
0x1125   : > { %v4640_v13 = vpop.xlane.xlu0 %4639  ;;  %v4277_v27 = vpop.xlane.xlu1 %4276  ;;  %v4827_v17 = vmul.f32 %v7633_v40, %v11197_v35 }
0x1126   : > { %7634 = vrcp.f32 %v4640_v13  ;;  %v4387_v2 = vsub.f32 %v11190_v57, %v4277_v27  ;;  %v4302_v27 = vsel %vm1260_vm1, %v11305_v48, -inf }
0x1127   : > { %6887 = vmatmul.msk.f32.gmra.mxu2 %vm1260_vm1, %v4827_v17 }
0x1128   : > { %v4491_v54 = vmul.f32 1.442695, %v4387_v2 }
0x112a   : > { %7636 = vpow2.f32 %v4491_v54 }
0x112c   : > { %v7635_v28 = vpop.eup %7634 }
0x112d   : > { %v4643_v7 = vpop.xlane.xlu2 %4642  ;;  %v4280_v29 = vpop.xlane.xlu0 %4279  ;;  %v4828_v63 = vmul.f32 %v7635_v28, %v11208_v46 }
0x112e   : > { %7638 = vrcp.f32 %v4643_v7  ;;  %v4388_v16 = vsub.f32 %v11201_v14, %v4280_v29  ;;  %v11335_v28 = vpop.f32.mrf.mxu1 }
0x112f   : > { %6888 = vmatmul.msk.f32.gmra.mxu2 %vm1260_vm1, %v4828_v63 }
0x1130   : > { %v11301_v35 = vpop.eup %7636  ;;  %v4493_v57 = vmul.f32 1.442695, %v4388_v16 }
0x1131   : > { %v4659_v37 = vsel %vm1260_vm1, %v11301_v35, 0.0 }
0x1132   : > { %7640 = vpow2.f32 %v4493_v57  ;;  %4660 = vadd.xlane.f32.xlu2 %v4659_v37  ;;  %v4305_v57 = vsel %vm1260_vm1, %v11318_v53, -inf  ;;  %v11345_v37 = vpop.f32.mrf.mxu2 }
0x1134   : > { %v7639_v19 = vpop.eup %7638 }
0x1135   : > { %v4646_v18 = vpop.xlane.xlu1 %4645  ;;  %v4283_v61 = vpop.xlane.xlu2 %4282  ;;  %v4829_v46 = vmul.f32 %v7639_v19, %v11219_v5 }
0x1136   : > { %7642 = vrcp.f32 %v4646_v18  ;;  %v4389_v14 = vsub.f32 %v11214_v52, %v4283_v61 }
0x1137   : > { %6889 = vmatmul.msk.f32.gmra.mxu2 %vm1260_vm1, %v4829_v46 }
0x1138   : > { %v11312_v24 = vpop.eup %7640  ;;  %v4495_v30 = vmul.f32 1.442695, %v4389_v14  ;;  %v11352_v14 = vpop.f32.mrf.mxu1 }
0x1139   : > { %v4662_v26 = vsel %vm1260_vm1, %v11312_v24, 0.0 }
0x113a   : > { %7644 = vpow2.f32 %v4495_v30  ;;  %4663 = vadd.xlane.f32.xlu1 %v4662_v26  ;;  %4300 = vmax.xlane.f32.xlu2 %v4299_v6  ;;  %v4308_v6 = vsel %vm1260_vm1, %v11335_v28, -inf }
0x113c   : > { %v7643_v5 = vpop.eup %7642 }
0x113d   : > { %v4649_v1 = vpop.xlane.xlu0 %4648  ;;  %v4286_v38 = vpop.xlane.xlu1 %4285  ;;  %v4830_v52 = vmul.f32 %v7643_v5, %v11232_v47 }
0x113e   : > { %7646 = vrcp.f32 %v4649_v1  ;;  %v4390_v49 = vsub.f32 %v11228_v21, %v4286_v38  ;;  %v6934_v21 = vld [vmem:[%s12771_s4 + $0xf8] sm:$0xff]  ;;  %v11361_v5 = vpop.f32.mrf.mxu2 }
0x113f   : > { %6890 = vmatmul.msk.f32.gmra.mxu2 %vm1260_vm1, %v4830_v52  ;;  %5397 = vmatpush.msra.mxu3 %v6934_v21  ;;  %v4311_v21 = vsel %vm1260_vm1, %v11352_v14, -inf }
0x1140   : > { %v11323_v10 = vpop.eup %7644  ;;  %v4497_v40 = vmul.f32 1.442695, %v4390_v49 }
0x1141   : > { %v4665_v13 = vsel %vm1260_vm1, %v11323_v10, 0.0 }
0x1142   : > { %7648 = vpow2.f32 %v4497_v40  ;;  %4666 = vadd.xlane.f32.xlu0 %v4665_v13  ;;  %4303 = vmax.xlane.f32.xlu1 %v4302_v27 }
0x1144   : > { %v7647_v47 = vpop.eup %7646 }
0x1145   : > { %v4652_v17 = vpop.xlane.xlu2 %4651  ;;  %v4289_v2 = vpop.xlane.xlu0 %4288  ;;  %v4831_v54 = vmul.f32 %v7647_v47, %v11243_v25 }
0x1146   : > { %7650 = vrcp.f32 %v4652_v17  ;;  %v4391_v7 = vsub.f32 %v11245_v42, %v4289_v2  ;;  %v11372_v47 = vpop.f32.mrf.mxu1 }
0x1147   : > { %6891 = vmatmul.msk.f32.gmra.mxu2 %vm1260_vm1, %v4831_v54  ;;  %v11376_v54 = vpop.f32.mrf.mxu2 }
0x1148   : > { %v11339_v29 = vpop.eup %7648  ;;  %v4499_v63 = vmul.f32 1.442695, %v4391_v7 }
0x1149   : > { %v4668_v16 = vsel %vm1260_vm1, %v11339_v29, 0.0 }
0x114a   : > { %7652 = vpow2.f32 %v4499_v63  ;;  %4669 = vadd.xlane.f32.xlu2 %v4668_v16  ;;  %4306 = vmax.xlane.f32.xlu0 %v4305_v57  ;;  %v4314_v57 = vsel %vm1260_vm1, %v11372_v47, -inf }
0x114c   : > { %v7651_v25 = vpop.eup %7650 }
0x114d   : > { %v4655_v19 = vpop.xlane.xlu1 %4654  ;;  %v4292_v18 = vpop.xlane.xlu2 %4291  ;;  %v4832_v42 = vmul.f32 %v7651_v25, %v11256_v41  ;;  %v6933_v41 = vld [vmem:[%s12771_s4 + $0xf0] sm:$0xff] }
0x114e   : > { %7654 = vrcp.f32 %v4655_v19  ;;  %v4392_v61 = vsub.f32 %v11262_v34, %v4292_v18  ;;  %5398 = vmatpush.msra.mxu3 %v6933_v41  ;;  %v11385_v25 = vpop.f32.mrf.mxu1  ;;  %v6931_v41 = vld [vmem:[%s12771_s4 + $0xe0] sm:$0xff] }
0x114f   : > { %6892 = vmatmul.msk.f32.gmra.mxu2 %vm1260_vm1, %v4832_v42  ;;  %v4317_v19 = vsel %vm1260_vm1, %v11385_v25, -inf }
0x1150   : > { %v11350_v46 = vpop.eup %7652  ;;  %v4501_v30 = vmul.f32 1.442695, %v4392_v61  ;;  %v6932_v61 = vld [vmem:[%s12771_s4 + $0xe8] sm:$0xff] }
0x1151   : > { %v4671_v26 = vsel %vm1260_vm1, %v11350_v46, 0.0  ;;  %5399 = vmatpush.msra.mxu3 %v6932_v61 }
0x1152   : > { %7656 = vpow2.f32 %v4501_v30  ;;  %4672 = vadd.xlane.f32.xlu1 %v4671_v26  ;;  %4309 = vmax.xlane.f32.xlu2 %v4308_v6  ;;  %v11400_v30 = vpop.f32.mrf.mxu2 }
0x1153   : > { %5400 = vmatpush.msra.mxu3 %v6931_v41 }
0x1154   : > { %v7655_v34 = vpop.eup %7654 }
0x1155   : > { %v4658_v1 = vpop.xlane.xlu0 %4657  ;;  %v4295_v38 = vpop.xlane.xlu1 %4294  ;;  %v4833_v52 = vmul.f32 %v7655_v34, %v11269_v31 }
0x1156   : > { %7658 = vrcp.f32 %v4658_v1  ;;  %v4393_v49 = vsub.f32 %v11275_v43, %v4295_v38  ;;  %v11393_v18 = vpop.f32.mrf.mxu1 }
0x1157   : > { %6893 = vmatmul.msk.f32.gmra.mxu2 %vm1260_vm1, %v4833_v52  ;;  %v4320_v42 = vsel %vm1260_vm1, %v11393_v18, -inf }
0x1158   : > { %v11366_v40 = vpop.eup %7656  ;;  %v4503_v13 = vmul.f32 1.442695, %v4393_v49 }
0x1159   : > { %v4674_v27 = vsel %vm1260_vm1, %v11366_v40, 0.0 }
0x115a   : > { %7660 = vpow2.f32 %v4503_v13  ;;  %4675 = vadd.xlane.f32.xlu0 %v4674_v27  ;;  %4312 = vmax.xlane.f32.xlu1 %v4311_v21  ;;  %v11402_v6 = vpop.f32.mrf.mxu2 }
0x115c   : > { %v7659_v31 = vpop.eup %7658 }
0x115d   : > { %v4298_v17 = vpop.xlane.xlu0 %4297  ;;  %v4834_v43 = vmul.f32 %v7659_v31, %v11277_v36 }
0x115e   : > { %v4394_v2 = vsub.f32 %v11283_v51, %v4298_v17  ;;  %v11410_v13 = vpop.f32.mrf.mxu1 }
0x115f   : > { %6894 = vmatmul.msk.f32.gmra.mxu2 %vm1260_vm1, %v4834_v43 }
0x1160   : > { %v11379_v7 = vpop.eup %7660  ;;  %v4505_v63 = vmul.f32 1.442695, %v4394_v2 }
0x1161   : > { %v4677_v16 = vsel %vm1260_vm1, %v11379_v7, 0.0 }
0x1162   : > { %7662 = vpow2.f32 %v4505_v63  ;;  %4678 = vadd.xlane.f32.xlu2 %v4677_v16  ;;  %4315 = vmax.xlane.f32.xlu0 %v4314_v57  ;;  %v11412_v31 = vpop.f32.mrf.mxu2 }
0x1166   : > { %v11421_v57 = vpop.f32.mrf.mxu1 }
0x1168   : > { %v11387_v36 = vpop.eup %7662 }
0x1169   : > { %v4680_v51 = vsel %vm1260_vm1, %v11387_v36, 0.0 }
0x116a   : > { %4681 = vadd.xlane.f32.xlu1 %v4680_v51  ;;  %4318 = vmax.xlane.f32.xlu2 %v4317_v19  ;;  %v11424_v61 = vpop.f32.mrf.mxu2 }
0x1172   : > { %4321 = vmax.xlane.f32.xlu1 %v4320_v42 }
0x11a5   : > { %v4661_v26 = vpop.xlane.xlu2 %4660 }
0x11a6   : > { %7664 = vrcp.f32 %v4661_v26 }
0x11ac   : > { %v7665_v34 = vpop.eup %7664 }
0x11ad   : > { %v4664_v1 = vpop.xlane.xlu1 %4663  ;;  %v4301_v38 = vpop.xlane.xlu2 %4300  ;;  %v4835_v52 = vmul.f32 %v7665_v34, %v11301_v35 }
0x11ae   : > { %7666 = vrcp.f32 %v4664_v1  ;;  %v4395_v49 = vsub.f32 %v11294_v9, %v4301_v38  ;;  %v4323_v1 = vsel %vm1260_vm1, %v11410_v13, -inf  ;;  %v11434_v38 = vpop.f32.mrf.mxu1 }
0x11af   : > { %6895 = vmatmul.msk.f32.gmra.mxu2 %vm1260_vm1, %v4835_v52 }
0x11b0   : > { %v4507_v27 = vmul.f32 1.442695, %v4395_v49 }
0x11b2   : > { %7668 = vpow2.f32 %v4507_v27 }
0x11b4   : > { %v7667_v21 = vpop.eup %7666 }
0x11b5   : > { %v4667_v17 = vpop.xlane.xlu0 %4666  ;;  %v4304_v43 = vpop.xlane.xlu1 %4303  ;;  %v4836_v2 = vmul.f32 %v7667_v21, %v11312_v24 }
0x11b6   : > { %7670 = vrcp.f32 %v4667_v17  ;;  %v4396_v63 = vsub.f32 %v11305_v48, %v4304_v43  ;;  %v11441_v17 = vpop.f32.mrf.mxu2 }
0x11b7   : > { %6896 = vmatmul.msk.f32.gmra.mxu2 %vm1260_vm1, %v4836_v2 }
0x11b8   : > { %v11417_v35 = vpop.eup %7668  ;;  %v4509_v9 = vmul.f32 1.442695, %v4396_v63  ;;  %v4326_v63 = vsel %vm1260_vm1, %v11421_v57, -inf }
0x11b9   : > { %v4683_v16 = vsel %vm1260_vm1, %v11417_v35, 0.0 }
0x11ba   : > { %7672 = vpow2.f32 %v4509_v9  ;;  %4684 = vadd.xlane.f32.xlu0 %v4683_v16 }
0x11bc   : > { %v7671_v51 = vpop.eup %7670 }
0x11bd   : > { %v4670_v19 = vpop.xlane.xlu2 %4669  ;;  %v4307_v42 = vpop.xlane.xlu0 %4306  ;;  %v4837_v24 = vmul.f32 %v7671_v51, %v11323_v10 }
0x11be   : > { %7674 = vrcp.f32 %v4670_v19  ;;  %v4397_v48 = vsub.f32 %v11318_v53, %v4307_v42  ;;  %v11451_v19 = vpop.f32.mrf.mxu1 }
0x11bf   : > { %6897 = vmatmul.msk.f32.gmra.mxu2 %vm1260_vm1, %v4837_v24 }
0x11c0   : > { %v11428_v26 = vpop.eup %7672  ;;  %v4511_v41 = vmul.f32 1.442695, %v4397_v48 }
0x11c1   : > { %v4686_v34 = vsel %vm1260_vm1, %v11428_v26, 0.0 }
0x11c2   : > { %7676 = vpow2.f32 %v4511_v41  ;;  %4687 = vadd.xlane.f32.xlu2 %v4686_v34  ;;  %4324 = vmax.xlane.f32.xlu0 %v4323_v1  ;;  %v4329_v34 = vsel %vm1260_vm1, %v11434_v38, -inf  ;;  %v11461_v1 = vpop.f32.mrf.mxu2 }
0x11c4   : > { %v7675_v10 = vpop.eup %7674 }
0x11c5   : > { %v4673_v52 = vpop.xlane.xlu1 %4672  ;;  %v4310_v49 = vpop.xlane.xlu2 %4309  ;;  %v4838_v53 = vmul.f32 %v7675_v10, %v11339_v29 }
0x11c6   : > { %7678 = vrcp.f32 %v4673_v52  ;;  %v4398_v27 = vsub.f32 %v11335_v28, %v4310_v49  ;;  %v6930_v28 = vld [vmem:[%s12771_s4 + $0xd8] sm:$0xff] }
0x11c7   : > { %6898 = vmatmul.msk.f32.gmra.mxu2 %vm1260_vm1, %v4838_v53  ;;  %5401 = vmatpush.msra.mxu3 %v6930_v28 }
0x11c8   : > { %v11439_v21 = vpop.eup %7676  ;;  %v4513_v43 = vmul.f32 1.442695, %v4398_v27  ;;  %v11468_v27 = vpop.f32.mrf.mxu1 }
0x11c9   : > { %v4689_v2 = vsel %vm1260_vm1, %v11439_v21, 0.0 }
0x11ca   : > { %7680 = vpow2.f32 %v4513_v43  ;;  %4690 = vadd.xlane.f32.xlu1 %v4689_v2  ;;  %4327 = vmax.xlane.f32.xlu2 %v4326_v63  ;;  %v4332_v63 = vsel %vm1260_vm1, %v11451_v19, -inf }
0x11cc   : > { %v7679_v29 = vpop.eup %7678 }
0x11cd   : > { %v4676_v9 = vpop.xlane.xlu0 %4675  ;;  %v4313_v16 = vpop.xlane.xlu1 %4312  ;;  %v4839_v51 = vmul.f32 %v7679_v29, %v11350_v46 }
0x11ce   : > { %7682 = vrcp.f32 %v4676_v9  ;;  %v4399_v42 = vsub.f32 %v11352_v14, %v4313_v16  ;;  %v11480_v29 = vpop.f32.mrf.mxu2 }
0x11cf   : > { %6899 = vmatmul.msk.f32.gmra.mxu2 %vm1260_vm1, %v4839_v51 }
0x11d0   : > { %v11455_v24 = vpop.eup %7680  ;;  %v4515_v48 = vmul.f32 1.442695, %v4399_v42 }
0x11d1   : > { %v4692_v41 = vsel %vm1260_vm1, %v11455_v24, 0.0 }
0x11d2   : > { %7684 = vpow2.f32 %v4515_v48  ;;  %4693 = vadd.xlane.f32.xlu0 %v4692_v41  ;;  %4330 = vmax.xlane.f32.xlu1 %v4329_v34 }
0x11d4   : > { %v7683_v46 = vpop.eup %7682 }
0x11d5   : > { %v4679_v10 = vpop.xlane.xlu2 %4678  ;;  %v4316_v52 = vpop.xlane.xlu0 %4315  ;;  %v4840_v14 = vmul.f32 %v7683_v46, %v11366_v40  ;;  %v6929_v40 = vld [vmem:[%s12771_s4 + $0xd0] sm:$0xff]  ;;  %v4335_v46 = vsel %vm1260_vm1, %v11468_v27, -inf }
0x11d6   : > { %7686 = vrcp.f32 %v4679_v10  ;;  %v4400_v49 = vsub.f32 %v11372_v47, %v4316_v52  ;;  %v6928_v47 = vld [vmem:[%s12771_s4 + $0xc8] sm:$0xff]  ;;  %5402 = vmatpush.msra.mxu3 %v6929_v40  ;;  %v11491_v10 = vpop.f32.mrf.mxu1 }
0x11d7   : > { %6900 = vmatmul.msk.f32.gmra.mxu2 %vm1260_vm1, %v4840_v14  ;;  %v4338_v40 = vsel %vm1260_vm1, %v11491_v10, -inf }
0x11d8   : > { %v11466_v53 = vpop.eup %7684  ;;  %v4517_v43 = vmul.f32 1.442695, %v4400_v49  ;;  %5403 = vmatpush.msra.mxu3 %v6928_v47  ;;  %v11495_v49 = vpop.f32.mrf.mxu2 }
0x11d9   : > { %v4695_v2 = vsel %vm1260_vm1, %v11466_v53, 0.0 }
0x11da   : > { %7688 = vpow2.f32 %v4517_v43  ;;  %4696 = vadd.xlane.f32.xlu2 %v4695_v2  ;;  %4333 = vmax.xlane.f32.xlu0 %v4332_v63 }
0x11dc   : > { %v7687_v28 = vpop.eup %7686 }
0x11dd   : > { %v4682_v9 = vpop.xlane.xlu1 %4681  ;;  %v4319_v16 = vpop.xlane.xlu2 %4318  ;;  %v4841_v51 = vmul.f32 %v7687_v28, %v11379_v7 }
0x11de   : > { %7690 = vrcp.f32 %v4682_v9  ;;  %v4401_v42 = vsub.f32 %v11385_v25, %v4319_v16  ;;  %v11504_v47 = vpop.f32.mrf.mxu1 }
0x11df   : > { %6901 = vmatmul.msk.f32.gmra.mxu2 %vm1260_vm1, %v4841_v51  ;;  %v4341_v28 = vsel %vm1260_vm1, %v11504_v47, -inf }
0x11e0   : > { %v11485_v48 = vpop.eup %7688  ;;  %v4519_v41 = vmul.f32 1.442695, %v4401_v42  ;;  %v11516_v51 = vpop.f32.mrf.mxu2 }
0x11e1   : > { %v4698_v34 = vsel %vm1260_vm1, %v11485_v48, 0.0 }
0x11e2   : > { %7692 = vpow2.f32 %v4519_v41  ;;  %4699 = vadd.xlane.f32.xlu1 %v4698_v34  ;;  %4336 = vmax.xlane.f32.xlu2 %v4335_v46  ;;  %v6927_v46 = vld [vmem:[%s12771_s4 + $0xc0] sm:$0xff] }
0x11e3   : > { %5404 = vmatpush.msra.mxu3 %v6927_v46 }
0x11e4   : > { %v7691_v7 = vpop.eup %7690 }
0x11e5   : > { %v4322_v52 = vpop.xlane.xlu1 %4321  ;;  %v4842_v25 = vmul.f32 %v7691_v7, %v11387_v36 }
0x11e6   : > { %v4402_v14 = vsub.f32 %v11393_v18, %v4322_v52  ;;  %v11512_v9 = vpop.f32.mrf.mxu1 }
0x11e7   : > { %6902 = vmatmul.msk.f32.gmra.mxu2 %vm1260_vm1, %v4842_v25  ;;  %v4344_v16 = vsel %vm1260_vm1, %v11512_v9, -inf }
0x11e8   : > { %v11498_v43 = vpop.eup %7692  ;;  %v4521_v2 = vmul.f32 1.442695, %v4402_v14  ;;  %v11518_v42 = vpop.f32.mrf.mxu2 }
0x11e9   : > { %v4701_v63 = vsel %vm1260_vm1, %v11498_v43, 0.0 }
0x11ea   : > { %7694 = vpow2.f32 %v4521_v2  ;;  %4702 = vadd.xlane.f32.xlu0 %v4701_v63  ;;  %4339 = vmax.xlane.f32.xlu1 %v4338_v40 }
0x11f0   : > { %v11506_v36 = vpop.eup %7694  ;;  %v11520_v41 = vpop.f32.mrf.mxu2 }
0x11f1   : > { %v4704_v18 = vsel %vm1260_vm1, %v11506_v36, 0.0 }
0x11f2   : > { %4705 = vadd.xlane.f32.xlu2 %v4704_v18  ;;  %4342 = vmax.xlane.f32.xlu0 %v4341_v28 }
0x11f8   : > { %v11522_v34 = vpop.f32.mrf.mxu2 }
0x11fa   : > { %4345 = vmax.xlane.f32.xlu2 %v4344_v16 }
0x1200   : > { %v11527_v52 = vpop.f32.mrf.mxu2 }
0x1208   : > { %v11532_v16 = vpop.f32.mrf.mxu2 }
0x122d   : > { %v4685_v7 = vpop.xlane.xlu0 %4684 }
0x122e   : > { %7696 = vrcp.f32 %v4685_v7 }
0x1234   : > { %v7697_v25 = vpop.eup %7696 }
0x1235   : > { %v4688_v14 = vpop.xlane.xlu2 %4687  ;;  %v4325_v2 = vpop.xlane.xlu0 %4324  ;;  %v4843_v63 = vmul.f32 %v7697_v25, %v11417_v35 }
0x1236   : > { %7698 = vrcp.f32 %v4688_v14  ;;  %v4403_v40 = vsub.f32 %v11410_v13, %v4325_v2 }
0x1237   : > { %6903 = vmatmul.msk.f32.gmra.mxu2 %vm1260_vm1, %v4843_v63 }
0x1238   : > { %v4523_v18 = vmul.f32 1.442695, %v4403_v40 }
0x123a   : > { %7700 = vpow2.f32 %v4523_v18  ;;  %v11542_v18 = vpop.f32.mrf.mxu2 }
0x123c   : > { %v7699_v28 = vpop.eup %7698 }
0x123d   : > { %v4691_v46 = vpop.xlane.xlu1 %4690  ;;  %v4328_v12 = vpop.xlane.xlu2 %4327  ;;  %v4844_v7 = vmul.f32 %v7699_v28, %v11428_v26  ;;  %v6926_v28 = vld [vmem:[%s12771_s4 + $0xb8] sm:$0xff] }
0x123e   : > { %7702 = vrcp.f32 %v4691_v46  ;;  %v4404_v58 = vsub.f32 %v11421_v57, %v4328_v12  ;;  %5405 = vmatpush.msra.mxu3 %v6926_v28 }
0x123f   : > { %6904 = vmatmul.msk.f32.gmra.mxu2 %vm1260_vm1, %v4844_v7 }
0x1240   : > { %v11537_v35 = vpop.eup %7700  ;;  %v4525_v25 = vmul.f32 1.442695, %v4404_v58 }
0x1241   : > { %v4707_v13 = vsel %vm1260_vm1, %v11537_v35, 0.0 }
0x1242   : > { %7704 = vpow2.f32 %v4525_v25  ;;  %4708 = vadd.xlane.f32.xlu1 %v4707_v13 }
0x1244   : > { %v7703_v14 = vpop.eup %7702 }
0x1245   : > { %v4694_v2 = vpop.xlane.xlu0 %4693  ;;  %v4331_v63 = vpop.xlane.xlu1 %4330  ;;  %v4845_v40 = vmul.f32 %v7703_v14, %v11439_v21 }
0x1246   : > { %7706 = vrcp.f32 %v4694_v2  ;;  %v4405_v12 = vsub.f32 %v11434_v38, %v4331_v63  ;;  %v11558_v14 = vpop.f32.mrf.mxu2 }
0x1247   : > { %6905 = vmatmul.msk.f32.gmra.mxu2 %vm1260_vm1, %v4845_v40  ;;  %12826 = vst [vmem:[#allocation11_spill] sm:$0xff] %v11558_v14 }
0x1248   : > { %v11546_v57 = vpop.eup %7704  ;;  %v4527_v58 = vmul.f32 1.442695, %v4405_v12 }
0x1249   : > { %v4710_v26 = vsel %vm1260_vm1, %v11546_v57, 0.0 }
0x124a   : > { %7708 = vpow2.f32 %v4527_v58  ;;  %4711 = vadd.xlane.f32.xlu0 %v4710_v26 }
0x124c   : > { %v7707_v21 = vpop.eup %7706 }
0x124d   : > { %v4697_v46 = vpop.xlane.xlu2 %4696  ;;  %v4334_v7 = vpop.xlane.xlu0 %4333  ;;  %v4846_v38 = vmul.f32 %v7707_v21, %v11455_v24 }
0x124e   : > { %7710 = vrcp.f32 %v4697_v46  ;;  %v4406_v25 = vsub.f32 %v11451_v19, %v4334_v7  ;;  %v11567_v28 = vpop.f32.mrf.mxu2  ;;  %v6925_v7 = vld [vmem:[%s12771_s4 + $0xb0] sm:$0xff] }
0x124f   : > { %6906 = vmatmul.msk.f32.gmra.mxu2 %vm1260_vm1, %v4846_v38  ;;  %5406 = vmatpush.msra.mxu3 %v6925_v7 }
0x1250   : > { %v11556_v13 = vpop.eup %7708  ;;  %v4529_v2 = vmul.f32 1.442695, %v4406_v25 }
0x1251   : > { %v4713_v63 = vsel %vm1260_vm1, %v11556_v13, 0.0 }
0x1252   : > { %7712 = vpow2.f32 %v4529_v2  ;;  %4714 = vadd.xlane.f32.xlu1 %v4713_v63 }
0x1254   : > { %v7711_v40 = vpop.eup %7710 }
0x1255   : > { %v4700_v12 = vpop.xlane.xlu1 %4699  ;;  %v4337_v58 = vpop.xlane.xlu2 %4336  ;;  %v4847_v24 = vmul.f32 %v7711_v40, %v11466_v53  ;;  %v6924_v53 = vld [vmem:[%s12771_s4 + $0xa8] sm:$0xff] }
0x1256   : > { %7714 = vrcp.f32 %v4700_v12  ;;  %v4407_v19 = vsub.f32 %v11468_v27, %v4337_v58  ;;  %5407 = vmatpush.msra.mxu3 %v6924_v53 }
0x1257   : > { %6907 = vmatmul.msk.f32.gmra.mxu2 %vm1260_vm1, %v4847_v24  ;;  %v11584_v24 = vpop.f32.mrf.mxu2 }
0x1258   : > { %v11565_v26 = vpop.eup %7712  ;;  %v4531_v21 = vmul.f32 1.442695, %v4407_v19 }
0x1259   : > { %v4716_v46 = vsel %vm1260_vm1, %v11565_v26, 0.0 }
0x125a   : > { %7716 = vpow2.f32 %v4531_v21  ;;  %4717 = vadd.xlane.f32.xlu2 %v4716_v46 }
0x125c   : > { %v7715_v27 = vpop.eup %7714 }
0x125d   : > { %v4703_v38 = vpop.xlane.xlu0 %4702  ;;  %v4340_v25 = vpop.xlane.xlu1 %4339  ;;  %v4848_v2 = vmul.f32 %v7715_v27, %v11485_v48 }
0x125e   : > { %7718 = vrcp.f32 %v4703_v38  ;;  %v4408_v63 = vsub.f32 %v11491_v10, %v4340_v25 }
0x125f   : > { %6908 = vmatmul.msk.f32.gmra.mxu2 %vm1260_vm1, %v4848_v2  ;;  %v11593_v25 = vpop.f32.mrf.mxu2 }
0x1260   : > { %v11580_v40 = vpop.eup %7716  ;;  %v4533_v12 = vmul.f32 1.442695, %v4408_v63 }
0x1261   : > { %v4719_v58 = vsel %vm1260_vm1, %v11580_v40, 0.0 }
0x1262   : > { %7720 = vpow2.f32 %v4533_v12  ;;  %4720 = vadd.xlane.f32.xlu0 %v4719_v58 }
0x1264   : > { %v7719_v19 = vpop.eup %7718 }
0x1265   : > { %v4706_v21 = vpop.xlane.xlu2 %4705  ;;  %v4343_v46 = vpop.xlane.xlu0 %4342  ;;  %v4849_v48 = vmul.f32 %v7719_v19, %v11498_v43 }
0x1266   : > { %7722 = vrcp.f32 %v4706_v21  ;;  %v4409_v10 = vsub.f32 %v11504_v47, %v4343_v46 }
0x1267   : > { %6909 = vmatmul.msk.f32.gmra.mxu2 %vm1260_vm1, %v4849_v48  ;;  %v11602_v19 = vpop.f32.mrf.mxu2 }
0x1268   : > { %v11589_v7 = vpop.eup %7720  ;;  %v4535_v53 = vmul.f32 1.442695, %v4409_v10 }
0x1269   : > { %v4722_v27 = vsel %vm1260_vm1, %v11589_v7, 0.0 }
0x126a   : > { %7724 = vpow2.f32 %v4535_v53  ;;  %4723 = vadd.xlane.f32.xlu1 %v4722_v27  ;;  %v6923_v27 = vld [vmem:[%s12771_s4 + $0xa0] sm:$0xff] }
0x126b   : > { %5408 = vmatpush.msra.mxu3 %v6923_v27  ;;  %v6922_v27 = vld [vmem:[%s12771_s4 + $0x98] sm:$0xff] }
0x126c   : > { %v7723_v38 = vpop.eup %7722 }
0x126d   : > { %v4346_v2 = vpop.xlane.xlu2 %4345  ;;  %v4850_v63 = vmul.f32 %v7723_v38, %v11506_v36  ;;  %5409 = vmatpush.msra.mxu3 %v6922_v27 }
0x126e   : > { %v4410_v43 = vsub.f32 %v11512_v9, %v4346_v2 }
0x126f   : > { %6910 = vmatmul.msk.f32.gmra.mxu2 %vm1260_vm1, %v4850_v63  ;;  %v11605_v48 = vpop.f32.mrf.mxu2 }
0x1270   : > { %v11598_v47 = vpop.eup %7724  ;;  %v4537_v12 = vmul.f32 1.442695, %v4410_v43 }
0x1271   : > { %v4725_v58 = vsel %vm1260_vm1, %v11598_v47, 0.0 }
0x1272   : > { %7726 = vpow2.f32 %v4537_v12  ;;  %4726 = vadd.xlane.f32.xlu2 %v4725_v58 }
0x1277   : > { %v11607_v36 = vpop.f32.mrf.mxu2 }
0x1278   : > { %v7727_v21 = vpop.eup %7726 }
0x1279   : > { %v4728_v46 = vsel %vm1260_vm1, %v7727_v21, 0.0 }
0x127a   : > { %4729 = vadd.xlane.f32.xlu0 %v4728_v46 }
0x127f   : > { %v11609_v9 = vpop.f32.mrf.mxu2 }
0x1287   : > { %v11611_v10 = vpop.f32.mrf.mxu2 }
0x1288   : > { %12827 = vst [vmem:[#allocation12_spill] sm:$0xff] %v11611_v10  ;;  %v11711_v10 = vld [vmem:[%s12779_s12 + $0x5] ss:$0 sm:$0xff] }
0x128f   : > { %v11613_v53 = vpop.f32.mrf.mxu2 }
0x1297   : > { %v11618_v38 = vpop.f32.mrf.mxu2 }
0x129f   : > { %v11620_v63 = vpop.f32.mrf.mxu2 }
0x12a7   : > { %v11624_v22 = vpop.f32.mrf.mxu2 }
0x12b5   : > { %v4709_v2 = vpop.xlane.xlu1 %4708 }
0x12b6   : > { %7728 = vrcp.f32 %v4709_v2 }
0x12bc   : > { %v7729_v43 = vpop.eup %7728 }
0x12bd   : > { %v4712_v12 = vpop.xlane.xlu0 %4711  ;;  %v4851_v58 = vmul.f32 %v7729_v43, %v11537_v35  ;;  %v11632_v43 = vpop.f32.mrf.mxu2 }
0x12be   : > { %7730 = vrcp.f32 %v4712_v12 }
0x12bf   : > { %6911 = vmatmul.msk.f32.gmra.mxu2 %vm1260_vm1, %v4851_v58 }
0x12c4   : > { %v7731_v46 = vpop.eup %7730 }
0x12c5   : > { %v4715_v23 = vpop.xlane.xlu1 %4714  ;;  %v4852_v0 = vmul.f32 %v7731_v46, %v11546_v57  ;;  %v6920_v57 = vld [vmem:[%s12771_s4 + $0x88] sm:$0xff] }
0x12c6   : > { %7732 = vrcp.f32 %v4715_v23 }
0x12c7   : > { %6912 = vmatmul.msk.f32.gmra.mxu2 %vm1260_vm1, %v4852_v0  ;;  %v6921_v0 = vld [vmem:[%s12771_s4 + $0x90] sm:$0xff] }
0x12c8   : > { %5410 = vmatpush.msra.mxu3 %v6921_v0 }
0x12ca   : > { %5411 = vmatpush.msra.mxu3 %v6920_v57 }
0x12cc   : > { %v7733_v2 = vpop.eup %7732 }
0x12cd   : > { %v4718_v39 = vpop.xlane.xlu2 %4717  ;;  %v4853_v35 = vmul.f32 %v7733_v2, %v11556_v13  ;;  %v11643_v13 = vpop.f32.mrf.mxu2 }
0x12ce   : > { %7734 = vrcp.f32 %v4718_v39 }
0x12cf   : > { %6913 = vmatmul.msk.f32.gmra.mxu2 %vm1260_vm1, %v4853_v35 }
0x12d4   : > { %v7735_v12 = vpop.eup %7734 }
0x12d5   : > { %v4721_v58 = vpop.xlane.xlu0 %4720  ;;  %v4854_v23 = vmul.f32 %v7735_v12, %v11565_v26  ;;  %v11647_v26 = vpop.f32.mrf.mxu2 }
0x12d6   : > { %7736 = vrcp.f32 %v4721_v58 }
0x12d7   : > { %6914 = vmatmul.msk.f32.gmra.mxu2 %vm1260_vm1, %v4854_v23 }
0x12dc   : > { %v7737_v39 = vpop.eup %7736 }
0x12dd   : > { %v4724_v46 = vpop.xlane.xlu1 %4723  ;;  %v4855_v27 = vmul.f32 %v7737_v39, %v11580_v40  ;;  %v11651_v23 = vpop.f32.mrf.mxu2 }
0x12de   : > { %7738 = vrcp.f32 %v4724_v46  ;;  %12828 = vst [vmem:[#allocation13_spill] sm:$0xff] %v11651_v23  ;;  %v11702_v23 = vld [vmem:[%s12779_s12 + $0x4] ss:$0 sm:$0xff] }
0x12df   : > { %6915 = vmatmul.msk.f32.gmra.mxu2 %vm1260_vm1, %v4855_v27 }
0x12e4   : > { %v7739_v2 = vpop.eup %7738 }
0x12e5   : > { %v4727_v35 = vpop.xlane.xlu2 %4726  ;;  %v4856_v12 = vmul.f32 %v7739_v2, %v11589_v7  ;;  %v5212_v39 = vpop.f32.mrf.mxu2 }
0x12e6   : > { %7740 = vrcp.f32 %v4727_v35  ;;  %v6919_v35 = vld [vmem:[%s12771_s4 + $0x80] sm:$0xff] }
0x12e7   : > { %6916 = vmatmul.msk.f32.gmra.mxu2 %vm1260_vm1, %v4856_v12  ;;  %5412 = vmatpush.msra.mxu3 %v6919_v35 }
0x12ec   : > { %v7741_v58 = vpop.eup %7740 }
0x12ed   : > { %v4730_v0 = vpop.xlane.xlu0 %4729  ;;  %v4857_v57 = vmul.f32 %v7741_v58, %v11598_v47  ;;  %v5215_v27 = vpop.f32.mrf.mxu2 }
0x12ee   : > { %7742 = vrcp.f32 %v4730_v0  ;;  %v11679_v0 = vld [vmem:[%s12779_s12] ss:$0 sm:$0xff] }
0x12ef   : > { %6917 = vmatmul.msk.f32.gmra.mxu2 %vm1260_vm1, %v4857_v57  ;;  %v5260_v57 = vmul.f32 %v11679_v0, %v11183_v20 }
0x12f4   : > { %v7743_v40 = vpop.eup %7742 }
0x12f5   : > { %v4858_v46 = vmul.f32 %v7743_v40, %v7727_v21  ;;  %v11656_v11 = vpop.f32.mrf.mxu2  ;;  %v11672_v21 = vld [vmem:[%s12779_s12 + $0x1] ss:$0 sm:$0xff]  ;;  %v11686_v40 = vld [vmem:[%s12779_s12 + $0x2] ss:$0 sm:$0xff] }
0x12f6   : > { %v5268_v58 = vmul.f32 %v11672_v21, %v11287_v56  ;;  %v11693_v56 = vld [vmem:[%s12779_s12 + $0x3] ss:$0 sm:$0xff] }
0x12f7   : > { %6918 = vmatmul.msk.f32.gmra.mxu2 %vm1260_vm1, %v4858_v46  ;;  %v5276_v46 = vmul.f32 %v11686_v40, %v11400_v30  ;;  %v5284_v50 = vmul.f32 %v11693_v56, %v11516_v51  ;;  %v5292_v30 = vmul.f32 %v11702_v23, %v11567_v28  ;;  %v5300_v51 = vmul.f32 %v11711_v10, %v11613_v53  ;;  %v6996_v28 = vld [vmem:[%s12773_s6 + $0x3e0] sm:$0xff] }
0x12f8   : > { %v5324_v35 = vadd.f32 %v5268_v58, %v5260_v57  ;;  %v5269_v58 = vmul.f32 %v11672_v21, %v11289_v3  ;;  %v11722_v3 = vld [vmem:[%s12779_s12 + $0x6] ss:$0 sm:$0xff]  ;;  %5845 = vmatpush.msrb.mxu0 %v6996_v28  ;;  %7086 = vmatpush.msrb.mxu1 %v6996_v28 }
0x12fa   : > { %v5325_v20 = vadd.f32 %v5324_v35, %v5276_v46  ;;  %v5261_v46 = vmul.f32 %v11679_v0, %v11185_v15  ;;  %v5277_v35 = vmul.f32 %v11686_v40, %v11402_v6  ;;  %v5285_v15 = vmul.f32 %v11693_v56, %v11518_v42 }
0x12fc   : > { %v5326_v57 = vadd.f32 %v5325_v20, %v5284_v50  ;;  %v5308_v50 = vmul.f32 %v11722_v3, %v5212_v39  ;;  %v5331_v53 = vadd.f32 %v5269_v58, %v5261_v46  ;;  %v11735_v39 = vld [vmem:[%s12779_s12 + $0x7] ss:$0 sm:$0xff]  ;;  %v5270_v58 = vmul.f32 %v11672_v21, %v11296_v60 }
0x12fd   : > { %v11658_v7 = vpop.f32.mrf.mxu2 }
0x1305   : > { %v11660_v2 = vpop.f32.mrf.mxu2 }
0x130d   : > { %v11665_v47 = vpop.f32.mrf.mxu2 }
0x1315   : > { %v11667_v12 = vpop.f32.mrf.mxu2 }
0x1316   : > { %12829 = vst [vmem:[#allocation14_spill] sm:$0xff] %v11667_v12 }
0x131d   : > { %v11697_v59 = vpop.f32.mrf.mxu2 }
0x131e   : > { %12830 = vst [vmem:[#allocation15_spill] sm:$0xff] %v11697_v59  ;;  %v5327_v59 = vadd.f32 %v5326_v57, %v5292_v30  ;;  %v5332_v30 = vadd.f32 %v5331_v53, %v5277_v35  ;;  %v5293_v57 = vmul.f32 %v11702_v23, %v11584_v24  ;;  %v5278_v24 = vmul.f32 %v11686_v40, %v11412_v31 }
0x131f   : > { %v5286_v53 = vmul.f32 %v11693_v56, %v11520_v41  ;;  %v5271_v31 = vmul.f32 %v11672_v21, %v11308_v45  ;;  %v5263_v41 = vmul.f32 %v11679_v0, %v11204_v44  ;;  %v5287_v45 = vmul.f32 %v11693_v56, %v11522_v34 }
0x1320   : > { %v5328_v20 = vadd.f32 %v5327_v59, %v5300_v51  ;;  %v5333_v46 = vadd.f32 %v5332_v30, %v5285_v15  ;;  %v5301_v59 = vmul.f32 %v11711_v10, %v11618_v38  ;;  %v5262_v51 = vmul.f32 %v11679_v0, %v11192_v8 }
0x1321   : > { %v5279_v30 = vmul.f32 %v11686_v40, %v11424_v61  ;;  %v5272_v61 = vmul.f32 %v11672_v21, %v11325_v55  ;;  %v5264_v34 = vmul.f32 %v11679_v0, %v11221_v32  ;;  %v5288_v55 = vmul.f32 %v11693_v56, %v11527_v52 }
0x1322   : > { %v5329_v14 = vadd.f32 %v5328_v20, %v5308_v50  ;;  %v5334_v35 = vadd.f32 %v5333_v46, %v5293_v57  ;;  %v5309_v50 = vmul.f32 %v11722_v3, %v5215_v27  ;;  %v5338_v28 = vadd.f32 %v5270_v58, %v5262_v51 }
0x1323   : > { %v5302_v27 = vmul.f32 %v11711_v10, %v11620_v63  ;;  %v5345_v58 = vadd.f32 %v5271_v31, %v5263_v41  ;;  %v5295_v63 = vmul.f32 %v11702_v23, %v11602_v19  ;;  %v5311_v19 = vmul.f32 %v11722_v3, %v11658_v7 }
0x1324   : > { %v5335_v60 = vadd.f32 %v5334_v35, %v5301_v59  ;;  %v5339_v20 = vadd.f32 %v5338_v28, %v5278_v24  ;;  %v5304_v7 = vmul.f32 %v11711_v10, %v11632_v43  ;;  %v5265_v52 = vmul.f32 %v11679_v0, %v11238_v4  ;;  %v6988_v43 = vld [vmem:[%s12773_s6 + $0x3a0] sm:$0xff] }
0x1325   : > { %v5281_v31 = vmul.f32 %v11686_v40, %v11461_v1  ;;  %v5289_v4 = vmul.f32 %v11693_v56, %v11532_v16  ;;  %v5274_v16 = vmul.f32 %v11672_v21, %v11361_v5  ;;  %v5290_v5 = vmul.f32 %v11693_v56, %v11542_v18 }
0x1326   : > { %v5336_v38 = vadd.f32 %v5335_v60, %v5309_v50  ;;  %v5280_v50 = vmul.f32 %v11686_v40, %v11441_v17  ;;  %v5273_v17 = vmul.f32 %v11672_v21, %v11345_v37  ;;  %v6992_v37 = vld [vmem:[%s12773_s6 + $0x3c0] sm:$0xff]  ;;  %v5267_v18 = vmul.f32 %v11679_v0, %v11266_v33 }
0x1327   : > { %5846 = vmatpush.msrb.mxu0 %v6992_v37  ;;  %7087 = vmatpush.msrb.mxu1 %v6992_v37 }
0x1329   : > { %5847 = vmatpush.msrb.mxu0 %v6988_v43  ;;  %7088 = vmatpush.msrb.mxu1 %v6988_v43  ;;  %v12837_v43 = vld [vmem:[#allocation3_spill] sm:$0xff] }
0x1342   : > { %v5236_v6 = vpop.f32.mrf.mxu2 }
0x1343   : > { %v5316_v12 = vmul.f32 %v11735_v39, %v5236_v6 }
0x1345   : > { %v5330_v42 = vadd.f32 %v5329_v14, %v5316_v12  ;;  %v5294_v14 = vmul.f32 %v11702_v23, %v11593_v25  ;;  %v5340_v12 = vadd.f32 %v5339_v20, %v5286_v53  ;;  %v5310_v25 = vmul.f32 %v11722_v3, %v11656_v11 }
0x1346   : > { %v5303_v11 = vmul.f32 %v11711_v10, %v11624_v22  ;;  %v5352_v53 = vadd.f32 %v5272_v61, %v5264_v34  ;;  %v5296_v22 = vmul.f32 %v11702_v23, %v11605_v48  ;;  %v5312_v48 = vmul.f32 %v11722_v3, %v11660_v2  ;;  %v6984_v2 = vld [vmem:[%s12773_s6 + $0x380] sm:$0xff] }
0x1347   : > { %5413 = vmatmul.f32.vlgmr.msra.gmra.mxu3 %v5330_v42  ;;  %v5341_v57 = vadd.f32 %v5340_v12, %v5294_v14  ;;  %v5346_v42 = vadd.f32 %v5345_v58, %v5279_v30  ;;  %v5297_v30 = vmul.f32 %v11702_v23, %v11607_v36  ;;  %5848 = vmatpush.msrb.mxu0 %v6984_v2 }
0x1348   : > { %v5353_v20 = vadd.f32 %v5352_v53, %v5280_v50  ;;  %7089 = vmatpush.msrb.mxu1 %v6984_v2  ;;  %v5283_v50 = vmul.f32 %v11686_v40, %v11495_v49  ;;  %v12834_v49 = vld [vmem:[#allocation13_spill] sm:$0xff]  ;;  %v12838_v2 = vld [vmem:[#allocation4_spill] sm:$0xff] }
0x1349   : > { %v5342_v46 = vadd.f32 %v5341_v57, %v5302_v27  ;;  %v5347_v24 = vadd.f32 %v5346_v42, %v5287_v45  ;;  %v5359_v27 = vadd.f32 %v5273_v17, %v5265_v52  ;;  %v5305_v45 = vmul.f32 %v11711_v10, %v11643_v13  ;;  %v12835_v17 = vld [vmem:[#allocation15_spill] sm:$0xff] }
0x134a   : > { %v5239_v15 = vpop.f32.mrf.mxu2  ;;  %v5282_v42 = vmul.f32 %v11686_v40, %v11480_v29  ;;  %v5298_v13 = vmul.f32 %v11702_v23, %v11609_v9  ;;  %v5275_v29 = vmul.f32 %v11672_v21, %v11376_v54  ;;  %v5307_v40 = vmul.f32 %v11711_v10, %v12834_v49 }
0x134b   : > { %v5317_v8 = vmul.f32 %v11735_v39, %v5239_v15  ;;  %v5343_v51 = vadd.f32 %v5342_v46, %v5310_v25  ;;  %v5348_v28 = vadd.f32 %v5347_v24, %v5295_v63  ;;  %v5360_v41 = vadd.f32 %v5359_v27, %v5281_v31 }
0x134c   : > { %v5313_v63 = vmul.f32 %v11722_v3, %v11665_v47  ;;  %v5306_v47 = vmul.f32 %v11711_v10, %v11647_v26  ;;  %v5373_v53 = vadd.f32 %v5275_v29, %v5267_v18  ;;  %v12833_v26 = vld [vmem:[#allocation12_spill] sm:$0xff]  ;;  %v7127_v10 = vld [vmem:[%s12772_s5 + $0x1] ss:$0 sm:$0xff] }
0x134d   : > { %v5337_v6 = vadd.f32 %v5336_v38, %v5317_v8  ;;  %v5349_v60 = vadd.f32 %v5348_v28, %v5303_v11  ;;  %v5354_v38 = vadd.f32 %v5353_v20, %v5288_v55  ;;  %v5361_v58 = vadd.f32 %v5360_v41, %v5289_v4  ;;  %v12832_v55 = vld [vmem:[#allocation11_spill] sm:$0xff]  ;;  %v6964_v29 = vld [vmem:[%s12773_s6 + $0x2e0] sm:$0xff] }
0x134e   : > { %v5291_v54 = vmul.f32 %v11693_v56, %v12832_v55  ;;  %v5299_v20 = vmul.f32 %v11702_v23, %v12833_v26  ;;  %v6980_v23 = vld [vmem:[%s12773_s6 + $0x360] sm:$0xff] }
0x134f   : > { %5416 = vmatmul.f32.gmra.mxu3 %v5337_v6  ;;  %v5350_v14 = vadd.f32 %v5349_v60, %v5311_v19  ;;  %v5355_v12 = vadd.f32 %v5354_v38, %v5296_v22  ;;  %v5362_v36 = vadd.f32 %v5361_v58, %v5297_v30  ;;  %v12831_v19 = vld [vmem:[#allocation14_spill] sm:$0xff]  ;;  %v5315_v38 = vmul.f32 %v11722_v3, %v12835_v17 }
0x1350   : > { %v5314_v9 = vmul.f32 %v11722_v3, %v12831_v19  ;;  %5849 = vmatpush.msrb.mxu0 %v6980_v23  ;;  %7090 = vmatpush.msrb.mxu1 %v6980_v23  ;;  %v12836_v3 = vld [vmem:[#allocation6_spill] sm:$0xff] }
0x1351   : > { %v5356_v1 = vadd.f32 %v5355_v12, %v5304_v7  ;;  %v6976_v30 = vld [vmem:[%s12773_s6 + $0x340] sm:$0xff] }
0x1352   : > { %v5242_v59 = vpop.f32.mrf.mxu2  ;;  %5850 = vmatpush.msrb.mxu0 %v6976_v30  ;;  %7091 = vmatpush.msrb.mxu1 %v6976_v30  ;;  %v6985_v30 = vld [vmem:[%s12773_s6 + $0x388] sm:$0xff] }
0x1353   : > { %v5318_v44 = vmul.f32 %v11735_v39, %v5242_v59  ;;  %v5357_v57 = vadd.f32 %v5356_v1, %v5312_v48  ;;  %v5266_v59 = vmul.f32 %v11679_v0, %v11251_v62 }
0x1355   : > { %v5344_v35 = vadd.f32 %v5343_v51, %v5318_v44  ;;  %v5366_v51 = vadd.f32 %v5274_v16, %v5266_v59  ;;  %v5363_v44 = vadd.f32 %v5362_v36, %v5305_v45  ;;  %v6972_v45 = vld [vmem:[%s12773_s6 + $0x320] sm:$0xff] }
0x1356   : > { %5851 = vmatpush.msrb.mxu0 %v6972_v45  ;;  %7092 = vmatpush.msrb.mxu1 %v6972_v45 }
0x1357   : > { %5419 = vmatmul.f32.gmra.mxu3 %v5344_v35  ;;  %v5367_v24 = vadd.f32 %v5366_v51, %v5282_v42  ;;  %v5364_v11 = vadd.f32 %v5363_v44, %v5313_v63  ;;  %v12840_v42 = vld [vmem:[#allocation7_spill] sm:$0xff] }
0x1359   : > { %v5368_v35 = vadd.f32 %v5367_v24, %v5290_v5  ;;  %v12841_v5 = vld [vmem:[#allocation8_spill] sm:$0xff] }
0x135a   : > { %v5245_v15 = vpop.f32.mrf.mxu2 }
0x135b   : > { %v5319_v32 = vmul.f32 %v11735_v39, %v5245_v15  ;;  %v5369_v28 = vadd.f32 %v5368_v35, %v5298_v13  ;;  %v5374_v15 = vadd.f32 %v5373_v53, %v5283_v50  ;;  %v12842_v13 = vld [vmem:[#allocation9_spill] sm:$0xff] }
0x135d   : > { %v5351_v8 = vadd.f32 %v5350_v14, %v5319_v32  ;;  %v5370_v21 = vadd.f32 %v5369_v28, %v5306_v47  ;;  %v5375_v0 = vadd.f32 %v5374_v15, %v5291_v54  ;;  %v12843_v47 = vld [vmem:[#allocation2_spill] sm:$0xff] }
0x135f   : > { %5422 = vmatmul.f32.gmra.mxu3 %v5351_v8  ;;  %v5371_v22 = vadd.f32 %v5370_v21, %v5314_v9  ;;  %v5376_v32 = vadd.f32 %v5375_v0, %v5299_v20  ;;  %v12844_v9 = vld [vmem:[#allocation10_spill] sm:$0xff] }
0x1360   : > { %v6956_v0 = vld [vmem:[%s12773_s6 + $0x2a0] sm:$0xff] }
0x1361   : > { %v5377_v56 = vadd.f32 %v5376_v32, %v5307_v40 }
0x1362   : > { %v5248_v6 = vpop.f32.mrf.mxu2 }
0x1363   : > { %v5320_v25 = vmul.f32 %v11735_v39, %v5248_v6  ;;  %v5378_v8 = vadd.f32 %v5377_v56, %v5315_v38 }
0x1365   : > { %v5358_v46 = vadd.f32 %v5357_v57, %v5320_v25  ;;  %v12839_v25 = vld [vmem:[#allocation5_spill] sm:$0xff] }
0x1367   : > { %5425 = vmatmul.f32.gmra.mxu3 %v5358_v46  ;;  %v6968_v46 = vld [vmem:[%s12773_s6 + $0x300] sm:$0xff] }
0x1368   : > { %5852 = vmatpush.msrb.mxu0 %v6968_v46  ;;  %7093 = vmatpush.msrb.mxu1 %v6968_v46 }
0x136a   : > { %v5251_v61 = vpop.f32.mrf.mxu2  ;;  %5853 = vmatpush.msrb.mxu0 %v6964_v29  ;;  %7094 = vmatpush.msrb.mxu1 %v6964_v29  ;;  %v6961_v29 = vld [vmem:[%s12773_s6 + $0x2c8] sm:$0xff] }
0x136b   : > { %v5321_v62 = vmul.f32 %v11735_v39, %v5251_v61 }
0x136d   : > { %v5365_v34 = vadd.f32 %v5364_v11, %v5321_v62 }
0x136f   : > { %5428 = vmatmul.f32.gmra.mxu3 %v5365_v34 }
0x1372   : > { %v5254_v60 = vpop.f32.mrf.mxu2 }
0x1373   : > { %v5322_v33 = vmul.f32 %v11735_v39, %v5254_v60 }
0x1375   : > { %v5372_v14 = vadd.f32 %v5371_v22, %v5322_v33  ;;  %v6960_v33 = vld [vmem:[%s12773_s6 + $0x2c0] sm:$0xff] }
0x1376   : > { %5854 = vmatpush.msrb.mxu0 %v6960_v33  ;;  %7095 = vmatpush.msrb.mxu1 %v6960_v33 }
0x1377   : > { %5431 = vmatmul.f32.gmra.mxu3 %v5372_v14 }
0x1378   : > { %5855 = vmatpush.msrb.mxu0 %v6956_v0  ;;  %7096 = vmatpush.msrb.mxu1 %v6956_v0 }
0x137a   : > { %v5257_v7 = vpop.f32.mrf.mxu2 }
0x137b   : > { %v5323_v52 = vmul.f32 %v11735_v39, %v5257_v7 }
0x137d   : > { %v5379_v31 = vadd.f32 %v5378_v8, %v5323_v52 }
0x137f   : > { %5434 = vmatmul.f32.gmra.mxu3 %v5379_v31 }
0x13ca   : > { %v5414_v12 = vpop.f32.mrf.mxu3 }
0x13cb   : > { %v5438_v48 = vadd.f32 %v5414_v12, %v12836_v3 }
0x13cd   : > { %v11848_v37 = vadd.f32 %v7127_v10, %v5438_v48 }
0x13cf   : > { %5459 = vadd.xlane.f32.xlu1 %v11848_v37 }
0x13d2   : > { %v5417_v39 = vpop.f32.mrf.mxu3 }
0x13d3   : > { %v5439_v27 = vadd.f32 %v5417_v39, %v12837_v43  ;;  %v6952_v39 = vld [vmem:[%s12773_s6 + $0x280] sm:$0xff]  ;;  %v6997_v43 = vld [vmem:[%s12773_s6 + $0x3e8] sm:$0xff] }
0x13d4   : > { %5856 = vmatpush.msrb.mxu0 %v6952_v39  ;;  %7097 = vmatpush.msrb.mxu1 %v6952_v39  ;;  %v6936_v39 = vld [vmem:[%s12773_s6 + $0x200] sm:$0xff] }
0x13d5   : > { %v11852_v4 = vadd.f32 %v7127_v10, %v5439_v27  ;;  %5886 = vmatpush.msrb.mxu3 %v6997_v43  ;;  %v6993_v27 = vld [vmem:[%s12773_s6 + $0x3c8] sm:$0xff] }
0x13d6   : > { %v6937_v43 = vld [vmem:[%s12773_s6 + $0x208] sm:$0xff] }
0x13d7   : > { %5461 = vadd.xlane.f32.xlu2 %v11852_v4  ;;  %5887 = vmatpush.msrb.mxu3 %v6993_v27 }
0x13da   : > { %v5420_v1 = vpop.f32.mrf.mxu3 }
0x13db   : > { %v5440_v6 = vadd.f32 %v5420_v1, %v12838_v2  ;;  %v6989_v1 = vld [vmem:[%s12773_s6 + $0x3a8] sm:$0xff] }
0x13dc   : > { %5888 = vmatpush.msrb.mxu3 %v6989_v1 }
0x13dd   : > { %v11856_v41 = vadd.f32 %v7127_v10, %v5440_v6 }
0x13de   : > { %5889 = vmatpush.msrb.mxu3 %v6985_v30 }
0x13df   : > { %5463 = vadd.xlane.f32.xlu0 %v11856_v41 }
0x13e2   : > { %v5423_v57 = vpop.f32.mrf.mxu3 }
0x13e3   : > { %v5441_v16 = vadd.f32 %v5423_v57, %v12839_v25  ;;  %v6981_v57 = vld [vmem:[%s12773_s6 + $0x368] sm:$0xff] }
0x13e4   : > { %5890 = vmatpush.msrb.mxu3 %v6981_v57  ;;  %v6977_v25 = vld [vmem:[%s12773_s6 + $0x348] sm:$0xff] }
0x13e5   : > { %v11863_v58 = vadd.f32 %v7127_v10, %v5441_v16  ;;  %v6973_v16 = vld [vmem:[%s12773_s6 + $0x328] sm:$0xff] }
0x13e6   : > { %5891 = vmatpush.msrb.mxu3 %v6977_v25 }
0x13e7   : > { %5465 = vadd.xlane.f32.xlu1 %v11863_v58 }
0x13e8   : > { %5892 = vmatpush.msrb.mxu3 %v6973_v16 }
0x13ea   : > { %v5426_v59 = vpop.f32.mrf.mxu3 }
0x13eb   : > { %v5442_v36 = vadd.f32 %v5426_v59, %v12840_v42 }
0x13ed   : > { %v11873_v63 = vadd.f32 %v7127_v10, %v5442_v36 }
0x13ef   : > { %5467 = vadd.xlane.f32.xlu2 %v11873_v63 }
0x13f2   : > { %v5429_v51 = vpop.f32.mrf.mxu3 }
0x13f3   : > { %v5443_v44 = vadd.f32 %v5429_v51, %v12841_v5  ;;  %v6969_v51 = vld [vmem:[%s12773_s6 + $0x308] sm:$0xff] }
0x13f4   : > { %5893 = vmatpush.msrb.mxu3 %v6969_v51 }
0x13f5   : > { %v11877_v61 = vadd.f32 %v7127_v10, %v5443_v44 }
0x13f7   : > { %5469 = vadd.xlane.f32.xlu0 %v11877_v61 }
0x13fa   : > { %v5432_v24 = vpop.f32.mrf.mxu3 }
0x13fb   : > { %v5444_v11 = vadd.f32 %v5432_v24, %v12842_v13  ;;  %v6965_v24 = vld [vmem:[%s12773_s6 + $0x2e8] sm:$0xff] }
0x13fc   : > { %5894 = vmatpush.msrb.mxu3 %v6965_v24 }
0x13fd   : > { %v11881_v62 = vadd.f32 %v7127_v10, %v5444_v11 }
0x13fe   : > { %5895 = vmatpush.msrb.mxu3 %v6961_v29 }
0x13ff   : > { %5471 = vadd.xlane.f32.xlu2 %v11881_v62 }
0x1402   : > { %v5435_v28 = vpop.f32.mrf.mxu3 }
0x1403   : > { %v5445_v53 = vadd.f32 %v5435_v28, %v12844_v9 }
0x1405   : > { %v11898_v21 = vadd.f32 %v7127_v10, %v5445_v53  ;;  %v6953_v53 = vld [vmem:[%s12773_s6 + $0x288] sm:$0xff] }
0x1442   : > { %v5460_v35 = vpop.xlane.xlu1 %5459 }
0x1443   : > { %v5475_v34 = vmul.f32 %v5460_v35, %v12843_v47 }
0x1445   : > { %v11889_v18 = vsub.f32 %v11848_v37, %v5475_v34  ;;  %v6957_v34 = vld [vmem:[%s12773_s6 + $0x2a8] sm:$0xff] }
0x1446   : > { %5896 = vmatpush.msrb.mxu3 %v6957_v34 }
0x1447   : > { %v5491_v50 = vmul.f32 %v11889_v18, %v11889_v18 }
0x1448   : > { %5897 = vmatpush.msrb.mxu3 %v6953_v53 }
0x1449   : > { %5499 = vadd.xlane.f32.xlu1 %v5491_v50 }
0x144a   : > { %v5462_v19 = vpop.xlane.xlu2 %5461 }
0x144b   : > { %v5476_v55 = vmul.f32 %v5462_v19, %v12843_v47 }
0x144d   : > { %v11896_v54 = vsub.f32 %v11852_v4, %v5476_v55 }
0x144f   : > { %v5492_v60 = vmul.f32 %v11896_v54, %v11896_v54 }
0x1451   : > { %5473 = vadd.xlane.f32.xlu1 %v11898_v21  ;;  %5501 = vadd.xlane.f32.xlu0 %v5492_v60 }
0x1452   : > { %v5464_v15 = vpop.xlane.xlu0 %5463 }
0x1453   : > { %v5477_v26 = vmul.f32 %v5464_v15, %v12843_v47  ;;  %v6948_v15 = vld [vmem:[%s12773_s6 + $0x260] sm:$0xff] }
0x1454   : > { %5857 = vmatpush.msrb.mxu0 %v6948_v15  ;;  %7098 = vmatpush.msrb.mxu1 %v6948_v15 }
0x1455   : > { %v11905_v20 = vsub.f32 %v11856_v41, %v5477_v26  ;;  %v6949_v26 = vld [vmem:[%s12773_s6 + $0x268] sm:$0xff] }
0x1456   : > { %5898 = vmatpush.msrb.mxu3 %v6949_v26 }
0x1457   : > { %v5493_v22 = vmul.f32 %v11905_v20, %v11905_v20 }
0x1459   : > { %5503 = vadd.xlane.f32.xlu2 %v5493_v22 }
0x145a   : > { %v5466_v49 = vpop.xlane.xlu1 %5465 }
0x145b   : > { %v5478_v40 = vmul.f32 %v5466_v49, %v12843_v47  ;;  %v6944_v49 = vld [vmem:[%s12773_s6 + $0x240] sm:$0xff] }
0x145c   : > { %5858 = vmatpush.msrb.mxu0 %v6944_v49  ;;  %7099 = vmatpush.msrb.mxu1 %v6944_v49 }
0x145d   : > { %v11917_v14 = vsub.f32 %v11863_v58, %v5478_v40  ;;  %v6945_v40 = vld [vmem:[%s12773_s6 + $0x248] sm:$0xff] }
0x145e   : > { %5899 = vmatpush.msrb.mxu3 %v6945_v40 }
0x145f   : > { %v5494_v32 = vmul.f32 %v11917_v14, %v11917_v14 }
0x1461   : > { %5505 = vadd.xlane.f32.xlu0 %v5494_v32 }
0x1462   : > { %v5468_v17 = vpop.xlane.xlu2 %5467 }
0x1463   : > { %v5479_v38 = vmul.f32 %v5468_v17, %v12843_v47 }
0x1465   : > { %v11923_v56 = vsub.f32 %v11873_v63, %v5479_v38 }
0x1467   : > { %v5495_v7 = vmul.f32 %v11923_v56, %v11923_v56 }
0x1469   : > { %5507 = vadd.xlane.f32.xlu1 %v5495_v7  ;;  %v6940_v7 = vld [vmem:[%s12773_s6 + $0x220] sm:$0xff] }
0x146a   : > { %v5470_v8 = vpop.xlane.xlu0 %5469  ;;  %5859 = vmatpush.msrb.mxu0 %v6940_v7  ;;  %7100 = vmatpush.msrb.mxu1 %v6940_v7 }
0x146b   : > { %v5480_v52 = vmul.f32 %v5470_v8, %v12843_v47  ;;  %v6941_v8 = vld [vmem:[%s12773_s6 + $0x228] sm:$0xff] }
0x146c   : > { %5900 = vmatpush.msrb.mxu3 %v6941_v8  ;;  %5860 = vmatpush.msrb.mxu0 %v6936_v39 }
0x146d   : > { %v11929_v31 = vsub.f32 %v11877_v61, %v5480_v52  ;;  %7101 = vmatpush.msrb.mxu1 %v6936_v39  ;;  %v12077_v39 = vld [vmem:[%s12768_s1 + $0x7] ss:$0 sm:$0xff] }
0x146e   : > { %5901 = vmatpush.msrb.mxu3 %v6937_v43 }
0x146f   : > { %v5496_v23 = vmul.f32 %v11929_v31, %v11929_v31 }
0x1471   : > { %5509 = vadd.xlane.f32.xlu2 %v5496_v23 }
0x1472   : > { %v5472_v10 = vpop.xlane.xlu2 %5471 }
0x1473   : > { %v5481_v12 = vmul.f32 %v5472_v10, %v12843_v47 }
0x1475   : > { %v11935_v3 = vsub.f32 %v11881_v62, %v5481_v12 }
0x1477   : > { %v5497_v48 = vmul.f32 %v11935_v3, %v11935_v3 }
0x1479   : > { %5511 = vadd.xlane.f32.xlu0 %v5497_v48 }
0x14bc   : > { %v5500_v2 = vpop.xlane.xlu1 %5499 }
0x14bd   : > { %v5515_v6 = vmul.f32 0.007874016, %v5500_v2 }
0x14bf   : > { %7744 = vrsqrt.f32 %v5515_v6  ;;  %vm5541_vm1 = vcmp.eq.f32.partialorder %v5515_v6, inf  ;;  %v5544_v0 = vand.u32 2147483648, %v5515_v6  ;;  %vm5543_vm8 = vcmp.eq.f32.partialorder %v5515_v6, 0.0 }
0x14c4   : > { %v5474_v45 = vpop.xlane.xlu1 %5473  ;;  %v5502_v46 = vpop.xlane.xlu0 %5501 }
0x14c5   : > { %v7745_v59 = vpop.eup %7744  ;;  %v5482_v42 = vmul.f32 %v5474_v45, %v12843_v47  ;;  %v11964_v36 = vmul.f32 0.007874016, %v5502_v46 }
0x14c6   : > { %v5535_v5 = vmul.f32 %v7745_v59, %v5515_v6 }
0x14c7   : > { %v11970_v44 = vsub.f32 %v11898_v21, %v5482_v42  ;;  %7746 = vrsqrt.f32 %v11964_v36  ;;  %vm5553_vm9 = vcmp.eq.f32.partialorder %v11964_v36, inf  ;;  %v5556_v30 = vand.u32 2147483648, %v11964_v36 }
0x14c8   : > { %v5536_v13 = vmul.f32 %v7745_v59, %v5535_v5  ;;  %vm5555_vm10 = vcmp.eq.f32.partialorder %v11964_v36, 0.0 }
0x14c9   : > { %v5498_v11 = vmul.f32 %v11970_v44, %v11970_v44 }
0x14ca   : > { %v5537_v35 = vmul.f32 0.5, %v5536_v13 }
0x14cb   : > { %5513 = vadd.xlane.f32.xlu1 %v5498_v11 }
0x14cc   : > { %v5538_v50 = vsub.f32 1.5, %v5537_v35  ;;  %v5504_v28 = vpop.xlane.xlu2 %5503 }
0x14cd   : > { %v7747_v19 = vpop.eup %7746  ;;  %v11984_v9 = vmul.f32 0.007874016, %v5504_v28 }
0x14ce   : > { %v5539_v55 = vmul.f32 %v7745_v59, %v5538_v50  ;;  %v5547_v60 = vmul.f32 %v7747_v19, %v11964_v36 }
0x14cf   : > { %7748 = vrsqrt.f32 %v11984_v9  ;;  %vm5565_vm11 = vcmp.eq.f32.partialorder %v11984_v9, inf  ;;  %vm5567_vm12 = vcmp.eq.f32.partialorder %v11984_v9, 0.0  ;;  %v5568_v34 = vand.u32 2147483648, %v11984_v9 }
0x14d0   : > { %v5540_v22 = vmul.f32 %v5539_v55, %v5515_v6  ;;  %v5548_v33 = vmul.f32 %v7747_v19, %v5547_v60  ;;  %v12044_v55 = vld [vmem:[%s12768_s1 + $0x6] ss:$0 sm:$0xff] }
0x14d2   : > { %v5542_v32 = vsel %vm5541_vm1, %v5515_v6, %v5540_v22  ;;  %v5549_v17 = vmul.f32 0.5, %v5548_v33 }
0x14d3   : > { %v5545_v38 = vsel %vm5543_vm8, %v5544_v0, %v5542_v32 }
0x14d4   : > { %v12009_v52 = vadd.f32 1e-06, %v5545_v38  ;;  %v5550_v23 = vsub.f32 1.5, %v5549_v17  ;;  %v5506_v10 = vpop.xlane.xlu0 %5505 }
0x14d5   : > { %v7749_v12 = vpop.eup %7748  ;;  %v12011_v48 = vmul.f32 0.007874016, %v5506_v10  ;;  %v6994_v10 = vld [vmem:[%s12773_s6 + $0x3d0] sm:$0xff] }
0x14d6   : > { %7750 = vrcp.f32 %v12009_v52  ;;  %v5551_v27 = vmul.f32 %v7747_v19, %v5550_v23  ;;  %v5559_v1 = vmul.f32 %v7749_v12, %v11984_v9  ;;  %v5649_v50 = vand.u32 2147483648, %v12009_v52 }
0x14d7   : > { %7752 = vrsqrt.f32 %v12011_v48  ;;  %v5647_v60 = vand.u32 2147483647, %v12009_v52  ;;  %vm5643_vm14 = vweird.f32 %v12009_v52  ;;  %vm5577_vm0 = vcmp.eq.f32.partialorder %v12011_v48, inf }
0x14d8   : > { %v5552_v2 = vmul.f32 %v5551_v27, %v11964_v36  ;;  %v5560_v6 = vmul.f32 %v7749_v12, %v5559_v1  ;;  %v5650_v17 = vor.u32 1.1754944e-38, %v5649_v50  ;;  %vm5579_vm3 = vcmp.eq.f32.partialorder %v12011_v48, 0.0 }
0x14d9   : > { %vm5648_vm2 = vcmp.eq.f32.partialorder %v5647_v60, 8.507059e+37 }
0x14da   : > { %v5554_v57 = vsel %vm5553_vm9, %v11964_v36, %v5552_v2  ;;  %v5561_v25 = vmul.f32 0.5, %v5560_v6  ;;  %v5580_v6 = vand.u32 2147483648, %v12011_v48 }
0x14db   : > { %v5557_v16 = vsel %vm5555_vm10, %v5556_v30, %v5554_v57 }
0x14dc   : > { %v7751_v45 = vpop.eup %7750  ;;  %v5562_v46 = vsub.f32 1.5, %v5561_v25  ;;  %v5508_v59 = vpop.xlane.xlu1 %5507  ;;  %v12027_v42 = vadd.f32 1e-06, %v5557_v16 }
0x14dd   : > { %v7753_v51 = vpop.eup %7752  ;;  %v12029_v5 = vmul.f32 0.007874016, %v5508_v59  ;;  %v5639_v24 = vmul.f32 %v7751_v45, %v12009_v52  ;;  %vm5644_vm13 = vweird.f32 %v7751_v45  ;;  %v6998_v52 = vld [vmem:[%s12773_s6 + $0x3f0] sm:$0xff] }
0x14de   : > { %v5563_v13 = vmul.f32 %v7749_v12, %v5562_v46  ;;  %v5571_v11 = vmul.f32 %v7753_v51, %v12011_v48  ;;  %7754 = vrcp.f32 %v12027_v42  ;;  %vm12054_vm15 = vmor %vm5643_vm14, %vm5644_vm13  ;;  %v5526_v12 = vmul.f32 %v12044_v55, %v11889_v18  ;;  %5927 = vmatpush.msra.mxu0 %v6998_v52  ;;  %v6990_v18 = vld [vmem:[%s12773_s6 + $0x3b0] sm:$0xff] }
0x14df   : > { %7756 = vrsqrt.f32 %v12029_v5  ;;  %v5640_v35 = vsub.f32 1.0, %v5639_v24  ;;  %v5664_v57 = vand.u32 2147483648, %v12027_v42  ;;  %v5662_v59 = vand.u32 2147483647, %v12027_v42 }
0x14e0   : > { %v5564_v36 = vmul.f32 %v5563_v13, %v11984_v9  ;;  %v5572_v29 = vmul.f32 %v7753_v51, %v5571_v11  ;;  %5928 = vmatpush.msra.mxu0 %v6994_v10  ;;  %vm5658_vm5 = vweird.f32 %v12027_v42  ;;  %vm5589_vm7 = vcmp.eq.f32.partialorder %v12029_v5, inf }
0x14e1   : > { %v5641_v53 = vmul.f32 %v7751_v45, %v5640_v35  ;;  %vm5591_vm1 = vcmp.eq.f32.partialorder %v12029_v5, 0.0  ;;  %vm5663_vm8 = vcmp.eq.f32.partialorder %v5662_v59, 8.507059e+37 }
0x14e2   : > { %v5566_v28 = vsel %vm5565_vm11, %v11984_v9, %v5564_v36  ;;  %v5573_v19 = vmul.f32 0.5, %v5572_v29  ;;  %5929 = vmatpush.msra.mxu0 %v6990_v18 }
0x14e3   : > { %v5569_v15 = vsel %vm5567_vm12, %v5568_v34, %v5566_v28  ;;  %v5642_v0 = vadd.f32 %v7751_v45, %v5641_v53  ;;  %v5527_v34 = vmul.f32 %v12044_v55, %v11896_v54  ;;  %v6982_v54 = vld [vmem:[%s12773_s6 + $0x370] sm:$0xff] }
0x14e4   : > { %v12047_v26 = vpop.eup %7754  ;;  %v5574_v22 = vsub.f32 1.5, %v5573_v19  ;;  %v5510_v33 = vpop.xlane.xlu2 %5509  ;;  %v12050_v49 = vadd.f32 1e-06, %v5569_v15  ;;  %v5665_v19 = vor.u32 1.1754944e-38, %v5664_v57  ;;  %v5528_v57 = vmul.f32 %v12044_v55, %v11905_v20 }
0x14e5   : > { %v7757_v9 = vpop.eup %7756  ;;  %v12052_v40 = vmul.f32 0.007874016, %v5510_v33  ;;  %v5654_v38 = vmul.f32 %v12047_v26, %v12027_v42  ;;  %v5646_v23 = vsel %vm12054_vm15, %v7751_v45, %v5642_v0  ;;  %vm5659_vm4 = vweird.f32 %v12047_v26 }
0x14e6   : > { %v5575_v7 = vmul.f32 %v7753_v51, %v5574_v22  ;;  %v5583_v8 = vmul.f32 %v7757_v9, %v12029_v5  ;;  %7758 = vrcp.f32 %v12050_v49  ;;  %v5651_v1 = vsel %vm5648_vm2, %v5650_v17, %v5646_v23  ;;  %v6986_v51 = vld [vmem:[%s12773_s6 + $0x390] sm:$0xff]  ;;  %vm12110_vm6 = vmor %vm5658_vm5, %vm5659_vm4 }
0x14e7   : > { %7760 = vrsqrt.f32 %v12052_v40  ;;  %v5655_v2 = vsub.f32 1.0, %v5654_v38  ;;  %v5652_v30 = vmul.f32 %v5651_v1, %v5526_v12  ;;  %5930 = vmatpush.msra.mxu0 %v6986_v51  ;;  %v6978_v22 = vld [vmem:[%s12773_s6 + $0x350] sm:$0xff]  ;;  %v5677_v38 = vand.u32 2147483647, %v12050_v49 }
0x14e8   : > { %v5576_v43 = vmul.f32 %v5575_v7, %v12011_v48  ;;  %v5584_v27 = vmul.f32 %v7757_v9, %v5583_v8  ;;  %v5679_v7 = vand.u32 2147483648, %v12050_v49  ;;  %v6974_v8 = vld [vmem:[%s12773_s6 + $0x330] sm:$0xff]  ;;  %vm5673_vm10 = vweird.f32 %v12050_v49 }
0x14e9   : > { %v5656_v45 = vmul.f32 %v12047_v26, %v5655_v2  ;;  %v12090_v46 = vadd.f32 %v12077_v39, %v5652_v30  ;;  %5931 = vmatpush.msra.mxu0 %v6982_v54  ;;  %vm5678_vm12 = vcmp.eq.f32.partialorder %v5677_v38, 8.507059e+37  ;;  %vm5601_vm13 = vcmp.eq.f32.partialorder %v12052_v40, inf }
0x14ea   : > { %v5578_v25 = vsel %vm5577_vm0, %v12011_v48, %v5576_v43  ;;  %v5585_v16 = vmul.f32 0.5, %v5584_v27  ;;  %v6970_v43 = vld [vmem:[%s12773_s6 + $0x310] sm:$0xff]  ;;  %vm5603_vm15 = vcmp.eq.f32.partialorder %v12052_v40, 0.0 }
0x14eb   : > { %v5581_v24 = vsel %vm5579_vm3, %v5580_v6, %v5578_v25  ;;  %v5657_v36 = vadd.f32 %v12047_v26, %v5656_v45  ;;  %5861 = vmatmul.f32.vlgmr.msrb.gmra.mxu0 %v12090_v46  ;;  %5902 = vmatmul.f32.vlgmr.msrb.gmra.mxu3 %v12090_v46 }
0x14ec   : > { %v12096_v13 = vpop.eup %7758  ;;  %v5586_v11 = vsub.f32 1.5, %v5585_v16  ;;  %v5512_v48 = vpop.xlane.xlu0 %5511  ;;  %v12100_v29 = vadd.f32 1e-06, %v5581_v24  ;;  %5932 = vmatpush.msra.mxu0 %v6978_v22  ;;  %v6962_v24 = vld [vmem:[%s12773_s6 + $0x2d0] sm:$0xff] }
0x14ed   : > { %v7761_v35 = vpop.eup %7760  ;;  %v12106_v50 = vmul.f32 0.007874016, %v5512_v48  ;;  %v5669_v42 = vmul.f32 %v12096_v13, %v12050_v49  ;;  %v5661_v15 = vsel %vm12110_vm6, %v12047_v26, %v5657_v36  ;;  %v5592_v26 = vand.u32 2147483648, %v12029_v5  ;;  %v6966_v49 = vld [vmem:[%s12773_s6 + $0x2f0] sm:$0xff] }
0x14ee   : > { %v5587_v53 = vmul.f32 %v7757_v9, %v5586_v11  ;;  %v5595_v60 = vmul.f32 %v7761_v35, %v12052_v40  ;;  %7762 = vrcp.f32 %v12100_v29  ;;  %v5666_v9 = vsel %vm5663_vm8, %v5665_v19, %v5661_v15  ;;  %5933 = vmatpush.msra.mxu0 %v6974_v8  ;;  %v6958_v19 = vld [vmem:[%s12773_s6 + $0x2b0] sm:$0xff] }
0x14ef   : > { %7764 = vrsqrt.f32 %v12106_v50  ;;  %v5670_v32 = vsub.f32 1.0, %v5669_v42  ;;  %v5667_v17 = vmul.f32 %v5666_v9, %v5527_v34  ;;  %vm5674_vm9 = vweird.f32 %v12096_v13  ;;  %v6954_v15 = vld [vmem:[%s12773_s6 + $0x290] sm:$0xff] }
0x14f0   : > { %v5588_v33 = vmul.f32 %v5587_v53, %v12029_v5  ;;  %v5596_v0 = vmul.f32 %v7761_v35, %v5595_v60  ;;  %vm5675_vm11 = vmor %vm5673_vm10, %vm5674_vm9  ;;  %5934 = vmatpush.msra.mxu0 %v6970_v43  ;;  %v5692_v28 = vand.u32 2147483647, %v12100_v29  ;;  %vm5688_vm0 = vweird.f32 %v12100_v29 }
0x14f1   : > { %v5671_v10 = vmul.f32 %v12096_v13, %v5670_v32  ;;  %v12141_v12 = vadd.f32 %v12077_v39, %v5667_v17  ;;  %v6950_v17 = vld [vmem:[%s12773_s6 + $0x270] sm:$0xff]  ;;  %vm5613_vm4 = vcmp.eq.f32.partialorder %v12106_v50, inf  ;;  %vm5615_vm6 = vcmp.eq.f32.partialorder %v12106_v50, 0.0 }
0x14f2   : > { %v5590_v23 = vsel %vm5589_vm7, %v12029_v5, %v5588_v33  ;;  %v5597_v52 = vmul.f32 0.5, %v5596_v0  ;;  %v5680_v5 = vor.u32 1.1754944e-38, %v5679_v7  ;;  %5935 = vmatpush.msra.mxu0 %v6966_v49  ;;  %vm5693_vm3 = vcmp.eq.f32.partialorder %v5692_v28, 8.507059e+37 }
0x14f3   : > { %v5593_v27 = vsel %vm5591_vm1, %v5592_v26, %v5590_v23  ;;  %v5672_v18 = vadd.f32 %v12096_v13, %v5671_v10  ;;  %5864 = vmatmul.f32.gmra.mxu0 %v12141_v12  ;;  %5905 = vmatmul.f32.gmra.mxu3 %v12141_v12  ;;  %v5616_v10 = vand.u32 2147483648, %v12106_v50  ;;  %v5531_v28 = vmul.f32 %v12044_v55, %v11929_v31 }
0x14f4   : > { %v7763_v1 = vpop.eup %7762  ;;  %v5598_v2 = vsub.f32 1.5, %v5597_v52  ;;  %v12150_v6 = vadd.f32 1e-06, %v5593_v27  ;;  %5936 = vmatpush.msra.mxu0 %v6962_v24 }
0x14f5   : > { %v7765_v30 = vpop.eup %7764  ;;  %v5684_v25 = vmul.f32 %v7763_v1, %v12100_v29  ;;  %v5676_v20 = vsel %vm5675_vm11, %v12096_v13, %v5672_v18  ;;  %v5604_v13 = vand.u32 2147483648, %v12052_v40  ;;  %vm5689_vm14 = vweird.f32 %v7763_v1  ;;  %v6942_v18 = vld [vmem:[%s12773_s6 + $0x230] sm:$0xff] }
0x14f6   : > { %v5599_v16 = vmul.f32 %v7761_v35, %v5598_v2  ;;  %v5607_v45 = vmul.f32 %v7765_v30, %v12106_v50  ;;  %7766 = vrcp.f32 %v12150_v6  ;;  %v5681_v59 = vsel %vm5678_vm12, %v5680_v5, %v5676_v20  ;;  %vm5690_vm2 = vmor %vm5688_vm0, %vm5689_vm14  ;;  %5937 = vmatpush.msra.mxu0 %v6958_v19 }
0x14f7   : > { %v5685_v51 = vsub.f32 1.0, %v5684_v25  ;;  %v5682_v36 = vmul.f32 %v5681_v59, %v5528_v57  ;;  %v5694_v35 = vand.u32 2147483648, %v12100_v29  ;;  %v5709_v43 = vand.u32 2147483648, %v12150_v6  ;;  %v6938_v25 = vld [vmem:[%s12773_s6 + $0x210] sm:$0xff] }
0x14f8   : > { %v5600_v11 = vmul.f32 %v5599_v16, %v12052_v40  ;;  %v5608_v48 = vmul.f32 %v7765_v30, %v5607_v45  ;;  %5938 = vmatpush.msra.mxu0 %v6954_v15  ;;  %v5707_v2 = vand.u32 2147483647, %v12150_v6  ;;  %vm5703_vm7 = vweird.f32 %v12150_v6 }
0x14f9   : > { %v5686_v34 = vmul.f32 %v7763_v1, %v5685_v51  ;;  %v12179_v53 = vadd.f32 %v12077_v39, %v5682_v36  ;;  %v5695_v9 = vor.u32 1.1754944e-38, %v5694_v35  ;;  %v5710_v45 = vor.u32 1.1754944e-38, %v5709_v43  ;;  %v7013_v43 = vld [vmem:[%s12775_s8 + $0x260] sm:$0xff] }
0x14fa   : > { %v5602_v42 = vsel %vm5601_vm13, %v12052_v40, %v5600_v11  ;;  %v5609_v54 = vmul.f32 0.5, %v5608_v48  ;;  %v5529_v40 = vmul.f32 %v12044_v55, %v11917_v14  ;;  %v6946_v14 = vld [vmem:[%s12773_s6 + $0x250] sm:$0xff]  ;;  %5939 = vmatpush.msra.mxu0 %v6950_v17  ;;  %v5530_v20 = vmul.f32 %v12044_v55, %v11923_v56 }
0x14fb   : > { %v5687_v60 = vadd.f32 %v7763_v1, %v5686_v34  ;;  %v5605_v22 = vsel %vm5603_vm15, %v5604_v13, %v5602_v42  ;;  %5867 = vmatmul.f32.gmra.mxu0 %v12179_v53  ;;  %5908 = vmatmul.f32.gmra.mxu3 %v12179_v53  ;;  %vm5708_vm8 = vcmp.eq.f32.partialorder %v5707_v2, 8.507059e+37  ;;  %v7012_v2 = vld [vmem:[%s12775_s8 + $0x258] sm:$0xff] }
0x14fc   : > { %v7767_v33 = vpop.eup %7766  ;;  %v5610_v0 = vsub.f32 1.5, %v5609_v54  ;;  %v12185_v32 = vadd.f32 1e-06, %v5605_v22  ;;  %5940 = vmatpush.msra.mxu0 %v6946_v14  ;;  %v6991_v14 = vld [vmem:[%s12773_s6 + $0x3b8] sm:$0xff] }
0x14fd   : > { %v5691_v29 = vsel %vm5690_vm2, %v7763_v1, %v5687_v60  ;;  %v5699_v26 = vmul.f32 %v7767_v33, %v12150_v6  ;;  %vm5704_vm5 = vweird.f32 %v7767_v33 }
0x14fe   : > { %v5611_v38 = vmul.f32 %v7765_v30, %v5610_v0  ;;  %v5696_v7 = vsel %vm5693_vm3, %v5695_v9, %v5691_v29  ;;  %7768 = vrcp.f32 %v12185_v32  ;;  %vm5705_vm1 = vmor %vm5703_vm7, %vm5704_vm5  ;;  %5941 = vmatpush.msra.mxu0 %v6942_v18  ;;  %v5724_v11 = vand.u32 2147483648, %v12185_v32  ;;  %v6979_v18 = vld [vmem:[%s12773_s6 + $0x358] sm:$0xff] }
0x14ff   : > { %v5697_v8 = vmul.f32 %v5696_v7, %v5529_v40  ;;  %v5700_v23 = vsub.f32 1.0, %v5699_v26  ;;  %v5722_v56 = vand.u32 2147483647, %v12185_v32  ;;  %vm5718_vm10 = vweird.f32 %v12185_v32  ;;  %v7016_v7 = vld [vmem:[%s12775_s8 + $0x278] sm:$0xff] }
0x1500   : > { %v5612_v52 = vmul.f32 %v5611_v38, %v12106_v50  ;;  %5942 = vmatpush.msra.mxu0 %v6938_v25  ;;  %v5725_v34 = vor.u32 1.1754944e-38, %v5724_v11  ;;  %v5532_v40 = vmul.f32 %v12044_v55, %v11935_v3  ;;  %v6999_v3 = vld [vmem:[%s12773_s6 + $0x3f8] sm:$0xff] }
0x1501   : > { %v12204_v27 = vadd.f32 %v12077_v39, %v5697_v8  ;;  %v5701_v1 = vmul.f32 %v7767_v33, %v5700_v23  ;;  %vm5723_vm12 = vcmp.eq.f32.partialorder %v5722_v56, 8.507059e+37  ;;  %v6995_v8 = vld [vmem:[%s12773_s6 + $0x3d8] sm:$0xff]  ;;  %5968 = vmatpush.msra.mxu3 %v6999_v3  ;;  %v7015_v23 = vld [vmem:[%s12775_s8 + $0x270] sm:$0xff] }
0x1502   : > { %v5614_v30 = vsel %vm5613_vm4, %v12106_v50, %v5612_v52  ;;  %6106 = vmatpush.msrb.mxu0 %v7016_v7  ;;  %v7014_v52 = vld [vmem:[%s12775_s8 + $0x268] sm:$0xff]  ;;  %v6963_v11 = vld [vmem:[%s12773_s6 + $0x2d8] sm:$0xff] }
0x1503   : > { %v5617_v57 = vsel %vm5615_vm6, %v5616_v10, %v5614_v30  ;;  %v5702_v5 = vadd.f32 %v7767_v33, %v5701_v1  ;;  %5870 = vmatmul.f32.gmra.mxu0 %v12204_v27  ;;  %5911 = vmatmul.f32.gmra.mxu3 %v12204_v27  ;;  %v6987_v10 = vld [vmem:[%s12773_s6 + $0x398] sm:$0xff]  ;;  %v7011_v30 = vld [vmem:[%s12775_s8 + $0x250] sm:$0xff] }
0x1504   : > { %v7769_v49 = vpop.eup %7768  ;;  %v5636_v16 = vadd.f32 1e-06, %v5617_v57  ;;  %5969 = vmatpush.msra.mxu3 %v6995_v8  ;;  %6107 = vmatpush.msrb.mxu0 %v7015_v23  ;;  %v6983_v1 = vld [vmem:[%s12773_s6 + $0x378] sm:$0xff] }
0x1505   : > { %v5706_v50 = vsel %vm5705_vm1, %v7767_v33, %v5702_v5  ;;  %v5714_v6 = vmul.f32 %v7769_v49, %v12185_v32  ;;  %vm5719_vm9 = vweird.f32 %v7769_v49  ;;  %v6975_v5 = vld [vmem:[%s12773_s6 + $0x338] sm:$0xff] }
0x1506   : > { %7770 = vrcp.f32 %v5636_v16  ;;  %v5711_v59 = vsel %vm5708_vm8, %v5710_v45, %v5706_v50  ;;  %vm5720_vm11 = vmor %vm5718_vm10, %vm5719_vm9  ;;  %v5739_v22 = vand.u32 2147483648, %v5636_v16  ;;  %v5737_v9 = vand.u32 2147483647, %v5636_v16  ;;  %5970 = vmatpush.msra.mxu3 %v6991_v14  ;;  %6108 = vmatpush.msrb.mxu0 %v7014_v52  ;;  %v7009_v45 = vld [vmem:[%s12775_s8 + $0x240] sm:$0xff]  ;;  %v7008_v50 = vld [vmem:[%s12775_s8 + $0x238] sm:$0xff] }
0x1507   : > { %v5712_v51 = vmul.f32 %v5711_v59, %v5530_v20  ;;  %v5715_v24 = vsub.f32 1.0, %v5714_v6  ;;  %vm5733_vm14 = vweird.f32 %v5636_v16  ;;  %v6967_v20 = vld [vmem:[%s12773_s6 + $0x2f8] sm:$0xff] }
0x1508   : > { %v5740_v31 = vor.u32 1.1754944e-38, %v5739_v22  ;;  %vm5738_vm0 = vcmp.eq.f32.partialorder %v5737_v9, 8.507059e+37  ;;  %5971 = vmatpush.msra.mxu3 %v6987_v10  ;;  %6109 = vmatpush.msrb.mxu0 %v7013_v43  ;;  %v6959_v56 = vld [vmem:[%s12773_s6 + $0x2b8] sm:$0xff] }
0x1509   : > { %v12223_v48 = vadd.f32 %v12077_v39, %v5712_v51  ;;  %v5716_v36 = vmul.f32 %v7769_v49, %v5715_v24  ;;  %v6947_v9 = vld [vmem:[%s12773_s6 + $0x258] sm:$0xff] }
0x150a   : > { %5972 = vmatpush.msra.mxu3 %v6983_v1  ;;  %6110 = vmatpush.msrb.mxu0 %v7012_v2  ;;  %v5533_v1 = vmul.f32 %v12044_v55, %v11970_v44 }
0x150b   : > { %v5717_v35 = vadd.f32 %v7769_v49, %v5716_v36  ;;  %5873 = vmatmul.f32.gmra.mxu0 %v12223_v48  ;;  %5914 = vmatmul.f32.gmra.mxu3 %v12223_v48  ;;  %v7007_v36 = vld [vmem:[%s12775_s8 + $0x230] sm:$0xff] }
0x150c   : > { %v7771_v13 = vpop.eup %7770  ;;  %5973 = vmatpush.msra.mxu3 %v6979_v18  ;;  %6111 = vmatpush.msrb.mxu0 %v7011_v30  ;;  %v12351_v30 = vld [vmem:[%s12774_s7 + $0x4] sm:$0xf] }
0x150d   : > { %v5721_v19 = vsel %vm5720_vm11, %v7769_v49, %v5717_v35  ;;  %v5729_v42 = vmul.f32 %v7771_v13, %v5636_v16  ;;  %vm5734_vm13 = vweird.f32 %v7771_v13  ;;  %v7010_v49 = vld [vmem:[%s12775_s8 + $0x248] sm:$0xff]  ;;  %v6971_v16 = vld [vmem:[%s12773_s6 + $0x318] sm:$0xff] }
0x150e   : > { %v5726_v54 = vsel %vm5723_vm12, %v5725_v34, %v5721_v19  ;;  %vm5735_vm15 = vmor %vm5733_vm14, %vm5734_vm13  ;;  %5974 = vmatpush.msra.mxu3 %v6975_v5  ;;  %6112 = vmatpush.msrb.mxu0 %v7010_v49  ;;  %v6955_v34 = vld [vmem:[%s12773_s6 + $0x298] sm:$0xff]  ;;  %v12357_v49 = vperm.slane %v12351_v30, 0 }
0x150f   : > { %v5727_v60 = vmul.f32 %v5726_v54, %v5531_v28  ;;  %v5730_v15 = vsub.f32 1.0, %v5729_v42  ;;  %v7005_v28 = vld [vmem:[%s12775_s8 + $0x220] sm:$0xff] }
0x1510   : > { %5975 = vmatpush.msra.mxu3 %v6971_v16  ;;  %6113 = vmatpush.msrb.mxu0 %v7009_v45 }
0x1511   : > { %v12232_v33 = vadd.f32 %v12077_v39, %v5727_v60  ;;  %v5731_v0 = vmul.f32 %v7771_v13, %v5730_v15  ;;  %v6951_v60 = vld [vmem:[%s12773_s6 + $0x278] sm:$0xff] }
0x1512   : > { %5976 = vmatpush.msra.mxu3 %v6967_v20  ;;  %6114 = vmatpush.msrb.mxu0 %v7008_v50  ;;  %v7004_v15 = vld [vmem:[%s12775_s8 + $0x218] sm:$0xff] }
0x1513   : > { %v5732_v32 = vadd.f32 %v7771_v13, %v5731_v0  ;;  %5876 = vmatmul.f32.gmra.mxu0 %v12232_v33  ;;  %5917 = vmatmul.f32.gmra.mxu3 %v12232_v33  ;;  %v7032_v20 = vld [vmem:[%s12775_s8 + $0x2f8] sm:$0xff] }
0x1514   : > { %5977 = vmatpush.msra.mxu3 %v6963_v11  ;;  %6115 = vmatpush.msrb.mxu0 %v7007_v36  ;;  %v7027_v36 = vld [vmem:[%s12775_s8 + $0x2d0] sm:$0xff] }
0x1515   : > { %v5736_v29 = vsel %vm5735_vm15, %v7771_v13, %v5732_v32  ;;  %v7006_v13 = vld [vmem:[%s12775_s8 + $0x228] sm:$0xff]  ;;  %v7003_v32 = vld [vmem:[%s12775_s8 + $0x210] sm:$0xff] }
0x1516   : > { %v5741_v26 = vsel %vm5738_vm0, %v5740_v31, %v5736_v29  ;;  %5978 = vmatpush.msra.mxu3 %v6959_v56  ;;  %6116 = vmatpush.msrb.mxu0 %v7006_v13  ;;  %v6943_v31 = vld [vmem:[%s12773_s6 + $0x238] sm:$0xff]  ;;  %v7002_v29 = vld [vmem:[%s12775_s8 + $0x208] sm:$0xff] }
0x1517   : > { %v5742_v17 = vmul.f32 %v5741_v26, %v5532_v40  ;;  %v6939_v26 = vld [vmem:[%s12773_s6 + $0x218] sm:$0xff]  ;;  %v7026_v56 = vld [vmem:[%s12775_s8 + $0x2c8] sm:$0xff] }
0x1518   : > { %5979 = vmatpush.msra.mxu3 %v6955_v34  ;;  %6117 = vmatpush.msrb.mxu0 %v7005_v28 }
0x1519   : > { %v12239_v38 = vadd.f32 %v12077_v39, %v5742_v17  ;;  %v7001_v17 = vld [vmem:[%s12775_s8 + $0x200] sm:$0xff] }
0x151a   : > { %5980 = vmatpush.msra.mxu3 %v6951_v60  ;;  %6118 = vmatpush.msrb.mxu0 %v7004_v15 }
0x151b   : > { %5879 = vmatmul.f32.vlgmr.msrb.gmra.mxu1 %v12239_v38  ;;  %5920 = vmatmul.f32.gmra.mxu3 %v12239_v38 }
0x151c   : > { %5943 = vmatmul.f32.vlgmr.msra.gmra.mxu0 %v12090_v46  ;;  %5981 = vmatpush.msra.mxu3 %v6947_v9  ;;  %v7018_v9 = vld [vmem:[%s12775_s8 + $0x288] sm:$0xff] }
0x151d   : > { %6119 = vmatpush.msrb.mxu0 %v7003_v32  ;;  %v7017_v32 = vld [vmem:[%s12775_s8 + $0x280] sm:$0xff] }
0x151e   : > { %5982 = vmatpush.msra.mxu3 %v6943_v31 }
0x151f   : > { %6120 = vmatpush.msrb.mxu0 %v7002_v29 }
0x1520   : > { %5983 = vmatpush.msra.mxu3 %v6939_v26 }
0x1521   : > { %6121 = vmatpush.msrb.mxu0 %v7001_v17 }
0x1522   : > { %6147 = vmatpush.msrb.mxu3 %v7032_v20  ;;  %v7041_v20 = vld [vmem:[%s12775_s8 + $0x340] sm:$0xff] }
0x1524   : > { %5946 = vmatmul.f32.gmra.mxu0 %v12141_v12 }
0x152c   : > { %5949 = vmatmul.f32.gmra.mxu0 %v12179_v53 }
0x1534   : > { %5952 = vmatmul.f32.gmra.mxu0 %v12204_v27 }
0x153c   : > { %5955 = vmatmul.f32.gmra.mxu0 %v12223_v48 }
0x153e   : > { %v5514_v57 = vpop.xlane.xlu1 %5513 }
0x153f   : > { %v5522_v25 = vmul.f32 0.007874016, %v5514_v57 }
0x1541   : > { %7772 = vrsqrt.f32 %v5522_v25  ;;  %vm5625_vm2 = vcmp.eq.f32.partialorder %v5522_v25, inf  ;;  %v5628_v54 = vand.u32 2147483648, %v5522_v25  ;;  %vm5627_vm3 = vcmp.eq.f32.partialorder %v5522_v25, 0.0 }
0x1544   : > { %5958 = vmatmul.f32.gmra.mxu0 %v12232_v33 }
0x1547   : > { %v7773_v6 = vpop.eup %7772 }
0x1548   : > { %v5619_v59 = vmul.f32 %v7773_v6, %v5522_v25 }
0x154a   : > { %v5620_v51 = vmul.f32 %v7773_v6, %v5619_v59  ;;  %v7029_v59 = vld [vmem:[%s12775_s8 + $0x2e0] sm:$0xff] }
0x154c   : > { %v5621_v24 = vmul.f32 0.5, %v5620_v51  ;;  %5961 = vmatmul.f32.gmra.mxu0 %v12239_v38 }
0x154e   : > { %v5622_v35 = vsub.f32 1.5, %v5621_v24 }
0x1550   : > { %v5623_v19 = vmul.f32 %v7773_v6, %v5622_v35  ;;  %v7031_v6 = vld [vmem:[%s12775_s8 + $0x2f0] sm:$0xff]  ;;  %v7025_v35 = vld [vmem:[%s12775_s8 + $0x2c0] sm:$0xff] }
0x1551   : > { %6148 = vmatpush.msrb.mxu3 %v7031_v6  ;;  %v7040_v6 = vld [vmem:[%s12775_s8 + $0x338] sm:$0xff] }
0x1552   : > { %v5624_v42 = vmul.f32 %v5623_v19, %v5522_v25  ;;  %v7023_v19 = vld [vmem:[%s12775_s8 + $0x2b0] sm:$0xff] }
0x1554   : > { %v5626_v22 = vsel %vm5625_vm2, %v5522_v25, %v5624_v42  ;;  %v7022_v42 = vld [vmem:[%s12775_s8 + $0x2a8] sm:$0xff] }
0x1555   : > { %v5629_v0 = vsel %vm5627_vm3, %v5628_v54, %v5626_v22  ;;  %v7021_v54 = vld [vmem:[%s12775_s8 + $0x2a0] sm:$0xff] }
0x1556   : > { %v5637_v40 = vadd.f32 1e-06, %v5629_v0  ;;  %v7019_v0 = vld [vmem:[%s12775_s8 + $0x290] sm:$0xff] }
0x1558   : > { %7774 = vrcp.f32 %v5637_v40  ;;  %v5754_v23 = vand.u32 2147483648, %v5637_v40  ;;  %v5752_v52 = vand.u32 2147483647, %v5637_v40  ;;  %vm5748_vm5 = vweird.f32 %v5637_v40 }
0x155a   : > { %v5755_v43 = vor.u32 1.1754944e-38, %v5754_v23  ;;  %vm5753_vm7 = vcmp.eq.f32.partialorder %v5752_v52, 8.507059e+37 }
0x155e   : > { %v7775_v3 = vpop.eup %7774 }
0x155f   : > { %v5744_v7 = vmul.f32 %v7775_v3, %v5637_v40  ;;  %vm5749_vm4 = vweird.f32 %v7775_v3 }
0x1560   : > { %vm5750_vm6 = vmor %vm5748_vm5, %vm5749_vm4 }
0x1561   : > { %v5745_v8 = vsub.f32 1.0, %v5744_v7  ;;  %v12425_v7 = vperm.slane %v12351_v30, 1 }
0x1563   : > { %v5746_v14 = vmul.f32 %v7775_v3, %v5745_v8 }
0x1565   : > { %v5747_v10 = vadd.f32 %v7775_v3, %v5746_v14 }
0x1567   : > { %v5751_v2 = vsel %vm5750_vm6, %v7775_v3, %v5747_v10  ;;  %v7046_v10 = vld [vmem:[%s12775_s8 + $0x368] sm:$0xff] }
0x1568   : > { %v5756_v18 = vsel %vm5753_vm7, %v5755_v43, %v5751_v2  ;;  %v5862_v5 = vpop.f32.mrf.mxu0  ;;  %v7064_v2 = vld [vmem:[%s12775_s8 + $0x3f8] sm:$0xff] }
0x1569   : > { %v5757_v57 = vmul.f32 %v5756_v18, %v5533_v1  ;;  %v5863_v44 = vadd.f32 %v5862_v5, %v12357_v49  ;;  %v7045_v1 = vld [vmem:[%s12775_s8 + $0x360] sm:$0xff]  ;;  %v7044_v18 = vld [vmem:[%s12775_s8 + $0x358] sm:$0xff]  ;;  %v7063_v5 = vld [vmem:[%s12775_s8 + $0x3f0] sm:$0xff] }
0x156b   : > { %v12354_v25 = vadd.f32 %v12077_v39, %v5757_v57  ;;  %v6009_v16 = vmax.f32 %v5863_v44, 0.0  ;;  %v7043_v44 = vld [vmem:[%s12775_s8 + $0x350] sm:$0xff] }
0x156d   : > { %5882 = vmatmul.f32.gmra.mxu1 %v12354_v25  ;;  %5923 = vmatmul.f32.gmra.mxu3 %v12354_v25 }
0x156e   : > { %5964 = vmatmul.f32.gmra.mxu0 %v12354_v25  ;;  %v5903_v29 = vpop.f32.mrf.mxu3 }
0x156f   : > { %v5904_v8 = vadd.f32 %v5903_v29, %v12425_v7  ;;  %v7050_v29 = vld [vmem:[%s12775_s8 + $0x388] sm:$0xff] }
0x1570   : > { %v5865_v55 = vpop.f32.mrf.mxu0 }
0x1571   : > { %v5866_v45 = vadd.f32 %v5865_v55, %v12357_v49  ;;  %v6010_v23 = vmax.f32 %v5904_v8, 0.0  ;;  %v7062_v55 = vld [vmem:[%s12775_s8 + $0x3e8] sm:$0xff] }
0x1573   : > { %v6013_v50 = vmax.f32 %v5866_v45, 0.0  ;;  %v7061_v45 = vld [vmem:[%s12775_s8 + $0x3e0] sm:$0xff] }
0x1575   : > { %5984 = vmatmul.f32.vlgmr.msra.gmra.mxu3 %v12090_v46  ;;  %v7030_v46 = vld [vmem:[%s12775_s8 + $0x2e8] sm:$0xff] }
0x1576   : > { %6122 = vmatmul.f32.vlgmr.msrb.gmra.mxu0 %v6009_v16  ;;  %6149 = vmatpush.msrb.mxu3 %v7030_v46  ;;  %v5906_v3 = vpop.f32.mrf.mxu3  ;;  %v7042_v16 = vld [vmem:[%s12775_s8 + $0x348] sm:$0xff]  ;;  %v7059_v46 = vld [vmem:[%s12775_s8 + $0x3d0] sm:$0xff] }
0x1577   : > { %v5907_v52 = vadd.f32 %v5906_v3, %v12425_v7 }
0x1578   : > { %v5868_v39 = vpop.f32.mrf.mxu0  ;;  %6150 = vmatpush.msrb.mxu3 %v7029_v59 }
0x1579   : > { %v5869_v51 = vadd.f32 %v5868_v39, %v12357_v49  ;;  %v6014_v43 = vmax.f32 %v5907_v52, 0.0 }
0x157b   : > { %v6017_v11 = vmax.f32 %v5869_v51, 0.0 }
0x157d   : > { %5987 = vmatmul.f32.gmra.mxu3 %v12141_v12  ;;  %v7028_v12 = vld [vmem:[%s12775_s8 + $0x2d8] sm:$0xff] }
0x157e   : > { %6125 = vmatmul.f32.gmra.mxu0 %v6013_v50  ;;  %6151 = vmatpush.msrb.mxu3 %v7028_v12  ;;  %v5909_v14 = vpop.f32.mrf.mxu3  ;;  %v7060_v50 = vld [vmem:[%s12775_s8 + $0x3d8] sm:$0xff]  ;;  %v7039_v12 = vld [vmem:[%s12775_s8 + $0x330] sm:$0xff] }
0x1580   : > { %v5871_v24 = vpop.f32.mrf.mxu0  ;;  %6152 = vmatpush.msrb.mxu3 %v7027_v36  ;;  %v7038_v36 = vld [vmem:[%s12775_s8 + $0x328] sm:$0xff] }
0x1581   : > { %v5872_v13 = vadd.f32 %v5871_v24, %v12357_v49 }
0x1582   : > { %6153 = vmatpush.msrb.mxu3 %v7026_v56 }
0x1583   : > { %v6021_v28 = vmax.f32 %v5872_v13, 0.0  ;;  %v7037_v13 = vld [vmem:[%s12775_s8 + $0x320] sm:$0xff] }
0x1584   : > { %6154 = vmatpush.msrb.mxu3 %v7025_v35  ;;  %v7057_v35 = vld [vmem:[%s12775_s8 + $0x3c0] sm:$0xff] }
0x1585   : > { %5990 = vmatmul.f32.gmra.mxu3 %v12179_v53  ;;  %v7024_v53 = vld [vmem:[%s12775_s8 + $0x2b8] sm:$0xff] }
0x1586   : > { %6128 = vmatmul.f32.gmra.mxu0 %v6017_v11  ;;  %6155 = vmatpush.msrb.mxu3 %v7024_v53  ;;  %v5912_v57 = vpop.f32.mrf.mxu3  ;;  %v7058_v11 = vld [vmem:[%s12775_s8 + $0x3c8] sm:$0xff]  ;;  %v7056_v53 = vld [vmem:[%s12775_s8 + $0x3b8] sm:$0xff] }
0x1587   : > { %v5913_v59 = vadd.f32 %v5912_v57, %v12425_v7  ;;  %v5840_v57 = vperm.slane %v12351_v30, 3 }
0x1588   : > { %v5874_v34 = vpop.f32.mrf.mxu0  ;;  %6156 = vmatpush.msrb.mxu3 %v7023_v19  ;;  %v7036_v19 = vld [vmem:[%s12775_s8 + $0x318] sm:$0xff] }
0x1589   : > { %v5875_v60 = vadd.f32 %v5874_v34, %v12357_v49  ;;  %v6022_v24 = vmax.f32 %v5913_v59, 0.0 }
0x158a   : > { %6157 = vmatpush.msrb.mxu3 %v7022_v42  ;;  %v7055_v42 = vld [vmem:[%s12775_s8 + $0x3b0] sm:$0xff] }
0x158b   : > { %v6025_v15 = vmax.f32 %v5875_v60, 0.0  ;;  %v7054_v60 = vld [vmem:[%s12775_s8 + $0x3a8] sm:$0xff] }
0x158c   : > { %6158 = vmatpush.msrb.mxu3 %v7021_v54  ;;  %v7035_v54 = vld [vmem:[%s12775_s8 + $0x310] sm:$0xff] }
0x158d   : > { %5993 = vmatmul.f32.gmra.mxu3 %v12204_v27  ;;  %v7020_v27 = vld [vmem:[%s12775_s8 + $0x298] sm:$0xff] }
0x158e   : > { %6131 = vmatmul.f32.gmra.mxu0 %v6021_v28  ;;  %6159 = vmatpush.msrb.mxu3 %v7020_v27  ;;  %v5915_v51 = vpop.f32.mrf.mxu3  ;;  %v7034_v27 = vld [vmem:[%s12775_s8 + $0x308] sm:$0xff] }
0x158f   : > { %v5916_v56 = vadd.f32 %v5915_v51, %v12425_v7 }
0x1590   : > { %v5877_v22 = vpop.f32.mrf.mxu0  ;;  %6160 = vmatpush.msrb.mxu3 %v7019_v0  ;;  %v7033_v0 = vld [vmem:[%s12775_s8 + $0x300] sm:$0xff] }
0x1591   : > { %v5878_v31 = vadd.f32 %v5877_v22, %v12357_v49  ;;  %v6026_v28 = vmax.f32 %v5916_v56, 0.0  ;;  %v7053_v22 = vld [vmem:[%s12775_s8 + $0x3a0] sm:$0xff] }
0x1592   : > { %6161 = vmatpush.msrb.mxu3 %v7018_v9  ;;  %v7052_v9 = vld [vmem:[%s12775_s8 + $0x398] sm:$0xff] }
0x1593   : > { %v6029_v40 = vmax.f32 %v5878_v31, 0.0 }
0x1594   : > { %6162 = vmatpush.msrb.mxu3 %v7017_v32 }
0x1595   : > { %5996 = vmatmul.f32.gmra.mxu3 %v12223_v48 }
0x1596   : > { %6134 = vmatmul.f32.gmra.mxu0 %v6025_v15  ;;  %6229 = vmatpush.msra.mxu3 %v7064_v2  ;;  %v5918_v34 = vpop.f32.mrf.mxu3 }
0x1597   : > { %v5919_v15 = vadd.f32 %v5918_v34, %v12425_v7 }
0x1598   : > { %v5880_v48 = vpop.f32.mrf.mxu1  ;;  %6230 = vmatpush.msra.mxu3 %v7063_v5 }
0x1599   : > { %v5881_v26 = vadd.f32 %v5880_v48, %v12357_v49  ;;  %v5944_v32 = vpop.f32.mrf.mxu0  ;;  %v6030_v31 = vmax.f32 %v5919_v15, 0.0 }
0x159a   : > { %6231 = vmatpush.msra.mxu3 %v7062_v55 }
0x159b   : > { %v6033_v17 = vmax.f32 %v5881_v26, 0.0 }
0x159c   : > { %6232 = vmatpush.msra.mxu3 %v7061_v45 }
0x159d   : > { %5999 = vmatmul.f32.gmra.mxu3 %v12232_v33  ;;  %v7048_v33 = vld [vmem:[%s12775_s8 + $0x378] sm:$0xff] }
0x159e   : > { %6137 = vmatmul.f32.gmra.mxu0 %v6029_v40  ;;  %6233 = vmatpush.msra.mxu3 %v7060_v50  ;;  %v7051_v40 = vld [vmem:[%s12775_s8 + $0x390] sm:$0xff]  ;;  %v5921_v48 = vpop.f32.mrf.mxu3 }
0x159f   : > { %6188 = vmatpush.msra.mxu0 %v7048_v33  ;;  %v5922_v26 = vadd.f32 %v5921_v48, %v12425_v7  ;;  %v5839_v33 = vperm.slane %v12351_v30, 2 }
0x15a0   : > { %6234 = vmatpush.msra.mxu3 %v7059_v46 }
0x15a1   : > { %v6034_v3 = vmax.f32 %v5922_v26, 0.0  ;;  %v5947_v8 = vpop.f32.mrf.mxu0 }
0x15a2   : > { %6235 = vmatpush.msra.mxu3 %v7058_v11 }
0x15a4   : > { %6236 = vmatpush.msra.mxu3 %v7057_v35 }
0x15a5   : > { %6002 = vmatmul.f32.gmra.mxu3 %v12239_v38  ;;  %v7047_v38 = vld [vmem:[%s12775_s8 + $0x370] sm:$0xff] }
0x15a6   : > { %6140 = vmatmul.f32.gmra.mxu0 %v6033_v17  ;;  %6237 = vmatpush.msra.mxu3 %v7056_v53  ;;  %v7049_v17 = vld [vmem:[%s12775_s8 + $0x380] sm:$0xff] }
0x15a7   : > { %6189 = vmatpush.msra.mxu0 %v7047_v38 }
0x15a8   : > { %6238 = vmatpush.msra.mxu3 %v7055_v42 }
0x15a9   : > { %6190 = vmatpush.msra.mxu0 %v7046_v10  ;;  %v5950_v52 = vpop.f32.mrf.mxu0 }
0x15aa   : > { %6239 = vmatpush.msra.mxu3 %v7054_v60 }
0x15ab   : > { %6191 = vmatpush.msra.mxu0 %v7045_v1 }
0x15ac   : > { %6240 = vmatpush.msra.mxu3 %v7053_v22 }
0x15ad   : > { %6005 = vmatmul.f32.gmra.mxu3 %v12354_v25  ;;  %v5910_v25 = vadd.f32 %v5909_v14, %v12425_v7  ;;  %6192 = vmatpush.msra.mxu0 %v7044_v18 }
0x15ae   : > { %6241 = vmatpush.msra.mxu3 %v7052_v9 }
0x15af   : > { %6193 = vmatpush.msra.mxu0 %v7043_v44  ;;  %v6018_v39 = vmax.f32 %v5910_v25, 0.0  ;;  %v5948_v44 = vadd.f32 %v5947_v8, %v5839_v33 }
0x15b0   : > { %6242 = vmatpush.msra.mxu3 %v7051_v40 }
0x15b1   : > { %6194 = vmatpush.msra.mxu0 %v7042_v16  ;;  %v5953_v5 = vpop.f32.mrf.mxu0  ;;  %v6015_v16 = vmax.f32 %v5948_v44, 0.0 }
0x15b2   : > { %6243 = vmatpush.msra.mxu3 %v7050_v29  ;;  %v5954_v59 = vadd.f32 %v5953_v5, %v5839_v33 }
0x15b3   : > { %6195 = vmatpush.msra.mxu0 %v7041_v20 }
0x15b4   : > { %6244 = vmatpush.msra.mxu3 %v7049_v17 }
0x15b5   : > { %6163 = vmatmul.f32.vlgmr.msrb.gmra.mxu3 %v6010_v23  ;;  %6196 = vmatpush.msra.mxu0 %v7040_v6 }
0x15b7   : > { %6197 = vmatpush.msra.mxu0 %v7039_v12  ;;  %v6023_v12 = vmax.f32 %v5954_v59, 0.0 }
0x15b9   : > { %6198 = vmatpush.msra.mxu0 %v7038_v36  ;;  %v5956_v50 = vpop.f32.mrf.mxu0 }
0x15ba   : > { %v5957_v36 = vadd.f32 %v5956_v50, %v5839_v33 }
0x15bb   : > { %6199 = vmatpush.msra.mxu0 %v7037_v13 }
0x15bc   : > { %v6027_v13 = vmax.f32 %v5957_v36, 0.0 }
0x15bd   : > { %6166 = vmatmul.f32.gmra.mxu3 %v6014_v43  ;;  %6200 = vmatpush.msra.mxu0 %v7036_v19  ;;  %v5945_v43 = vadd.f32 %v5944_v32, %v5839_v33 }
0x15bf   : > { %6201 = vmatpush.msra.mxu0 %v7035_v54  ;;  %v6011_v18 = vmax.f32 %v5945_v43, 0.0 }
0x15c1   : > { %6202 = vmatpush.msra.mxu0 %v7034_v27 }
0x15c3   : > { %6203 = vmatpush.msra.mxu0 %v7033_v0 }
0x15c5   : > { %6169 = vmatmul.f32.gmra.mxu3 %v6018_v39  ;;  %v5951_v39 = vadd.f32 %v5950_v52, %v5839_v33 }
0x15cd   : > { %6172 = vmatmul.f32.gmra.mxu3 %v6022_v24  ;;  %v5959_v24 = vpop.f32.mrf.mxu0 }
0x15d5   : > { %6175 = vmatmul.f32.gmra.mxu3 %v6026_v28  ;;  %v5962_v53 = vpop.f32.mrf.mxu0  ;;  %v5960_v28 = vadd.f32 %v5959_v24, %v5839_v33 }
0x15d6   : > { %v5963_v15 = vadd.f32 %v5962_v53, %v5839_v33 }
0x15d7   : > { %v6031_v54 = vmax.f32 %v5960_v28, 0.0 }
0x15d8   : > { %v6035_v9 = vmax.f32 %v5963_v15, 0.0 }
0x15dd   : > { %6178 = vmatmul.f32.gmra.mxu3 %v6030_v31 }
0x15e5   : > { %6181 = vmatmul.f32.gmra.mxu3 %v6034_v3 }
0x15ea   : > { %v5883_v23 = vpop.f32.mrf.mxu1 }
0x15eb   : > { %v5884_v14 = vadd.f32 %v5883_v23, %v12357_v49  ;;  %v5965_v60 = vpop.f32.mrf.mxu0 }
0x15ec   : > { %v5966_v40 = vadd.f32 %v5965_v60, %v5839_v33 }
0x15ed   : > { %v6037_v38 = vmax.f32 %v5884_v14, 0.0 }
0x15ee   : > { %v6039_v26 = vmax.f32 %v5966_v40, 0.0 }
0x15ef   : > { %6143 = vmatmul.f32.gmra.mxu0 %v6037_v38 }
0x15f0   : > { %v5924_v10 = vpop.f32.mrf.mxu3 }
0x15f1   : > { %v5925_v1 = vadd.f32 %v5924_v10, %v12425_v7  ;;  %v6019_v7 = vmax.f32 %v5951_v39, 0.0 }
0x15f3   : > { %v6038_v2 = vmax.f32 %v5925_v1, 0.0  ;;  %v6123_v32 = vpop.f32.mrf.mxu0 }
0x15f5   : > { %6184 = vmatmul.f32.gmra.mxu3 %v6038_v2 }
0x15f7   : > { %6204 = vmatmul.f32.vlgmr.msra.gmra.mxu0 %v6011_v18 }
0x15f8   : > { %v5985_v25 = vpop.f32.mrf.mxu3 }
0x15f9   : > { %v5986_v55 = vadd.f32 %v5985_v25, %v5840_v57 }
0x15fb   : > { %v6012_v49 = vmax.f32 %v5986_v55, 0.0  ;;  %v6126_v8 = vpop.f32.mrf.mxu0 }
0x15fd   : > { %6245 = vmatmul.f32.vlgmr.msra.gmra.mxu3 %v6012_v49 }
0x15ff   : > { %6207 = vmatmul.f32.gmra.mxu0 %v6015_v16 }
0x1600   : > { %v5988_v45 = vpop.f32.mrf.mxu3 }
0x1601   : > { %v5989_v20 = vadd.f32 %v5988_v45, %v5840_v57 }
0x1603   : > { %v6016_v6 = vmax.f32 %v5989_v20, 0.0  ;;  %v6129_v38 = vpop.f32.mrf.mxu0 }
0x1605   : > { %6248 = vmatmul.f32.gmra.mxu3 %v6016_v6 }
0x1607   : > { %6210 = vmatmul.f32.gmra.mxu0 %v6019_v7  ;;  %v7130_v7 = vld [vmem:[%s12776_s9 + $0x1] ss:$0 sm:$0xff] }
0x1608   : > { %v5991_v46 = vpop.f32.mrf.mxu3 }
0x1609   : > { %v5992_v30 = vadd.f32 %v5991_v46, %v5840_v57 }
0x160b   : > { %v6020_v51 = vmax.f32 %v5992_v30, 0.0  ;;  %v6132_v10 = vpop.f32.mrf.mxu0 }
0x160d   : > { %6251 = vmatmul.f32.gmra.mxu3 %v6020_v51 }
0x160f   : > { %6213 = vmatmul.f32.gmra.mxu0 %v6023_v12 }
0x1610   : > { %v5994_v11 = vpop.f32.mrf.mxu3 }
0x1611   : > { %v5995_v56 = vadd.f32 %v5994_v11, %v5840_v57 }
0x1613   : > { %v6024_v35 = vmax.f32 %v5995_v56, 0.0  ;;  %v6135_v1 = vpop.f32.mrf.mxu0 }
0x1615   : > { %6254 = vmatmul.f32.gmra.mxu3 %v6024_v35 }
0x1617   : > { %6216 = vmatmul.f32.gmra.mxu0 %v6027_v13 }
0x1618   : > { %v5997_v34 = vpop.f32.mrf.mxu3 }
0x1619   : > { %v5998_v19 = vadd.f32 %v5997_v34, %v5840_v57 }
0x161b   : > { %v6028_v42 = vmax.f32 %v5998_v19, 0.0  ;;  %v6138_v18 = vpop.f32.mrf.mxu0 }
0x161d   : > { %6257 = vmatmul.f32.gmra.mxu3 %v6028_v42 }
0x161f   : > { %6219 = vmatmul.f32.gmra.mxu0 %v6031_v54 }
0x1620   : > { %v6000_v27 = vpop.f32.mrf.mxu3 }
0x1621   : > { %v6001_v22 = vadd.f32 %v6000_v27, %v5840_v57 }
0x1623   : > { %v6032_v0 = vmax.f32 %v6001_v22, 0.0  ;;  %v6141_v33 = vpop.f32.mrf.mxu0 }
0x1625   : > { %6260 = vmatmul.f32.gmra.mxu3 %v6032_v0 }
0x1627   : > { %6222 = vmatmul.f32.gmra.mxu0 %v6035_v9 }
0x1628   : > { %v6003_v31 = vpop.f32.mrf.mxu3 }
0x1629   : > { %v6004_v48 = vadd.f32 %v6003_v31, %v5840_v57 }
0x162b   : > { %v6036_v29 = vmax.f32 %v6004_v48, 0.0 }
0x162d   : > { %6263 = vmatmul.f32.gmra.mxu3 %v6036_v29 }
0x162f   : > { %6225 = vmatmul.f32.gmra.mxu0 %v6039_v26 }
0x1630   : > { %v6006_v17 = vpop.f32.mrf.mxu3 }
0x1631   : > { %v6007_v3 = vadd.f32 %v6006_v17, %v5840_v57 }
0x1633   : > { %v6040_v23 = vmax.f32 %v6007_v3, 0.0 }
0x1635   : > { %6266 = vmatmul.f32.gmra.mxu3 %v6040_v23 }
0x1638   : > { %v6164_v14 = vpop.f32.mrf.mxu3 }
0x1639   : > { %v6165_v39 = vadd.f32 %v6164_v14, %v6123_v32 }
0x1640   : > { %v6167_v52 = vpop.f32.mrf.mxu3 }
0x1641   : > { %v6168_v30 = vadd.f32 %v6167_v52, %v6126_v8 }
0x1648   : > { %v6170_v43 = vpop.f32.mrf.mxu3 }
0x1649   : > { %v6171_v35 = vadd.f32 %v6170_v43, %v6129_v38 }
0x1650   : > { %v6173_v2 = vpop.f32.mrf.mxu3 }
0x1651   : > { %v6174_v42 = vadd.f32 %v6173_v2, %v6132_v10 }
0x1658   : > { %v6176_v5 = vpop.f32.mrf.mxu3 }
0x1659   : > { %v6177_v0 = vadd.f32 %v6176_v5, %v6135_v1 }
0x1660   : > { %v6179_v25 = vpop.f32.mrf.mxu3 }
0x1661   : > { %v6180_v29 = vadd.f32 %v6179_v25, %v6138_v18 }
0x1668   : > { %v6182_v55 = vpop.f32.mrf.mxu3 }
0x1669   : > { %v6183_v14 = vadd.f32 %v6182_v55, %v6141_v33 }
0x166c   : > { %v6144_v44 = vpop.f32.mrf.mxu0 }
0x1674   : > { %v6205_v49 = vpop.f32.mrf.mxu0 }
0x1675   : > { %v6206_v20 = vadd.f32 %v6205_v49, %v6165_v39 }
0x1678   : > { %v6185_v16 = vpop.f32.mrf.mxu3 }
0x1679   : > { %v6186_v45 = vadd.f32 %v6185_v16, %v6144_v44 }
0x167c   : > { %v6208_v57 = vpop.f32.mrf.mxu0 }
0x167d   : > { %v6209_v24 = vadd.f32 %v6208_v57, %v6168_v30 }
0x1680   : > { %v6246_v50 = vpop.f32.mrf.mxu3 }
0x1681   : > { %v6247_v6 = vadd.f32 %v6246_v50, %v6206_v20 }
0x1683   : > { %v6270_v46 = vadd.f32 %v6247_v6, %v11848_v37 }
0x1684   : > { %v6211_v59 = vpop.f32.mrf.mxu0 }
0x1685   : > { %v6283_v51 = vadd.f32 %v7130_v7, %v6270_v46  ;;  %v6212_v53 = vadd.f32 %v6211_v59, %v6171_v35 }
0x1687   : > { %6291 = vadd.xlane.f32.xlu2 %v6283_v51 }
0x1688   : > { %v6249_v12 = vpop.f32.mrf.mxu3 }
0x1689   : > { %v6250_v11 = vadd.f32 %v6249_v12, %v6209_v24 }
0x168b   : > { %v6271_v36 = vadd.f32 %v6250_v11, %v11852_v4 }
0x168c   : > { %v6214_v56 = vpop.f32.mrf.mxu0 }
0x168d   : > { %v6284_v13 = vadd.f32 %v7130_v7, %v6271_v36  ;;  %v6215_v60 = vadd.f32 %v6214_v56, %v6174_v42  ;;  %v6615_v42 = vld [vmem:[%s12777_s10 + $0x70] sm:$0xff] }
0x168f   : > { %6293 = vadd.xlane.f32.xlu0 %v6284_v13 }
0x1690   : > { %v6252_v34 = vpop.f32.mrf.mxu3 }
0x1691   : > { %v6253_v28 = vadd.f32 %v6252_v34, %v6212_v53 }
0x1693   : > { %v6272_v19 = vadd.f32 %v6253_v28, %v11856_v41 }
0x1694   : > { %v6217_v54 = vpop.f32.mrf.mxu0 }
0x1695   : > { %v6285_v37 = vadd.f32 %v7130_v7, %v6272_v19  ;;  %v6218_v9 = vadd.f32 %v6217_v54, %v6177_v0  ;;  %v6616_v19 = vld [vmem:[%s12777_s10 + $0x78] sm:$0xff]  ;;  %v6610_v0 = vld [vmem:[%s12777_s10 + $0x48] sm:$0xff] }
0x1696   : > { %6621 = vmatpush.msrb.mxu0 %v6616_v19 }
0x1697   : > { %6295 = vadd.xlane.f32.xlu1 %v6285_v37 }
0x1698   : > { %v6255_v27 = vpop.f32.mrf.mxu3  ;;  %6622 = vmatpush.msrb.mxu0 %v6615_v42 }
0x1699   : > { %v6256_v15 = vadd.f32 %v6255_v27, %v6215_v60  ;;  %v6613_v27 = vld [vmem:[%s12777_s10 + $0x60] sm:$0xff] }
0x169b   : > { %v6273_v22 = vadd.f32 %v6256_v15, %v11863_v58  ;;  %v6612_v15 = vld [vmem:[%s12777_s10 + $0x58] sm:$0xff] }
0x169c   : > { %v6220_v32 = vpop.f32.mrf.mxu0 }
0x169d   : > { %v6286_v4 = vadd.f32 %v7130_v7, %v6273_v22  ;;  %v6221_v26 = vadd.f32 %v6220_v32, %v6180_v29  ;;  %v6611_v22 = vld [vmem:[%s12777_s10 + $0x50] sm:$0xff] }
0x169f   : > { %6297 = vadd.xlane.f32.xlu2 %v6286_v4 }
0x16a0   : > { %v6258_v31 = vpop.f32.mrf.mxu3 }
0x16a1   : > { %v6259_v40 = vadd.f32 %v6258_v31, %v6218_v9 }
0x16a3   : > { %v6274_v48 = vadd.f32 %v6259_v40, %v11873_v63 }
0x16a4   : > { %v6223_v8 = vpop.f32.mrf.mxu0 }
0x16a5   : > { %v6287_v41 = vadd.f32 %v7130_v7, %v6274_v48  ;;  %v6224_v38 = vadd.f32 %v6223_v8, %v6183_v14  ;;  %v6609_v48 = vld [vmem:[%s12777_s10 + $0x40] sm:$0xff] }
0x16a7   : > { %6299 = vadd.xlane.f32.xlu0 %v6287_v41 }
0x16a8   : > { %v6261_v17 = vpop.f32.mrf.mxu3 }
0x16a9   : > { %v6262_v3 = vadd.f32 %v6261_v17, %v6221_v26  ;;  %v6608_v26 = vld [vmem:[%s12777_s10 + $0x38] sm:$0xff] }
0x16ab   : > { %v6275_v23 = vadd.f32 %v6262_v3, %v11877_v61 }
0x16ac   : > { %v6226_v1 = vpop.f32.mrf.mxu0 }
0x16ad   : > { %v6288_v58 = vadd.f32 %v7130_v7, %v6275_v23  ;;  %v6227_v63 = vadd.f32 %v6226_v1, %v6186_v45  ;;  %v6606_v23 = vld [vmem:[%s12777_s10 + $0x28] sm:$0xff] }
0x16af   : > { %6301 = vadd.xlane.f32.xlu1 %v6288_v58 }
0x16b0   : > { %v6264_v52 = vpop.f32.mrf.mxu3 }
0x16b1   : > { %v6265_v10 = vadd.f32 %v6264_v52, %v6224_v38 }
0x16b3   : > { %v6276_v43 = vadd.f32 %v6265_v10, %v11881_v62  ;;  %v6605_v10 = vld [vmem:[%s12777_s10 + $0x20] sm:$0xff] }
0x16b5   : > { %v6289_v2 = vadd.f32 %v7130_v7, %v6276_v43 }
0x16b7   : > { %6303 = vadd.xlane.f32.xlu0 %v6289_v2 }
0x16b8   : > { %v6267_v18 = vpop.f32.mrf.mxu3 }
0x16b9   : > { %v6268_v5 = vadd.f32 %v6267_v18, %v6227_v63 }
0x16bb   : > { %v6277_v25 = vadd.f32 %v6268_v5, %v11898_v21 }
0x16bd   : > { %v12546_v44 = vadd.f32 %v7130_v7, %v6277_v25  ;;  %v6603_v25 = vld [vmem:[%s12777_s10 + $0x10] sm:$0xff] }
0x16fa   : > { %v6292_v49 = vpop.xlane.xlu2 %6291 }
0x16fb   : > { %v6307_v61 = vmul.f32 %v6292_v49, %v12843_v47 }
0x16fd   : > { %v12549_v33 = vsub.f32 %v6283_v51, %v6307_v61 }
0x16ff   : > { %v6323_v55 = vmul.f32 %v12549_v33, %v12549_v33 }
0x1701   : > { %6331 = vadd.xlane.f32.xlu2 %v6323_v55  ;;  %v6602_v55 = vld [vmem:[%s12777_s10 + $0x8] sm:$0xff] }
0x1702   : > { %v6294_v62 = vpop.xlane.xlu0 %6293 }
0x1703   : > { %v6308_v16 = vmul.f32 %v6294_v62, %v12843_v47 }
0x1705   : > { %v12554_v45 = vsub.f32 %v6284_v13, %v6308_v16 }
0x1707   : > { %v6324_v57 = vmul.f32 %v12554_v45, %v12554_v45 }
0x1709   : > { %6333 = vadd.xlane.f32.xlu1 %v6324_v57  ;;  %6305 = vadd.xlane.f32.xlu2 %v12546_v44 }
0x170a   : > { %v6296_v21 = vpop.xlane.xlu1 %6295 }
0x170b   : > { %v6309_v39 = vmul.f32 %v6296_v21, %v12843_v47 }
0x170d   : > { %v12560_v20 = vsub.f32 %v6285_v37, %v6309_v39  ;;  %v6614_v37 = vld [vmem:[%s12777_s10 + $0x68] sm:$0xff] }
0x170e   : > { %6623 = vmatpush.msrb.mxu0 %v6614_v37 }
0x170f   : > { %v6325_v50 = vmul.f32 %v12560_v20, %v12560_v20 }
0x1710   : > { %6624 = vmatpush.msrb.mxu0 %v6613_v27 }
0x1711   : > { %6335 = vadd.xlane.f32.xlu0 %v6325_v50  ;;  %v6601_v50 = vld [vmem:[%s12777_s10] sm:$0xff] }
0x1712   : > { %v6298_v6 = vpop.xlane.xlu2 %6297  ;;  %6625 = vmatpush.msrb.mxu0 %v6612_v15  ;;  %v12655_v15 = vld [vmem:[%s12768_s1 + $0x8] ss:$0 sm:$0xff] }
0x1713   : > { %v6310_v7 = vmul.f32 %v6298_v6, %v12843_v47 }
0x1714   : > { %6626 = vmatpush.msrb.mxu0 %v6611_v22 }
0x1715   : > { %v12565_v46 = vsub.f32 %v6286_v4, %v6310_v7 }
0x1716   : > { %6627 = vmatpush.msrb.mxu0 %v6610_v0 }
0x1717   : > { %v6326_v59 = vmul.f32 %v12565_v46, %v12565_v46 }
0x1718   : > { %6628 = vmatpush.msrb.mxu0 %v6609_v48 }
0x1719   : > { %6337 = vadd.xlane.f32.xlu1 %v6326_v59 }
0x171a   : > { %v6300_v30 = vpop.xlane.xlu0 %6299  ;;  %6629 = vmatpush.msrb.mxu0 %v6608_v26 }
0x171b   : > { %v6311_v51 = vmul.f32 %v6300_v30, %v12843_v47 }
0x171d   : > { %v12570_v24 = vsub.f32 %v6287_v41, %v6311_v51 }
0x171f   : > { %v6327_v12 = vmul.f32 %v12570_v24, %v12570_v24 }
0x1721   : > { %6339 = vadd.xlane.f32.xlu2 %v6327_v12 }
0x1722   : > { %v6302_v11 = vpop.xlane.xlu1 %6301 }
0x1723   : > { %v6312_v36 = vmul.f32 %v6302_v11, %v12843_v47 }
0x1725   : > { %v12575_v56 = vsub.f32 %v6288_v58, %v6312_v36 }
0x1727   : > { %v6328_v35 = vmul.f32 %v12575_v56, %v12575_v56 }
0x1729   : > { %6341 = vadd.xlane.f32.xlu0 %v6328_v35 }
0x172a   : > { %v6304_v13 = vpop.xlane.xlu0 %6303 }
0x172b   : > { %v6313_v53 = vmul.f32 %v6304_v13, %v12843_v47 }
0x172d   : > { %v12580_v34 = vsub.f32 %v6289_v2, %v6313_v53  ;;  %v6604_v2 = vld [vmem:[%s12777_s10 + $0x18] sm:$0xff] }
0x172f   : > { %v6329_v28 = vmul.f32 %v12580_v34, %v12580_v34 }
0x1731   : > { %6343 = vadd.xlane.f32.xlu1 %v6329_v28 }
0x1774   : > { %v6332_v54 = vpop.xlane.xlu2 %6331 }
0x1775   : > { %v6347_v60 = vmul.f32 0.007874016, %v6332_v54 }
0x1777   : > { %7776 = vrsqrt.f32 %v6347_v60  ;;  %vm6373_vm1 = vcmp.eq.f32.partialorder %v6347_v60, inf  ;;  %v6376_v5 = vand.u32 2147483648, %v6347_v60  ;;  %vm6375_vm8 = vcmp.eq.f32.partialorder %v6347_v60, 0.0 }
0x177c   : > { %v6334_v4 = vpop.xlane.xlu1 %6333  ;;  %v6306_v9 = vpop.xlane.xlu2 %6305 }
0x177d   : > { %v7777_v32 = vpop.eup %7776  ;;  %v6348_v31 = vmul.f32 0.007874016, %v6334_v4  ;;  %v6314_v40 = vmul.f32 %v6306_v9, %v12843_v47  ;;  %v6607_v47 = vld [vmem:[%s12777_s10 + $0x30] sm:$0xff] }
0x177e   : > { %v6367_v29 = vmul.f32 %v7777_v32, %v6347_v60  ;;  %6630 = vmatpush.msrb.mxu0 %v6607_v47 }
0x177f   : > { %7778 = vrsqrt.f32 %v6348_v31  ;;  %v12610_v41 = vsub.f32 %v12546_v44, %v6314_v40  ;;  %vm6385_vm9 = vcmp.eq.f32.partialorder %v6348_v31, inf  ;;  %v6388_v51 = vand.u32 2147483648, %v6348_v31 }
0x1780   : > { %v6368_v17 = vmul.f32 %v7777_v32, %v6367_v29  ;;  %6631 = vmatpush.msrb.mxu0 %v6606_v23  ;;  %vm6387_vm10 = vcmp.eq.f32.partialorder %v6348_v31, 0.0 }
0x1781   : > { %v6330_v3 = vmul.f32 %v12610_v41, %v12610_v41 }
0x1782   : > { %v6369_v8 = vmul.f32 0.5, %v6368_v17  ;;  %6632 = vmatpush.msrb.mxu0 %v6605_v10 }
0x1783   : > { %6345 = vadd.xlane.f32.xlu2 %v6330_v3  ;;  %v6358_v3 = vmul.f32 %v12655_v15, %v12549_v33  ;;  %v12673_v33 = vld [vmem:[%s12768_s1 + $0x9] ss:$0 sm:$0xff] }
0x1784   : > { %v6370_v14 = vsub.f32 1.5, %v6369_v8  ;;  %v6336_v58 = vpop.xlane.xlu0 %6335  ;;  %6633 = vmatpush.msrb.mxu0 %v6604_v2 }
0x1785   : > { %v7779_v38 = vpop.eup %7778  ;;  %v12623_v52 = vmul.f32 0.007874016, %v6336_v58 }
0x1786   : > { %v6371_v43 = vmul.f32 %v7777_v32, %v6370_v14  ;;  %v6379_v1 = vmul.f32 %v7779_v38, %v6348_v31  ;;  %6634 = vmatpush.msrb.mxu0 %v6603_v25 }
0x1787   : > { %7780 = vrsqrt.f32 %v12623_v52  ;;  %vm6397_vm11 = vcmp.eq.f32.partialorder %v12623_v52, inf  ;;  %v6400_v9 = vand.u32 2147483648, %v12623_v52  ;;  %vm6399_vm13 = vcmp.eq.f32.partialorder %v12623_v52, 0.0 }
0x1788   : > { %v6372_v63 = vmul.f32 %v6371_v43, %v6347_v60  ;;  %v6380_v18 = vmul.f32 %v7779_v38, %v6379_v1  ;;  %6635 = vmatpush.msrb.mxu0 %v6602_v55 }
0x178a   : > { %v6374_v44 = vsel %vm6373_vm1, %v6347_v60, %v6372_v63  ;;  %v6381_v49 = vmul.f32 0.5, %v6380_v18  ;;  %6636 = vmatpush.msrb.mxu0 %v6601_v50 }
0x178b   : > { %v6377_v61 = vsel %vm6375_vm8, %v6376_v5, %v6374_v44 }
0x178c   : > { %v6462_v62 = vadd.f32 1e-06, %v6377_v61  ;;  %v6382_v16 = vsub.f32 1.5, %v6381_v49  ;;  %v6338_v57 = vpop.xlane.xlu1 %6337 }
0x178d   : > { %v7781_v21 = vpop.eup %7780  ;;  %v12638_v39 = vmul.f32 0.007874016, %v6338_v57 }
0x178e   : > { %7782 = vrcp.f32 %v6462_v62  ;;  %v6383_v6 = vmul.f32 %v7779_v38, %v6382_v16  ;;  %v6391_v7 = vmul.f32 %v7781_v21, %v12623_v52  ;;  %v6481_v4 = vand.u32 2147483648, %v6462_v62 }
0x178f   : > { %7784 = vrsqrt.f32 %v12638_v39  ;;  %vm6475_vm14 = vweird.f32 %v6462_v62  ;;  %vm6409_vm2 = vcmp.eq.f32.partialorder %v12638_v39, inf  ;;  %v6412_v44 = vand.u32 2147483648, %v12638_v39 }
0x1790   : > { %v6384_v59 = vmul.f32 %v6383_v6, %v6348_v31  ;;  %v6392_v30 = vmul.f32 %v7781_v21, %v6391_v7  ;;  %v6482_v23 = vor.u32 1.1754944e-38, %v6481_v4  ;;  %vm6411_vm4 = vcmp.eq.f32.partialorder %v12638_v39, 0.0 }
0x1792   : > { %v6393_v12 = vmul.f32 0.5, %v6392_v30  ;;  %v6386_v11 = vsel %vm6385_vm9, %v6348_v31, %v6384_v59  ;;  %v6479_v31 = vand.u32 2147483647, %v6462_v62 }
0x1793   : > { %v6389_v36 = vsel %vm6387_vm10, %v6388_v51, %v6386_v11 }
0x1794   : > { %v7783_v35 = vpop.eup %7782  ;;  %v6394_v13 = vsub.f32 1.5, %v6393_v12  ;;  %v6340_v53 = vpop.xlane.xlu2 %6339  ;;  %v12645_v28 = vadd.f32 1e-06, %v6389_v36  ;;  %vm6480_vm0 = vcmp.eq.f32.partialorder %v6479_v31, 8.507059e+37  ;;  %v6359_v12 = vmul.f32 %v12655_v15, %v12554_v45 }
0x1795   : > { %v7785_v19 = vpop.eup %7784  ;;  %v12647_v42 = vmul.f32 0.007874016, %v6340_v53  ;;  %v6471_v37 = vmul.f32 %v7783_v35, %v6462_v62  ;;  %vm6476_vm12 = vweird.f32 %v7783_v35 }
0x1796   : > { %v6395_v54 = vmul.f32 %v7781_v21, %v6394_v13  ;;  %v6403_v60 = vmul.f32 %v7785_v19, %v12638_v39  ;;  %7786 = vrcp.f32 %v12645_v28  ;;  %vm6477_vm15 = vmor %vm6475_vm14, %vm6476_vm12  ;;  %v6496_v49 = vand.u32 2147483648, %v12645_v28 }
0x1797   : > { %7788 = vrsqrt.f32 %v12647_v42  ;;  %v6472_v27 = vsub.f32 1.0, %v6471_v37  ;;  %v6494_v57 = vand.u32 2147483647, %v12645_v28  ;;  %vm6490_vm5 = vweird.f32 %v12645_v28 }
0x1798   : > { %v6396_v22 = vmul.f32 %v6395_v54, %v12623_v52  ;;  %v6404_v0 = vmul.f32 %v7785_v19, %v6403_v60  ;;  %vm6421_vm7 = vcmp.eq.f32.partialorder %v12647_v42, inf  ;;  %vm6423_vm8 = vcmp.eq.f32.partialorder %v12647_v42, 0.0 }
0x1799   : > { %v6473_v32 = vmul.f32 %v7783_v35, %v6472_v27  ;;  %vm6495_vm1 = vcmp.eq.f32.partialorder %v6494_v57, 8.507059e+37 }
0x179a   : > { %v6405_v40 = vmul.f32 0.5, %v6404_v0  ;;  %v6398_v48 = vsel %vm6397_vm11, %v12623_v52, %v6396_v22 }
0x179b   : > { %v6474_v29 = vadd.f32 %v7783_v35, %v6473_v32  ;;  %v6401_v26 = vsel %vm6399_vm13, %v6400_v9, %v6398_v48 }
0x179c   : > { %v7787_v17 = vpop.eup %7786  ;;  %v6406_v47 = vsub.f32 1.5, %v6405_v40  ;;  %v6342_v8 = vpop.xlane.xlu0 %6341  ;;  %v12664_v14 = vadd.f32 1e-06, %v6401_v26 }
0x179d   : > { %v7789_v58 = vpop.eup %7788  ;;  %v12666_v38 = vmul.f32 0.007874016, %v6342_v8  ;;  %v6478_v10 = vsel %vm6477_vm15, %v7783_v35, %v6474_v29  ;;  %v6486_v52 = vmul.f32 %v7787_v17, %v12645_v28  ;;  %vm6491_vm3 = vweird.f32 %v7787_v17 }
0x179e   : > { %v6407_v43 = vmul.f32 %v7785_v19, %v6406_v47  ;;  %v6415_v1 = vmul.f32 %v7789_v58, %v12647_v42  ;;  %v6483_v2 = vsel %vm6480_vm0, %v6482_v23, %v6478_v10  ;;  %7790 = vrcp.f32 %v12664_v14  ;;  %vm6492_vm6 = vmor %vm6490_vm5, %vm6491_vm3 }
0x179f   : > { %7792 = vrsqrt.f32 %v12666_v38  ;;  %v6484_v5 = vmul.f32 %v6483_v2, %v6358_v3  ;;  %v6487_v25 = vsub.f32 1.0, %v6486_v52  ;;  %v6424_v28 = vand.u32 2147483648, %v12647_v42 }
0x17a0   : > { %v6408_v63 = vmul.f32 %v6407_v43, %v12638_v39  ;;  %v6416_v18 = vmul.f32 %v7789_v58, %v6415_v1  ;;  %v6509_v27 = vand.u32 2147483647, %v12664_v14  ;;  %v6511_v22 = vand.u32 2147483648, %v12664_v14 }
0x17a1   : > { %v6593_v55 = vadd.f32 %v12673_v33, %v6484_v5  ;;  %v6488_v62 = vmul.f32 %v7787_v17, %v6487_v25  ;;  %vm6505_vm10 = vweird.f32 %v12664_v14  ;;  %v6360_v3 = vmul.f32 %v12655_v15, %v12560_v20 }
0x17a2   : > { %v6417_v61 = vmul.f32 0.5, %v6416_v18  ;;  %v6410_v16 = vsel %vm6409_vm2, %v12638_v39, %v6408_v63  ;;  %v6497_v39 = vor.u32 1.1754944e-38, %v6496_v49  ;;  %vm6510_vm12 = vcmp.eq.f32.partialorder %v6509_v27, 8.507059e+37 }
0x17a3   : > { %v6413_v21 = vsel %vm6411_vm4, %v6412_v44, %v6410_v16  ;;  %6637 = vmatmul.f32.vlgmr.msrb.gmra.mxu0 %v6593_v55  ;;  %v6489_v59 = vadd.f32 %v7787_v17, %v6488_v62  ;;  %v6512_v47 = vor.u32 1.1754944e-38, %v6511_v22  ;;  %vm6433_vm13 = vcmp.eq.f32.partialorder %v12666_v38, inf }
0x17a4   : > { %v7791_v50 = vpop.eup %7790  ;;  %v6418_v6 = vsub.f32 1.5, %v6417_v61  ;;  %v6344_v7 = vpop.xlane.xlu1 %6343  ;;  %v12686_v30 = vadd.f32 1e-06, %v6413_v21  ;;  %v6436_v2 = vand.u32 2147483648, %v12666_v38  ;;  %vm6435_vm15 = vcmp.eq.f32.partialorder %v12666_v38, 0.0 }
0x17a5   : > { %v7793_v51 = vpop.eup %7792  ;;  %v12690_v11 = vmul.f32 0.007874016, %v6344_v7  ;;  %v6501_v36 = vmul.f32 %v7791_v50, %v12664_v14  ;;  %v6493_v53 = vsel %vm6492_vm6, %v7787_v17, %v6489_v59  ;;  %vm6506_vm9 = vweird.f32 %v7791_v50 }
0x17a6   : > { %v6419_v35 = vmul.f32 %v7789_v58, %v6418_v6  ;;  %v6427_v13 = vmul.f32 %v7793_v51, %v12666_v38  ;;  %7794 = vrcp.f32 %v12686_v30  ;;  %v6498_v37 = vsel %vm6495_vm1, %v6497_v39, %v6493_v53  ;;  %vm6507_vm11 = vmor %vm6505_vm10, %vm6506_vm9 }
0x17a7   : > { %7796 = vrsqrt.f32 %v12690_v11  ;;  %v6502_v54 = vsub.f32 1.0, %v6501_v36  ;;  %v6499_v60 = vmul.f32 %v6498_v37, %v6359_v12  ;;  %v6526_v1 = vand.u32 2147483648, %v12686_v30 }
0x17a8   : > { %v6420_v45 = vmul.f32 %v6419_v35, %v12647_v42  ;;  %v6428_v19 = vmul.f32 %v7793_v51, %v6427_v13  ;;  %v6524_v18 = vand.u32 2147483647, %v12686_v30  ;;  %vm6520_vm0 = vweird.f32 %v12686_v30 }
0x17a9   : > { %v6503_v4 = vmul.f32 %v7791_v50, %v6502_v54  ;;  %v6594_v32 = vadd.f32 %v12673_v33, %v6499_v60  ;;  %v6527_v16 = vor.u32 1.1754944e-38, %v6526_v1  ;;  %v6361_v21 = vmul.f32 %v12655_v15, %v12565_v46 }
0x17aa   : > { %v6429_v0 = vmul.f32 0.5, %v6428_v19  ;;  %v6422_v9 = vsel %vm6421_vm7, %v12647_v42, %v6420_v45  ;;  %vm6525_vm3 = vcmp.eq.f32.partialorder %v6524_v18, 8.507059e+37  ;;  %vm6445_vm4 = vcmp.eq.f32.partialorder %v12690_v11, inf }
0x17ab   : > { %v6425_v31 = vsel %vm6423_vm8, %v6424_v28, %v6422_v9  ;;  %v6504_v29 = vadd.f32 %v7791_v50, %v6503_v4  ;;  %6640 = vmatmul.f32.gmra.mxu0 %v6594_v32  ;;  %v6448_v12 = vand.u32 2147483648, %v12690_v11  ;;  %vm6447_vm6 = vcmp.eq.f32.partialorder %v12690_v11, 0.0 }
0x17ac   : > { %v7795_v40 = vpop.eup %7794  ;;  %v6430_v48 = vsub.f32 1.5, %v6429_v0  ;;  %v12706_v26 = vadd.f32 1e-06, %v6425_v31  ;;  %v6362_v54 = vmul.f32 %v12655_v15, %v12570_v24  ;;  %v6363_v24 = vmul.f32 %v12655_v15, %v12575_v56 }
0x17ad   : > { %v7797_v17 = vpop.eup %7796  ;;  %v6516_v42 = vmul.f32 %v7795_v40, %v12686_v30  ;;  %v6508_v58 = vsel %vm6507_vm11, %v7791_v50, %v6504_v29  ;;  %vm6521_vm14 = vweird.f32 %v7795_v40  ;;  %v6364_v56 = vmul.f32 %v12655_v15, %v12580_v34 }
0x17ae   : > { %v6431_v8 = vmul.f32 %v7793_v51, %v6430_v48  ;;  %v6439_v23 = vmul.f32 %v7797_v17, %v12690_v11  ;;  %7798 = vrcp.f32 %v12706_v26  ;;  %v6513_v14 = vsel %vm6510_vm12, %v6512_v47, %v6508_v58  ;;  %vm6522_vm2 = vmor %vm6520_vm0, %vm6521_vm14 }
0x17af   : > { %v6517_v10 = vsub.f32 1.0, %v6516_v42  ;;  %v6514_v20 = vmul.f32 %v6513_v14, %v6360_v3  ;;  %v6541_v39 = vand.u32 2147483648, %v12706_v26  ;;  %v6539_v35 = vand.u32 2147483647, %v12706_v26 }
0x17b0   : > { %v6432_v52 = vmul.f32 %v6431_v8, %v12666_v38  ;;  %v6440_v43 = vmul.f32 %v7797_v17, %v6439_v23  ;;  %vm6535_vm7 = vweird.f32 %v12706_v26 }
0x17b1   : > { %v6518_v63 = vmul.f32 %v7795_v40, %v6517_v10  ;;  %v6595_v44 = vadd.f32 %v12673_v33, %v6514_v20  ;;  %v6542_v19 = vor.u32 1.1754944e-38, %v6541_v39  ;;  %vm6540_vm8 = vcmp.eq.f32.partialorder %v6539_v35, 8.507059e+37 }
0x17b2   : > { %v6434_v5 = vsel %vm6433_vm13, %v12666_v38, %v6432_v52  ;;  %v6441_v25 = vmul.f32 0.5, %v6440_v43 }
0x17b3   : > { %v6519_v49 = vadd.f32 %v7795_v40, %v6518_v63  ;;  %v6437_v61 = vsel %vm6435_vm15, %v6436_v2, %v6434_v5  ;;  %6643 = vmatmul.f32.gmra.mxu0 %v6595_v44 }
0x17b4   : > { %v7799_v55 = vpop.eup %7798  ;;  %v6442_v62 = vsub.f32 1.5, %v6441_v25  ;;  %v6467_v57 = vadd.f32 1e-06, %v6437_v61 }
0x17b5   : > { %v6523_v50 = vsel %vm6522_vm2, %v7795_v40, %v6519_v49  ;;  %v6531_v38 = vmul.f32 %v7799_v55, %v12706_v26  ;;  %vm6536_vm5 = vweird.f32 %v7799_v55 }
0x17b6   : > { %v6443_v6 = vmul.f32 %v7797_v17, %v6442_v62  ;;  %v6528_v7 = vsel %vm6525_vm3, %v6527_v16, %v6523_v50  ;;  %7800 = vrcp.f32 %v6467_v57  ;;  %vm6537_vm1 = vmor %vm6535_vm7, %vm6536_vm5  ;;  %v6554_v31 = vand.u32 2147483647, %v6467_v57 }
0x17b7   : > { %v6529_v59 = vmul.f32 %v6528_v7, %v6361_v21  ;;  %v6532_v51 = vsub.f32 1.0, %v6531_v38  ;;  %vm6550_vm10 = vweird.f32 %v6467_v57 }
0x17b8   : > { %v6444_v30 = vmul.f32 %v6443_v6, %v12690_v11  ;;  %vm6555_vm12 = vcmp.eq.f32.partialorder %v6554_v31, 8.507059e+37 }
0x17b9   : > { %v6596_v46 = vadd.f32 %v12673_v33, %v6529_v59  ;;  %v6533_v36 = vmul.f32 %v7799_v55, %v6532_v51 }
0x17ba   : > { %v6446_v13 = vsel %vm6445_vm4, %v12690_v11, %v6444_v30  ;;  %v6556_v11 = vand.u32 2147483648, %v6467_v57 }
0x17bb   : > { %v6534_v53 = vadd.f32 %v7799_v55, %v6533_v36  ;;  %v6449_v28 = vsel %vm6447_vm6, %v6448_v12, %v6446_v13  ;;  %6646 = vmatmul.f32.gmra.mxu0 %v6596_v46  ;;  %v7133_v12 = vld [vmem:[%s12778_s11] ss:$0 sm:$0xff]  ;;  %v6365_v46 = vmul.f32 %v12655_v15, %v12610_v41 }
0x17bc   : > { %v7801_v45 = vpop.eup %7800  ;;  %v6468_v37 = vadd.f32 1e-06, %v6449_v28  ;;  %v6557_v29 = vor.u32 1.1754944e-38, %v6556_v11 }
0x17bd   : > { %v6538_v60 = vsel %vm6537_vm1, %v7799_v55, %v6534_v53  ;;  %v6546_v27 = vmul.f32 %v7801_v45, %v6467_v57  ;;  %vm6551_vm9 = vweird.f32 %v7801_v45 }
0x17be   : > { %v6543_v22 = vsel %vm6540_vm8, %v6542_v19, %v6538_v60  ;;  %7802 = vrcp.f32 %v6468_v37  ;;  %vm6552_vm11 = vmor %vm6550_vm10, %vm6551_vm9  ;;  %v6571_v8 = vand.u32 2147483648, %v6468_v37  ;;  %v6569_v14 = vand.u32 2147483647, %v6468_v37 }
0x17bf   : > { %v6544_v0 = vmul.f32 %v6543_v22, %v6362_v54  ;;  %v6547_v4 = vsub.f32 1.0, %v6546_v27  ;;  %vm6565_vm14 = vweird.f32 %v6468_v37 }
0x17c0   : > { %v6572_v52 = vor.u32 1.1754944e-38, %v6571_v8  ;;  %vm6570_vm0 = vcmp.eq.f32.partialorder %v6569_v14, 8.507059e+37 }
0x17c1   : > { %v6597_v9 = vadd.f32 %v12673_v33, %v6544_v0  ;;  %v6548_v32 = vmul.f32 %v7801_v45, %v6547_v4 }
0x17c3   : > { %v6549_v40 = vadd.f32 %v7801_v45, %v6548_v32  ;;  %6649 = vmatmul.f32.gmra.mxu0 %v6597_v9 }
0x17c4   : > { %v7803_v48 = vpop.eup %7802 }
0x17c5   : > { %v6553_v26 = vsel %vm6552_vm11, %v7801_v45, %v6549_v40  ;;  %v6561_v17 = vmul.f32 %v7803_v48, %v6468_v37  ;;  %vm6566_vm13 = vweird.f32 %v7803_v48 }
0x17c6   : > { %v6558_v3 = vsel %vm6555_vm12, %v6557_v29, %v6553_v26  ;;  %vm6567_vm15 = vmor %vm6565_vm14, %vm6566_vm13 }
0x17c7   : > { %v6559_v47 = vmul.f32 %v6558_v3, %v6363_v24  ;;  %v6562_v42 = vsub.f32 1.0, %v6561_v17 }
0x17c9   : > { %v6598_v23 = vadd.f32 %v12673_v33, %v6559_v47  ;;  %v6563_v58 = vmul.f32 %v7803_v48, %v6562_v42 }
0x17cb   : > { %v6564_v10 = vadd.f32 %v7803_v48, %v6563_v58  ;;  %6652 = vmatmul.f32.gmra.mxu0 %v6598_v23 }
0x17cd   : > { %v6568_v43 = vsel %vm6567_vm15, %v7803_v48, %v6564_v10 }
0x17ce   : > { %v6573_v20 = vsel %vm6570_vm0, %v6572_v52, %v6568_v43 }
0x17cf   : > { %v6574_v1 = vmul.f32 %v6573_v20, %v6364_v56 }
0x17d1   : > { %v6599_v2 = vadd.f32 %v12673_v33, %v6574_v1 }
0x17d3   : > { %6655 = vmatmul.f32.gmra.mxu0 %v6599_v2 }
0x17f6   : > { %v6346_v63 = vpop.xlane.xlu2 %6345 }
0x17f7   : > { %v6354_v18 = vmul.f32 0.007874016, %v6346_v63 }
0x17f9   : > { %7804 = vrsqrt.f32 %v6354_v18  ;;  %vm6457_vm2 = vcmp.eq.f32.partialorder %v6354_v18, inf  ;;  %v6460_v34 = vand.u32 2147483648, %v6354_v18  ;;  %vm6459_vm3 = vcmp.eq.f32.partialorder %v6354_v18, 0.0 }
0x17ff   : > { %v7805_v5 = vpop.eup %7804 }
0x1800   : > { %v6451_v25 = vmul.f32 %v7805_v5, %v6354_v18 }
0x1802   : > { %v6452_v44 = vmul.f32 %v7805_v5, %v6451_v25 }
0x1804   : > { %v6453_v49 = vmul.f32 0.5, %v6452_v44 }
0x1806   : > { %v6454_v61 = vsub.f32 1.5, %v6453_v49 }
0x1808   : > { %v6455_v55 = vmul.f32 %v7805_v5, %v6454_v61 }
0x180a   : > { %v6456_v62 = vmul.f32 %v6455_v55, %v6354_v18 }
0x180c   : > { %v6458_v16 = vsel %vm6457_vm2, %v6354_v18, %v6456_v62 }
0x180d   : > { %v6461_v57 = vsel %vm6459_vm3, %v6460_v34, %v6458_v16 }
0x180e   : > { %v6469_v21 = vadd.f32 1e-06, %v6461_v57 }
0x1810   : > { %7806 = vrcp.f32 %v6469_v21  ;;  %v6586_v7 = vand.u32 2147483648, %v6469_v21  ;;  %v6584_v51 = vand.u32 2147483647, %v6469_v21  ;;  %vm6580_vm5 = vweird.f32 %v6469_v21 }
0x1812   : > { %v6587_v39 = vor.u32 1.1754944e-38, %v6586_v7  ;;  %vm6585_vm7 = vcmp.eq.f32.partialorder %v6584_v51, 8.507059e+37 }
0x1816   : > { %v7807_v50 = vpop.eup %7806 }
0x1817   : > { %v6576_v38 = vmul.f32 %v7807_v50, %v6469_v21  ;;  %vm6581_vm4 = vweird.f32 %v7807_v50 }
0x1818   : > { %vm6582_vm6 = vmor %vm6580_vm5, %vm6581_vm4 }
0x1819   : > { %v6577_v6 = vsub.f32 1.0, %v6576_v38 }
0x181b   : > { %v6578_v59 = vmul.f32 %v7807_v50, %v6577_v6 }
0x181d   : > { %v6579_v30 = vadd.f32 %v7807_v50, %v6578_v59 }
0x181f   : > { %v6583_v36 = vsel %vm6582_vm6, %v7807_v50, %v6579_v30 }
0x1820   : > { %v6588_v35 = vsel %vm6585_vm7, %v6587_v39, %v6583_v36  ;;  %v6638_v13 = vpop.f32.mrf.mxu0 }
0x1821   : > { %v6589_v53 = vmul.f32 %v6588_v35, %v6365_v46  ;;  %v6639_v28 = vadd.f32 %v7133_v12, %v6638_v13 }
0x1823   : > { %v6600_v45 = vadd.f32 %v12673_v33, %v6589_v53  ;;  %v6662_v19 = vmax.f32 %v6639_v28, 0.0 }
0x1825   : > { %6658 = vmatmul.f32.gmra.mxu0 %v6600_v45  ;;  %6670 = vst [vmem:[%s12753_s20] sm:$0xff] %v6662_v19 }
0x1828   : > { %v6641_v41 = vpop.f32.mrf.mxu0 }
0x1829   : > { %v6642_v15 = vadd.f32 %v7133_v12, %v6641_v41 }
0x182b   : > { %v6663_v37 = vmax.f32 %v6642_v15, 0.0 }
0x182d   : > { %6671 = vst [vmem:[%s12753_s20 + $0x8] sm:$0xff] %v6663_v37 }
0x1830   : > { %v6644_v54 = vpop.f32.mrf.mxu0 }
0x1831   : > { %v6645_v60 = vadd.f32 %v7133_v12, %v6644_v54 }
0x1833   : > { %v6664_v27 = vmax.f32 %v6645_v60, 0.0 }
0x1835   : > { %6672 = vst [vmem:[%s12753_s20 + $0x10] sm:$0xff] %v6664_v27 }
0x1838   : > { %v6647_v22 = vpop.f32.mrf.mxu0 }
0x1839   : > { %v6648_v0 = vadd.f32 %v7133_v12, %v6647_v22 }
0x183b   : > { %v6665_v4 = vmax.f32 %v6648_v0, 0.0 }
0x183d   : > { %6673 = vst [vmem:[%s12753_s20 + $0x18] sm:$0xff] %v6665_v4 }
0x1840   : > { %v6650_v33 = vpop.f32.mrf.mxu0 }
0x1841   : > { %v6651_v11 = vadd.f32 %v7133_v12, %v6650_v33 }
0x1843   : > { %v6666_v9 = vmax.f32 %v6651_v11, 0.0 }
0x1845   : > { %6674 = vst [vmem:[%s12753_s20 + $0x20] sm:$0xff] %v6666_v9 }
0x1848   : > { %v6653_v32 = vpop.f32.mrf.mxu0 }
0x1849   : > { %v6654_v31 = vadd.f32 %v7133_v12, %v6653_v32 }
0x184b   : > { %v6667_v40 = vmax.f32 %v6654_v31, 0.0 }
0x184d   : > { %6675 = vst [vmem:[%s12753_s20 + $0x28] sm:$0xff] %v6667_v40 }
0x1850   : > { %v6656_v48 = vpop.f32.mrf.mxu0 }
0x1851   : > { %v6657_v29 = vadd.f32 %v7133_v12, %v6656_v48 }
0x1853   : > { %v6668_v24 = vmax.f32 %v6657_v29, 0.0 }
0x1855   : > { %6676 = vst [vmem:[%s12753_s20 + $0x30] sm:$0xff] %v6668_v24 }
0x18a2   : > { %v6659_v26 = vpop.f32.mrf.mxu0 }
0x18a3   : > { %v6660_v17 = vadd.f32 %v7133_v12, %v6659_v26 }
0x18a5   : > { %v6669_v3 = vmax.f32 %v6660_v17, 0.0 }
0x18a7   : > { %6677 = vst [vmem:[%s12753_s20 + $0x38] sm:$0xff] %v6669_v3 }
0x18a8 PF: > { %s23_s25 = sadd.s32 1, %s7846_s25  }
0x18a9   : > { %p20_p4 = scmp.ge.s32.totalorder %s23_s25, 4  }
0x18ab   :  { %22 = sbr.rel (!%p20_p4) target bundleno = 1 (0x1), region = 110 }

</bundles_post_ra>
